<compile_context>
chip_gen: v5e
topology: v5e:2x2
jax: 0.10.0
libtpu: 0.0.40
codegen_flags: <defaults>
</compile_context>

<pallas_src>
import math
import jax
import jax.numpy as jnp
from jax import lax
from jax.experimental import pallas as pl
from jax.experimental.pallas import tpu as pltpu


def _bilinear_matrix(out_size, in_size):
    """Dense (out, in) matrix for 1-D bilinear interpolation, align_corners=True."""
    if out_size == 1:
        coords = jnp.zeros((1,), jnp.float32)
    else:
        coords = jnp.arange(out_size, dtype=jnp.float32) * (
            (in_size - 1) / (out_size - 1))
    lo = jnp.clip(jnp.floor(coords), 0, in_size - 1).astype(jnp.int32)
    hi = jnp.clip(lo + 1, 0, in_size - 1)
    frac = coords - lo.astype(jnp.float32)
    rows = jnp.arange(out_size)
    m = jnp.zeros((out_size, in_size), jnp.float32)
    m = m.at[rows, lo].add(1.0 - frac)
    m = m.at[rows, hi].add(frac)
    return m


def _bilinear_taps(out_size, in_size):
    """2-tap (lo, hi, frac) indices/weights for 1-D bilinear, align_corners=True."""
    if out_size == 1:
        coords = jnp.zeros((1,), jnp.float32)
    else:
        coords = jnp.arange(out_size, dtype=jnp.float32) * (
            (in_size - 1) / (out_size - 1))
    lo = jnp.clip(jnp.floor(coords), 0, in_size - 1).astype(jnp.int32)
    hi = jnp.clip(lo + 1, 0, in_size - 1)
    frac = coords - lo.astype(jnp.float32)
    return lo, hi, frac


def fusion_node_forward(x_h, x_l, weight, *, compute_dtype=jnp.float32):
    """x_h: (N, C, Hh, Wh), x_l: (N, C, Hl, Wl) NCHW.
    weight: (Cout, 2*C, 3, 3) PyTorch OIHW (conv3x3, no bias).
    Returns (N, Cout, Hl, Wl) NCHW float32.
    compute_dtype: dtype fed to the MXU (use jnp.bfloat16 on v6e/v7x for speed);
    accumulation is always float32."""
    N, C, Hh, Wh = x_h.shape
    N2, C2, Hl, Wl = x_l.shape
    assert N == N2 and C == C2
    Cout = weight.shape[0]
    assert weight.shape == (Cout, 2 * C, 3, 3)
    M = Hl * Wl
    f32 = jnp.float32

    # ---------------- wrapper glue: layouts + small constants ----------------
    # Height interpolation matrix, broadcast over output width for a batched
    # (flash-attention style) einsum inside the kernel.
    mh = _bilinear_matrix(Hl, Hh)                                  # (Hl, Hh)
    mh_b = jnp.broadcast_to(mh[None], (Wl, Hl, Hh)).astype(compute_dtype)

    # Width interpolation: 2 taps per output column (indices gathered here,
    # the lerp arithmetic happens inside the kernel on the VPU).
    lo, hi, frac = _bilinear_taps(Wl, Wh)
    frac3 = frac.reshape(Wl, 1, 1).astype(compute_dtype)           # (Wl, 1, 1)

    # x_h in W-major channels-last layout, pre-gathered to the two width taps.
    xh_nwhc = jnp.transpose(x_h, (0, 3, 2, 1))                     # (N, Wh, Hh, C)
    xh_lo = jnp.take(xh_nwhc, lo, axis=1).astype(compute_dtype)    # (N, Wl, Hh, C)
    xh_hi = jnp.take(xh_nwhc, hi, axis=1).astype(compute_dtype)    # (N, Wl, Hh, C)

    # x_l as flat pixels x channels (pixel index p = v*Hl + i, W-major).
    xl_f = jnp.transpose(x_l, (0, 3, 2, 1)).reshape(N, M, C).astype(compute_dtype)

    # Per-tap (2C, Cout) conv weights (channel concat folded into K = 2C).
    w_taps = jnp.stack([weight[:, :, dy, dx].T.astype(compute_dtype)
                        for dy in range(3) for dx in range(3)])    # (9, 2C, Cout)

    # (v, i) coordinates per flat pixel, used for conv boundary masks.
    vv, ii = jnp.meshgrid(jnp.arange(Wl, dtype=f32),
                          jnp.arange(Hl, dtype=f32), indexing='ij')
    pos = jnp.stack([vv.reshape(M), ii.reshape(M)], axis=-1)       # (M, 2)

    # ---------------- Pallas kernel (one batch element per grid step) ----------------
    def kernel(xh_lo_ref, xh_hi_ref, xl_ref, mh_ref, frac_ref, w_ref, pos_ref,
               o_ref, cat_ref):
        # Bilinear upsample of x_h:
        #   width  = 2-tap lerp (VPU), height = batched matmul (MXU).
        f = frac_ref[...]                                          # (Wl, 1, 1)
        xw = xh_lo_ref[0] * (1.0 - f) + xh_hi_ref[0] * f           # (Wl, Hh, C)
        up = jnp.einsum('via,vac->vic', mh_ref[...], xw,
                        preferred_element_type=jnp.float32)        # (Wl, Hl, C)

        # Fused channel concat: one (pixels, 2C) slab (torch.cat order: x_h|x_l).
        cat_ref[:, :C] = up.reshape(M, C).astype(cat_ref.dtype)
        cat_ref[:, C:] = xl_ref[0]
        x = cat_ref[...]                                           # (M, 2C)

        v_idx = pos_ref[:, 0:1]                                    # (M, 1) width coord
        i_idx = pos_ref[:, 1:2]                                    # (M, 1) height coord

        # 3x3 conv as 9 channel-contraction matmuls; the spatial offset of each
        # tap becomes a flat-pixel shift (XLU roll) + boundary mask of the tap's
        # output, so no padded im2col buffer is needed.
        accs = [jnp.zeros((M, Cout), jnp.float32) for _ in range(3)]
        for k in range(9):
            dy, dx = k // 3, k % 3
            y = jnp.dot(x, w_ref[k], preferred_element_type=jnp.float32)  # (M, Cout)
            s = (dx - 1) * Hl + (dy - 1)       # out[p] += X[p + s] @ W[dy,dx]
            if s != 0:
                y = pltpu.roll(y, shift=(-s) % M, axis=0)
            conds = []
            if dx == 0:
                conds.append(v_idx >= 1.0)
            elif dx == 2:
                conds.append(v_idx < float(Wl - 1))
            if dy == 0:
                conds.append(i_idx >= 1.0)
            elif dy == 2:
                conds.append(i_idx < float(Hl - 1))
            if conds:
                valid = conds[0]
                for cnd in conds[1:]:
                    valid = jnp.logical_and(valid, cnd)
                y = jnp.where(valid, y, 0.0)
            accs[k % 3] = accs[k % 3] + y      # 3 partial accumulators
        o_ref[0] = (accs[0] + accs[1] + accs[2]).astype(o_ref.dtype)

    out_flat = pl.pallas_call(
        kernel,
        out_shape=jax.ShapeDtypeStruct((N, M, Cout), f32),
        grid_spec=pltpu.PrefetchScalarGridSpec(
            num_scalar_prefetch=0,
            grid=(N,),
            in_specs=[
                pl.BlockSpec((1, Wl, Hh, C), lambda n: (n, 0, 0, 0)),   # xh_lo
                pl.BlockSpec((1, Wl, Hh, C), lambda n: (n, 0, 0, 0)),   # xh_hi
                pl.BlockSpec((1, M, C), lambda n: (n, 0, 0)),           # x_l (flat)
                pl.BlockSpec((Wl, Hl, Hh), lambda n: (0, 0, 0)),        # mh (bcast)
                pl.BlockSpec((Wl, 1, 1), lambda n: (0, 0, 0)),          # width frac
                pl.BlockSpec((9, 2 * C, Cout), lambda n: (0, 0, 0)),    # conv taps
                pl.BlockSpec((M, 2), lambda n: (0, 0)),                 # (v, i) coords
            ],
            out_specs=pl.BlockSpec((1, M, Cout), lambda n: (n, 0, 0)),
            scratch_shapes=[pltpu.VMEM((M, 2 * C), compute_dtype)],     # concat slab
        ),
        compiler_params=pltpu.CompilerParams(
            dimension_semantics=("parallel",)),
    )(xh_lo, xh_hi, xl_f, mh_b, frac3, w_taps, pos)

    # glue: flat W-major pixels -> NCHW
    return out_flat.reshape(N, Wl, Hl, Cout).transpose(0, 3, 2, 1)


def _reference(x_h, x_l, weight):
    """Pure-JAX reference of the PyTorch forward (align_corners=True bilinear + conv3x3)."""
    _, _, Hh, Wh = x_h.shape
    _, _, Hl, Wl = x_l.shape
    mh = _bilinear_matrix(Hl, Hh)
    mw = _bilinear_matrix(Wl, Wh)
    up = jnp.einsum('ia,ncab,jb->ncij', mh, x_h.astype(jnp.float32), mw)
    cat = jnp.concatenate([up, x_l.astype(jnp.float32)], axis=1)
    return lax.conv_general_dilated(
        cat, weight.astype(jnp.float32), window_strides=(1, 1),
        padding=((1, 1), (1, 1)),
        dimension_numbers=('NCHW', 'OIHW', 'NCHW'))


if __name__ == "__main__":
    key = jax.random.PRNGKey(0)
    k1, k2, k3 = jax.random.split(key, 3)

    N, C = 2, 4            # inplane = 4
    Hh, Wh = 8, 8          # high-level (low resolution) feature map x_h
    Hl, Wl = 16, 16        # low-level (high resolution) feature map x_l

    x_h = jax.random.normal(k1, (N, C, Hh, Wh), jnp.float32)
    x_l = jax.random.normal(k2, (N, C, Hl, Wl), jnp.float32)
    # conv3x3(inplane*2, inplane): weight (inplane, 2*inplane, 3, 3), bias=False
    fan_in = 2 * C * 3 * 3
    weight = jax.random.normal(k3, (C, 2 * C, 3, 3), jnp.float32) / math.sqrt(fan_in)

    out = fusion_node_forward(x_h, x_l, weight)
    out = jax.block_until_ready(out)

    ref = _reference(x_h, x_l, weight)
    assert out.shape == (N, C, Hl, Wl), out.shape
    max_err = float(jnp.max(jnp.abs(out - ref)))
    assert jnp.allclose(out, ref, atol=1e-4, rtol=1e-4), max_err
    print("KERNEL_OK")
</pallas_src>

<mosaic_0001>
module attributes {stable_mosaic.version = 11 : i64} {
  func.func @kernel(%arg0: i32, %arg1: memref<1x16x8x4xf32, #tpu.memory_space<vmem>>, %arg2: memref<1x16x8x4xf32, #tpu.memory_space<vmem>>, %arg3: memref<1x256x4xf32, #tpu.memory_space<vmem>>, %arg4: memref<16x16x8xf32, #tpu.memory_space<vmem>>, %arg5: memref<16x1x1xf32, #tpu.memory_space<vmem>>, %arg6: memref<9x8x4xf32, #tpu.memory_space<vmem>>, %arg7: memref<256x2xf32, #tpu.memory_space<vmem>>, %arg8: memref<1x256x4xf32, #tpu.memory_space<vmem>>, %arg9: memref<256x8xf32, #tpu.memory_space<vmem>>) attributes {dimension_semantics = [#tpu.dimension_semantics<parallel>], iteration_bounds = array<i64: 2>, scalar_prefetch = 0 : i64, scratch_operands = 1 : i64, tpu.core_type = #tpu.core_type<tc>, window_params = [{transform_indices = @transform_0, window_bounds = array<i64: 1, 16, 8, 4>}, {transform_indices = @transform_1, window_bounds = array<i64: 1, 16, 8, 4>}, {transform_indices = @transform_2, window_bounds = array<i64: 1, 256, 4>}, {pipeline_mode = #tpu.pipeline_mode<synchronous>, transform_indices = @transform_3, window_bounds = array<i64: 16, 16, 8>}, {pipeline_mode = #tpu.pipeline_mode<synchronous>, transform_indices = @transform_4, window_bounds = array<i64: 16, 1, 1>}, {pipeline_mode = #tpu.pipeline_mode<synchronous>, transform_indices = @transform_5, window_bounds = array<i64: 9, 8, 4>}, {pipeline_mode = #tpu.pipeline_mode<synchronous>, transform_indices = @transform_6, window_bounds = array<i64: 256, 2>}, {transform_indices = @transform_7, window_bounds = array<i64: 1, 256, 4>}]} {
    %c0 = arith.constant 0 : index
    %c0_0 = arith.constant 0 : index
    %c0_1 = arith.constant 0 : index
    %0 = vector.load %arg5[%c0, %c0_0, %c0_1] : memref<16x1x1xf32, #tpu.memory_space<vmem>>, vector<16x1x1xf32>
    %c0_2 = arith.constant 0 : index
    %c0_3 = arith.constant 0 : index
    %c0_4 = arith.constant 0 : index
    %c0_5 = arith.constant 0 : index
    %1 = vector.load %arg1[%c0_2, %c0_3, %c0_4, %c0_5] : memref<1x16x8x4xf32, #tpu.memory_space<vmem>>, vector<1x16x8x4xf32>
    %2 = vector.shape_cast %1 : vector<1x16x8x4xf32> to vector<16x8x4xf32>
    %cst = arith.constant 1.000000e+00 : f32
    %3 = vector.broadcast %cst : f32 to vector<16x1x1xf32>
    %4 = arith.subf %3, %0 : vector<16x1x1xf32>
    %5 = vector.broadcast %4 : vector<16x1x1xf32> to vector<16x8x4xf32>
    %6 = arith.mulf %2, %5 : vector<16x8x4xf32>
    %c0_6 = arith.constant 0 : index
    %c0_7 = arith.constant 0 : index
    %c0_8 = arith.constant 0 : index
    %c0_9 = arith.constant 0 : index
    %7 = vector.load %arg2[%c0_6, %c0_7, %c0_8, %c0_9] : memref<1x16x8x4xf32, #tpu.memory_space<vmem>>, vector<1x16x8x4xf32>
    %8 = vector.shape_cast %7 : vector<1x16x8x4xf32> to vector<16x8x4xf32>
    %9 = vector.broadcast %0 : vector<16x1x1xf32> to vector<16x8x4xf32>
    %10 = arith.mulf %8, %9 : vector<16x8x4xf32>
    %11 = arith.addf %6, %10 : vector<16x8x4xf32>
    %c0_10 = arith.constant 0 : index
    %c0_11 = arith.constant 0 : index
    %c0_12 = arith.constant 0 : index
    %12 = vector.load %arg4[%c0_10, %c0_11, %c0_12] : memref<16x16x8xf32, #tpu.memory_space<vmem>>, vector<16x16x8xf32>
    "tpu.trace_start"() <{level = 10 : i32, message = "via,vac->vic"}> : () -> ()
    %cst_13 = arith.constant dense<0.000000e+00> : vector<16x16x4xf32>
    %13 = tpu.matmul %12, %11, %cst_13 {dimension_numbers = #tpu.dot_dimension_numbers<[2], [1], [1], [2], [0, 0, 0, 1, 1, 2], [0], [0]>} : vector<16x16x8xf32>, vector<16x8x4xf32>, vector<16x16x4xf32> -> vector<16x16x4xf32>
    "tpu.trace_stop"() : () -> ()
    %14 = vector.shape_cast %13 : vector<16x16x4xf32> to vector<256x4xf32>
    %c0_14 = arith.constant 0 : index
    %c0_15 = arith.constant 0 : index
    %15 = vector.load %arg9[%c0_14, %c0_15] : memref<256x8xf32, #tpu.memory_space<vmem>>, vector<256x4xf32>
    tpu.vector_store %arg9[%c0_14, %c0_15], %14 {strides = array<i32>} : memref<256x8xf32, #tpu.memory_space<vmem>>, vector<256x4xf32>,
    %c0_16 = arith.constant 0 : index
    %c0_17 = arith.constant 0 : index
    %c0_18 = arith.constant 0 : index
    %16 = vector.load %arg3[%c0_16, %c0_17, %c0_18] : memref<1x256x4xf32, #tpu.memory_space<vmem>>, vector<1x256x4xf32>
    %17 = vector.shape_cast %16 : vector<1x256x4xf32> to vector<256x4xf32>
    %c0_19 = arith.constant 0 : index
    %c4 = arith.constant 4 : index
    %18 = vector.load %arg9[%c0_19, %c4] : memref<256x8xf32, #tpu.memory_space<vmem>>, vector<256x4xf32>
    tpu.vector_store %arg9[%c0_19, %c4], %17 {strides = array<i32>} : memref<256x8xf32, #tpu.memory_space<vmem>>, vector<256x4xf32>,
    %c0_20 = arith.constant 0 : index
    %c0_21 = arith.constant 0 : index
    %19 = vector.load %arg9[%c0_20, %c0_21] : memref<256x8xf32, #tpu.memory_space<vmem>>, vector<256x8xf32>
    %c0_22 = arith.constant 0 : index
    %c0_23 = arith.constant 0 : index
    %20 = vector.load %arg7[%c0_22, %c0_23] : memref<256x2xf32, #tpu.memory_space<vmem>>, vector<256x1xf32>
    %c0_24 = arith.constant 0 : index
    %c1 = arith.constant 1 : index
    %21 = vector.load %arg7[%c0_24, %c1] : memref<256x2xf32, #tpu.memory_space<vmem>>, vector<256x1xf32>
    %cst_25 = arith.constant 0.000000e+00 : f32
    %22 = vector.broadcast %cst_25 : f32 to vector<256x4xf32>
    %cst_26 = arith.constant 0.000000e+00 : f32
    %23 = vector.broadcast %cst_26 : f32 to vector<256x4xf32>
    %cst_27 = arith.constant 0.000000e+00 : f32
    %24 = vector.broadcast %cst_27 : f32 to vector<256x4xf32>
    %c0_28 = arith.constant 0 : index
    %c0_29 = arith.constant 0 : index
    %c0_30 = arith.constant 0 : index
    %25 = vector.load %arg6[%c0_28, %c0_29, %c0_30] : memref<9x8x4xf32, #tpu.memory_space<vmem>>, vector<1x8x4xf32>
    %26 = vector.shape_cast %25 : vector<1x8x4xf32> to vector<8x4xf32>
    %cst_31 = arith.constant dense<0.000000e+00> : vector<256x4xf32>
    %27 = tpu.matmul %19, %26, %cst_31 {dimension_numbers = #tpu.dot_dimension_numbers<[1], [0], [0], [1], [0, 0, 1, 1], [], []>} : vector<256x8xf32>, vector<8x4xf32>, vector<256x4xf32> -> vector<256x4xf32>
    %c17_i32 = arith.constant 17 : i32
    %28 = tpu.dynamic_rotate %27 by %c17_i32 dim 0 : vector<256x4xf32>, i32 -> vector<256x4xf32>
    %cst_32 = arith.constant 1.000000e+00 : f32
    %29 = vector.broadcast %cst_32 : f32 to vector<256x1xf32>
    %30 = arith.cmpf oge, %20, %29 : vector<256x1xf32>
    %cst_33 = arith.constant 1.000000e+00 : f32
    %31 = vector.broadcast %cst_33 : f32 to vector<256x1xf32>
    %32 = arith.cmpf oge, %21, %31 : vector<256x1xf32>
    %33 = arith.andi %30, %32 : vector<256x1xi1>
    %cst_34 = arith.constant 0.000000e+00 : f32
    %34 = vector.shape_cast %33 : vector<256x1xi1> to vector<256x1xi1>
    %35 = vector.broadcast %34 : vector<256x1xi1> to vector<256x4xi1>
    %36 = vector.broadcast %cst_34 : f32 to vector<256x4xf32>
    %37 = arith.select %35, %28, %36 : vector<256x4xi1>, vector<256x4xf32>
    %38 = arith.addf %22, %37 : vector<256x4xf32>
    %c1_35 = arith.constant 1 : index
    %c0_36 = arith.constant 0 : index
    %c0_37 = arith.constant 0 : index
    %39 = vector.load %arg6[%c1_35, %c0_36, %c0_37] : memref<9x8x4xf32, #tpu.memory_space<vmem>>, vector<1x8x4xf32>
    %40 = vector.shape_cast %39 : vector<1x8x4xf32> to vector<8x4xf32>
    %cst_38 = arith.constant dense<0.000000e+00> : vector<256x4xf32>
    %41 = tpu.matmul %19, %40, %cst_38 {dimension_numbers = #tpu.dot_dimension_numbers<[1], [0], [0], [1], [0, 0, 1, 1], [], []>} : vector<256x8xf32>, vector<8x4xf32>, vector<256x4xf32> -> vector<256x4xf32>
    %c1_i32 = arith.constant 1 : i32
    %42 = tpu.dynamic_rotate %41 by %c1_i32 dim 0 : vector<256x4xf32>, i32 -> vector<256x4xf32>
    %cst_39 = arith.constant 1.000000e+00 : f32
    %43 = vector.broadcast %cst_39 : f32 to vector<256x1xf32>
    %44 = arith.cmpf oge, %21, %43 : vector<256x1xf32>
    %cst_40 = arith.constant 0.000000e+00 : f32
    %45 = vector.shape_cast %44 : vector<256x1xi1> to vector<256x1xi1>
    %46 = vector.broadcast %45 : vector<256x1xi1> to vector<256x4xi1>
    %47 = vector.broadcast %cst_40 : f32 to vector<256x4xf32>
    %48 = arith.select %46, %42, %47 : vector<256x4xi1>, vector<256x4xf32>
    %49 = arith.addf %23, %48 : vector<256x4xf32>
    %c2 = arith.constant 2 : index
    %c0_41 = arith.constant 0 : index
    %c0_42 = arith.constant 0 : index
    %50 = vector.load %arg6[%c2, %c0_41, %c0_42] : memref<9x8x4xf32, #tpu.memory_space<vmem>>, vector<1x8x4xf32>
    %51 = vector.shape_cast %50 : vector<1x8x4xf32> to vector<8x4xf32>
    %cst_43 = arith.constant dense<0.000000e+00> : vector<256x4xf32>
    %52 = tpu.matmul %19, %51, %cst_43 {dimension_numbers = #tpu.dot_dimension_numbers<[1], [0], [0], [1], [0, 0, 1, 1], [], []>} : vector<256x8xf32>, vector<8x4xf32>, vector<256x4xf32> -> vector<256x4xf32>
    %c241_i32 = arith.constant 241 : i32
    %53 = tpu.dynamic_rotate %52 by %c241_i32 dim 0 : vector<256x4xf32>, i32 -> vector<256x4xf32>
    %cst_44 = arith.constant 1.500000e+01 : f32
    %54 = vector.broadcast %cst_44 : f32 to vector<256x1xf32>
    %55 = arith.cmpf olt, %20, %54 : vector<256x1xf32>
    %cst_45 = arith.constant 1.000000e+00 : f32
    %56 = vector.broadcast %cst_45 : f32 to vector<256x1xf32>
    %57 = arith.cmpf oge, %21, %56 : vector<256x1xf32>
    %58 = arith.andi %55, %57 : vector<256x1xi1>
    %cst_46 = arith.constant 0.000000e+00 : f32
    %59 = vector.shape_cast %58 : vector<256x1xi1> to vector<256x1xi1>
    %60 = vector.broadcast %59 : vector<256x1xi1> to vector<256x4xi1>
    %61 = vector.broadcast %cst_46 : f32 to vector<256x4xf32>
    %62 = arith.select %60, %53, %61 : vector<256x4xi1>, vector<256x4xf32>
    %63 = arith.addf %24, %62 : vector<256x4xf32>
    %c3 = arith.constant 3 : index
    %c0_47 = arith.constant 0 : index
    %c0_48 = arith.constant 0 : index
    %64 = vector.load %arg6[%c3, %c0_47, %c0_48] : memref<9x8x4xf32, #tpu.memory_space<vmem>>, vector<1x8x4xf32>
    %65 = vector.shape_cast %64 : vector<1x8x4xf32> to vector<8x4xf32>
    %cst_49 = arith.constant dense<0.000000e+00> : vector<256x4xf32>
    %66 = tpu.matmul %19, %65, %cst_49 {dimension_numbers = #tpu.dot_dimension_numbers<[1], [0], [0], [1], [0, 0, 1, 1], [], []>} : vector<256x8xf32>, vector<8x4xf32>, vector<256x4xf32> -> vector<256x4xf32>
    %c16_i32 = arith.constant 16 : i32
    %67 = tpu.dynamic_rotate %66 by %c16_i32 dim 0 : vector<256x4xf32>, i32 -> vector<256x4xf32>
    %cst_50 = arith.constant 1.000000e+00 : f32
    %68 = vector.broadcast %cst_50 : f32 to vector<256x1xf32>
    %69 = arith.cmpf oge, %20, %68 : vector<256x1xf32>
    %cst_51 = arith.constant 0.000000e+00 : f32
    %70 = vector.shape_cast %69 : vector<256x1xi1> to vector<256x1xi1>
    %71 = vector.broadcast %70 : vector<256x1xi1> to vector<256x4xi1>
    %72 = vector.broadcast %cst_51 : f32 to vector<256x4xf32>
    %73 = arith.select %71, %67, %72 : vector<256x4xi1>, vector<256x4xf32>
    %74 = arith.addf %38, %73 : vector<256x4xf32>
    %c4_52 = arith.constant 4 : index
    %c0_53 = arith.constant 0 : index
    %c0_54 = arith.constant 0 : index
    %75 = vector.load %arg6[%c4_52, %c0_53, %c0_54] : memref<9x8x4xf32, #tpu.memory_space<vmem>>, vector<1x8x4xf32>
    %76 = vector.shape_cast %75 : vector<1x8x4xf32> to vector<8x4xf32>
    %cst_55 = arith.constant dense<0.000000e+00> : vector<256x4xf32>
    %77 = tpu.matmul %19, %76, %cst_55 {dimension_numbers = #tpu.dot_dimension_numbers<[1], [0], [0], [1], [0, 0, 1, 1], [], []>} : vector<256x8xf32>, vector<8x4xf32>, vector<256x4xf32> -> vector<256x4xf32>
    %78 = arith.addf %49, %77 : vector<256x4xf32>
    %c5 = arith.constant 5 : index
    %c0_56 = arith.constant 0 : index
    %c0_57 = arith.constant 0 : index
    %79 = vector.load %arg6[%c5, %c0_56, %c0_57] : memref<9x8x4xf32, #tpu.memory_space<vmem>>, vector<1x8x4xf32>
    %80 = vector.shape_cast %79 : vector<1x8x4xf32> to vector<8x4xf32>
    %cst_58 = arith.constant dense<0.000000e+00> : vector<256x4xf32>
    %81 = tpu.matmul %19, %80, %cst_58 {dimension_numbers = #tpu.dot_dimension_numbers<[1], [0], [0], [1], [0, 0, 1, 1], [], []>} : vector<256x8xf32>, vector<8x4xf32>, vector<256x4xf32> -> vector<256x4xf32>
    %c240_i32 = arith.constant 240 : i32
    %82 = tpu.dynamic_rotate %81 by %c240_i32 dim 0 : vector<256x4xf32>, i32 -> vector<256x4xf32>
    %cst_59 = arith.constant 1.500000e+01 : f32
    %83 = vector.broadcast %cst_59 : f32 to vector<256x1xf32>
    %84 = arith.cmpf olt, %20, %83 : vector<256x1xf32>
    %cst_60 = arith.constant 0.000000e+00 : f32
    %85 = vector.shape_cast %84 : vector<256x1xi1> to vector<256x1xi1>
    %86 = vector.broadcast %85 : vector<256x1xi1> to vector<256x4xi1>
    %87 = vector.broadcast %cst_60 : f32 to vector<256x4xf32>
    %88 = arith.select %86, %82, %87 : vector<256x4xi1>, vector<256x4xf32>
    %89 = arith.addf %63, %88 : vector<256x4xf32>
    %c6 = arith.constant 6 : index
    %c0_61 = arith.constant 0 : index
    %c0_62 = arith.constant 0 : index
    %90 = vector.load %arg6[%c6, %c0_61, %c0_62] : memref<9x8x4xf32, #tpu.memory_space<vmem>>, vector<1x8x4xf32>
    %91 = vector.shape_cast %90 : vector<1x8x4xf32> to vector<8x4xf32>
    %cst_63 = arith.constant dense<0.000000e+00> : vector<256x4xf32>
    %92 = tpu.matmul %19, %91, %cst_63 {dimension_numbers = #tpu.dot_dimension_numbers<[1], [0], [0], [1], [0, 0, 1, 1], [], []>} : vector<256x8xf32>, vector<8x4xf32>, vector<256x4xf32> -> vector<256x4xf32>
    %c15_i32 = arith.constant 15 : i32
    %93 = tpu.dynamic_rotate %92 by %c15_i32 dim 0 : vector<256x4xf32>, i32 -> vector<256x4xf32>
    %cst_64 = arith.constant 1.000000e+00 : f32
    %94 = vector.broadcast %cst_64 : f32 to vector<256x1xf32>
    %95 = arith.cmpf oge, %20, %94 : vector<256x1xf32>
    %cst_65 = arith.constant 1.500000e+01 : f32
    %96 = vector.broadcast %cst_65 : f32 to vector<256x1xf32>
    %97 = arith.cmpf olt, %21, %96 : vector<256x1xf32>
    %98 = arith.andi %95, %97 : vector<256x1xi1>
    %cst_66 = arith.constant 0.000000e+00 : f32
    %99 = vector.shape_cast %98 : vector<256x1xi1> to vector<256x1xi1>
    %100 = vector.broadcast %99 : vector<256x1xi1> to vector<256x4xi1>
    %101 = vector.broadcast %cst_66 : f32 to vector<256x4xf32>
    %102 = arith.select %100, %93, %101 : vector<256x4xi1>, vector<256x4xf32>
    %103 = arith.addf %74, %102 : vector<256x4xf32>
    %c7 = arith.constant 7 : index
    %c0_67 = arith.constant 0 : index
    %c0_68 = arith.constant 0 : index
    %104 = vector.load %arg6[%c7, %c0_67, %c0_68] : memref<9x8x4xf32, #tpu.memory_space<vmem>>, vector<1x8x4xf32>
    %105 = vector.shape_cast %104 : vector<1x8x4xf32> to vector<8x4xf32>
    %cst_69 = arith.constant dense<0.000000e+00> : vector<256x4xf32>
    %106 = tpu.matmul %19, %105, %cst_69 {dimension_numbers = #tpu.dot_dimension_numbers<[1], [0], [0], [1], [0, 0, 1, 1], [], []>} : vector<256x8xf32>, vector<8x4xf32>, vector<256x4xf32> -> vector<256x4xf32>
    %c255_i32 = arith.constant 255 : i32
    %107 = tpu.dynamic_rotate %106 by %c255_i32 dim 0 : vector<256x4xf32>, i32 -> vector<256x4xf32>
    %cst_70 = arith.constant 1.500000e+01 : f32
    %108 = vector.broadcast %cst_70 : f32 to vector<256x1xf32>
    %109 = arith.cmpf olt, %21, %108 : vector<256x1xf32>
    %cst_71 = arith.constant 0.000000e+00 : f32
    %110 = vector.shape_cast %109 : vector<256x1xi1> to vector<256x1xi1>
    %111 = vector.broadcast %110 : vector<256x1xi1> to vector<256x4xi1>
    %112 = vector.broadcast %cst_71 : f32 to vector<256x4xf32>
    %113 = arith.select %111, %107, %112 : vector<256x4xi1>, vector<256x4xf32>
    %114 = arith.addf %78, %113 : vector<256x4xf32>
    %c8 = arith.constant 8 : index
    %c0_72 = arith.constant 0 : index
    %c0_73 = arith.constant 0 : index
    %115 = vector.load %arg6[%c8, %c0_72, %c0_73] : memref<9x8x4xf32, #tpu.memory_space<vmem>>, vector<1x8x4xf32>
    %116 = vector.shape_cast %115 : vector<1x8x4xf32> to vector<8x4xf32>
    %cst_74 = arith.constant dense<0.000000e+00> : vector<256x4xf32>
    %117 = tpu.matmul %19, %116, %cst_74 {dimension_numbers = #tpu.dot_dimension_numbers<[1], [0], [0], [1], [0, 0, 1, 1], [], []>} : vector<256x8xf32>, vector<8x4xf32>, vector<256x4xf32> -> vector<256x4xf32>
    %c239_i32 = arith.constant 239 : i32
    %118 = tpu.dynamic_rotate %117 by %c239_i32 dim 0 : vector<256x4xf32>, i32 -> vector<256x4xf32>
    %cst_75 = arith.constant 1.500000e+01 : f32
    %119 = vector.broadcast %cst_75 : f32 to vector<256x1xf32>
    %120 = arith.cmpf olt, %20, %119 : vector<256x1xf32>
    %cst_76 = arith.constant 1.500000e+01 : f32
    %121 = vector.broadcast %cst_76 : f32 to vector<256x1xf32>
    %122 = arith.cmpf olt, %21, %121 : vector<256x1xf32>
    %123 = arith.andi %120, %122 : vector<256x1xi1>
    %cst_77 = arith.constant 0.000000e+00 : f32
    %124 = vector.shape_cast %123 : vector<256x1xi1> to vector<256x1xi1>
    %125 = vector.broadcast %124 : vector<256x1xi1> to vector<256x4xi1>
    %126 = vector.broadcast %cst_77 : f32 to vector<256x4xf32>
    %127 = arith.select %125, %118, %126 : vector<256x4xi1>, vector<256x4xf32>
    %128 = arith.addf %89, %127 : vector<256x4xf32>
    %129 = arith.addf %103, %114 : vector<256x4xf32>
    %130 = arith.addf %129, %128 : vector<256x4xf32>
    %c0_78 = arith.constant 0 : index
    %c0_79 = arith.constant 0 : index
    %c0_80 = arith.constant 0 : index
    %131 = vector.load %arg8[%c0_78, %c0_79, %c0_80] : memref<1x256x4xf32, #tpu.memory_space<vmem>>, vector<1x256x4xf32>
    %132 = vector.shape_cast %131 : vector<1x256x4xf32> to vector<256x4xf32>
    %133 = vector.shape_cast %130 : vector<256x4xf32> to vector<1x256x4xf32>
    tpu.vector_store %arg8[%c0_78, %c0_79, %c0_80], %133 {strides = array<i32>} : memref<1x256x4xf32, #tpu.memory_space<vmem>>, vector<1x256x4xf32>,
    return
  }
  func.func @transform_0(%arg0: i32) -> (i32, i32, i32, i32) {
    %c0_i32 = arith.constant 0 : i32
    %c0_i32_0 = arith.constant 0 : i32
    %c0_i32_1 = arith.constant 0 : i32
    %c0_i32_2 = arith.constant 0 : i32
    return %arg0, %c0_i32, %c0_i32_0, %c0_i32_1 : i32, i32, i32, i32
  }
  func.func @transform_1(%arg0: i32) -> (i32, i32, i32, i32) {
    %c0_i32 = arith.constant 0 : i32
    %c0_i32_0 = arith.constant 0 : i32
    %c0_i32_1 = arith.constant 0 : i32
    %c0_i32_2 = arith.constant 0 : i32
    return %arg0, %c0_i32, %c0_i32_0, %c0_i32_1 : i32, i32, i32, i32
  }
  func.func @transform_2(%arg0: i32) -> (i32, i32, i32) {
    %c0_i32 = arith.constant 0 : i32
    %c0_i32_0 = arith.constant 0 : i32
    %c0_i32_1 = arith.constant 0 : i32
    return %arg0, %c0_i32, %c0_i32_0 : i32, i32, i32
  }
  func.func @transform_3(%arg0: i32) -> (i32, i32, i32) {
    %c0_i32 = arith.constant 0 : i32
    %c0_i32_0 = arith.constant 0 : i32
    %c0_i32_1 = arith.constant 0 : i32
    %c0_i32_2 = arith.constant 0 : i32
    return %c0_i32, %c0_i32_0, %c0_i32_1 : i32, i32, i32
  }
  func.func @transform_4(%arg0: i32) -> (i32, i32, i32) {
    %c0_i32 = arith.constant 0 : i32
    %c0_i32_0 = arith.constant 0 : i32
    %c0_i32_1 = arith.constant 0 : i32
    %c0_i32_2 = arith.constant 0 : i32
    return %c0_i32, %c0_i32_0, %c0_i32_1 : i32, i32, i32
  }
  func.func @transform_5(%arg0: i32) -> (i32, i32, i32) {
    %c0_i32 = arith.constant 0 : i32
    %c0_i32_0 = arith.constant 0 : i32
    %c0_i32_1 = arith.constant 0 : i32
    %c0_i32_2 = arith.constant 0 : i32
    return %c0_i32, %c0_i32_0, %c0_i32_1 : i32, i32, i32
  }
  func.func @transform_6(%arg0: i32) -> (i32, i32) {
    %c0_i32 = arith.constant 0 : i32
    %c0_i32_0 = arith.constant 0 : i32
    %c0_i32_1 = arith.constant 0 : i32
    return %c0_i32, %c0_i32_0 : i32, i32
  }
  func.func @transform_7(%arg0: i32) -> (i32, i32, i32) {
    %c0_i32 = arith.constant 0 : i32
    %c0_i32_0 = arith.constant 0 : i32
    %c0_i32_1 = arith.constant 0 : i32
    return %arg0, %c0_i32, %c0_i32_0 : i32, i32, i32
  }
}

</mosaic_0001>

<bundles_post_ra>
// kernel: tpu_custom_call.1
= control target key start
LH: loop header
LB: loop body
LE: loop exit
PB: predicated region body
PF: predicated region fallthrough
CT: control target
= control target key end

     0   :  { %s5759_s24 = smov 0   ;;  %s11499_s0 = inlined_call_operand.vmem [shape: f32[2,16,8,4], index: 0, kind: input, shape index: {}]   ;;  %s11500_s1 = inlined_call_operand.vmem [shape: f32[2,16,8,4], index: 1, kind: input, shape index: {}]   ;;  %s11501_s2 = inlined_call_operand.vmem [shape: f32[2,256,4], index: 2, kind: input, shape index: {}]   ;;  %s11502_s3 = inlined_call_operand.vmem [shape: f32[16,16,8], index: 3, kind: input, shape index: {}]   ;;  %s11503_s4 = inlined_call_operand.vmem [shape: f32[16,1,1], index: 4, kind: input, shape index: {}]   ;;  %s11504_s5 = inlined_call_operand.vmem [shape: f32[9,8,4], index: 5, kind: input, shape index: {}]   ;;  %s11505_s6 = inlined_call_operand.vmem [shape: f32[256,2], index: 6, kind: input, shape index: {}]   ;;  %s11506_s7 = inlined_call_operand.vmem [shape: f32[2,256,4], index: 7, kind: output, shape index: {}]  }
   0x1 LB: > { %s5247_s25 = sadd.s32 4294967295, %s5713_s24   ;;  %p5251_p0 = scmp.ge.s32.totalorder %s5713_s24, 1  ;;  %s5713_s24 = sphi %s5759_s24, %s17_s24  }
   0x2   : > { %p257_p1 = scmp.lt.s32.totalorder %s5713_s24, 3 }
   0x4   : > { %p258_p2 = pnand %p5251_p0, %p257_p1 }
   0x6   : > { %261 = sbr.rel (%p258_p2) target bundleno = 1237 (0x4d5), region = 48 }
   0xb   : > { %v323_v0 = vld [vmem:[%s11503_s4 + $0x4] sm:$0x1]  ;;  %v321_v1 = vld [vmem:[%s11503_s4 + $0x2] sm:$0x1]  ;;  %v11584_v2 = vmov 0   ;;  %p299_p3 = scmp.lt.s32.totalorder %s5247_s25, 1 }
   0xc   : > { %5611 = vset.pattern.permute.xlu2 %v11584_v2  ;;  %5610 = vset.pattern.permute.xlu1 %v11584_v2  ;;  %v355_v3 = vsub.f32 1.0, %v323_v0  ;;  %v353_v4 = vsub.f32 1.0, %v321_v1  ;;  %v319_v5 = vld [vmem:[%s11503_s4] sm:$0x1]  ;;  %v324_v7 = vld [vmem:[%s11503_s4 + $0x5] sm:$0x1] }
   0xd   : > { %5609 = vset.pattern.permute.xlu0 %v11584_v2  ;;  %v351_v6 = vsub.f32 1.0, %v319_v5  ;;  %v322_v8 = vld [vmem:[%s11503_s4 + $0x3] sm:$0x1]  ;;  %v320_v11 = vld [vmem:[%s11503_s4 + $0x1] sm:$0x1]  ;;  %v356_v13 = vsub.f32 1.0, %v324_v7 }
   0xe   : > { %v387_v9 = vperm.slane %v355_v3, 0  ;;  %v385_v10 = vperm.slane %v353_v4, 0  ;;  %v354_v14 = vsub.f32 1.0, %v322_v8  ;;  %v352_v15 = vsub.f32 1.0, %v320_v11  ;;  %v327_v19 = vld [vmem:[%s11503_s4 + $0x8] sm:$0x1] }
   0xf   : > { %v383_v12 = vperm.slane %v351_v6, 0  ;;  %v388_v16 = vperm.slane %v356_v13, 0  ;;  %v326_v20 = vld [vmem:[%s11503_s4 + $0x7] sm:$0x1]  ;;  %v325_v21 = vld [vmem:[%s11503_s4 + $0x6] sm:$0x1] }
  0x10   : > { %416 = vperm.xlu2 %5611, %v387_v9   ;;  %408 = vperm.xlu1 %5610, %v385_v10   ;;  %v386_v17 = vperm.slane %v354_v14, 0  ;;  %v384_v18 = vperm.slane %v352_v15, 0  ;;  %v359_v22 = vsub.f32 1.0, %v327_v19  ;;  %v358_v23 = vsub.f32 1.0, %v326_v20  ;;  %v330_v28 = vld [vmem:[%s11503_s4 + $0xb] sm:$0x1] }
  0x11   : > { %400 = vperm.xlu0 %5609, %v383_v12   ;;  %v357_v24 = vsub.f32 1.0, %v325_v21  ;;  %v329_v29 = vld [vmem:[%s11503_s4 + $0xa] sm:$0x1]  ;;  %v328_v30 = vld [vmem:[%s11503_s4 + $0x9] sm:$0x1]  ;;  %v362_v31 = vsub.f32 1.0, %v330_v28 }
  0x12   : > { %v391_v25 = vperm.slane %v359_v22, 0  ;;  %v390_v26 = vperm.slane %v358_v23, 0  ;;  %v361_v32 = vsub.f32 1.0, %v329_v29  ;;  %v360_v33 = vsub.f32 1.0, %v328_v30  ;;  %v333_v37 = vld [vmem:[%s11503_s4 + $0xe] sm:$0x1] }
  0x13   : > { %v389_v27 = vperm.slane %v357_v24, 0  ;;  %v394_v34 = vperm.slane %v362_v31, 0  ;;  %v332_v38 = vld [vmem:[%s11503_s4 + $0xd] sm:$0x1]  ;;  %v331_v39 = vld [vmem:[%s11503_s4 + $0xc] sm:$0x1] }
  0x14   : > { %v393_v35 = vperm.slane %v361_v32, 0  ;;  %v392_v36 = vperm.slane %v360_v33, 0  ;;  %v365_v40 = vsub.f32 1.0, %v333_v37  ;;  %v364_v41 = vsub.f32 1.0, %v332_v38  ;;  %v334_v46 = vld [vmem:[%s11503_s4 + $0xf] sm:$0x1] }
  0x15   : > { %v363_v42 = vsub.f32 1.0, %v331_v39  ;;  %v366_v47 = vsub.f32 1.0, %v334_v46  ;;  %v5622_v48 = vld [vmem:[%s11503_s4 + $0x1] ss:$0 sm:$0xff]  ;;  %v5623_v49 = vld [vmem:[%s11503_s4] ss:$0 sm:$0xff] }
  0x16   : > { %v397_v43 = vperm.slane %v365_v40, 0  ;;  %v396_v44 = vperm.slane %v364_v41, 0  ;;  %v5624_v51 = vld [vmem:[%s11503_s4 + $0x4] ss:$0 sm:$0xff]  ;;  %v5625_v52 = vld [vmem:[%s11503_s4 + $0x3] ss:$0 sm:$0xff] }
  0x17   : > { %v395_v45 = vperm.slane %v363_v42, 0  ;;  %v398_v50 = vperm.slane %v366_v47, 0  ;;  %v5626_v53 = vld [vmem:[%s11503_s4 + $0x2] ss:$0 sm:$0xff]  ;;  %v5627_v54 = vld [vmem:[%s11503_s4 + $0x7] ss:$0 sm:$0xff] }
  0x18   : > { %420 = vperm.xlu2 %5611, %v388_v16   ;;  %412 = vperm.xlu1 %5610, %v386_v17   ;;  %v5628_v55 = vld [vmem:[%s11503_s4 + $0x6] ss:$0 sm:$0xff]  ;;  %v5629_v56 = vld [vmem:[%s11503_s4 + $0x5] ss:$0 sm:$0xff]  ;;  %v5630_v57 = vld [vmem:[%s11503_s4 + $0xa] ss:$0 sm:$0xff] }
  0x19   : > { %404 = vperm.xlu0 %5609, %v384_v18   ;;  %v5631_v58 = vld [vmem:[%s11503_s4 + $0x9] ss:$0 sm:$0xff]  ;;  %v5632_v59 = vld [vmem:[%s11503_s4 + $0x8] ss:$0 sm:$0xff]  ;;  %s13406_s25 = smov (!%p299_p3, %s5247_s25), 1  ;;  %s5716_s8 = smov 4  }
  0x1a   : > { %v5633_v60 = vld [vmem:[%s11503_s4 + $0xd] ss:$0 sm:$0xff]  ;;  %v5634_v61 = vld [vmem:[%s11503_s4 + $0xc] ss:$0 sm:$0xff]  ;;  %v5635_v62 = vld [vmem:[%s11503_s4 + $0xb] ss:$0 sm:$0xff] }
  0x1b   : > { %s5592_s21 = sshll.u32 %s13406_s25, 8  ;;  %v5636_v63 = vld [vmem:[%s11503_s4 + $0xf] ss:$0 sm:$0xff]  ;;  %v5637_v0 = vld [vmem:[%s11503_s4 + $0xe] ss:$0 sm:$0xff]  ;;  %s5590_s9 = sshll.u32 %s13406_s25, 7 }
  0x1c   : > { %s5872_s26 = scalar_lea.vmem %s11501_s2, %s5592_s21  ;;  %s5933_s12 = scalar_lea.vmem %s11500_s1, %s5590_s9  ;;  %v625_v39 = vld [vmem:[%s11502_s3 + $0x10] sm:$0xff]  ;;  %vm655_vm0 = vcmask 64512   ;;  %v626_v46 = vld [vmem:[%s11502_s3 + $0x18] sm:$0xff] }
  0x1d   : > { %v1153_v1 = vld [vmem:[%s5872_s26] sm:$0xff]  ;;  %v1156_v3 = vld [vmem:[%s5872_s26 + $0x18] sm:$0xff]  ;;  %v1155_v4 = vld [vmem:[%s5872_s26 + $0x10] sm:$0xff]  ;;  %s5940_s15 = scalar_lea.vmem %s11499_s0, %s5590_s9  ;;  %s11080_s22 = scalar_lea.vmem %s11506_s7, %s5592_s21 }
  0x1e   : > { %v1154_v5 = vld [vmem:[%s5872_s26 + $0x8] sm:$0xff]  ;;  %v1159_v7 = vld [vmem:[%s5872_s26 + $0x30] sm:$0xff]  ;;  %v1157_v9 = vld [vmem:[%s5872_s26 + $0x20] sm:$0xff] }
  0x1f   : > { %v1158_v8 = vld [vmem:[%s5872_s26 + $0x28] sm:$0xff]  ;;  %v1161_v12 = vld [vmem:[%s5872_s26 + $0x40] sm:$0xff]  ;;  %v1160_v13 = vld [vmem:[%s5872_s26 + $0x38] sm:$0xff] }
  0x20   : > { %432 = vperm.xlu2 %5611, %v391_v25   ;;  %428 = vperm.xlu1 %5610, %v390_v26   ;;  %v1162_v11 = vld [vmem:[%s5872_s26 + $0x48] sm:$0xff]  ;;  %v1165_v15 = vld [vmem:[%s5872_s26 + $0x60] sm:$0xff]  ;;  %v1164_v16 = vld [vmem:[%s5872_s26 + $0x58] sm:$0xff] }
  0x21   : > { %424 = vperm.xlu0 %5609, %v389_v27   ;;  %v1163_v17 = vld [vmem:[%s5872_s26 + $0x50] sm:$0xff]  ;;  %v1168_v21 = vld [vmem:[%s5872_s26 + $0x78] sm:$0xff]  ;;  %v1166_v23 = vld [vmem:[%s5872_s26 + $0x68] sm:$0xff] }
  0x22   : > { %v1167_v22 = vld [vmem:[%s5872_s26 + $0x70] sm:$0xff]  ;;  %v1170_v28 = vld [vmem:[%s5872_s26 + $0x88] sm:$0xff]  ;;  %v1169_v29 = vld [vmem:[%s5872_s26 + $0x80] sm:$0xff] }
  0x23   : > { %v1171_v27 = vld [vmem:[%s5872_s26 + $0x90] sm:$0xff]  ;;  %v336_v30 = vld [vmem:[%s5940_s15 + $0x8] sm:$0xff]  ;;  %v1172_v40 = vld [vmem:[%s5872_s26 + $0x98] sm:$0xff] }
  0x24   : > { %v480_v31 = vld [vmem:[%s5933_s12 + $0x8] sm:$0xff]  ;;  %v1173_v41 = vld [vmem:[%s5872_s26 + $0xa0] sm:$0xff]  ;;  %v1175_v47 = vld [vmem:[%s5872_s26 + $0xb0] sm:$0xff] }
  0x25   : > { %v1174_v38 = vld [vmem:[%s5872_s26 + $0xa8] sm:$0xff] }
  0x28   : > { %444 = vperm.xlu2 %5611, %v394_v34   ;;  %440 = vperm.xlu1 %5610, %v393_v35  }
  0x29   : > { %436 = vperm.xlu0 %5609, %v392_v36  }
  0x30   : > { %456 = vperm.xlu2 %5611, %v397_v43   ;;  %452 = vperm.xlu1 %5610, %v396_v44  }
  0x31   : > { %448 = vperm.xlu0 %5609, %v395_v45   ;;  %v1177_v45 = vld [vmem:[%s5872_s26 + $0xc0] sm:$0xff] }
  0x38   : > { %532 = vperm.xlu2 %5611, %v5622_v48   ;;  %528 = vperm.xlu1 %5610, %v5623_v49   ;;  %v1176_v48 = vld [vmem:[%s5872_s26 + $0xb8] sm:$0xff] }
  0x39   : > { %460 = vperm.xlu0 %5609, %v398_v50  }
  0x40   : > { %544 = vperm.xlu2 %5611, %v5624_v51   ;;  %540 = vperm.xlu1 %5610, %v5625_v52   ;;  %v1180_v52 = vld [vmem:[%s5872_s26 + $0xd8] sm:$0xff] }
  0x41   : > { %536 = vperm.xlu0 %5609, %v5626_v53   ;;  %v1178_v53 = vld [vmem:[%s5872_s26 + $0xc8] sm:$0xff] }
  0x48   : > { %556 = vperm.xlu2 %5611, %v5627_v54   ;;  %552 = vperm.xlu1 %5610, %v5628_v55   ;;  %v1179_v54 = vld [vmem:[%s5872_s26 + $0xd0] sm:$0xff]  ;;  %v335_v55 = vld [vmem:[%s5940_s15] sm:$0xff] }
  0x49   : > { %548 = vperm.xlu0 %5609, %v5629_v56   ;;  %v483_v56 = vld [vmem:[%s5933_s12 + $0x20] sm:$0xff] }
  0x50   : > { %568 = vperm.xlu2 %5611, %v5630_v57   ;;  %564 = vperm.xlu1 %5610, %v5631_v58   ;;  %v479_v57 = vld [vmem:[%s5933_s12] sm:$0xff] }
  0x51   : > { %560 = vperm.xlu0 %5609, %v5632_v59   ;;  %v339_v58 = vld [vmem:[%s5940_s15 + $0x20] sm:$0xff] }
  0x58   : > { %580 = vperm.xlu2 %5611, %v5633_v60   ;;  %576 = vperm.xlu1 %5610, %v5634_v61  }
  0x59   : > { %572 = vperm.xlu0 %5609, %v5635_v62  }
  0x60   : > { %588 = vperm.xlu1 %5610, %v5636_v63   ;;  %1217 = vrot.lane.b32.xlu2 %v1153_v1, %s5716_s8 }
  0x61   : > { %584 = vperm.xlu0 %5609, %v5637_v0  }
  0x68   : > { %1223 = vrot.lane.b32.xlu2 %v1156_v3, %s5716_s8  ;;  %1221 = vrot.lane.b32.xlu1 %v1155_v4, %s5716_s8  ;;  %v1183_v4 = vld [vmem:[%s5872_s26 + $0xf0] sm:$0xff] }
  0x69   : > { %1219 = vrot.lane.b32.xlu0 %v1154_v5, %s5716_s8  ;;  %v623_v5 = vld [vmem:[%s11502_s3] sm:$0xff] }
  0x6a   : > { %v5888_v6 = vpop.permute.xlu2 %416 }
  0x6b   : > { %v467_v1 = vmul.f32 %v5888_v6, %v339_v58  ;;  %v482_v6 = vld [vmem:[%s5933_s12 + $0x18] sm:$0xff] }
  0x70   : > { %1229 = vrot.lane.b32.xlu2 %v1159_v7, %s5716_s8  ;;  %1227 = vrot.lane.b32.xlu1 %v1158_v8, %s5716_s8  ;;  %v1181_v7 = vld [vmem:[%s5872_s26 + $0xe0] sm:$0xff] }
  0x71   : > { %1225 = vrot.lane.b32.xlu0 %v1157_v9, %s5716_s8  ;;  %v1182_v9 = vld [vmem:[%s5872_s26 + $0xe8] sm:$0xff] }
  0x72   : > { %v5896_v10 = vpop.permute.xlu2 %420 }
  0x78   : > { %1235 = vrot.lane.b32.xlu2 %v1162_v11, %s5716_s8  ;;  %1233 = vrot.lane.b32.xlu1 %v1161_v12, %s5716_s8  ;;  %v6004_v11 = vld [vmem:[%s11505_s6 + $0x8] sm:$0xff]  ;;  %v338_v12 = vld [vmem:[%s5940_s15 + $0x18] sm:$0xff] }
  0x79   : > { %1231 = vrot.lane.b32.xlu0 %v1160_v13, %s5716_s8  ;;  %12007 = vst [vmem:[#allocation3_spill] sm:$0xff] %v6004_v11  ;;  %v337_v13 = vld [vmem:[%s5940_s15 + $0x10] sm:$0xff]  ;;  %vm11598_vm1 = vcmp.ge.f32.partialorder %v6004_v11, 1.0 }
  0x7a   : > { %v5904_v14 = vpop.permute.xlu2 %432 }
  0x80   : > { %1241 = vrot.lane.b32.xlu2 %v1165_v15, %s5716_s8  ;;  %1239 = vrot.lane.b32.xlu1 %v1164_v16, %s5716_s8  ;;  %v342_v15 = vld [vmem:[%s5940_s15 + $0x38] sm:$0xff]  ;;  %v481_v16 = vld [vmem:[%s5933_s12 + $0x10] sm:$0xff] }
  0x81   : > { %1237 = vrot.lane.b32.xlu0 %v1163_v17, %s5716_s8  ;;  %v486_v17 = vld [vmem:[%s5933_s12 + $0x38] sm:$0xff] }
  0x82   : > { %v5912_v18 = vpop.permute.xlu2 %444  ;;  %v5914_v19 = vpop.permute.xlu1 %408 }
  0x83   : > { %v5916_v20 = vpop.permute.xlu0 %400 }
  0x84   : > { %v463_v61 = vmul.f32 %v5916_v20, %v335_v55 }
  0x88   : > { %1247 = vrot.lane.b32.xlu2 %v1168_v21, %s5716_s8  ;;  %1245 = vrot.lane.b32.xlu1 %v1167_v22, %s5716_s8  ;;  %v6022_v22 = vld [vmem:[%s11505_s6] sm:$0xff] }
  0x89   : > { %1243 = vrot.lane.b32.xlu0 %v1166_v23, %s5716_s8  ;;  %12008 = vst [vmem:[#allocation4_spill] sm:$0xff] %v6022_v22  ;;  %vm11512_vm2 = vcmp.ge.f32.partialorder %v6022_v22, 1.0 }
  0x8a   : > { %v5924_v24 = vpop.permute.xlu2 %456  ;;  %v5926_v25 = vpop.permute.xlu1 %412 }
  0x8b   : > { %v405_v26 = vpop.permute.xlu0 %404  ;;  %v466_v23 = vmul.f32 %v5926_v25, %v338_v12  ;;  %v343_v12 = vld [vmem:[%s5940_s15 + $0x40] sm:$0xff] }
  0x8c   : > { %v464_v34 = vmul.f32 %v405_v26, %v336_v30 }
  0x90   : > { %1253 = vrot.lane.b32.xlu2 %v1171_v27, %s5716_s8  ;;  %1251 = vrot.lane.b32.xlu1 %v1170_v28, %s5716_s8  ;;  %v465_v28 = vmul.f32 %v5914_v19, %v337_v13  ;;  %v624_v19 = vld [vmem:[%s11502_s3 + $0x8] sm:$0xff]  ;;  %v487_v13 = vld [vmem:[%s5933_s12 + $0x40] sm:$0xff] }
  0x91   : > { %1249 = vrot.lane.b32.xlu0 %v1169_v29, %s5716_s8 }
  0x92   : > { %v5947_v32 = vpop.permute.xlu1 %428  ;;  %v533_v33 = vpop.permute.xlu2 %532 }
  0x93   : > { %v592_v35 = vmul.f32 %v533_v33, %v480_v31  ;;  %v5949_v36 = vpop.permute.xlu0 %424  ;;  %v470_v29 = vmul.f32 %v5947_v32, %v342_v15  ;;  %v627_v32 = vld [vmem:[%s11502_s3 + $0x20] sm:$0xff] }
  0x95   : > { %v608_v37 = vadd.f32 %v592_v35, %v464_v34  ;;  %v6030_v34 = vsel %vm11598_vm1, 1, %v11584_v2  ;;  %v1184_v35 = vld [vmem:[%s5872_s26 + $0xf8] sm:$0xff]  ;;  %s5717_s26 = smov 127  }
  0x96   : > { %12009 = vst [vmem:[#allocation5_spill] sm:$0xff] %v6030_v34 }
  0x97   : > { %706 = vmatpush.msra.mxu1 %v608_v37  ;;  %v629_v37 = vld [vmem:[%s11502_s3 + $0x30] sm:$0xff] }
  0x98   : > { %1259 = vrot.lane.b32.xlu2 %v1174_v38, %s5716_s8  ;;  %5262 = vmatmul.msk.f32.vlgmr.msra.gmra.mxu1 %vm655_vm0, %v625_v39  ;;  %v6046_v38 = vld [vmem:[%s11505_s6 + $0x20] sm:$0xff]  ;;  %v341_v39 = vld [vmem:[%s5940_s15 + $0x30] sm:$0xff] }
  0x99   : > { %1255 = vrot.lane.b32.xlu0 %v1172_v40, %s5716_s8  ;;  %1257 = vrot.lane.b32.xlu1 %v1173_v41, %s5716_s8  ;;  %12010 = vst [vmem:[#allocation6_spill] sm:$0xff] %v6046_v38  ;;  %v485_v40 = vld [vmem:[%s5933_s12 + $0x30] sm:$0xff]  ;;  %v6055_v41 = vsel %vm11512_vm2, 1, %v11584_v2  ;;  %vm11602_vm3 = vcmp.ge.f32.partialorder %v6046_v38, 1.0 }
  0x9a   : > { %v5961_v42 = vpop.permute.xlu1 %440  ;;  %v545_v43 = vpop.permute.xlu2 %544  ;;  %12011 = vst [vmem:[#allocation7_spill] sm:$0xff] %v6055_v41 }
  0x9b   : > { %v5963_v44 = vpop.permute.xlu0 %436  ;;  %v595_v62 = vmul.f32 %v545_v43, %v483_v56  ;;  %v6060_v43 = vld [vmem:[%s11505_s6 + $0x10] sm:$0xff] }
  0x9c   : > { %12012 = vst [vmem:[#allocation8_spill] sm:$0xff] %v6060_v43  ;;  %vm11617_vm4 = vcmp.ge.f32.partialorder %v6060_v43, 1.0 }
  0x9d   : > { %v611_v8 = vadd.f32 %v595_v62, %v467_v1  ;;  %v344_v1 = vld [vmem:[%s5940_s15 + $0x48] sm:$0xff] }
  0xa0   : > { %1265 = vrot.lane.b32.xlu2 %v1177_v45, %s5716_s8  ;;  %5263 = vmatmul.msk.f32.gmra.mxu1 %vm655_vm0, %v626_v46  ;;  %v340_v45 = vld [vmem:[%s5940_s15 + $0x28] sm:$0xff] }
  0xa1   : > { %1261 = vrot.lane.b32.xlu0 %v1175_v47, %s5716_s8  ;;  %1263 = vrot.lane.b32.xlu1 %v1176_v48, %s5716_s8  ;;  %v484_v47 = vld [vmem:[%s5933_s12 + $0x28] sm:$0xff]  ;;  %v345_v48 = vld [vmem:[%s5940_s15 + $0x50] sm:$0xff]  ;;  %v468_v58 = vmul.f32 %v5896_v10, %v340_v45 }
  0xa2   : > { %v5975_v49 = vpop.permute.xlu1 %452  ;;  %v557_v50 = vpop.permute.xlu2 %556  ;;  %v631_v10 = vld [vmem:[%s11502_s3 + $0x40] sm:$0xff]  ;;  %v634_v45 = vld [vmem:[%s11502_s3 + $0x58] sm:$0xff] }
  0xa3   : > { %v5977_v51 = vpop.permute.xlu0 %448  ;;  %v598_v31 = vmul.f32 %v557_v50, %v486_v17  ;;  %v489_v50 = vld [vmem:[%s5933_s12 + $0x50] sm:$0xff] }
  0xa5   : > { %v614_v46 = vadd.f32 %v598_v31, %v470_v29  ;;  %v471_v29 = vmul.f32 %v5904_v14, %v343_v12  ;;  %v641_v12 = vld [vmem:[%s11502_s3 + $0x90] sm:$0xff] }
  0xa8   : > { %1271 = vrot.lane.b32.xlu2 %v1180_v52, %s5716_s8 }
  0xa9   : > { %1267 = vrot.lane.b32.xlu0 %v1178_v53, %s5716_s8  ;;  %1269 = vrot.lane.b32.xlu1 %v1179_v54, %s5716_s8  ;;  %v469_v54 = vmul.f32 %v5949_v36, %v341_v39  ;;  %v6175_v39 = vld [vmem:[%s11505_s6 + $0x50] sm:$0xff] }
  0xaa   : > { %v5989_v59 = vpop.permute.xlu2 %568  ;;  %v529_v60 = vpop.permute.xlu1 %528  ;;  %12022 = vst [vmem:[#allocation18_spill] sm:$0xff] %v6175_v39  ;;  %vm11608_vm9 = vcmp.ge.f32.partialorder %v6175_v39, 1.0 }
  0xab   : > { %v591_v63 = vmul.f32 %v529_v60, %v479_v57  ;;  %v5992_v0 = vpop.permute.xlu0 %460  ;;  %v6080_v57 = vld [vmem:[%s11505_s6 + $0x18] sm:$0xff]  ;;  %v601_v36 = vmul.f32 %v5989_v59, %v489_v50 }
  0xac   : > { %12013 = vst [vmem:[#allocation9_spill] sm:$0xff] %v6080_v57  ;;  %vm11510_vm5 = vcmp.ge.f32.partialorder %v6080_v57, 1.0  ;;  %v630_v59 = vld [vmem:[%s11502_s3 + $0x38] sm:$0xff] }
  0xad   : > { %v607_v3 = vadd.f32 %v591_v63, %v463_v61  ;;  %v473_v61 = vmul.f32 %v5961_v42, %v345_v48  ;;  %v6088_v63 = vsel %vm11602_vm3, 1, %v11584_v2  ;;  %v628_v42 = vld [vmem:[%s11502_s3 + $0x28] sm:$0xff]  ;;  %v6130_v15 = vsel %vm11510_vm5, 1, %v11584_v2  ;;  %v346_v48 = vld [vmem:[%s5940_s15 + $0x58] sm:$0xff] }
  0xae   : > { %12014 = vst [vmem:[#allocation10_spill] sm:$0xff] %v6088_v63 }
  0xaf   : > { %677 = vmatpush.msra.mxu0 %v607_v3  ;;  %12018 = vst [vmem:[#allocation14_spill] sm:$0xff] %v6130_v15 }
  0xb0   : > { %1277 = vrot.lane.b32.xlu2 %v1183_v4, %s5716_s8  ;;  %5260 = vmatmul.msk.f32.vlgmr.msra.gmra.mxu0 %vm655_vm0, %v623_v5  ;;  %v6094_v4 = vsel %vm11617_vm4, 1, %v11584_v2  ;;  %v6109_v5 = vld [vmem:[%s11505_s6 + $0x38] sm:$0xff] }
  0xb1   : > { %1273 = vrot.lane.b32.xlu0 %v1181_v7, %s5716_s8  ;;  %793 = vmatpush.msrb.mxu0 %v611_v8  ;;  %12015 = vst [vmem:[#allocation11_spill] sm:$0xff] %v6094_v4  ;;  %v633_v7 = vld [vmem:[%s11502_s3 + $0x50] sm:$0xff]  ;;  %v488_v8 = vld [vmem:[%s5933_s12 + $0x48] sm:$0xff]  ;;  %vm11610_vm6 = vcmp.ge.f32.partialorder %v6109_v5, 1.0 }
  0xb2   : > { %v6015_v20 = vpop.permute.xlu2 %580  ;;  %v541_v21 = vpop.permute.xlu1 %540  ;;  %1275 = vrot.lane.b32.xlu1 %v1182_v9, %s5716_s8  ;;  %12016 = vst [vmem:[#allocation12_spill] sm:$0xff] %v6109_v5  ;;  %v6120_v9 = vld [vmem:[%s11505_s6 + $0x28] sm:$0xff] }
  0xb3   : > { %v594_v26 = vmul.f32 %v541_v21, %v482_v6  ;;  %v537_v27 = vpop.permute.xlu0 %536  ;;  %12017 = vst [vmem:[#allocation13_spill] sm:$0xff] %v6120_v9  ;;  %v617_v6 = vadd.f32 %v601_v36, %v473_v61  ;;  %v472_v21 = vmul.f32 %v5963_v44, %v344_v1  ;;  %vm11620_vm7 = vcmp.ge.f32.partialorder %v6120_v9, 1.0  ;;  %v348_v44 = vld [vmem:[%s5940_s15 + $0x68] sm:$0xff] }
  0xb4   : > { %v593_v30 = vmul.f32 %v537_v27, %v481_v16  ;;  %v6160_v14 = vsel %vm11620_vm7, 1, %v11584_v2  ;;  %v6210_v61 = vld [vmem:[%s11505_s6 + $0x48] sm:$0xff]  ;;  %v474_v36 = vmul.f32 %v5912_v18, %v346_v48  ;;  %v6218_v1 = vsel %vm11608_vm9, 1, %v11584_v2  ;;  %v6311_v48 = vld [vmem:[%s11505_s6 + $0x70] sm:$0xff] }
  0xb5   : > { %v610_v33 = vadd.f32 %v594_v26, %v466_v23  ;;  %v492_v23 = vld [vmem:[%s5933_s12 + $0x68] sm:$0xff]  ;;  %12021 = vst [vmem:[#allocation17_spill] sm:$0xff] %v6160_v14  ;;  %vm11507_vm11 = vcmp.ge.f32.partialorder %v6210_v61, 1.0 }
  0xb6   : > { %v609_v25 = vadd.f32 %v593_v30, %v465_v28  ;;  %v6144_v28 = vld [vmem:[%s11505_s6 + $0x30] sm:$0xff]  ;;  %12025 = vst [vmem:[#allocation21_spill] sm:$0xff] %v6210_v61  ;;  %v1410_v61 = vld [vmem:[%s11504_s5] sm:$0xff] }
  0xb7   : > { %764 = vmatpush.msra.mxu3 %v610_v33  ;;  %12019 = vst [vmem:[#allocation15_spill] sm:$0xff] %v6144_v28  ;;  %v6153_v33 = vsel %vm11610_vm6, 1, %v11584_v2  ;;  %vm11509_vm8 = vcmp.ge.f32.partialorder %v6144_v28, 1.0 }
  0xb8   : > { %735 = vmatpush.msra.mxu2 %v609_v25  ;;  %1753 = vrot.lane.b32.xlu2 %v6030_v34, %s5717_s26  ;;  %12020 = vst [vmem:[#allocation16_spill] sm:$0xff] %v6153_v33  ;;  %v347_v25 = vld [vmem:[%s5940_s15 + $0x60] sm:$0xff]  ;;  %v6197_v50 = vsel %vm11509_vm8, 1, %v11584_v2 }
  0xb9   : > { %1279 = vrot.lane.b32.xlu0 %v1184_v35, %s5716_s8  ;;  %5261 = vmatmul.msk.f32.gmra.mxu0 %vm655_vm0, %v624_v19  ;;  %v604_v35 = vmul.f32 %v6015_v20, %v492_v23  ;;  %v637_v20 = vld [vmem:[%s11502_s3 + $0x70] sm:$0xff]  ;;  %12024 = vst [vmem:[#allocation20_spill] sm:$0xff] %v6197_v50  ;;  %v6260_v23 = vsel %vm11507_vm11, 1, %v11584_v2  ;;  %vm11524_vm11 = vcmp.ge.f32.partialorder %v6311_v48, 1.0 }
  0xba   : > { %5264 = vmatmul.msk.f32.vlgmr.msra.gmra.mxu2 %vm655_vm0, %v627_v32  ;;  %5266 = vmatmul.msk.f32.vlgmr.msra.gmra.mxu3 %vm655_vm0, %v629_v37  ;;  %v553_v52 = vpop.permute.xlu1 %552  ;;  %v6070_v53 = vpop.permute.xlu2 %1217  ;;  %v632_v32 = vld [vmem:[%s11502_s3 + $0x48] sm:$0xff]  ;;  %v635_v37 = vld [vmem:[%s11502_s3 + $0x60] sm:$0xff]  ;;  %12026 = vst [vmem:[#allocation22_spill] sm:$0xff] %v6218_v1 }
  0xbb   : > { %880 = vmatpush.msrb.mxu3 %v614_v46  ;;  %v597_v55 = vmul.f32 %v553_v52, %v485_v40  ;;  %v549_v56 = vpop.permute.xlu0 %548  ;;  %1751 = vrot.lane.b32.xlu1 %v6055_v41, %s5717_s26  ;;  %v476_v40 = vmul.f32 %v5975_v49, %v348_v44  ;;  %v491_v46 = vld [vmem:[%s5933_s12 + $0x60] sm:$0xff]  ;;  %v490_v49 = vld [vmem:[%s5933_s12 + $0x58] sm:$0xff]  ;;  %12030 = vst [vmem:[#allocation26_spill] sm:$0xff] %v6260_v23 }
  0xbc   : > { %v596_v60 = vmul.f32 %v549_v56, %v484_v47  ;;  %v6187_v47 = vld [vmem:[%s11505_s6 + $0x40] sm:$0xff]  ;;  %v475_v56 = vmul.f32 %v5977_v51, %v347_v25  ;;  %12035 = vst [vmem:[#allocation31_spill] sm:$0xff] %v6311_v48 }
  0xbd   : > { %v613_v62 = vadd.f32 %v597_v55, %v469_v54  ;;  %12023 = vst [vmem:[#allocation19_spill] sm:$0xff] %v6187_v47  ;;  %v620_v52 = vadd.f32 %v604_v35, %v476_v40  ;;  %vm11623_vm10 = vcmp.ge.f32.partialorder %v6187_v47, 1.0  ;;  %v645_v40 = vld [vmem:[%s11502_s3 + $0xb0] sm:$0xff] }
  0xbe   : > { %v612_v3 = vadd.f32 %v596_v60, %v468_v58  ;;  %v6224_v18 = vsel %vm11623_vm10, 1, %v11584_v2 }
  0xbf   : > { %851 = vmatpush.msrb.mxu2 %v613_v62  ;;  %12027 = vst [vmem:[#allocation23_spill] sm:$0xff] %v6224_v18 }
  0xc0   : > { %822 = vmatpush.msrb.mxu1 %v612_v3  ;;  %1759 = vrot.lane.b32.xlu2 %v6088_v63, %s5717_s26  ;;  %v350_v3 = vld [vmem:[%s5940_s15 + $0x78] sm:$0xff] }
  0xc1   : > { %1755 = vrot.lane.b32.xlu0 %v6094_v4, %s5717_s26  ;;  %5268 = vmatmul.msk.f32.vlgmr.msrb.gmra.mxu0 %vm655_vm0, %v631_v10 }
  0xc2   : > { %5265 = vmatmul.msk.f32.gmra.mxu2 %vm655_vm0, %v628_v42  ;;  %5267 = vmatmul.msk.f32.gmra.mxu3 %vm655_vm0, %v630_v59  ;;  %v565_v16 = vpop.permute.xlu1 %564  ;;  %v6134_v17 = vpop.permute.xlu2 %1223  ;;  %v639_v42 = vld [vmem:[%s11502_s3 + $0x80] sm:$0xff]  ;;  %v636_v59 = vld [vmem:[%s11502_s3 + $0x68] sm:$0xff] }
  0xc3   : > { %5270 = vmatmul.msk.f32.vlgmr.msrb.gmra.mxu1 %vm655_vm0, %v633_v7  ;;  %967 = vmatpush.msra.mxu2 %v617_v6  ;;  %v600_v26 = vmul.f32 %v565_v16, %v488_v8  ;;  %v561_v27 = vpop.permute.xlu0 %560  ;;  %v638_v7 = vld [vmem:[%s11502_s3 + $0x78] sm:$0xff]  ;;  %v6239_v8 = vld [vmem:[%s11505_s6 + $0x68] sm:$0xff]  ;;  %v349_v16 = vld [vmem:[%s5940_s15 + $0x70] sm:$0xff] }
  0xc4   : > { %v599_v30 = vmul.f32 %v561_v27, %v487_v13  ;;  %1757 = vrot.lane.b32.xlu1 %v6130_v15, %s5717_s26  ;;  %12028 = vst [vmem:[#allocation24_spill] sm:$0xff] %v6239_v8  ;;  %v494_v6 = vld [vmem:[%s5933_s12 + $0x78] sm:$0xff]  ;;  %vm11613_vm12 = vcmp.ge.f32.partialorder %v6239_v8, 1.0  ;;  %v477_v25 = vmul.f32 %v5924_v24, %v349_v16  ;;  %v640_v24 = vld [vmem:[%s11502_s3 + $0x88] sm:$0xff] }
  0xc5   : > { %v616_v31 = vadd.f32 %v600_v26, %v472_v21  ;;  %v6250_v13 = vld [vmem:[%s11505_s6 + $0x58] sm:$0xff]  ;;  %v493_v21 = vld [vmem:[%s5933_s12 + $0x70] sm:$0xff]  ;;  %v6581_v15 = vld [vmem:[%s11505_s6 + $0xe8] sm:$0xff] }
  0xc6   : > { %v615_v19 = vadd.f32 %v599_v30, %v471_v29  ;;  %12029 = vst [vmem:[#allocation25_spill] sm:$0xff] %v6250_v13  ;;  %v478_v29 = vmul.f32 %v5992_v0, %v350_v3  ;;  %vm11626_vm13 = vcmp.ge.f32.partialorder %v6250_v13, 1.0  ;;  %v6281_v0 = vsel %vm11613_vm12, 1, %v11584_v2  ;;  %v646_v3 = vld [vmem:[%s11502_s3 + $0xb8] sm:$0xff] }
  0xc7   : > { %938 = vmatpush.msra.mxu1 %v616_v31  ;;  %v6273_v31 = vld [vmem:[%s11505_s6 + $0x60] sm:$0xff]  ;;  %12032 = vst [vmem:[#allocation28_spill] sm:$0xff] %v6281_v0 }
  0xc8   : > { %909 = vmatpush.msra.mxu0 %v615_v19  ;;  %1765 = vrot.lane.b32.xlu2 %v6153_v33, %s5717_s26  ;;  %12031 = vst [vmem:[#allocation27_spill] sm:$0xff] %v6273_v31  ;;  %vm11508_vm14 = vcmp.ge.f32.partialorder %v6273_v31, 1.0 }
  0xc9   : > { %1761 = vrot.lane.b32.xlu0 %v6160_v14, %s5717_s26  ;;  %5269 = vmatmul.msk.f32.gmra.mxu0 %vm655_vm0, %v632_v32  ;;  %12065 = vst [vmem:[#allocation61_spill] sm:$0xff] %v6581_v15 }
  0xca   : > { %5272 = vmatmul.msk.f32.vlgmr.msrb.gmra.mxu2 %vm655_vm0, %v635_v37  ;;  %5274 = vmatmul.msk.f32.vlgmr.msrb.gmra.mxu3 %vm655_vm0, %v637_v20  ;;  %v577_v54 = vpop.permute.xlu1 %576  ;;  %v6201_v55 = vpop.permute.xlu2 %1229  ;;  %v6286_v37 = vsel %vm11626_vm13, 1, %v11584_v2  ;;  %v643_v20 = vld [vmem:[%s11502_s3 + $0xa0] sm:$0xff] }
  0xcb   : > { %5271 = vmatmul.msk.f32.gmra.mxu1 %vm655_vm0, %v634_v45  ;;  %v603_v58 = vmul.f32 %v577_v54, %v491_v46  ;;  %v573_v60 = vpop.permute.xlu0 %572  ;;  %12033 = vst [vmem:[#allocation29_spill] sm:$0xff] %v6286_v37  ;;  %v6301_v45 = vld [vmem:[%s11505_s6 + $0x80] sm:$0xff]  ;;  %v642_v46 = vld [vmem:[%s11502_s3 + $0x98] sm:$0xff] }
  0xcc   : > { %1054 = vmatpush.msrb.mxu1 %v620_v52  ;;  %v602_v62 = vmul.f32 %v573_v60, %v490_v49  ;;  %1763 = vrot.lane.b32.xlu1 %v6197_v50, %s5717_s26  ;;  %12034 = vst [vmem:[#allocation30_spill] sm:$0xff] %v6301_v45  ;;  %v6319_v49 = vsel %vm11508_vm14, 1, %v11584_v2  ;;  %vm11619_vm15 = vcmp.ge.f32.partialorder %v6301_v45, 1.0 }
  0xcd   : > { %v619_v51 = vadd.f32 %v603_v58, %v475_v56  ;;  %12036 = vst [vmem:[#allocation32_spill] sm:$0xff] %v6319_v49  ;;  %v6335_v58 = vld [vmem:[%s11505_s6 + $0x78] sm:$0xff]  ;;  %v6342_v60 = vsel %vm11619_vm15, 1, %v11584_v2 }
  0xce   : > { %v618_v10 = vadd.f32 %v602_v62, %v474_v36  ;;  %12037 = vst [vmem:[#allocation33_spill] sm:$0xff] %v6335_v58  ;;  %v6347_v36 = vsel %vm11524_vm11, 1, %v11584_v2  ;;  %v647_v62 = vld [vmem:[%s11502_s3 + $0xc0] sm:$0xff]  ;;  %vm11511_vm14 = vcmp.ge.f32.partialorder %v6335_v58, 1.0  ;;  %v6601_v58 = vld [vmem:[%s11505_s6 + $0xf0] sm:$0xff] }
  0xcf   : > { %1025 = vmatpush.msrb.mxu0 %v619_v51  ;;  %12038 = vst [vmem:[#allocation34_spill] sm:$0xff] %v6342_v60  ;;  %v644_v51 = vld [vmem:[%s11502_s3 + $0xa8] sm:$0xff] }
  0xd0   : > { %996 = vmatpush.msra.mxu3 %v618_v10  ;;  %1771 = vrot.lane.b32.xlu2 %v6218_v1, %s5717_s26  ;;  %12039 = vst [vmem:[#allocation35_spill] sm:$0xff] %v6347_v36  ;;  %v6362_v10 = vld [vmem:[%s11505_s6 + $0x98] sm:$0xff] }
  0xd1   : > { %1767 = vrot.lane.b32.xlu0 %v6224_v18, %s5717_s26  ;;  %5276 = vmatmul.msk.f32.vlgmr.msra.gmra.mxu0 %vm655_vm0, %v639_v42  ;;  %12040 = vst [vmem:[#allocation36_spill] sm:$0xff] %v6362_v10  ;;  %v649_v42 = vld [vmem:[%s11502_s3 + $0xd0] sm:$0xff]  ;;  %vm11622_vm8 = vcmp.ge.f32.partialorder %v6362_v10, 1.0 }
  0xd2   : > { %5273 = vmatmul.msk.f32.gmra.mxu2 %vm655_vm0, %v636_v59  ;;  %5275 = vmatmul.msk.f32.gmra.mxu3 %vm655_vm0, %v638_v7  ;;  %v589_v26 = vpop.permute.xlu1 %588  ;;  %v6264_v27 = vpop.permute.xlu2 %1235  ;;  %v6372_v59 = vld [vmem:[%s11505_s6 + $0x88] sm:$0xff]  ;;  %v6380_v7 = vsel %vm11511_vm14, 1, %v11584_v2  ;;  %12067 = vst [vmem:[#allocation63_spill] sm:$0xff] %v6601_v58 }
  0xd3   : > { %5278 = vmatmul.msk.f32.vlgmr.msra.gmra.mxu1 %vm655_vm0, %v641_v12  ;;  %v606_v30 = vmul.f32 %v589_v26, %v494_v6  ;;  %v585_v44 = vpop.permute.xlu0 %584  ;;  %12041 = vst [vmem:[#allocation37_spill] sm:$0xff] %v6372_v59  ;;  %vm11513_vm5 = vcmp.ge.f32.partialorder %v6372_v59, 1.0  ;;  %v6403_v26 = vsel %vm11622_vm8, 1, %v11584_v2  ;;  %1522 = vmatpush.msra.mxu0 %v1410_v61 }
  0xd4   : > { %v605_v35 = vmul.f32 %v585_v44, %v493_v21  ;;  %1769 = vrot.lane.b32.xlu1 %v6260_v23, %s5717_s26  ;;  %12042 = vst [vmem:[#allocation38_spill] sm:$0xff] %v6380_v7  ;;  %v6396_v21 = vld [vmem:[%s11505_s6 + $0x90] sm:$0xff]  ;;  %v651_v44 = vld [vmem:[%s11502_s3 + $0xe0] sm:$0xff]  ;;  %5594 = vmatpush.msra.mxu1 %v1410_v61 }
  0xd5   : > { %v622_v19 = vadd.f32 %v606_v30, %v478_v29  ;;  %12043 = vst [vmem:[#allocation39_spill] sm:$0xff] %v6396_v21  ;;  %v6408_v29 = vsel %vm11513_vm5, 1, %v11584_v2  ;;  %v648_v30 = vld [vmem:[%s11502_s3 + $0xc8] sm:$0xff]  ;;  %vm11514_vm14 = vcmp.ge.f32.partialorder %v6396_v21, 1.0 }
  0xd6   : > { %v621_v32 = vadd.f32 %v605_v35, %v477_v25  ;;  %12044 = vst [vmem:[#allocation40_spill] sm:$0xff] %v6403_v26  ;;  %v653_v25 = vld [vmem:[%s11502_s3 + $0xf0] sm:$0xff] }
  0xd7   : > { %1112 = vmatpush.msrb.mxu3 %v622_v19  ;;  %12045 = vst [vmem:[#allocation41_spill] sm:$0xff] %v6408_v29  ;;  %v6423_v35 = vld [vmem:[%s11505_s6 + $0xb0] sm:$0xff]  ;;  %v650_v19 = vld [vmem:[%s11502_s3 + $0xd8] sm:$0xff] }
  0xd8   : > { %1083 = vmatpush.msrb.mxu2 %v621_v32  ;;  %1777 = vrot.lane.b32.xlu2 %v6281_v0, %s5717_s26  ;;  %12046 = vst [vmem:[#allocation42_spill] sm:$0xff] %v6423_v35  ;;  %v6433_v32 = vld [vmem:[%s11505_s6 + $0xa0] sm:$0xff]  ;;  %vm11589_vm2 = vcmp.ge.f32.partialorder %v6423_v35, 1.0  ;;  %v6574_v0 = vld [vmem:[%s11505_s6 + $0xf8] sm:$0xff] }
  0xd9   : > { %1773 = vrot.lane.b32.xlu0 %v6286_v37, %s5717_s26  ;;  %5277 = vmatmul.msk.f32.gmra.mxu0 %vm655_vm0, %v640_v24  ;;  %12047 = vst [vmem:[#allocation43_spill] sm:$0xff] %v6433_v32  ;;  %v6441_v24 = vsel %vm11514_vm14, 1, %v11584_v2  ;;  %vm11521_vm5 = vcmp.ge.f32.partialorder %v6433_v32, 1.0  ;;  %v6529_v37 = vld [vmem:[%s11505_s6 + $0xe0] sm:$0xff] }
  0xda   : > { %5280 = vmatmul.msk.f32.vlgmr.msra.gmra.mxu2 %vm655_vm0, %v643_v20  ;;  %5282 = vmatmul.msk.f32.vlgmr.msra.gmra.mxu3 %vm655_vm0, %v645_v40  ;;  %v6323_v52 = vpop.permute.xlu2 %1241  ;;  %v6325_v54 = vpop.permute.xlu1 %1221  ;;  %12048 = vst [vmem:[#allocation44_spill] sm:$0xff] %v6441_v24 }
  0xdb   : > { %5279 = vmatmul.msk.f32.gmra.mxu1 %vm655_vm0, %v642_v46  ;;  %v6329_v56 = vpop.permute.xlu0 %1219  ;;  %12058 = vst [vmem:[#allocation54_spill] sm:$0xff] %v6529_v37  ;;  %5595 = vmatpush.msra.mxu2 %v1410_v61 }
  0xdc   : > { %1775 = vrot.lane.b32.xlu1 %v6319_v49, %s5717_s26  ;;  %12064 = vst [vmem:[#allocation60_spill] sm:$0xff] %v6574_v0  ;;  %5596 = vmatpush.msra.mxu3 %v1410_v61 }
  0xe0   : > { %1783 = vrot.lane.b32.xlu2 %v6342_v60, %s5717_s26 }
  0xe1   : > { %1779 = vrot.lane.b32.xlu0 %v6347_v36, %s5717_s26  ;;  %5284 = vmatmul.msk.f32.vlgmr.msrb.gmra.mxu0 %vm655_vm0, %v647_v62  ;;  %v6457_v62 = vld [vmem:[%s11505_s6 + $0xa8] sm:$0xff] }
  0xe2   : > { %5281 = vmatmul.msk.f32.gmra.mxu2 %vm655_vm0, %v644_v51  ;;  %5283 = vmatmul.msk.f32.gmra.mxu3 %vm655_vm0, %v646_v3  ;;  %v6384_v12 = vpop.permute.xlu2 %1247  ;;  %v6386_v6 = vpop.permute.xlu1 %1227  ;;  %12049 = vst [vmem:[#allocation45_spill] sm:$0xff] %v6457_v62  ;;  %v6464_v51 = vsel %vm11589_vm2, 1, %v11584_v2  ;;  %v11515_v3 = vmov 1   ;;  %vm11527_vm14 = vcmp.ge.f32.partialorder %v6457_v62, 1.0  ;;  %v6556_v62 = vld [vmem:[%s11505_s6 + $0xd8] sm:$0xff] }
  0xe3   : > { %5286 = vmatmul.msk.f32.vlgmr.msrb.gmra.mxu1 %vm655_vm0, %v649_v42  ;;  %v6390_v16 = vpop.permute.xlu0 %1225  ;;  %12050 = vst [vmem:[#allocation46_spill] sm:$0xff] %v6464_v51  ;;  %5613 = vset.pattern.permute.xlu0 %v11515_v3  ;;  %v6470_v42 = vsel %vm11521_vm5, 1, %v11584_v2  ;;  %v6496_v3 = vsel %vm11527_vm14, 1, %v11584_v2 }
  0xe4   : > { %1781 = vrot.lane.b32.xlu1 %v6380_v7, %s5717_s26  ;;  %12051 = vst [vmem:[#allocation47_spill] sm:$0xff] %v6470_v42 }
  0xe5   : > { %12054 = vst [vmem:[#allocation50_spill] sm:$0xff] %v6496_v3 }
  0xe6   : > { %12061 = vst [vmem:[#allocation57_spill] sm:$0xff] %v6556_v62 }
  0xe8   : > { %1789 = vrot.lane.b32.xlu2 %v6403_v26, %s5717_s26  ;;  %v6536_v26 = vld [vmem:[%s11505_s6 + $0xd0] sm:$0xff] }
  0xe9   : > { %1785 = vrot.lane.b32.xlu0 %v6408_v29, %s5717_s26  ;;  %5285 = vmatmul.msk.f32.gmra.mxu0 %vm655_vm0, %v648_v30  ;;  %v652_v30 = vld [vmem:[%s11502_s3 + $0xe8] sm:$0xff]  ;;  %12059 = vst [vmem:[#allocation55_spill] sm:$0xff] %v6536_v26 }
  0xea   : > { %5288 = vmatmul.msk.f32.vlgmr.msrb.gmra.mxu2 %vm655_vm0, %v651_v44  ;;  %5290 = vmatmul.msk.f32.vlgmr.msrb.gmra.mxu3 %vm655_vm0, %v653_v25  ;;  %v6445_v20 = vpop.permute.xlu2 %1253  ;;  %v6447_v40 = vpop.permute.xlu1 %1233  ;;  %v654_v44 = vld [vmem:[%s11502_s3 + $0xf8] sm:$0xff]  ;;  %v6482_v25 = vld [vmem:[%s11505_s6 + $0xc8] sm:$0xff] }
  0xeb   : > { %5287 = vmatmul.msk.f32.gmra.mxu1 %vm655_vm0, %v650_v19  ;;  %v6451_v46 = vpop.permute.xlu0 %1231  ;;  %12052 = vst [vmem:[#allocation48_spill] sm:$0xff] %v6482_v25  ;;  %v6489_v19 = vld [vmem:[%s11505_s6 + $0xb8] sm:$0xff]  ;;  %vm11541_vm5 = vcmp.ge.f32.partialorder %v6482_v25, 1.0 }
  0xec   : > { %1787 = vrot.lane.b32.xlu1 %v6441_v24, %s5717_s26  ;;  %12053 = vst [vmem:[#allocation49_spill] sm:$0xff] %v6489_v19  ;;  %vm11538_vm11 = vcmp.ge.f32.partialorder %v6489_v19, 1.0 }
  0xf0   : > { %1795 = vrot.lane.b32.xlu2 %v6464_v51, %s5717_s26 }
  0xf1   : > { %1791 = vrot.lane.b32.xlu0 %v6470_v42, %s5717_s26  ;;  %v6511_v42 = vld [vmem:[%s11505_s6 + $0xc0] sm:$0xff] }
  0xf2   : > { %5289 = vmatmul.msk.f32.gmra.mxu2 %vm655_vm0, %v652_v30  ;;  %5291 = vmatmul.msk.f32.gmra.mxu3 %vm655_vm0, %v654_v44  ;;  %v6500_v29 = vpop.permute.xlu2 %1259  ;;  %v6502_v36 = vpop.permute.xlu1 %1239  ;;  %12055 = vst [vmem:[#allocation51_spill] sm:$0xff] %v6511_v42  ;;  %v6518_v30 = vsel %vm11541_vm5, 1, %v11584_v2  ;;  %v6523_v44 = vsel %vm11538_vm11, 1, %v11584_v2  ;;  %vm11548_vm14 = vcmp.ge.f32.partialorder %v6511_v42, 1.0  ;;  %vm11562_vm11 = vcmp.ge.f32.partialorder %v6529_v37, 1.0 }
  0xf3   : > { %v6505_v51 = vpop.permute.xlu0 %1237  ;;  %12056 = vst [vmem:[#allocation52_spill] sm:$0xff] %v6518_v30  ;;  %v6543_v18 = vsel %vm11548_vm14, 1, %v11584_v2  ;;  %vm11559_vm5 = vcmp.ge.f32.partialorder %v6536_v26, 1.0  ;;  %vm11569_vm14 = vcmp.ge.f32.partialorder %v6556_v62, 1.0 }
  0xf4   : > { %1793 = vrot.lane.b32.xlu1 %v6496_v3, %s5717_s26  ;;  %12057 = vst [vmem:[#allocation53_spill] sm:$0xff] %v6523_v44  ;;  %v6568_v42 = vsel %vm11559_vm5, 1, %v11584_v2  ;;  %v6588_v21 = vsel %vm11569_vm14, 1, %v11584_v2  ;;  %vm11583_vm5 = vcmp.ge.f32.partialorder %v6574_v0, 1.0  ;;  %vm11586_vm14 = vcmp.ge.f32.partialorder %v6601_v58, 1.0 }
  0xf5   : > { %12060 = vst [vmem:[#allocation56_spill] sm:$0xff] %v6543_v18  ;;  %v6623_v33 = vsel %vm11586_vm14, 1, %v11584_v2  ;;  %vm1313_vm14 = vcmask 64544   ;;  %v12072_v58 = vmov 0  }
  0xf6   : > { %12063 = vst [vmem:[#allocation59_spill] sm:$0xff] %v6568_v42 }
  0xf7   : > { %12066 = vst [vmem:[#allocation62_spill] sm:$0xff] %v6588_v21 }
  0xf8   : > { %1801 = vrot.lane.b32.xlu2 %v6518_v30, %s5717_s26  ;;  %12070 = vst [vmem:[#allocation66_spill] sm:$0xff] %v6623_v33 }
  0xf9   : > { %1797 = vrot.lane.b32.xlu0 %v6523_v44, %s5717_s26  ;;  %v6563_v44 = vsel %vm11562_vm11, 1, %v11584_v2  ;;  %vm11582_vm11 = vcmp.ge.f32.partialorder %v6581_v15, 1.0 }
  0xfa   : > { %v6545_v60 = vpop.permute.xlu2 %1265  ;;  %v6547_v14 = vpop.permute.xlu1 %1245  ;;  %12062 = vst [vmem:[#allocation58_spill] sm:$0xff] %v6563_v44  ;;  %v6613_v62 = vsel %vm11582_vm11, 1, %v11584_v2 }
  0xfb   : > { %v6550_v30 = vpop.permute.xlu0 %1243  ;;  %12069 = vst [vmem:[#allocation65_spill] sm:$0xff] %v6613_v62 }
  0xfc   : > { %1799 = vrot.lane.b32.xlu1 %v6543_v18, %s5717_s26 }
 0x100   : > { %1807 = vrot.lane.b32.xlu2 %v6563_v44, %s5717_s26 }
 0x101   : > { %1803 = vrot.lane.b32.xlu0 %v6568_v42, %s5717_s26  ;;  %v6608_v42 = vsel %vm11583_vm5, 1, %v11584_v2  ;;  %vm11654_vm5 = vcmask 31744  }
 0x102   : > { %v6590_v1 = vpop.permute.xlu2 %1271  ;;  %v6592_v41 = vpop.permute.xlu1 %1251  ;;  %12068 = vst [vmem:[#allocation64_spill] sm:$0xff] %v6608_v42 }
 0x103   : > { %v6595_v44 = vpop.permute.xlu0 %1249 }
 0x104   : > { %1805 = vrot.lane.b32.xlu1 %v6588_v21, %s5717_s26 }
 0x108   : > { %1813 = vrot.lane.b32.xlu2 %v6608_v42, %s5717_s26 }
 0x109   : > { %1809 = vrot.lane.b32.xlu0 %v6613_v62, %s5717_s26 }
 0x10a   : > { %v6625_v31 = vpop.permute.xlu2 %1277 }
 0x10b   : > { %v6627_v63 = vpop.permute.xlu0 %1255  ;;  %v6629_v15 = vpop.permute.xlu1 %1257 }
 0x10c   : > { %1811 = vrot.lane.b32.xlu1 %v6623_v33, %s5717_s26 }
 0x111   : > { %2286 = vperm.xlu0 %5613, %v6030_v34  }
 0x112   : > { %v6634_v42 = vpop.permute.xlu2 %1753 }
 0x113   : > { %12071 = vst [vmem:[#allocation67_spill] sm:$0xff] %v6634_v42  ;;  %v6636_v26 = vpop.permute.xlu0 %1261  ;;  %vm11601_vm11 = vcmp.ne.s32.totalorder %v6634_v42, 0  ;;  %v6639_v2 = vpop.permute.xlu1 %1263 }
 0x114   : > { %vm1848_vm2 = vmand %vm11598_vm1, %vm11601_vm11 }
 0x115   : > { %v708_v62 = vpop.f32.mrf.mxu1  ;;  %v1880_v34 = vsel %vm1848_vm2, 1, %v12072_v58 }
 0x116   : > { %1123 = vst.msk [vmem:[#allocation2 + $0x10] sm:$0xff] %vm11654_vm5, %v708_v62  ;;  %1915 = vperm.xlu1 %5610, %v1880_v34  }
 0x117   : > { %1316 = vst.msk [vmem:[#allocation2 + $0x10] sm:$0xff] %vm1313_vm14, %v6325_v54 }
 0x119   : > { %2301 = vperm.xlu0 %5613, %v6197_v50  }
 0x11a   : > { %v6653_v4 = vpop.permute.xlu2 %1759 }
 0x11b   : > { %v6655_v11 = vpop.permute.xlu0 %1267  ;;  %vm11604_vm1 = vcmp.ne.s32.totalorder %v6653_v4, 0  ;;  %v6658_v62 = vpop.permute.xlu1 %1269 }
 0x11c   : > { %vm1851_vm2 = vmand %vm11602_vm3, %vm11604_vm1 }
 0x11d   : > { %v711_v54 = vpop.f32.mrf.mxu1  ;;  %v1883_v34 = vsel %vm1851_vm2, 1, %v12072_v58 }
 0x11e   : > { %1124 = vst.msk [vmem:[#allocation2 + $0x18] sm:$0xff] %vm11654_vm5, %v711_v54  ;;  %1924 = vperm.xlu1 %5610, %v1883_v34  }
 0x11f   : > { %1317 = vst.msk [vmem:[#allocation2 + $0x18] sm:$0xff] %vm1313_vm14, %v6134_v17 }
 0x121   : > { %2310 = vperm.xlu0 %5613, %v6260_v23  }
 0x122   : > { %v6669_v42 = vpop.permute.xlu2 %1765 }
 0x123   : > { %v6671_v50 = vpop.permute.xlu0 %1273  ;;  %vm1822_vm11 = vcmp.ne.s32.totalorder %v6669_v42, 0 }
 0x124   : > { %v6674_v61 = vpop.permute.xlu1 %1275  ;;  %vm1854_vm3 = vmand %vm11610_vm6, %vm1822_vm11 }
 0x125   : > { %v1886_v54 = vsel %vm1854_vm3, 1, %v12072_v58 }
 0x126   : > { %1933 = vperm.xlu1 %5610, %v1886_v54  }
 0x129   : > { %2319 = vperm.xlu0 %5613, %v6319_v49  }
 0x12a   : > { %v6682_v17 = vpop.permute.xlu2 %1771 }
 0x12b   : > { %v6684_v34 = vpop.permute.xlu0 %1279  ;;  %vm1825_vm2 = vcmp.ne.s32.totalorder %v6682_v17, 0 }
 0x12c   : > { %vm1857_vm1 = vmand %vm11608_vm9, %vm1825_vm2 }
 0x12d   : > { %v679_v38 = vpop.f32.mrf.mxu0  ;;  %v6691_v23 = vpop.permute.xlu1 %1751  ;;  %v1889_v54 = vsel %vm1857_vm1, 1, %v12072_v58 }
 0x12e   : > { %1121 = vst.msk [vmem:[#allocation2] sm:$0xff] %vm11654_vm5, %v679_v38  ;;  %1942 = vperm.xlu1 %5610, %v1889_v54  }
 0x12f   : > { %1314 = vst.msk [vmem:[#allocation2] sm:$0xff] %vm1313_vm14, %v6070_v53 }
 0x131   : > { %2328 = vperm.xlu0 %5613, %v6380_v7  }
 0x132   : > { %v6698_v5 = vpop.permute.xlu2 %1777 }
 0x133   : > { %12073 = vst [vmem:[#allocation68_spill] sm:$0xff] %v6698_v5  ;;  %v6700_v49 = vpop.permute.xlu0 %1755  ;;  %vm1828_vm9 = vcmp.ne.s32.totalorder %v6698_v5, 0 }
 0x134   : > { %vm1817_vm3 = vcmp.ne.s32.totalorder %v6700_v49, 0  ;;  %vm1860_vm6 = vmand %vm11613_vm12, %vm1828_vm9 }
 0x135   : > { %vm1849_vm1 = vmand %vm11617_vm4, %vm1817_vm3  ;;  %v1892_v43 = vsel %vm1860_vm6, 1, %v12072_v58 }
 0x136   : > { %v682_v39 = vpop.f32.mrf.mxu0  ;;  %v6708_v38 = vld [vmem:[#allocation2] sm:$0xff]  ;;  %v6710_v53 = vpop.permute.xlu1 %1757  ;;  %v1881_v54 = vsel %vm1849_vm1, 1, %v12072_v58  ;;  %1951 = vperm.xlu1 %5610, %v1892_v43  }
 0x137   : > { %12074 = vst [vmem:[#allocation69_spill] sm:$0xff] %v6710_v53  ;;  %5292 = vmatmul.msk.f32.vlgmr.msra.gmra.mxu0 %vm655_vm0, %v6708_v38  ;;  %1918 = vperm.xlu2 %5611, %v1881_v54  }
 0x138   : > { %1122 = vst.msk [vmem:[#allocation2 + $0x8] sm:$0xff] %vm11654_vm5, %v682_v39 }
 0x139   : > { %1315 = vst.msk [vmem:[#allocation2 + $0x8] sm:$0xff] %vm1313_vm14, %v6329_v56  ;;  %2337 = vperm.xlu0 %5613, %v6441_v24  }
 0x13a   : > { %v6724_v39 = vpop.permute.xlu2 %1783 }
 0x13b   : > { %v6726_v7 = vpop.permute.xlu0 %1761  ;;  %vm11638_vm12 = vcmp.ne.s32.totalorder %v6724_v39, 0 }
 0x13c   : > { %vm1820_vm1 = vcmp.ne.s32.totalorder %v6726_v7, 0  ;;  %vm1863_vm4 = vmand %vm11619_vm15, %vm11638_vm12 }
 0x13d   : > { %v737_v8 = vpop.f32.mrf.mxu2  ;;  %v766_v5 = vpop.f32.mrf.mxu3  ;;  %vm1852_vm6 = vmand %vm11620_vm7, %vm1820_vm1  ;;  %v1895_v9 = vsel %vm1863_vm4, 1, %v12072_v58 }
 0x13e   : > { %1125 = vst.msk [vmem:[#allocation2 + $0x20] sm:$0xff] %vm11654_vm5, %v737_v8  ;;  %v795_v53 = vpop.f32.mrf.mxu0  ;;  %v6735_v43 = vpop.permute.xlu1 %1763  ;;  %v1884_v56 = vsel %vm1852_vm6, 1, %v12072_v58  ;;  %1960 = vperm.xlu1 %5610, %v1895_v9  }
 0x13f   : > { %1318 = vst.msk [vmem:[#allocation2 + $0x20] sm:$0xff] %vm1313_vm14, %v6390_v16  ;;  %1927 = vperm.xlu2 %5611, %v1884_v56  }
 0x140   : > { %v6744_v54 = vld [vmem:[#allocation2 + $0x8] sm:$0xff]  ;;  %1127 = vst.msk [vmem:[#allocation2 + $0x30] sm:$0xff] %vm11654_vm5, %v766_v5  ;;  %v824_v8 = vpop.f32.mrf.mxu1 }
 0x141   : > { %5293 = vmatmul.msk.f32.gmra.mxu0 %vm655_vm0, %v6744_v54  ;;  %1320 = vst.msk [vmem:[#allocation2 + $0x30] sm:$0xff] %vm1313_vm14, %v6201_v55  ;;  %2346 = vperm.xlu0 %5613, %v6496_v3   ;;  %v12104_v3 = vld [vmem:[#allocation16_spill] sm:$0xff] }
 0x142   : > { %1129 = vst.msk [vmem:[#allocation2 + $0x40] sm:$0xff] %vm11654_vm5, %v795_v53  ;;  %v6754_v16 = vpop.permute.xlu2 %1789 }
 0x143   : > { %1322 = vst.msk [vmem:[#allocation2 + $0x40] sm:$0xff] %vm1313_vm14, %v6447_v40  ;;  %v6758_v5 = vpop.permute.xlu0 %1767  ;;  %vm11624_vm6 = vcmp.ne.s32.totalorder %v6754_v16, 0 }
 0x144   : > { %1131 = vst.msk [vmem:[#allocation2 + $0x50] sm:$0xff] %vm11654_vm5, %v824_v8  ;;  %vm11632_vm4 = vcmp.ne.s32.totalorder %v6758_v5, 0  ;;  %vm1866_vm7 = vmand %vm11622_vm8, %vm11624_vm6 }
 0x145   : > { %1324 = vst.msk [vmem:[#allocation2 + $0x50] sm:$0xff] %vm1313_vm14, %v6505_v51  ;;  %v740_v9 = vpop.f32.mrf.mxu2  ;;  %v769_v55 = vpop.f32.mrf.mxu3  ;;  %vm1855_vm15 = vmand %vm11623_vm10, %vm11632_vm4  ;;  %v6779_v51 = vld [vmem:[#allocation2 + $0x10] sm:$0xff]  ;;  %vm12075_vm10 = vcmp.ge.f32.partialorder %v6423_v35, 1.0 }
 0x146   : > { %1126 = vst.msk [vmem:[#allocation2 + $0x28] sm:$0xff] %vm11654_vm5, %v740_v9  ;;  %v798_v53 = vpop.f32.mrf.mxu0  ;;  %v6770_v40 = vpop.permute.xlu1 %1769  ;;  %v1887_v56 = vsel %vm1855_vm15, 1, %v12072_v58  ;;  %v1898_v9 = vsel %vm1866_vm7, 1, %v12072_v58 }
 0x147   : > { %1319 = vst.msk [vmem:[#allocation2 + $0x28] sm:$0xff] %vm1313_vm14, %v6386_v6  ;;  %1936 = vperm.xlu2 %5611, %v1887_v56   ;;  %1969 = vperm.xlu1 %5610, %v1898_v9  }
 0x148   : > { %1128 = vst.msk [vmem:[#allocation2 + $0x38] sm:$0xff] %vm11654_vm5, %v769_v55  ;;  %v827_v8 = vpop.f32.mrf.mxu1 }
 0x149   : > { %5294 = vmatmul.msk.f32.gmra.mxu0 %vm655_vm0, %v6779_v51  ;;  %1321 = vst.msk [vmem:[#allocation2 + $0x38] sm:$0xff] %vm1313_vm14, %v6451_v46  ;;  %2355 = vperm.xlu0 %5613, %v6543_v18  }
 0x14a   : > { %1130 = vst.msk [vmem:[#allocation2 + $0x48] sm:$0xff] %vm11654_vm5, %v798_v53  ;;  %v6789_v6 = vld [vmem:[#allocation2 + $0x40] sm:$0xff]  ;;  %v6791_v10 = vpop.permute.xlu2 %1795 }
 0x14b   : > { %1323 = vst.msk [vmem:[#allocation2 + $0x48] sm:$0xff] %vm1313_vm14, %v6264_v27  ;;  %5300 = vmatmul.msk.f32.vlgmr.msra.gmra.mxu1 %vm655_vm0, %v6789_v6  ;;  %v6797_v55 = vpop.permute.xlu0 %1773  ;;  %vm11627_vm15 = vcmp.ne.s32.totalorder %v6791_v10, 0 }
 0x14c   : > { %1132 = vst.msk [vmem:[#allocation2 + $0x58] sm:$0xff] %vm11654_vm5, %v827_v8  ;;  %vm11628_vm7 = vcmp.ne.s32.totalorder %v6797_v55, 0  ;;  %vm1869_vm6 = vmand %vm12075_vm10, %vm11627_vm15  ;;  %vm12077_vm15 = vcmp.ge.f32.partialorder %v6482_v25, 1.0 }
 0x14d   : > { %1325 = vst.msk [vmem:[#allocation2 + $0x58] sm:$0xff] %vm1313_vm14, %v6502_v36  ;;  %v853_v46 = vpop.f32.mrf.mxu2  ;;  %v882_v53 = vpop.f32.mrf.mxu3  ;;  %vm1858_vm8 = vmand %vm11626_vm13, %vm11628_vm7  ;;  %v6818_v36 = vld [vmem:[#allocation2 + $0x18] sm:$0xff] }
 0x14e   : > { %1133 = vst.msk [vmem:[#allocation2 + $0x60] sm:$0xff] %vm11654_vm5, %v853_v46  ;;  %v911_v56 = vpop.f32.mrf.mxu0  ;;  %v6809_v27 = vpop.permute.xlu1 %1775  ;;  %v1890_v8 = vsel %vm1858_vm8, 1, %v12072_v58  ;;  %v1901_v46 = vsel %vm1869_vm6, 1, %v12072_v58  ;;  %vm12076_vm6 = vcmp.ge.f32.partialorder %v6311_v48, 1.0 }
 0x14f   : > { %1326 = vst.msk [vmem:[#allocation2 + $0x60] sm:$0xff] %vm1313_vm14, %v6323_v52  ;;  %1945 = vperm.xlu2 %5611, %v1890_v8   ;;  %1978 = vperm.xlu1 %5610, %v1901_v46  }
 0x150   : > { %1135 = vst.msk [vmem:[#allocation2 + $0x70] sm:$0xff] %vm11654_vm5, %v882_v53  ;;  %v940_v9 = vpop.f32.mrf.mxu1 }
 0x151   : > { %5295 = vmatmul.msk.f32.gmra.mxu0 %vm655_vm0, %v6818_v36  ;;  %1328 = vst.msk [vmem:[#allocation2 + $0x70] sm:$0xff] %vm1313_vm14, %v6547_v14  ;;  %2364 = vperm.xlu0 %5613, %v6588_v21  }
 0x152   : > { %1137 = vst.msk [vmem:[#allocation2 + $0x80] sm:$0xff] %vm11654_vm5, %v911_v56  ;;  %v6828_v52 = vld [vmem:[#allocation2 + $0x48] sm:$0xff]  ;;  %v6830_v35 = vpop.permute.xlu2 %1801 }
 0x153   : > { %1330 = vst.msk [vmem:[#allocation2 + $0x80] sm:$0xff] %vm1313_vm14, %v6595_v44  ;;  %5301 = vmatmul.msk.f32.gmra.mxu1 %vm655_vm0, %v6828_v52  ;;  %v6836_v53 = vpop.permute.xlu0 %1779  ;;  %vm11630_vm10 = vcmp.ne.s32.totalorder %v6830_v35, 0 }
 0x154   : > { %1139 = vst.msk [vmem:[#allocation2 + $0x90] sm:$0xff] %vm11654_vm5, %v940_v9  ;;  %vm11631_vm8 = vcmp.ne.s32.totalorder %v6836_v53, 0  ;;  %vm1872_vm7 = vmand %vm12077_vm15, %vm11630_vm10  ;;  %vm11734_vm15 = vcmp.lt.f32.partialorder %v6022_v22, 15.0 }
 0x155   : > { %1332 = vst.msk [vmem:[#allocation2 + $0x90] sm:$0xff] %vm1313_vm14, %v6445_v20  ;;  %v856_v14 = vpop.f32.mrf.mxu2  ;;  %v885_v56 = vpop.f32.mrf.mxu3  ;;  %vm1861_vm13 = vmand %vm12076_vm6, %vm11631_vm8  ;;  %v6857_v20 = vld [vmem:[#allocation2 + $0x20] sm:$0xff]  ;;  %vm12078_vm6 = vcmp.ge.f32.partialorder %v6372_v59, 1.0  ;;  %vm12081_vm8 = vcmp.ge.f32.partialorder %v6529_v37, 1.0 }
 0x156   : > { %1134 = vst.msk [vmem:[#allocation2 + $0x68] sm:$0xff] %vm11654_vm5, %v856_v14  ;;  %v914_v8 = vpop.f32.mrf.mxu0  ;;  %v6848_v44 = vpop.permute.xlu1 %1781  ;;  %v1893_v9 = vsel %vm1861_vm13, 1, %v12072_v58  ;;  %v1904_v14 = vsel %vm1872_vm7, 1, %v12072_v58 }
 0x157   : > { %1327 = vst.msk [vmem:[#allocation2 + $0x68] sm:$0xff] %vm1313_vm14, %v6550_v30  ;;  %1954 = vperm.xlu2 %5611, %v1893_v9   ;;  %1987 = vperm.xlu1 %5610, %v1904_v14   ;;  %v5423_v30 = vld [vmem:[%s11504_s5 + $0x20] sm:$0xff] }
 0x158   : > { %1136 = vst.msk [vmem:[#allocation2 + $0x78] sm:$0xff] %vm11654_vm5, %v885_v56  ;;  %v943_v46 = vpop.f32.mrf.mxu1  ;;  %v6870_v56 = vld [vmem:[#allocation2 + $0x50] sm:$0xff]  ;;  %3265 = vmatpush.msrb.mxu0 %v5423_v30  ;;  %v6900_v30 = vsel %vm11734_vm15, 1, %v12072_v58 }
 0x159   : > { %5296 = vmatmul.msk.f32.gmra.mxu0 %vm655_vm0, %v6857_v20  ;;  %1329 = vst.msk [vmem:[#allocation2 + $0x78] sm:$0xff] %vm1313_vm14, %v6384_v12  ;;  %2373 = vperm.xlu0 %5613, %v6623_v33  }
 0x15a   : > { %1138 = vst.msk [vmem:[#allocation2 + $0x88] sm:$0xff] %vm11654_vm5, %v914_v8  ;;  %v6872_v9 = vld [vmem:[#allocation2 + $0x80] sm:$0xff]  ;;  %v6874_v25 = vpop.permute.xlu2 %1807 }
 0x15b   : > { %1331 = vst.msk [vmem:[#allocation2 + $0x88] sm:$0xff] %vm1313_vm14, %v6592_v41  ;;  %5302 = vmatmul.msk.f32.gmra.mxu1 %vm655_vm0, %v6870_v56  ;;  %5308 = vmatmul.msk.f32.vlgmr.msra.gmra.mxu2 %vm655_vm0, %v6872_v9  ;;  %v6882_v12 = vpop.permute.xlu0 %1785  ;;  %vm11636_vm7 = vcmp.ne.s32.totalorder %v6874_v25, 0 }
 0x15c   : > { %1140 = vst.msk [vmem:[#allocation2 + $0x98] sm:$0xff] %vm11654_vm5, %v943_v46  ;;  %vm11637_vm13 = vcmp.ne.s32.totalorder %v6882_v12, 0  ;;  %vm1875_vm4 = vmand %vm12081_vm8, %vm11636_vm7 }
 0x15d   : > { %1333 = vst.msk [vmem:[#allocation2 + $0x98] sm:$0xff] %vm1313_vm14, %v6627_v63  ;;  %v969_v41 = vpop.f32.mrf.mxu2  ;;  %v998_v8 = vpop.f32.mrf.mxu3  ;;  %vm1864_vm10 = vmand %vm12078_vm6, %vm11637_vm13  ;;  %v1907_v59 = vsel %vm1875_vm4, 1, %v12072_v58  ;;  %vm12082_vm6 = vcmp.ge.f32.partialorder %v6433_v32, 1.0  ;;  %vm12085_vm13 = vcmp.ge.f32.partialorder %v6574_v0, 1.0 }
 0x15e   : > { %1141 = vst.msk [vmem:[#allocation2 + $0xa0] sm:$0xff] %vm11654_vm5, %v969_v41  ;;  %v1027_v14 = vpop.f32.mrf.mxu0  ;;  %v6895_v46 = vpop.permute.xlu1 %1787  ;;  %v1896_v63 = vsel %vm1864_vm10, 1, %v12072_v58  ;;  %v6909_v41 = vld [vmem:[#allocation2 + $0x28] sm:$0xff]  ;;  %vm11743_vm10 = vcmp.lt.f32.partialorder %v6080_v57, 15.0 }
 0x15f   : > { %12079 = vst [vmem:[#allocation70_spill] sm:$0xff] %v6895_v46  ;;  %1963 = vperm.xlu2 %5611, %v1896_v63   ;;  %1996 = vperm.xlu1 %5610, %v1907_v59   ;;  %v12127_v46 = vld [vmem:[#allocation51_spill] sm:$0xff] }
 0x160   : > { %12080 = vst [vmem:[#allocation71_spill] sm:$0xff] %v6900_v30  ;;  %v1056_v45 = vpop.f32.mrf.mxu1 }
 0x161   : > { %1334 = vst.msk [vmem:[#allocation2 + $0xa0] sm:$0xff] %vm1313_vm14, %v6629_v15  ;;  %5297 = vmatmul.msk.f32.gmra.mxu0 %vm655_vm0, %v6909_v41  ;;  %3914 = vrot.lane.b32.xlu0 %v6900_v30, %s5717_s26  ;;  %v6920_v15 = vld [vmem:[#allocation2 + $0x58] sm:$0xff] }
 0x162   : > { %1143 = vst.msk [vmem:[#allocation2 + $0xb0] sm:$0xff] %vm11654_vm5, %v998_v8  ;;  %v6922_v37 = vld [vmem:[#allocation2 + $0x88] sm:$0xff]  ;;  %v6924_v8 = vpop.permute.xlu2 %1813 }
 0x163   : > { %1336 = vst.msk [vmem:[#allocation2 + $0xb0] sm:$0xff] %vm1313_vm14, %v6636_v26  ;;  %5303 = vmatmul.msk.f32.gmra.mxu1 %vm655_vm0, %v6920_v15  ;;  %5309 = vmatmul.msk.f32.gmra.mxu2 %vm655_vm0, %v6922_v37  ;;  %v6932_v59 = vpop.permute.xlu0 %1791  ;;  %vm1846_vm8 = vcmp.ne.s32.totalorder %v6924_v8, 0 }
 0x164   : > { %1145 = vst.msk [vmem:[#allocation2 + $0xc0] sm:$0xff] %vm11654_vm5, %v1027_v14  ;;  %vm1835_vm4 = vcmp.ne.s32.totalorder %v6932_v59, 0  ;;  %vm1878_vm12 = vmand %vm12085_vm13, %vm1846_vm8  ;;  %vm11648_vm13 = vcmp.lt.f32.partialorder %v6144_v28, 15.0 }
 0x165   : > { %1338 = vst.msk [vmem:[#allocation2 + $0xc0] sm:$0xff] %vm1313_vm14, %v6545_v60  ;;  %v972_v60 = vpop.f32.mrf.mxu2  ;;  %v1001_v26 = vpop.f32.mrf.mxu3  ;;  %vm1867_vm7 = vmand %vm12082_vm6, %vm1835_vm4  ;;  %v1910_v32 = vsel %vm1878_vm12, 1, %v12072_v58 }
 0x166   : > { %1147 = vst.msk [vmem:[#allocation2 + $0xd0] sm:$0xff] %vm11654_vm5, %v1056_v45  ;;  %v6945_v14 = vpop.permute.xlu1 %1793  ;;  %v6950_v45 = vsel %vm11743_vm10, 1, %v12072_v58  ;;  %v1899_v63 = vsel %vm1867_vm7, 1, %v12072_v58  ;;  %vm12086_vm7 = vcmp.ge.f32.partialorder %v6489_v19, 1.0  ;;  %v7019_v19 = vld [vmem:[#allocation2 + $0x98] sm:$0xff] }
 0x167   : > { %1340 = vst.msk [vmem:[#allocation2 + $0xd0] sm:$0xff] %vm1313_vm14, %v6658_v62  ;;  %v1030_v62 = vpop.f32.mrf.mxu0  ;;  %1972 = vperm.xlu2 %5611, %v1899_v63   ;;  %2005 = vperm.xlu1 %5610, %v1910_v32   ;;  %v6975_v63 = vld [vmem:[#allocation2 + $0x90] sm:$0xff] }
 0x168   : > { %1142 = vst.msk [vmem:[#allocation2 + $0xa8] sm:$0xff] %vm11654_vm5, %v972_v60  ;;  %v6959_v60 = vld [vmem:[#allocation2 + $0x30] sm:$0xff]  ;;  %v1059_v48 = vpop.f32.mrf.mxu1 }
 0x169   : > { %12083 = vst [vmem:[#allocation72_spill] sm:$0xff] %v6945_v14  ;;  %5298 = vmatmul.msk.f32.gmra.mxu0 %vm655_vm0, %v6959_v60  ;;  %3920 = vrot.lane.b32.xlu0 %v6950_v45, %s5717_s26 }
 0x16a   : > { %12084 = vst [vmem:[#allocation73_spill] sm:$0xff] %v6950_v45 }
 0x16b   : > { %1335 = vst.msk [vmem:[#allocation2 + $0xa8] sm:$0xff] %vm1313_vm14, %v6500_v29  ;;  %v5324_v29 = vld [vmem:[%s11504_s5 + $0x8] sm:$0xff]  ;;  %5310 = vmatmul.msk.f32.gmra.mxu2 %vm655_vm0, %v6975_v63 }
 0x16c   : > { %1144 = vst.msk [vmem:[#allocation2 + $0xb8] sm:$0xff] %vm11654_vm5, %v1001_v26  ;;  %v6973_v26 = vld [vmem:[#allocation2 + $0x60] sm:$0xff]  ;;  %2120 = vmatpush.msrb.mxu1 %v5324_v29  ;;  %v12089_v29 = vmov 1  }
 0x16d   : > { %1337 = vst.msk [vmem:[#allocation2 + $0xb8] sm:$0xff] %vm1313_vm14, %v6639_v2  ;;  %v1370_v0 = vld [vmem:[#allocation2 + $0xc0] sm:$0xff]  ;;  %5304 = vmatmul.msk.f32.gmra.mxu1 %vm655_vm0, %v6973_v26  ;;  %v6983_v2 = vpop.permute.xlu0 %1797  ;;  %v1114_v32 = vpop.f32.mrf.mxu3 }
 0x16e   : > { %1146 = vst.msk [vmem:[#allocation2 + $0xc8] sm:$0xff] %vm11654_vm5, %v1030_v62  ;;  %5316 = vmatmul.msk.f32.vlgmr.msra.gmra.mxu3 %vm655_vm0, %v1370_v0  ;;  %vm11649_vm12 = vcmp.ne.s32.totalorder %v6983_v2, 0  ;;  %v6996_v62 = vpop.permute.xlu1 %1799  ;;  %v7001_v0 = vsel %vm11648_vm13, 1, %v12072_v58 }
 0x16f   : > { %1339 = vst.msk [vmem:[#allocation2 + $0xc8] sm:$0xff] %vm1313_vm14, %v6655_v11  ;;  %v1085_v11 = vpop.f32.mrf.mxu2  ;;  %vm1870_vm6 = vmand %vm12086_vm7, %vm11649_vm12  ;;  %5614 = vset.pattern.permute.xlu1 %v12089_v29 }
 0x170   : > { %1148 = vst.msk [vmem:[#allocation2 + $0xd8] sm:$0xff] %vm11654_vm5, %v1059_v48  ;;  %v7006_v48 = vld [vmem:[#allocation2 + $0x38] sm:$0xff] }
 0x171   : > { %1341 = vst.msk [vmem:[#allocation2 + $0xd8] sm:$0xff] %vm1313_vm14, %v6590_v1  ;;  %v1902_v1 = vsel %vm1870_vm6, 1, %v12072_v58  ;;  %5299 = vmatmul.msk.f32.gmra.mxu0 %vm655_vm0, %v7006_v48  ;;  %3926 = vrot.lane.b32.xlu0 %v7001_v0, %s5717_s26 }
 0x172   : > { %1149 = vst.msk [vmem:[#allocation2 + $0xe0] sm:$0xff] %vm11654_vm5, %v1085_v11  ;;  %1981 = vperm.xlu2 %5611, %v1902_v1   ;;  %v12090_v11 = vld [vmem:[#allocation11_spill] sm:$0xff]  ;;  %v12092_v1 = vld [vmem:[#allocation21_spill] sm:$0xff]  ;;  %v7094_v24 = vld [vmem:[#allocation2 + $0xa8] sm:$0xff] }
 0x173   : > { %12087 = vst [vmem:[#allocation74_spill] sm:$0xff] %v6996_v62  ;;  %2289 = vperm.xlu1 %5614, %v12090_v11   ;;  %5311 = vmatmul.msk.f32.gmra.mxu2 %vm655_vm0, %v7019_v19  ;;  %vm11713_vm6 = vcmp.lt.f32.partialorder %v12092_v1, 15.0 }
 0x174   : > { %12088 = vst [vmem:[#allocation75_spill] sm:$0xff] %v7001_v0  ;;  %v12093_v0 = vld [vmem:[#allocation55_spill] sm:$0xff]  ;;  %v7046_v45 = vsel %vm11713_vm6, 1, %v12072_v58 }
 0x175   : > { %1342 = vst.msk [vmem:[#allocation2 + $0xe0] sm:$0xff] %vm1313_vm14, %v6671_v50  ;;  %v7017_v50 = vld [vmem:[#allocation2 + $0x68] sm:$0xff]  ;;  %v1117_v33 = vpop.f32.mrf.mxu3  ;;  %vm12094_vm13 = vcmp.ge.f32.partialorder %v12093_v0, 1.0  ;;  %v7061_v0 = vld [vmem:[#allocation2 + $0xa0] sm:$0xff] }
 0x176   : > { %1151 = vst.msk [vmem:[#allocation2 + $0xf0] sm:$0xff] %vm11654_vm5, %v1114_v32  ;;  %v7021_v13 = vld [vmem:[#allocation2 + $0xc8] sm:$0xff]  ;;  %5305 = vmatmul.msk.f32.gmra.mxu1 %vm655_vm0, %v7017_v50  ;;  %v5357_v32 = vld [vmem:[%s11504_s5 + $0x10] sm:$0xff]  ;;  %v7041_v21 = vpop.permute.xlu1 %1805 }
 0x177   : > { %1344 = vst.msk [vmem:[#allocation2 + $0xf0] sm:$0xff] %vm1313_vm14, %v6625_v31  ;;  %v7027_v31 = vpop.permute.xlu0 %1803  ;;  %5317 = vmatmul.msk.f32.gmra.mxu3 %vm655_vm0, %v7021_v13  ;;  %v1088_v47 = vpop.f32.mrf.mxu2  ;;  %2491 = vmatpush.msrb.mxu2 %v5357_v32  ;;  %v7059_v32 = vld [vmem:[#allocation2 + $0x70] sm:$0xff] }
 0x178   : > { %12091 = vst [vmem:[#allocation11_spill] sm:$0xff] %v7021_v13  ;;  %vm11780_vm7 = vcmp.ne.s32.totalorder %v7027_v31, 0  ;;  %v12113_v13 = vld [vmem:[#allocation39_spill] sm:$0xff] }
 0x179   : > { %1150 = vst.msk [vmem:[#allocation2 + $0xe8] sm:$0xff] %vm11654_vm5, %v1088_v47  ;;  %vm1873_vm12 = vmand %vm12094_vm13, %vm11780_vm7  ;;  %5424 = vmatmul.msk.f32.vlgmr.msrb.gmra.mxu0 %vm655_vm0, %v6708_v38  ;;  %3932 = vrot.lane.b32.xlu0 %v7046_v45, %s5717_s26  ;;  %v12097_v47 = vld [vmem:[#allocation10_spill] sm:$0xff] }
 0x17a   : > { %12095 = vst [vmem:[#allocation76_spill] sm:$0xff] %v7041_v21  ;;  %v1905_v18 = vsel %vm1873_vm12, 1, %v12072_v58 }
 0x17b   : > { %12096 = vst [vmem:[#allocation77_spill] sm:$0xff] %v7046_v45  ;;  %1990 = vperm.xlu2 %5611, %v1905_v18   ;;  %2295 = vperm.xlu1 %5614, %v12097_v47  }
 0x17c   : > { %1343 = vst.msk [vmem:[#allocation2 + $0xe8] sm:$0xff] %vm1313_vm14, %v6674_v61  ;;  %5312 = vmatmul.msk.f32.gmra.mxu2 %vm655_vm0, %v7061_v0  ;;  %v12099_v61 = vld [vmem:[#allocation27_spill] sm:$0xff] }
 0x17d   : > { %1152 = vst.msk [vmem:[#allocation2 + $0xf8] sm:$0xff] %vm11654_vm5, %v1117_v33  ;;  %v7067_v33 = vld [vmem:[#allocation2 + $0xd0] sm:$0xff]  ;;  %vm11712_vm12 = vcmp.lt.f32.partialorder %v12099_v61, 15.0  ;;  %v1374_v62 = vld [vmem:[#allocation2 + $0xe0] sm:$0xff] }
 0x17e   : > { %1345 = vst.msk [vmem:[#allocation2 + $0xf8] sm:$0xff] %vm1313_vm14, %v6684_v34  ;;  %5306 = vmatmul.msk.f32.gmra.mxu1 %vm655_vm0, %v7059_v32  ;;  %v12100_v34 = vld [vmem:[#allocation61_spill] sm:$0xff]  ;;  %v7082_v47 = vsel %vm11712_vm12, 1, %v12072_v58  ;;  %v7085_v30 = vpop.permute.xlu1 %1811 }
 0x17f   : > { %12098 = vst [vmem:[#allocation78_spill] sm:$0xff] %v7067_v33  ;;  %v7069_v18 = vpop.permute.xlu0 %1809  ;;  %5318 = vmatmul.msk.f32.gmra.mxu3 %vm655_vm0, %v7067_v33  ;;  %vm12101_vm13 = vcmp.ge.f32.partialorder %v12100_v34, 1.0  ;;  %v7092_v34 = vld [vmem:[#allocation2 + $0x78] sm:$0xff] }
 0x180   : > { %vm11717_vm14 = vcmp.ne.s32.totalorder %v7069_v18, 0  ;;  %12102 = vst [vmem:[#allocation79_spill] sm:$0xff] %v7082_v47  ;;  %v12111_v33 = vld [vmem:[#allocation22_spill] sm:$0xff] }
 0x181   : > { %vm1876_vm5 = vmand %vm12101_vm13, %vm11717_vm14  ;;  %12103 = vst [vmem:[#allocation80_spill] sm:$0xff] %v7085_v30  ;;  %5425 = vmatmul.msk.f32.gmra.mxu0 %vm655_vm0, %v6744_v54  ;;  %3938 = vrot.lane.b32.xlu0 %v7082_v47, %s5717_s26  ;;  %v7100_v30 = vld [vmem:[#allocation2 + $0xd8] sm:$0xff]  ;;  %v12107_v47 = vld [vmem:[#allocation33_spill] sm:$0xff]  ;;  %vm11678_vm13 = vcmp.lt.f32.partialorder %v12113_v13, 15.0 }
 0x182   : > { %v1908_v45 = vsel %vm1876_vm5, 1, %v12072_v58  ;;  %12105 = vst [vmem:[#allocation81_spill] sm:$0xff] %v7100_v30  ;;  %vm11708_vm5 = vcmp.lt.f32.partialorder %v12107_v47, 15.0 }
 0x183   : > { %1999 = vperm.xlu2 %5611, %v1908_v45   ;;  %2304 = vperm.xlu1 %5614, %v12104_v3   ;;  %v5390_v3 = vld [vmem:[%s11504_s5 + $0x18] sm:$0xff]  ;;  %v7113_v21 = vsel %vm11708_vm5, 1, %v12072_v58 }
 0x184   : > { %5313 = vmatmul.msk.f32.gmra.mxu2 %vm655_vm0, %v7094_v24  ;;  %2958 = vmatpush.msrb.mxu3 %v5390_v3  ;;  %12108 = vst [vmem:[#allocation83_spill] sm:$0xff] %v7113_v21  ;;  %v7124_v3 = vld [vmem:[#allocation2 + $0xb0] sm:$0xff] }
 0x186   : > { %5307 = vmatmul.msk.f32.gmra.mxu1 %vm655_vm0, %v7092_v34 }
 0x187   : > { %v7102_v45 = vpop.permute.xlu0 %2286  ;;  %5319 = vmatmul.msk.f32.gmra.mxu3 %vm655_vm0, %v7100_v30 }
 0x188   : > { %12106 = vst [vmem:[#allocation82_spill] sm:$0xff] %v7102_v45  ;;  %v12109_v45 = vld [vmem:[#allocation7_spill] sm:$0xff]  ;;  %v7121_v30 = vpop.permute.xlu1 %1915 }
 0x189   : > { %5426 = vmatmul.msk.f32.gmra.mxu0 %vm655_vm0, %v6779_v51  ;;  %3944 = vrot.lane.b32.xlu0 %v7113_v21, %s5717_s26  ;;  %12110 = vst [vmem:[#allocation84_spill] sm:$0xff] %v7121_v30  ;;  %v7137_v30 = vsel %vm11678_vm13, 1, %v12072_v58 }
 0x18a   : > { %12114 = vst [vmem:[#allocation86_spill] sm:$0xff] %v7137_v30 }
 0x18b   : > { %5612 = vset.pattern.permute.xlu2 %v12089_v29  ;;  %2313 = vperm.xlu1 %5614, %v12111_v33   ;;  %v12115_v33 = vld [vmem:[#allocation14_spill] sm:$0xff] }
 0x18c   : > { %2283 = vperm.xlu2 %5612, %v12109_v45   ;;  %5314 = vmatmul.msk.f32.gmra.mxu2 %vm655_vm0, %v7124_v3  ;;  %v1375_v45 = vld [vmem:[#allocation2 + $0xe8] sm:$0xff] }
 0x18e   : > { %5325 = vmatmul.msk.f32.vlgmr.msrb.gmra.mxu1 %vm655_vm0, %v6708_v38 }
 0x18f   : > { %v7130_v29 = vpop.permute.xlu0 %2301  ;;  %5320 = vmatmul.msk.f32.gmra.mxu3 %vm655_vm0, %v1374_v62  ;;  %v7147_v62 = vld [vmem:[#allocation2 + $0xb8] sm:$0xff] }
 0x190   : > { %12112 = vst [vmem:[#allocation85_spill] sm:$0xff] %v7130_v29  ;;  %v7144_v21 = vpop.permute.xlu1 %1924  ;;  %v12117_v29 = vld [vmem:[#allocation28_spill] sm:$0xff] }
 0x191   : > { %5427 = vmatmul.msk.f32.gmra.mxu0 %vm655_vm0, %v6818_v36  ;;  %3950 = vrot.lane.b32.xlu0 %v7137_v30, %s5717_s26  ;;  %12116 = vst [vmem:[#allocation87_spill] sm:$0xff] %v7144_v21  ;;  %v7149_v14 = vpop.permute.xlu2 %1918  ;;  %v12120_v30 = vld [vmem:[#allocation45_spill] sm:$0xff] }
 0x192   : > { %12118 = vst [vmem:[#allocation88_spill] sm:$0xff] %v7149_v14  ;;  %vm11682_vm13 = vcmp.lt.f32.partialorder %v12120_v30, 15.0  ;;  %v12122_v14 = vld [vmem:[#allocation17_spill] sm:$0xff] }
 0x193   : > { %2322 = vperm.xlu1 %5614, %v12117_v29   ;;  %v7162_v21 = vsel %vm11682_vm13, 1, %v12072_v58  ;;  %vm11689_vm13 = vcmp.lt.f32.partialorder %v12127_v46, 15.0 }
 0x194   : > { %2292 = vperm.xlu2 %5612, %v12115_v33   ;;  %5315 = vmatmul.msk.f32.gmra.mxu2 %vm655_vm0, %v7147_v62  ;;  %12121 = vst [vmem:[#allocation90_spill] sm:$0xff] %v7162_v21  ;;  %v1376_v33 = vld [vmem:[#allocation2 + $0xf0] sm:$0xff] }
 0x196   : > { %5326 = vmatmul.msk.f32.gmra.mxu1 %vm655_vm0, %v6744_v54 }
 0x197   : > { %v7155_v13 = vpop.permute.xlu0 %2310  ;;  %5321 = vmatmul.msk.f32.gmra.mxu3 %vm655_vm0, %v1375_v45 }
 0x198   : > { %12119 = vst [vmem:[#allocation89_spill] sm:$0xff] %v7155_v13  ;;  %v7169_v29 = vpop.permute.xlu1 %1933  ;;  %v12124_v13 = vld [vmem:[#allocation34_spill] sm:$0xff] }
 0x199   : > { %5428 = vmatmul.msk.f32.gmra.mxu0 %vm655_vm0, %v6857_v20  ;;  %3956 = vrot.lane.b32.xlu0 %v7162_v21, %s5717_s26  ;;  %12123 = vst [vmem:[#allocation17_spill] sm:$0xff] %v7169_v29  ;;  %v7172_v45 = vpop.permute.xlu2 %1927  ;;  %v7185_v29 = vsel %vm11689_vm13, 1, %v12072_v58  ;;  %v1377_v21 = vld [vmem:[#allocation2 + $0xf8] sm:$0xff] }
 0x19a   : > { %12125 = vst [vmem:[#allocation91_spill] sm:$0xff] %v7172_v45  ;;  %v12129_v45 = vld [vmem:[#allocation23_spill] sm:$0xff] }
 0x19b   : > { %2331 = vperm.xlu1 %5614, %v12124_v13   ;;  %12128 = vst [vmem:[#allocation93_spill] sm:$0xff] %v7185_v29 }
 0x19c   : > { %2298 = vperm.xlu2 %5612, %v12122_v14   ;;  %5358 = vmatmul.msk.f32.vlgmr.msrb.gmra.mxu2 %vm655_vm0, %v6708_v38 }
 0x19e   : > { %5327 = vmatmul.msk.f32.gmra.mxu1 %vm655_vm0, %v6779_v51 }
 0x19f   : > { %v7178_v30 = vpop.permute.xlu0 %2319  ;;  %5322 = vmatmul.msk.f32.gmra.mxu3 %vm655_vm0, %v1376_v33 }
 0x1a0   : > { %12126 = vst [vmem:[#allocation92_spill] sm:$0xff] %v7178_v30  ;;  %v7192_v13 = vpop.permute.xlu1 %1942  ;;  %v12131_v30 = vld [vmem:[#allocation40_spill] sm:$0xff] }
 0x1a1   : > { %5429 = vmatmul.msk.f32.gmra.mxu0 %vm655_vm0, %v6909_v41  ;;  %3962 = vrot.lane.b32.xlu0 %v7185_v29, %s5717_s26  ;;  %12130 = vst [vmem:[#allocation94_spill] sm:$0xff] %v7192_v13  ;;  %v7195_v33 = vpop.permute.xlu2 %1936 }
 0x1a2   : > { %12132 = vst [vmem:[#allocation95_spill] sm:$0xff] %v7195_v33  ;;  %v12136_v33 = vld [vmem:[#allocation29_spill] sm:$0xff] }
 0x1a3   : > { %2340 = vperm.xlu1 %5614, %v12131_v30   ;;  %v12137_v30 = vld [vmem:[#allocation46_spill] sm:$0xff] }
 0x1a4   : > { %2307 = vperm.xlu2 %5612, %v12129_v45   ;;  %5359 = vmatmul.msk.f32.gmra.mxu2 %vm655_vm0, %v6744_v54  ;;  %v12134_v45 = vld [vmem:[#allocation57_spill] sm:$0xff] }
 0x1a5   : > { %vm11695_vm13 = vcmp.lt.f32.partialorder %v12134_v45, 15.0  ;;  %v12141_v45 = vld [vmem:[#allocation63_spill] sm:$0xff] }
 0x1a6   : > { %5328 = vmatmul.msk.f32.gmra.mxu1 %vm655_vm0, %v6818_v36  ;;  %v7208_v13 = vsel %vm11695_vm13, 1, %v12072_v58  ;;  %vm11701_vm13 = vcmp.lt.f32.partialorder %v12141_v45, 15.0 }
 0x1a7   : > { %v7201_v46 = vpop.permute.xlu0 %2328  ;;  %5323 = vmatmul.msk.f32.gmra.mxu3 %vm655_vm0, %v1377_v21  ;;  %12135 = vst [vmem:[#allocation97_spill] sm:$0xff] %v7208_v13 }
 0x1a8   : > { %12133 = vst [vmem:[#allocation96_spill] sm:$0xff] %v7201_v46  ;;  %v7222_v21 = vpop.permute.xlu1 %1951 }
 0x1a9   : > { %5430 = vmatmul.msk.f32.gmra.mxu0 %vm655_vm0, %v6959_v60  ;;  %3968 = vrot.lane.b32.xlu0 %v7208_v13, %s5717_s26  ;;  %v7216_v46 = vpop.permute.xlu2 %1945  ;;  %12139 = vst [vmem:[#allocation98_spill] sm:$0xff] %v7222_v21  ;;  %v12143_v13 = vld [vmem:[#allocation35_spill] sm:$0xff]  ;;  %v12144_v21 = vld [vmem:[#allocation52_spill] sm:$0xff] }
 0x1aa   : > { %12138 = vst [vmem:[#allocation29_spill] sm:$0xff] %v7216_v46 }
 0x1ab   : > { %2349 = vperm.xlu1 %5614, %v12137_v30   ;;  %v7232_v30 = vsel %vm11701_vm13, 1, %v12072_v58 }
 0x1ac   : > { %2316 = vperm.xlu2 %5612, %v12136_v33   ;;  %5360 = vmatmul.msk.f32.gmra.mxu2 %vm655_vm0, %v6779_v51  ;;  %12142 = vst [vmem:[#allocation100_spill] sm:$0xff] %v7232_v30 }
 0x1ae   : > { %5329 = vmatmul.msk.f32.gmra.mxu1 %vm655_vm0, %v6857_v20 }
 0x1af   : > { %v7224_v29 = vpop.permute.xlu0 %2337  ;;  %5391 = vmatmul.msk.f32.vlgmr.msrb.gmra.mxu3 %vm655_vm0, %v6708_v38 }
 0x1b0   : > { %12140 = vst [vmem:[#allocation99_spill] sm:$0xff] %v7224_v29  ;;  %v7246_v38 = vpop.permute.xlu1 %1960 }
 0x1b1   : > { %5431 = vmatmul.msk.f32.gmra.mxu0 %vm655_vm0, %v7006_v48  ;;  %3974 = vrot.lane.b32.xlu0 %v7232_v30, %s5717_s26  ;;  %v7240_v29 = vpop.permute.xlu2 %1954  ;;  %12146 = vst [vmem:[#allocation101_spill] sm:$0xff] %v7246_v38 }
 0x1b2   : > { %12145 = vst [vmem:[#allocation35_spill] sm:$0xff] %v7240_v29 }
 0x1b3   : > { %2358 = vperm.xlu1 %5614, %v12144_v21   ;;  %v7257_v21 = vld [vmem:[%s11505_s6 + $0x10] sm:$0xff] }
 0x1b4   : > { %2325 = vperm.xlu2 %5612, %v12143_v13   ;;  %5361 = vmatmul.msk.f32.gmra.mxu2 %vm655_vm0, %v6818_v36  ;;  %v7252_v45 = vpop.f32.mrf.mxu0  ;;  %12149 = vst [vmem:[#allocation104_spill] sm:$0xff] %v7257_v21  ;;  %vm11716_vm13 = vcmp.lt.f32.partialorder %v7257_v21, 15.0 }
 0x1b5   : > { %12148 = vst [vmem:[#allocation103_spill] sm:$0xff] %v7252_v45  ;;  %v7263_v30 = vsel %vm11716_vm13, 1, %v12072_v58  ;;  %vm2687_vm6 = vmand %vm11716_vm13, %vm1817_vm3  ;;  %vm12176_vm13 = vcmp.ne.s32.totalorder %v6653_v4, 0 }
 0x1b6   : > { %5330 = vmatmul.msk.f32.gmra.mxu1 %vm655_vm0, %v6909_v41  ;;  %12150 = vst [vmem:[#allocation105_spill] sm:$0xff] %v7263_v30  ;;  %v2719_v21 = vsel %vm2687_vm6, 1, %v12072_v58 }
 0x1b7   : > { %v7248_v46 = vpop.permute.xlu0 %2346  ;;  %5392 = vmatmul.msk.f32.gmra.mxu3 %vm655_vm0, %v6744_v54  ;;  %v12152_v54 = vld [vmem:[#allocation58_spill] sm:$0xff] }
 0x1b8   : > { %12147 = vst [vmem:[#allocation102_spill] sm:$0xff] %v7248_v46  ;;  %v12151_v46 = vld [vmem:[#allocation41_spill] sm:$0xff] }
 0x1b9   : > { %5432 = vmatmul.msk.f32.gmra.mxu0 %vm655_vm0, %v6789_v6  ;;  %4452 = vperm.xlu0 %5613, %v7263_v30   ;;  %v7270_v38 = vpop.permute.xlu2 %1963  ;;  %v7276_v45 = vpop.permute.xlu1 %1969  ;;  %v7285_v30 = vld [vmem:[%s11505_s6 + $0x38] sm:$0xff] }
 0x1ba   : > { %12153 = vst [vmem:[#allocation106_spill] sm:$0xff] %v7270_v38  ;;  %vm11729_vm5 = vcmp.lt.f32.partialorder %v7285_v30, 15.0 }
 0x1bb   : > { %2367 = vperm.xlu1 %5614, %v12152_v54   ;;  %12154 = vst [vmem:[#allocation107_spill] sm:$0xff] %v7276_v45  ;;  %v7293_v38 = vsel %vm11729_vm5, 1, %v12072_v58 }
 0x1bc   : > { %2334 = vperm.xlu2 %5612, %v12151_v46   ;;  %5362 = vmatmul.msk.f32.gmra.mxu2 %vm655_vm0, %v6857_v20  ;;  %12156 = vst [vmem:[#allocation109_spill] sm:$0xff] %v7285_v30 }
 0x1bd   : > { %12158 = vst [vmem:[#allocation111_spill] sm:$0xff] %v7293_v38 }
 0x1be   : > { %5331 = vmatmul.msk.f32.gmra.mxu1 %vm655_vm0, %v6959_v60  ;;  %v7288_v54 = vpop.f32.mrf.mxu0 }
 0x1bf   : > { %v7278_v29 = vpop.permute.xlu0 %2355  ;;  %5393 = vmatmul.msk.f32.gmra.mxu3 %vm655_vm0, %v6779_v51  ;;  %12157 = vst [vmem:[#allocation110_spill] sm:$0xff] %v7288_v54  ;;  %v12160_v51 = vld [vmem:[#allocation64_spill] sm:$0xff] }
 0x1c0   : > { %12155 = vst [vmem:[#allocation108_spill] sm:$0xff] %v7278_v29  ;;  %v12159_v29 = vld [vmem:[#allocation47_spill] sm:$0xff] }
 0x1c1   : > { %5433 = vmatmul.msk.f32.gmra.mxu0 %vm655_vm0, %v6828_v52  ;;  %4467 = vperm.xlu0 %5613, %v7293_v38   ;;  %v7300_v45 = vpop.permute.xlu2 %1972  ;;  %v7306_v54 = vpop.permute.xlu1 %1978  ;;  %v7315_v38 = vld [vmem:[%s11505_s6 + $0x50] sm:$0xff] }
 0x1c2   : > { %12161 = vst [vmem:[#allocation47_spill] sm:$0xff] %v7300_v45  ;;  %vm11753_vm12 = vcmp.lt.f32.partialorder %v7315_v38, 15.0 }
 0x1c3   : > { %2376 = vperm.xlu1 %5614, %v12160_v51   ;;  %12162 = vst [vmem:[#allocation112_spill] sm:$0xff] %v7306_v54  ;;  %v7323_v45 = vsel %vm11753_vm12, 1, %v12072_v58 }
 0x1c4   : > { %2343 = vperm.xlu2 %5612, %v12159_v29   ;;  %5363 = vmatmul.msk.f32.gmra.mxu2 %vm655_vm0, %v6909_v41  ;;  %12164 = vst [vmem:[#allocation114_spill] sm:$0xff] %v7315_v38 }
 0x1c5   : > { %12166 = vst [vmem:[#allocation116_spill] sm:$0xff] %v7323_v45 }
 0x1c6   : > { %5332 = vmatmul.msk.f32.gmra.mxu1 %vm655_vm0, %v7006_v48  ;;  %v7318_v51 = vpop.f32.mrf.mxu0 }
 0x1c7   : > { %v7308_v46 = vpop.permute.xlu0 %2364  ;;  %5394 = vmatmul.msk.f32.gmra.mxu3 %vm655_vm0, %v6818_v36  ;;  %12165 = vst [vmem:[#allocation115_spill] sm:$0xff] %v7318_v51 }
 0x1c8   : > { %12163 = vst [vmem:[#allocation113_spill] sm:$0xff] %v7308_v46  ;;  %v7329_v36 = vpop.f32.mrf.mxu1  ;;  %v12168_v46 = vld [vmem:[#allocation53_spill] sm:$0xff] }
 0x1c9   : > { %12167 = vst [vmem:[#allocation117_spill] sm:$0xff] %v7329_v36  ;;  %5434 = vmatmul.msk.f32.gmra.mxu0 %vm655_vm0, %v6870_v56  ;;  %4476 = vperm.xlu0 %5613, %v7323_v45   ;;  %v7342_v49 = vpop.permute.xlu1 %1987  ;;  %v7358_v36 = vld [vmem:[%s11505_s6 + $0x68] sm:$0xff] }
 0x1ca   : > { %12170 = vst [vmem:[#allocation118_spill] sm:$0xff] %v7342_v49  ;;  %vm11752_vm6 = vcmp.lt.f32.partialorder %v7358_v36, 15.0 }
 0x1cb   : > { %5616 = vset.pattern.permute.xlu1 %v12072_v58  ;;  %12173 = vst [vmem:[#allocation121_spill] sm:$0xff] %v7358_v36 }
 0x1cc   : > { %2352 = vperm.xlu2 %5612, %v12168_v46   ;;  %v7336_v51 = vpop.permute.xlu2 %1981  ;;  %5364 = vmatmul.msk.f32.gmra.mxu2 %vm655_vm0, %v6959_v60 }
 0x1cd   : > { %12169 = vst [vmem:[#allocation53_spill] sm:$0xff] %v7336_v51  ;;  %2756 = vperm.xlu1 %5616, %v2719_v21   ;;  %v7352_v51 = vld [vmem:[%s11505_s6 + $0x20] sm:$0xff] }
 0x1ce   : > { %5333 = vmatmul.msk.f32.gmra.mxu1 %vm655_vm0, %v6789_v6  ;;  %12172 = vst [vmem:[#allocation120_spill] sm:$0xff] %v7352_v51  ;;  %vm11725_vm3 = vcmp.lt.f32.partialorder %v7352_v51, 15.0  ;;  %v7361_v49 = vpop.f32.mrf.mxu0  ;;  %v7477_v51 = vld [vmem:[%s11505_s6 + $0xb0] sm:$0xff] }
 0x1cf   : > { %v7345_v54 = vpop.permute.xlu0 %2373  ;;  %5395 = vmatmul.msk.f32.gmra.mxu3 %vm655_vm0, %v6857_v20  ;;  %12174 = vst [vmem:[#allocation122_spill] sm:$0xff] %v7361_v49  ;;  %v7366_v20 = vsel %vm11752_vm6, 1, %v12072_v58  ;;  %vm2689_vm14 = vmand %vm11725_vm3, %vm12176_vm13  ;;  %vm1815_vm3 = vcmp.ne.s32.totalorder %v6691_v23, 0 }
 0x1d0   : > { %12171 = vst [vmem:[#allocation119_spill] sm:$0xff] %v7345_v54  ;;  %v7372_v21 = vpop.f32.mrf.mxu1  ;;  %v12178_v54 = vld [vmem:[#allocation59_spill] sm:$0xff]  ;;  %v2721_v45 = vsel %vm2689_vm14, 1, %v12072_v58  ;;  %vm2692_vm14 = vmand %vm11729_vm5, %vm1822_vm11 }
 0x1d1   : > { %12175 = vst [vmem:[#allocation123_spill] sm:$0xff] %v7366_v20  ;;  %5435 = vmatmul.msk.f32.gmra.mxu0 %vm655_vm0, %v6920_v15  ;;  %4485 = vperm.xlu0 %5613, %v7366_v20   ;;  %v7384_v4 = vpop.permute.xlu1 %1996  ;;  %v2724_v42 = vsel %vm2692_vm14, 1, %v12072_v58  ;;  %vm2685_vm14 = vmand %vm11734_vm15, %vm1815_vm3 }
 0x1d2   : > { %12177 = vst [vmem:[#allocation124_spill] sm:$0xff] %v7372_v21  ;;  %vm2695_vm5 = vmand %vm11753_vm12, %vm1825_vm2  ;;  %vm11777_vm2 = vcmp.lt.f32.partialorder %v7477_v51, 15.0 }
 0x1d3   : > { %12180 = vst [vmem:[#allocation125_spill] sm:$0xff] %v7384_v4  ;;  %v2727_v17 = vsel %vm2695_vm5, 1, %v12072_v58 }
 0x1d4   : > { %2361 = vperm.xlu2 %5612, %v12178_v54   ;;  %5365 = vmatmul.msk.f32.gmra.mxu2 %vm655_vm0, %v7006_v48  ;;  %12199 = vst [vmem:[#allocation141_spill] sm:$0xff] %v7477_v51 }
 0x1d5   : > { %v7378_v49 = vpop.permute.xlu2 %1990  ;;  %2762 = vperm.xlu1 %5616, %v2721_v45   ;;  %v12186_v45 = vld [vmem:[#allocation65_spill] sm:$0xff] }
 0x1d6   : > { %12179 = vst [vmem:[#allocation59_spill] sm:$0xff] %v7378_v49  ;;  %5334 = vmatmul.msk.f32.gmra.mxu1 %vm655_vm0, %v6828_v52  ;;  %v7394_v49 = vld [vmem:[%s11505_s6 + $0x80] sm:$0xff]  ;;  %v7397_v20 = vpop.f32.mrf.mxu0 }
 0x1d7   : > { %v7387_v21 = vpop.permute.xlu0 %3914  ;;  %5396 = vmatmul.msk.f32.gmra.mxu3 %vm655_vm0, %v6909_v41  ;;  %12182 = vst [vmem:[#allocation127_spill] sm:$0xff] %v7394_v49  ;;  %vm11762_vm13 = vcmp.lt.f32.partialorder %v7394_v49, 15.0 }
 0x1d8   : > { %12181 = vst [vmem:[#allocation126_spill] sm:$0xff] %v7387_v21  ;;  %v7402_v4 = vsel %vm11762_vm13, 1, %v12072_v58  ;;  %v7408_v41 = vpop.f32.mrf.mxu1  ;;  %v7431_v21 = vld [vmem:[%s11505_s6 + $0x98] sm:$0xff] }
 0x1d9   : > { %12183 = vst [vmem:[#allocation128_spill] sm:$0xff] %v7397_v20  ;;  %5436 = vmatmul.msk.f32.gmra.mxu0 %vm655_vm0, %v6973_v26  ;;  %4494 = vperm.xlu0 %5613, %v7402_v4   ;;  %v7422_v30 = vpop.permute.xlu1 %2005  ;;  %vm11772_vm11 = vcmp.lt.f32.partialorder %v7431_v21, 15.0 }
 0x1da   : > { %12184 = vst [vmem:[#allocation129_spill] sm:$0xff] %v7402_v4  ;;  %v12195_v4 = vld [vmem:[#allocation69_spill] sm:$0xff] }
 0x1db   : > { %12185 = vst [vmem:[#allocation130_spill] sm:$0xff] %v7408_v41  ;;  %vm1818_vm15 = vcmp.ne.s32.totalorder %v12195_v4, 0 }
 0x1dc   : > { %2370 = vperm.xlu2 %5612, %v12186_v45   ;;  %5366 = vmatmul.msk.f32.gmra.mxu2 %vm655_vm0, %v6789_v6  ;;  %12188 = vst [vmem:[#allocation132_spill] sm:$0xff] %v7422_v30  ;;  %vm2688_vm5 = vmand %vm11743_vm10, %vm1818_vm15 }
 0x1dd   : > { %v7414_v20 = vpop.permute.xlu2 %1999  ;;  %2771 = vperm.xlu1 %5616, %v2724_v42   ;;  %12190 = vst [vmem:[#allocation134_spill] sm:$0xff] %v7431_v21 }
 0x1de   : > { %12187 = vst [vmem:[#allocation131_spill] sm:$0xff] %v7414_v20  ;;  %5335 = vmatmul.msk.f32.gmra.mxu1 %vm655_vm0, %v6870_v56  ;;  %v7434_v20 = vpop.f32.mrf.mxu0  ;;  %v7440_v30 = vpop.f32.mrf.mxu2 }
 0x1df   : > { %v7424_v41 = vpop.permute.xlu0 %3920  ;;  %5397 = vmatmul.msk.f32.gmra.mxu3 %vm655_vm0, %v6959_v60  ;;  %12191 = vst [vmem:[#allocation135_spill] sm:$0xff] %v7434_v20  ;;  %v7445_v60 = vsel %vm11772_vm11, 1, %v12072_v58  ;;  %v1652_v20 = vlaneseq }
 0x1e0   : > { %12189 = vst [vmem:[#allocation133_spill] sm:$0xff] %v7424_v41  ;;  %v7451_v42 = vpop.f32.mrf.mxu1  ;;  %v2717_v41 = vsel %vm2685_vm14, 1, %v12072_v58  ;;  %vm2698_vm14 = vmand %vm11752_vm6, %vm1828_vm9  ;;  %vm12211_vm6 = vcmp.ne.s32.totalorder %v6724_v39, 0  ;;  %v7564_v39 = vld [vmem:[%s11505_s6 + $0x40] sm:$0xff] }
 0x1e1   : > { %12192 = vst [vmem:[#allocation136_spill] sm:$0xff] %v7440_v30  ;;  %5437 = vmatmul.msk.f32.gmra.mxu0 %vm655_vm0, %v7017_v50  ;;  %4503 = vperm.xlu0 %5613, %v7445_v60   ;;  %v2730_v36 = vsel %vm2698_vm14, 1, %v12072_v58  ;;  %vm2701_vm12 = vmand %vm11762_vm13, %vm12211_vm6  ;;  %vm12221_vm13 = vcmp.ne.s32.totalorder %v6754_v16, 0 }
 0x1e2   : > { %12193 = vst [vmem:[#allocation137_spill] sm:$0xff] %v7445_v60 }
 0x1e3   : > { %12194 = vst [vmem:[#allocation138_spill] sm:$0xff] %v7451_v42 }
 0x1e4   : > { %5615 = vset.pattern.permute.xlu2 %v12072_v58  ;;  %5367 = vmatmul.msk.f32.gmra.mxu2 %vm655_vm0, %v6828_v52  ;;  %12213 = vst [vmem:[#allocation152_spill] sm:$0xff] %v7564_v39 }
 0x1e5   : > { %2750 = vperm.xlu2 %5615, %v2717_v41   ;;  %2780 = vperm.xlu1 %5616, %v2727_v17   ;;  %v7470_v60 = vpop.permute.xlu1 %2289  ;;  %v7472_v41 = vshrl.u32 %v1652_v20, 7  ;;  %v7489_v20 = vsel %vm11777_vm2, 1, %v12072_v58  ;;  %v11748_v17 = vrot.slane %v7440_v30, 7 }
 0x1e6   : > { %5336 = vmatmul.msk.f32.gmra.mxu1 %vm655_vm0, %v6920_v15  ;;  %v7464_v38 = vpop.permute.xlu2 %2283  ;;  %12198 = vst [vmem:[#allocation140_spill] sm:$0xff] %v7470_v60  ;;  %v7480_v45 = vpop.f32.mrf.mxu0  ;;  %v7512_v60 = vld [vmem:[%s11505_s6 + $0x28] sm:$0xff] }
 0x1e7   : > { %12196 = vst [vmem:[#allocation69_spill] sm:$0xff] %v7464_v38  ;;  %v7466_v42 = vpop.permute.xlu0 %3926  ;;  %5398 = vmatmul.msk.f32.gmra.mxu3 %vm655_vm0, %v7006_v48  ;;  %v1575_v48 = vpop.f32.mrf.mxu2  ;;  %vm11997_vm10 = vcmp.lt.s32.totalorder %v7472_v41, 1  ;;  %vm11763_vm9 = vcmp.lt.f32.partialorder %v7512_v60, 15.0 }
 0x1e8   : > { %12197 = vst [vmem:[#allocation139_spill] sm:$0xff] %v7466_v42  ;;  %v1637_v38 = vrot.slane %v1575_v48, 7  ;;  %v2720_v42 = vsel %vm2688_vm5, 1, %v12072_v58  ;;  %vm2690_vm14 = vmand %vm11763_vm9, %vm1820_vm1  ;;  %vm11773_vm1 = vcmp.lt.f32.partialorder %v7564_v39, 15.0 }
 0x1e9   : > { %12200 = vst [vmem:[#allocation142_spill] sm:$0xff] %v7480_v45  ;;  %5438 = vmatmul.msk.f32.gmra.mxu0 %vm655_vm0, %v7059_v32  ;;  %4512 = vperm.xlu0 %5613, %v7489_v20   ;;  %v2722_v7 = vsel %vm2690_vm14, 1, %v12072_v58  ;;  %vm2704_vm9 = vmand %vm11772_vm11, %vm12221_vm13  ;;  %vm12231_vm11 = vcmp.ne.s32.totalorder %v6791_v10, 0 }
 0x1ea   : > { %12201 = vst [vmem:[#allocation143_spill] sm:$0xff] %v7489_v20  ;;  %v7496_v45 = vpop.f32.mrf.mxu1  ;;  %v7507_v48 = vsel %vm11997_vm10, %v11748_v17, %v1637_v38 }
 0x1eb   : > { %12203 = vst [vmem:[#allocation68_spill] sm:$0xff] %v7496_v45 }
 0x1ec   : > { %12204 = vst [vmem:[#allocation144_spill] sm:$0xff] %v7507_v48  ;;  %5368 = vmatmul.msk.f32.gmra.mxu2 %vm655_vm0, %v6870_v56  ;;  %v7531_v48 = vld [vmem:[%s11505_s6 + $0xc8] sm:$0xff] }
 0x1ed   : > { %2759 = vperm.xlu2 %5615, %v2720_v42   ;;  %12205 = vst [vmem:[#allocation145_spill] sm:$0xff] %v7512_v60  ;;  %2789 = vperm.xlu1 %5616, %v2730_v36   ;;  %v7526_v42 = vpop.permute.xlu1 %2295  ;;  %vm11799_vm5 = vcmp.lt.f32.partialorder %v7531_v48, 15.0 }
 0x1ee   : > { %5337 = vmatmul.msk.f32.gmra.mxu1 %vm655_vm0, %v6973_v26  ;;  %v7520_v20 = vpop.permute.xlu2 %2292  ;;  %12207 = vst [vmem:[#allocation147_spill] sm:$0xff] %v7526_v42  ;;  %v7534_v30 = vpop.f32.mrf.mxu0 }
 0x1ef   : > { %v7522_v17 = vpop.permute.xlu0 %3932  ;;  %5399 = vmatmul.msk.f32.gmra.mxu3 %vm655_vm0, %v6789_v6  ;;  %12208 = vst [vmem:[#allocation148_spill] sm:$0xff] %v7531_v48  ;;  %v7543_v6 = vsel %vm11799_vm5, 1, %v12072_v58 }
 0x1f0   : > { %12206 = vst [vmem:[#allocation146_spill] sm:$0xff] %v7522_v17  ;;  %v1578_v17 = vpop.f32.mrf.mxu2 }
 0x1f1   : > { %12209 = vst [vmem:[#allocation149_spill] sm:$0xff] %v7534_v30  ;;  %v1638_v36 = vrot.slane %v1578_v17, 7  ;;  %v7545_v42 = vpop.f32.mrf.mxu3  ;;  %5439 = vmatmul.msk.f32.gmra.mxu0 %vm655_vm0, %v7092_v34  ;;  %4521 = vperm.xlu0 %5613, %v7543_v6   ;;  %v2733_v17 = vsel %vm2701_vm12, 1, %v12072_v58  ;;  %vm12219_vm12 = vcmp.ne.s32.totalorder %v6758_v5, 0 }
 0x1f2   : > { %12210 = vst [vmem:[#allocation150_spill] sm:$0xff] %v7543_v6  ;;  %vm2693_vm14 = vmand %vm11773_vm1, %vm12219_vm12  ;;  %v12257_v8 = vrot.slane %v7545_v42, 7 }
 0x1f3   : > { %v7551_v30 = vpop.f32.mrf.mxu1  ;;  %v7559_v60 = vsel %vm11997_vm10, %v1637_v38, %v1638_v36  ;;  %v2725_v39 = vsel %vm2693_vm14, 1, %v12072_v58  ;;  %vm2707_vm1 = vmand %vm11777_vm2, %vm12231_vm11  ;;  %vm12239_vm2 = vcmp.ne.s32.totalorder %v6836_v53, 0 }
 0x1f4   : > { %12212 = vst [vmem:[#allocation151_spill] sm:$0xff] %v7551_v30  ;;  %5369 = vmatmul.msk.f32.gmra.mxu2 %vm655_vm0, %v6920_v15  ;;  %v7583_v30 = vld [vmem:[%s11505_s6 + $0xe0] sm:$0xff] }
 0x1f5   : > { %2765 = vperm.xlu2 %5615, %v2722_v7   ;;  %2798 = vperm.xlu1 %5616, %v2733_v17   ;;  %v7578_v7 = vpop.permute.xlu1 %2304  ;;  %12217 = vst [vmem:[#allocation156_spill] sm:$0xff] %v7583_v30  ;;  %vm11794_vm6 = vcmp.lt.f32.partialorder %v7583_v30, 15.0 }
 0x1f6   : > { %5338 = vmatmul.msk.f32.gmra.mxu1 %vm655_vm0, %v7017_v50  ;;  %v7572_v49 = vpop.permute.xlu2 %2298  ;;  %12216 = vst [vmem:[#allocation155_spill] sm:$0xff] %v7578_v7  ;;  %v7586_v6 = vpop.f32.mrf.mxu0 }
 0x1f7   : > { %12214 = vst [vmem:[#allocation153_spill] sm:$0xff] %v7572_v49  ;;  %v7574_v38 = vpop.permute.xlu0 %3938  ;;  %5400 = vmatmul.msk.f32.gmra.mxu3 %vm655_vm0, %v6828_v52  ;;  %v7595_v52 = vsel %vm11794_vm6, 1, %v12072_v58 }
 0x1f8   : > { %12215 = vst [vmem:[#allocation154_spill] sm:$0xff] %v7574_v38  ;;  %v1581_v49 = vpop.f32.mrf.mxu2 }
 0x1f9   : > { %12218 = vst [vmem:[#allocation157_spill] sm:$0xff] %v7586_v6  ;;  %v1639_v17 = vrot.slane %v1581_v49, 7  ;;  %v11768_v6 = vrot.slane %v7545_v42, 7  ;;  %5440 = vmatmul.msk.f32.gmra.mxu0 %vm655_vm0, %v6872_v9  ;;  %4530 = vperm.xlu0 %5613, %v7595_v52   ;;  %v7835_v42 = vld [vmem:[%s11505_s6 + $0xb8] sm:$0xff] }
 0x1fa   : > { %12220 = vst [vmem:[#allocation158_spill] sm:$0xff] %v7595_v52  ;;  %v1599_v7 = vpop.f32.mrf.mxu3 }
 0x1fb   : > { %v1645_v38 = vrot.slane %v1599_v7, 7  ;;  %v7602_v5 = vpop.f32.mrf.mxu1  ;;  %v7610_v49 = vsel %vm11997_vm10, %v1638_v36, %v1639_v17  ;;  %v7621_v7 = vld [vmem:[%s11505_s6 + $0x58] sm:$0xff]  ;;  %v2736_v36 = vsel %vm2704_vm9, 1, %v12072_v58  ;;  %vm12230_vm9 = vcmp.ne.s32.totalorder %v6797_v55, 0  ;;  %12260 = vst [vmem:[#allocation185_spill] sm:$0xff] %v7835_v42 }
 0x1fc   : > { %12222 = vst [vmem:[#allocation159_spill] sm:$0xff] %v7602_v5  ;;  %vm11779_vm13 = vcmp.lt.f32.partialorder %v7621_v7, 15.0  ;;  %5370 = vmatmul.msk.f32.gmra.mxu2 %vm655_vm0, %v6973_v26 }
 0x1fd   : > { %12223 = vst [vmem:[#allocation160_spill] sm:$0xff] %v7610_v49  ;;  %2774 = vperm.xlu2 %5615, %v2725_v39   ;;  %v7616_v16 = vsel %vm11997_vm10, %v11768_v6, %v1645_v38  ;;  %2807 = vperm.xlu1 %5616, %v2736_v36   ;;  %v7635_v6 = vpop.permute.xlu1 %2313  ;;  %vm2696_vm14 = vmand %vm11779_vm13, %vm12230_vm9  ;;  %vm12237_vm9 = vcmp.ge.f32.partialorder %v6022_v22, 1.0  ;;  %vm12240_vm13 = vcmp.ne.s32.totalorder %v6830_v35, 0 }
 0x1fe   : > { %12224 = vst [vmem:[#allocation161_spill] sm:$0xff] %v7616_v16  ;;  %5339 = vmatmul.msk.f32.gmra.mxu1 %vm655_vm0, %v7059_v32  ;;  %v7629_v39 = vpop.permute.xlu2 %2307  ;;  %v7640_v16 = vld [vmem:[%s11505_s6 + $0xf8] sm:$0xff]  ;;  %v7643_v52 = vpop.f32.mrf.mxu0  ;;  %v2728_v55 = vsel %vm2696_vm14, 1, %v12072_v58  ;;  %vm1847_vm14 = vmand %vm12237_vm9, %vm1815_vm3  ;;  %vm12246_vm9 = vcmp.ne.s32.totalorder %v6882_v12, 0 }
 0x1ff   : > { %12225 = vst [vmem:[#allocation162_spill] sm:$0xff] %v7621_v7  ;;  %v7631_v21 = vpop.permute.xlu0 %3944  ;;  %5401 = vmatmul.msk.f32.gmra.mxu3 %vm655_vm0, %v6870_v56  ;;  %vm11793_vm12 = vcmp.lt.f32.partialorder %v7640_v16, 15.0  ;;  %vm2710_vm7 = vmand %vm11799_vm5, %vm12240_vm13 }
 0x200   : > { %12226 = vst [vmem:[#allocation163_spill] sm:$0xff] %v7631_v21  ;;  %v1584_v21 = vpop.f32.mrf.mxu2  ;;  %v7652_v56 = vsel %vm11793_vm12, 1, %v12072_v58 }
 0x201   : > { %12227 = vst [vmem:[#allocation164_spill] sm:$0xff] %v7635_v6  ;;  %v1640_v36 = vrot.slane %v1584_v21, 7  ;;  %5441 = vmatmul.msk.f32.gmra.mxu0 %vm655_vm0, %v6922_v37  ;;  %4539 = vperm.xlu0 %5613, %v7652_v56   ;;  %v7675_v21 = vld [vmem:[%s11505_s6 + $0x70] sm:$0xff] }
 0x202   : > { %12228 = vst [vmem:[#allocation165_spill] sm:$0xff] %v7640_v16  ;;  %v1602_v6 = vpop.f32.mrf.mxu3  ;;  %vm11917_vm11 = vcmp.lt.f32.partialorder %v7675_v21, 15.0 }
 0x203   : > { %12229 = vst [vmem:[#allocation166_spill] sm:$0xff] %v7643_v52  ;;  %v1646_v49 = vrot.slane %v1602_v6, 7  ;;  %v7658_v52 = vpop.f32.mrf.mxu1  ;;  %v7666_v7 = vsel %vm11997_vm10, %v1639_v17, %v1640_v36  ;;  %v2739_v6 = vsel %vm2707_vm1, 1, %v12072_v58  ;;  %vm2699_vm1 = vmand %vm11917_vm11, %vm12239_vm2  ;;  %vm12245_vm2 = vcmp.ge.f32.partialorder %v6080_v57, 1.0 }
 0x204   : > { %12232 = vst [vmem:[#allocation167_spill] sm:$0xff] %v7666_v7  ;;  %5371 = vmatmul.msk.f32.gmra.mxu2 %vm655_vm0, %v7017_v50  ;;  %v2731_v53 = vsel %vm2699_vm1, 1, %v12072_v58  ;;  %vm1850_vm13 = vmand %vm12245_vm2, %vm1818_vm15  ;;  %vm1821_vm15 = vcmp.ne.s32.totalorder %v6735_v43, 0 }
 0x205   : > { %2783 = vperm.xlu2 %5615, %v2728_v55   ;;  %v7670_v10 = vsel %vm11997_vm10, %v1645_v38, %v1646_v49  ;;  %12234 = vst [vmem:[#allocation169_spill] sm:$0xff] %v7675_v21  ;;  %2816 = vperm.xlu1 %5616, %v2739_v6   ;;  %v7689_v38 = vpop.permute.xlu1 %2322  ;;  %v1879_v6 = vsel %vm1847_vm14, 1, %v12072_v58  ;;  %vm12247_vm14 = vcmp.ne.s32.totalorder %v6874_v25, 0  ;;  %v1882_v12 = vsel %vm1850_vm13, 1, %v12072_v58 }
 0x206   : > { %12233 = vst [vmem:[#allocation168_spill] sm:$0xff] %v7670_v10  ;;  %5340 = vmatmul.msk.f32.gmra.mxu1 %vm655_vm0, %v7092_v34  ;;  %v7683_v17 = vpop.permute.xlu2 %2316  ;;  %v7695_v51 = vpop.f32.mrf.mxu0  ;;  %vm2713_vm1 = vmand %vm11794_vm6, %vm12247_vm14  ;;  %vm12252_vm13 = vcmp.ge.f32.partialorder %v6144_v28, 1.0 }
 0x207   : > { %v7685_v55 = vpop.permute.xlu0 %3950  ;;  %5402 = vmatmul.msk.f32.gmra.mxu3 %vm655_vm0, %v6920_v15  ;;  %12236 = vst [vmem:[#allocation171_spill] sm:$0xff] %v7689_v38  ;;  %vm7807_vm14 = vmand %vm11793_vm12, %vm1846_vm8  ;;  %vm11811_vm8 = vcmp.lt.f32.partialorder %v7835_v42, 15.0  ;;  %vm12273_vm12 = vcmp.ne.s32.totalorder %v7027_v31, 0 }
 0x208   : > { %12235 = vst [vmem:[#allocation170_spill] sm:$0xff] %v7685_v55  ;;  %v1587_v10 = vpop.f32.mrf.mxu2 }
 0x209   : > { %12238 = vst [vmem:[#allocation172_spill] sm:$0xff] %v7695_v51  ;;  %v1641_v55 = vrot.slane %v1587_v10, 7  ;;  %5442 = vmatmul.msk.f32.gmra.mxu0 %vm655_vm0, %v6975_v63  ;;  %5619 = vset.pattern.permute.xlu0 %v12072_v58 }
 0x20a   : > { %v1605_v7 = vpop.f32.mrf.mxu3  ;;  %1912 = vperm.xlu0 %5619, %v1879_v6  }
 0x20b   : > { %v1647_v15 = vrot.slane %v1605_v7, 7  ;;  %v7705_v23 = vpop.f32.mrf.mxu1  ;;  %v7714_v10 = vsel %vm11997_vm10, %v1640_v36, %v1641_v55  ;;  %v7723_v7 = vld [vmem:[%s11505_s6 + $0x88] sm:$0xff]  ;;  %v2742_v36 = vsel %vm2710_vm7, 1, %v12072_v58 }
 0x20c   : > { %12241 = vst [vmem:[#allocation173_spill] sm:$0xff] %v7705_v23  ;;  %vm11826_vm3 = vcmp.lt.f32.partialorder %v7723_v7, 15.0  ;;  %5372 = vmatmul.msk.f32.gmra.mxu2 %vm655_vm0, %v7059_v32 }
 0x20d   : > { %2792 = vperm.xlu2 %5615, %v2731_v53   ;;  %v7718_v35 = vsel %vm11997_vm10, %v1646_v49, %v1647_v15  ;;  %12242 = vst [vmem:[#allocation174_spill] sm:$0xff] %v7723_v7  ;;  %2825 = vperm.xlu1 %5616, %v2742_v36   ;;  %v7737_v49 = vpop.permute.xlu1 %2331  ;;  %vm2702_vm7 = vmand %vm11826_vm3, %vm12246_vm9 }
 0x20e   : > { %5341 = vmatmul.msk.f32.gmra.mxu1 %vm655_vm0, %v6872_v9  ;;  %v7731_v53 = vpop.permute.xlu2 %2325  ;;  %12244 = vst [vmem:[#allocation176_spill] sm:$0xff] %v7737_v49  ;;  %v7743_v48 = vpop.f32.mrf.mxu0  ;;  %v2734_v36 = vsel %vm2702_vm7, 1, %v12072_v58  ;;  %vm1853_vm9 = vmand %vm12252_vm13, %vm1821_vm15 }
 0x20f   : > { %v7733_v6 = vpop.permute.xlu0 %3956  ;;  %5403 = vmatmul.msk.f32.gmra.mxu3 %vm655_vm0, %v6973_v26 }
 0x210   : > { %12243 = vst [vmem:[#allocation175_spill] sm:$0xff] %v7733_v6  ;;  %v1590_v23 = vpop.f32.mrf.mxu2 }
 0x211   : > { %v1642_v38 = vrot.slane %v1590_v23, 7  ;;  %5443 = vmatmul.msk.f32.gmra.mxu0 %vm655_vm0, %v7019_v19  ;;  %v7771_v23 = vld [vmem:[%s11505_s6 + $0xa0] sm:$0xff] }
 0x212   : > { %v1608_v6 = vpop.f32.mrf.mxu3  ;;  %1921 = vperm.xlu0 %5619, %v1882_v12   ;;  %12249 = vst [vmem:[#allocation178_spill] sm:$0xff] %v7771_v23  ;;  %vm11817_vm2 = vcmp.lt.f32.partialorder %v7771_v23, 15.0 }
 0x213   : > { %v1648_v26 = vrot.slane %v1608_v6, 7  ;;  %v7753_v4 = vpop.f32.mrf.mxu1  ;;  %v7761_v49 = vsel %vm11997_vm10, %v1641_v55, %v1642_v38  ;;  %v2745_v55 = vsel %vm2713_vm1, 1, %v12072_v58  ;;  %vm2705_vm7 = vmand %vm11817_vm2, %vm1835_vm4  ;;  %vm1824_vm4 = vcmp.ne.s32.totalorder %v6770_v40, 0 }
 0x214   : > { %12248 = vst [vmem:[#allocation177_spill] sm:$0xff] %v7753_v4  ;;  %5373 = vmatmul.msk.f32.gmra.mxu2 %vm655_vm0, %v7092_v34  ;;  %v1885_v4 = vsel %vm1853_vm9, 1, %v12072_v58  ;;  %vm12263_vm1 = vcmp.ge.f32.partialorder %v12092_v1, 1.0  ;;  %vm12265_vm9 = vcmp.ne.s32.totalorder %v6983_v2, 0 }
 0x215   : > { %2801 = vperm.xlu2 %5615, %v2734_v36   ;;  %v7766_v25 = vsel %vm11997_vm10, %v1647_v15, %v1648_v26  ;;  %2834 = vperm.xlu1 %5616, %v2745_v55   ;;  %v7785_v15 = vpop.permute.xlu1 %2340  ;;  %v5522_v55 = vld [vmem:[%s11504_s5 + $0x38] sm:$0xff]  ;;  %vm1856_vm13 = vmand %vm12263_vm1, %vm1824_vm4 }
 0x216   : > { %5342 = vmatmul.msk.f32.gmra.mxu1 %vm655_vm0, %v6922_v37  ;;  %v7779_v6 = vpop.permute.xlu2 %2334  ;;  %12251 = vst [vmem:[#allocation180_spill] sm:$0xff] %v7785_v15  ;;  %v7791_v12 = vpop.f32.mrf.mxu0  ;;  %4283 = vmatpush.msra.mxu3 %v5522_v55 }
 0x217   : > { %v7781_v36 = vpop.permute.xlu0 %3962  ;;  %5404 = vmatmul.msk.f32.gmra.mxu3 %vm655_vm0, %v7017_v50  ;;  %12253 = vst [vmem:[#allocation181_spill] sm:$0xff] %v7791_v12  ;;  %v5489_v50 = vld [vmem:[%s11504_s5 + $0x30] sm:$0xff] }
 0x218   : > { %12250 = vst [vmem:[#allocation179_spill] sm:$0xff] %v7781_v36  ;;  %v1593_v30 = vpop.f32.mrf.mxu2  ;;  %3751 = vmatpush.msra.mxu2 %v5489_v50 }
 0x219   : > { %v1643_v36 = vrot.slane %v1593_v30, 7  ;;  %5444 = vmatmul.msk.f32.gmra.mxu0 %vm655_vm0, %v7061_v0  ;;  %v2737_v30 = vsel %vm2705_vm7, 1, %v12072_v58  ;;  %vm2708_vm7 = vmand %vm11811_vm8, %vm12265_vm9  ;;  %vm2381_vm9 = vcmp.eq.s32.totalorder %v7520_v20, 1 }
 0x21a   : > { %v1611_v51 = vpop.f32.mrf.mxu3  ;;  %1930 = vperm.xlu0 %5619, %v1885_v4  }
 0x21b   : > { %v1649_v15 = vrot.slane %v1611_v51, 7  ;;  %v7811_v12 = vpop.f32.mrf.mxu1  ;;  %v7821_v16 = vsel %vm11997_vm10, %v1643_v36, %v12257_v8  ;;  %v7825_v51 = vsel %vm11997_vm10, %v1642_v38, %v1643_v36  ;;  %v2748_v38 = vsel %vm7807_vm14, 1, %v12072_v58 }
 0x21c   : > { %12256 = vst [vmem:[#allocation182_spill] sm:$0xff] %v7811_v12  ;;  %5374 = vmatmul.msk.f32.gmra.mxu2 %vm655_vm0, %v6872_v9  ;;  %vm1827_vm14 = vcmp.ne.s32.totalorder %v6809_v27, 0 }
 0x21d   : > { %12258 = vst [vmem:[#allocation183_spill] sm:$0xff] %v7825_v51  ;;  %2810 = vperm.xlu2 %5615, %v2737_v30   ;;  %v7830_v50 = vsel %vm11997_vm10, %v1648_v26, %v1649_v15  ;;  %2843 = vperm.xlu1 %5616, %v2748_v38   ;;  %v7851_v36 = vpop.permute.xlu1 %2349  ;;  %v11792_v38 = vrot.slane %v7811_v12, 7  ;;  %v12296_v51 = vld [vmem:[#allocation72_spill] sm:$0xff]  ;;  %v12308_v12 = vld [vmem:[#allocation74_spill] sm:$0xff] }
 0x21e   : > { %12259 = vst [vmem:[#allocation184_spill] sm:$0xff] %v7830_v50  ;;  %5343 = vmatmul.msk.f32.gmra.mxu1 %vm655_vm0, %v6975_v63  ;;  %v7845_v4 = vpop.permute.xlu2 %2343  ;;  %v7857_v9 = vpop.f32.mrf.mxu0 }
 0x21f   : > { %v7847_v26 = vpop.permute.xlu0 %3968  ;;  %5405 = vmatmul.msk.f32.gmra.mxu3 %vm655_vm0, %v7059_v32  ;;  %12262 = vst [vmem:[#allocation187_spill] sm:$0xff] %v7851_v36  ;;  %v5555_v32 = vld [vmem:[%s11504_s5 + $0x40] sm:$0xff]  ;;  %v1888_v36 = vsel %vm1856_vm13, 1, %v12072_v58  ;;  %vm12270_vm13 = vcmp.ge.f32.partialorder %v12099_v61, 1.0 }
 0x220   : > { %12261 = vst [vmem:[#allocation186_spill] sm:$0xff] %v7847_v26  ;;  %v7863_v55 = vpop.f32.mrf.mxu2  ;;  %4654 = vmatpush.msra.mxu0 %v5555_v32  ;;  %v7884_v26 = vld [vmem:[%s11505_s6 + $0xd0] sm:$0xff] }
 0x221   : > { %12264 = vst [vmem:[#allocation188_spill] sm:$0xff] %v7857_v9  ;;  %5445 = vmatmul.msk.f32.gmra.mxu0 %vm655_vm0, %v7094_v24  ;;  %v2740_v9 = vsel %vm2708_vm7, 1, %v12072_v58  ;;  %vm11808_vm1 = vcmp.lt.f32.partialorder %v7884_v26, 15.0  ;;  %vm1859_vm7 = vmand %vm12270_vm13, %vm1827_vm14 }
 0x222   : > { %v1614_v59 = vpop.f32.mrf.mxu3  ;;  %1939 = vperm.xlu0 %5619, %v1888_v36   ;;  %12267 = vst [vmem:[#allocation190_spill] sm:$0xff] %v7884_v26  ;;  %vm2711_vm6 = vmand %vm11808_vm1, %vm12273_vm12  ;;  %v1891_v31 = vsel %vm1859_vm7, 1, %v12072_v58  ;;  %vm1830_vm12 = vcmp.ne.s32.totalorder %v6848_v44, 0  ;;  %vm12282_vm7 = vcmp.ne.s32.totalorder %v7069_v18, 0  ;;  %v12286_v18 = vld [vmem:[#allocation70_spill] sm:$0xff]  ;;  %vm2386_vm1 = vcmp.eq.s32.totalorder %v7629_v39, 1 }
 0x223   : > { %v1650_v30 = vrot.slane %v1614_v59, 7  ;;  %v7868_v8 = vpop.f32.mrf.mxu1 }
 0x224   : > { %12266 = vst [vmem:[#allocation189_spill] sm:$0xff] %v7868_v8  ;;  %v11791_v2 = vrot.slane %v7868_v8, 7  ;;  %5375 = vmatmul.msk.f32.gmra.mxu2 %vm655_vm0, %v6922_v37  ;;  %v5456_v37 = vld [vmem:[%s11504_s5 + $0x28] sm:$0xff] }
 0x225   : > { %2819 = vperm.xlu2 %5615, %v2740_v9   ;;  %v7879_v59 = vsel %vm11997_vm10, %v1649_v15, %v1650_v30  ;;  %3063 = vperm.xlu1 %5616, %v12090_v11   ;;  %v7905_v20 = vpop.permute.xlu1 %2358 }
 0x226   : > { %v2278_v36 = vsel %vm11997_vm10, %v11792_v38, %v11791_v2  ;;  %5344 = vmatmul.msk.f32.gmra.mxu1 %vm655_vm0, %v7019_v19  ;;  %v7898_v15 = vpop.permute.xlu2 %2352  ;;  %12269 = vst [vmem:[#allocation192_spill] sm:$0xff] %v7905_v20  ;;  %v7911_v2 = vpop.f32.mrf.mxu0 }
 0x227   : > { %v7900_v9 = vpop.permute.xlu0 %3974  ;;  %5406 = vmatmul.msk.f32.gmra.mxu3 %vm655_vm0, %v7092_v34  ;;  %v2413_v32 = vsel %vm2381_vm9, %v2278_v36, 0.0  ;;  %12271 = vst [vmem:[#allocation193_spill] sm:$0xff] %v7911_v2  ;;  %3412 = vmatpush.msra.mxu1 %v5456_v37  ;;  %v11797_v34 = vrot.slane %v7863_v55, 7  ;;  %vm12280_vm9 = vcmp.ge.f32.partialorder %v12107_v47, 1.0 }
 0x228   : > { %12268 = vst [vmem:[#allocation191_spill] sm:$0xff] %v7900_v9  ;;  %v7917_v38 = vadd.f32 %v7743_v48, %v2413_v32  ;;  %v2496_v11 = vpop.f32.mrf.mxu2  ;;  %v2743_v48 = vsel %vm2711_vm6, 1, %v12072_v58  ;;  %vm1862_vm13 = vmand %vm12280_vm9, %vm1830_vm12  ;;  %vm1833_vm9 = vcmp.ne.s32.totalorder %v12286_v18, 0  ;;  %v12288_v9 = vld [vmem:[#allocation23_spill] sm:$0xff] }
 0x229   : > { %v2590_v20 = vrot.slane %v2496_v11, 7  ;;  %5446 = vmatmul.msk.f32.gmra.mxu0 %vm655_vm0, %v7124_v3  ;;  %v7949_v11 = vld [vmem:[%s11505_s6 + $0xe8] sm:$0xff] }
 0x22a   : > { %12272 = vst [vmem:[#allocation194_spill] sm:$0xff] %v7917_v38  ;;  %v7924_v36 = vpop.f32.mrf.mxu3  ;;  %1948 = vperm.xlu0 %5619, %v1891_v31   ;;  %vm11807_vm6 = vcmp.lt.f32.partialorder %v7949_v11, 15.0 }
 0x22b   : > { %12274 = vst [vmem:[#allocation195_spill] sm:$0xff] %v7924_v36  ;;  %v11798_v2 = vrot.slane %v7924_v36, 7  ;;  %v7927_v8 = vpop.f32.mrf.mxu1  ;;  %v7937_v32 = vsel %vm11997_vm10, %v11797_v34, %v2590_v20  ;;  %v5658_v34 = vld [vmem:[#allocation2 + $0x80] sm:$0xff]  ;;  %vm2714_vm5 = vmand %vm11807_vm6, %vm12282_vm7  ;;  %vm1836_vm7 = vcmp.ne.s32.totalorder %v12296_v51, 0 }
 0x22c   : > { %12275 = vst [vmem:[#allocation196_spill] sm:$0xff] %v7927_v8  ;;  %5376 = vmatmul.msk.f32.gmra.mxu2 %vm655_vm0, %v6975_v63 }
 0x22d   : > { %12276 = vst [vmem:[#allocation197_spill] sm:$0xff] %v7937_v32  ;;  %2828 = vperm.xlu2 %5615, %v2743_v48   ;;  %v7944_v37 = vsel %vm11997_vm10, %v1650_v30, %v11798_v2  ;;  %3072 = vperm.xlu1 %5616, %v12122_v14   ;;  %v7962_v30 = vpop.permute.xlu1 %2367  ;;  %v2746_v14 = vsel %vm2714_vm5, 1, %v12072_v58 }
 0x22e   : > { %12277 = vst [vmem:[#allocation198_spill] sm:$0xff] %v7949_v11  ;;  %5345 = vmatmul.msk.f32.gmra.mxu1 %vm655_vm0, %v7061_v0  ;;  %v7956_v48 = vpop.permute.xlu2 %2361  ;;  %v7968_v2 = vpop.f32.mrf.mxu0 }
 0x22f   : > { %v7958_v31 = vpop.permute.xlu0 %4452  ;;  %5407 = vmatmul.msk.f32.gmra.mxu3 %vm655_vm0, %v5658_v34  ;;  %12279 = vst [vmem:[#allocation200_spill] sm:$0xff] %v7962_v30  ;;  %v1894_v30 = vsel %vm1862_vm13, 1, %v12072_v58 }
 0x230   : > { %12278 = vst [vmem:[#allocation199_spill] sm:$0xff] %v7958_v31  ;;  %v2499_v63 = vpop.f32.mrf.mxu2 }
 0x231   : > { %12281 = vst [vmem:[#allocation201_spill] sm:$0xff] %v7968_v2  ;;  %v2591_v38 = vrot.slane %v2499_v63, 7  ;;  %5447 = vmatmul.msk.f32.gmra.mxu0 %vm655_vm0, %v7147_v62 }
 0x232   : > { %v7974_v8 = vpop.f32.mrf.mxu3  ;;  %1957 = vperm.xlu0 %5619, %v1894_v30  }
 0x233   : > { %12283 = vst [vmem:[#allocation202_spill] sm:$0xff] %v7974_v8  ;;  %v7976_v34 = vpop.f32.mrf.mxu1  ;;  %v7984_v36 = vsel %vm11997_vm10, %v2590_v20, %v2591_v38  ;;  %v5659_v8 = vld [vmem:[#allocation2 + $0x88] sm:$0xff] }
 0x234   : > { %12284 = vst [vmem:[#allocation203_spill] sm:$0xff] %v7976_v34  ;;  %5377 = vmatmul.msk.f32.gmra.mxu2 %vm655_vm0, %v7019_v19 }
 0x235   : > { %12285 = vst [vmem:[#allocation204_spill] sm:$0xff] %v7984_v36  ;;  %2837 = vperm.xlu2 %5615, %v2746_v14   ;;  %3081 = vperm.xlu1 %5616, %v12288_v9   ;;  %v7997_v20 = vpop.permute.xlu1 %2376  ;;  %v12290_v14 = vld [vmem:[#allocation39_spill] sm:$0xff] }
 0x236   : > { %5346 = vmatmul.msk.f32.gmra.mxu1 %vm655_vm0, %v7094_v24  ;;  %v7991_v63 = vpop.permute.xlu2 %2370  ;;  %12289 = vst [vmem:[#allocation23_spill] sm:$0xff] %v7997_v20  ;;  %v7999_v30 = vpop.f32.mrf.mxu0  ;;  %vm12291_vm5 = vcmp.ge.f32.partialorder %v12290_v14, 1.0  ;;  %v12295_v20 = vld [vmem:[#allocation7_spill] sm:$0xff] }
 0x237   : > { %v7993_v34 = vpop.permute.xlu0 %4467  ;;  %5408 = vmatmul.msk.f32.gmra.mxu3 %vm655_vm0, %v5659_v8  ;;  %vm1865_vm13 = vmand %vm12291_vm5, %vm1833_vm9 }
 0x238   : > { %12287 = vst [vmem:[#allocation70_spill] sm:$0xff] %v7993_v34  ;;  %v2502_v36 = vpop.f32.mrf.mxu2  ;;  %v8009_v34 = vld [vmem:[#allocation2 + $0xc0] sm:$0xff]  ;;  %v1897_v8 = vsel %vm1865_vm13, 1, %v12072_v58 }
 0x239   : > { %v2592_v19 = vrot.slane %v2502_v36, 7  ;;  %5448 = vmatmul.msk.f32.gmra.mxu0 %vm655_vm0, %v8009_v34 }
 0x23a   : > { %v8005_v50 = vpop.f32.mrf.mxu3  ;;  %1966 = vperm.xlu0 %5619, %v1897_v8  }
 0x23b   : > { %12292 = vst [vmem:[#allocation205_spill] sm:$0xff] %v8005_v50  ;;  %v8007_v2 = vpop.f32.mrf.mxu1  ;;  %v8016_v9 = vsel %vm11997_vm10, %v2591_v38, %v2592_v19  ;;  %v5661_v50 = vld [vmem:[#allocation2 + $0x90] sm:$0xff] }
 0x23c   : > { %12293 = vst [vmem:[#allocation206_spill] sm:$0xff] %v8007_v2  ;;  %5378 = vmatmul.msk.f32.gmra.mxu2 %vm655_vm0, %v7061_v0 }
 0x23d   : > { %12294 = vst [vmem:[#allocation207_spill] sm:$0xff] %v8016_v9  ;;  %3057 = vperm.xlu2 %5615, %v12295_v20   ;;  %3090 = vperm.xlu1 %5616, %v12136_v33   ;;  %v12300_v20 = vld [vmem:[#allocation45_spill] sm:$0xff] }
 0x23e   : > { %5347 = vmatmul.msk.f32.gmra.mxu1 %vm655_vm0, %v7124_v3  ;;  %v8030_v9 = vpop.f32.mrf.mxu0  ;;  %vm12301_vm5 = vcmp.ge.f32.partialorder %v12300_v20, 1.0 }
 0x23f   : > { %v8024_v36 = vpop.permute.xlu0 %4476  ;;  %5409 = vmatmul.msk.f32.gmra.mxu3 %vm655_vm0, %v5661_v50  ;;  %v8028_v38 = vpop.permute.xlu2 %2750  ;;  %12299 = vst [vmem:[#allocation208_spill] sm:$0xff] %v8030_v9  ;;  %vm1868_vm13 = vmand %vm12301_vm5, %vm1836_vm7  ;;  %v12305_v50 = vld [vmem:[#allocation11_spill] sm:$0xff]  ;;  %v12307_v9 = vld [vmem:[#allocation14_spill] sm:$0xff]  ;;  %vm1839_vm5 = vcmp.ne.s32.totalorder %v12308_v12, 0 }
 0x240   : > { %12297 = vst [vmem:[#allocation7_spill] sm:$0xff] %v8024_v36  ;;  %v8036_v8 = vpop.permute.xlu1 %2756  ;;  %v2505_v2 = vpop.f32.mrf.mxu2  ;;  %v1900_v33 = vsel %vm1868_vm13, 1, %v12072_v58 }
 0x241   : > { %12298 = vst [vmem:[#allocation72_spill] sm:$0xff] %v8028_v38  ;;  %v2593_v0 = vrot.slane %v2505_v2, 7  ;;  %5449 = vmatmul.msk.f32.gmra.mxu0 %vm655_vm0, %v12305_v50  ;;  %v5662_v50 = vld [vmem:[#allocation2 + $0x98] sm:$0xff] }
 0x242   : > { %12302 = vst [vmem:[#allocation209_spill] sm:$0xff] %v8036_v8  ;;  %v8038_v31 = vpop.f32.mrf.mxu3  ;;  %1975 = vperm.xlu0 %5619, %v1900_v33  }
 0x243   : > { %12303 = vst [vmem:[#allocation210_spill] sm:$0xff] %v8038_v31  ;;  %v8040_v36 = vpop.f32.mrf.mxu1  ;;  %v8047_v38 = vsel %vm11997_vm10, %v2592_v19, %v2593_v0 }
 0x244   : > { %12304 = vst [vmem:[#allocation211_spill] sm:$0xff] %v8040_v36  ;;  %5379 = vmatmul.msk.f32.gmra.mxu2 %vm655_vm0, %v7094_v24 }
 0x245   : > { %12306 = vst [vmem:[#allocation11_spill] sm:$0xff] %v8047_v38  ;;  %3066 = vperm.xlu2 %5615, %v12307_v9   ;;  %3099 = vperm.xlu1 %5616, %v12143_v13   ;;  %v12312_v9 = vld [vmem:[#allocation51_spill] sm:$0xff]  ;;  %v11810_v13 = vrot.slane %v8040_v36, 7  ;;  %v8125_v36 = vld [vmem:[#allocation2 + $0xc8] sm:$0xff] }
 0x246   : > { %5348 = vmatmul.msk.f32.gmra.mxu1 %vm655_vm0, %v7147_v62  ;;  %v8061_v31 = vpop.f32.mrf.mxu0  ;;  %vm12313_vm13 = vcmp.ge.f32.partialorder %v12312_v9, 1.0 }
 0x247   : > { %v8055_v2 = vpop.permute.xlu0 %4485  ;;  %5410 = vmatmul.msk.f32.gmra.mxu3 %vm655_vm0, %v5662_v50  ;;  %v8059_v19 = vpop.permute.xlu2 %2759  ;;  %12311 = vst [vmem:[#allocation212_spill] sm:$0xff] %v8061_v31  ;;  %vm1871_vm6 = vmand %vm12313_vm13, %vm1839_vm5  ;;  %v12317_v50 = vld [vmem:[#allocation78_spill] sm:$0xff] }
 0x248   : > { %12309 = vst [vmem:[#allocation14_spill] sm:$0xff] %v8055_v2  ;;  %v8067_v33 = vpop.permute.xlu1 %2762  ;;  %v2508_v38 = vpop.f32.mrf.mxu2  ;;  %v1903_v31 = vsel %vm1871_vm6, 1, %v12072_v58 }
 0x249   : > { %12310 = vst [vmem:[#allocation74_spill] sm:$0xff] %v8059_v19  ;;  %v2594_v24 = vrot.slane %v2508_v38, 7  ;;  %5450 = vmatmul.msk.f32.gmra.mxu0 %vm655_vm0, %v12317_v50  ;;  %v12320_v38 = vld [vmem:[#allocation76_spill] sm:$0xff] }
 0x24a   : > { %12314 = vst [vmem:[#allocation213_spill] sm:$0xff] %v8067_v33  ;;  %v8069_v8 = vpop.f32.mrf.mxu3  ;;  %v12319_v33 = vld [vmem:[#allocation20_spill] sm:$0xff]  ;;  %1984 = vperm.xlu0 %5619, %v1903_v31   ;;  %vm1842_vm13 = vcmp.ne.s32.totalorder %v12320_v38, 0  ;;  %v5663_v31 = vld [vmem:[#allocation2 + $0xa0] sm:$0xff] }
 0x24b   : > { %12315 = vst [vmem:[#allocation214_spill] sm:$0xff] %v8069_v8  ;;  %v8071_v2 = vpop.f32.mrf.mxu1  ;;  %v8080_v32 = vsel %vm11997_vm10, %v2593_v0, %v2594_v24 }
 0x24c   : > { %12316 = vst [vmem:[#allocation215_spill] sm:$0xff] %v8071_v2  ;;  %v11809_v19 = vrot.slane %v8071_v2, 7  ;;  %5380 = vmatmul.msk.f32.gmra.mxu2 %vm655_vm0, %v7124_v3 }
 0x24d   : > { %12318 = vst [vmem:[#allocation78_spill] sm:$0xff] %v8080_v32  ;;  %3075 = vperm.xlu2 %5615, %v12319_v33   ;;  %v12322_v33 = vld [vmem:[#allocation41_spill] sm:$0xff] }
 0x24e   : > { %v2273_v50 = vsel %vm11997_vm10, %v11810_v13, %v11809_v19  ;;  %5349 = vmatmul.msk.f32.gmra.mxu1 %vm655_vm0, %v8009_v34  ;;  %3108 = vperm.xlu1 %5616, %v12322_v33   ;;  %v8101_v8 = vpop.f32.mrf.mxu0  ;;  %v12325_v13 = vld [vmem:[#allocation57_spill] sm:$0xff] }
 0x24f   : > { %v8095_v0 = vpop.permute.xlu0 %4494  ;;  %5411 = vmatmul.msk.f32.gmra.mxu3 %vm655_vm0, %v5663_v31  ;;  %v8099_v39 = vpop.permute.xlu2 %2765  ;;  %v2418_v32 = vsel %vm2386_vm1, %v2273_v50, 0.0  ;;  %vm12326_vm6 = vcmp.ge.f32.partialorder %v12325_v13, 1.0 }
 0x250   : > { %12321 = vst [vmem:[#allocation20_spill] sm:$0xff] %v8095_v0  ;;  %v8104_v19 = vadd.f32 %v7999_v30, %v2418_v32  ;;  %vm1874_vm8 = vmand %vm12326_vm6, %vm1842_vm13  ;;  %v8110_v3 = vpop.permute.xlu1 %2771  ;;  %v2511_v2 = vpop.f32.mrf.mxu2  ;;  %v12332_v30 = vld [vmem:[#allocation26_spill] sm:$0xff] }
 0x251   : > { %12323 = vst [vmem:[#allocation76_spill] sm:$0xff] %v8099_v39  ;;  %v2595_v0 = vrot.slane %v2511_v2, 7  ;;  %v12330_v39 = vld [vmem:[#allocation81_spill] sm:$0xff]  ;;  %v1906_v50 = vsel %vm1874_vm8, 1, %v12072_v58 }
 0x252   : > { %12324 = vst [vmem:[#allocation41_spill] sm:$0xff] %v8104_v19  ;;  %v8112_v31 = vpop.f32.mrf.mxu3  ;;  %5451 = vmatmul.msk.f32.gmra.mxu0 %vm655_vm0, %v12330_v39  ;;  %1993 = vperm.xlu0 %5619, %v1906_v50   ;;  %v12333_v19 = vld [vmem:[#allocation80_spill] sm:$0xff] }
 0x253   : > { %12327 = vst [vmem:[#allocation216_spill] sm:$0xff] %v8110_v3  ;;  %v8114_v33 = vpop.f32.mrf.mxu1  ;;  %v8121_v32 = vsel %vm11997_vm10, %v2594_v24, %v2595_v0  ;;  %vm1845_vm1 = vcmp.ne.s32.totalorder %v12333_v19, 0  ;;  %v5665_v39 = vld [vmem:[#allocation2 + $0xa8] sm:$0xff] }
 0x254   : > { %12328 = vst [vmem:[#allocation217_spill] sm:$0xff] %v8112_v31  ;;  %5381 = vmatmul.msk.f32.gmra.mxu2 %vm655_vm0, %v7147_v62 }
 0x255   : > { %12329 = vst [vmem:[#allocation218_spill] sm:$0xff] %v8114_v33  ;;  %3084 = vperm.xlu2 %5615, %v12332_v30   ;;  %v12337_v30 = vld [vmem:[#allocation63_spill] sm:$0xff] }
 0x256   : > { %12331 = vst [vmem:[#allocation81_spill] sm:$0xff] %v8121_v32  ;;  %5350 = vmatmul.msk.f32.gmra.mxu1 %vm655_vm0, %v8125_v36  ;;  %3117 = vperm.xlu1 %5616, %v12159_v29   ;;  %v8137_v50 = vpop.f32.mrf.mxu0  ;;  %vm12338_vm8 = vcmp.ge.f32.partialorder %v12337_v30, 1.0 }
 0x257   : > { %v8131_v2 = vpop.permute.xlu0 %4503  ;;  %5412 = vmatmul.msk.f32.gmra.mxu3 %vm655_vm0, %v5665_v39  ;;  %v8135_v24 = vpop.permute.xlu2 %2774  ;;  %12336 = vst [vmem:[#allocation219_spill] sm:$0xff] %v8137_v50  ;;  %vm1877_vm6 = vmand %vm12338_vm8, %vm1845_vm1  ;;  %v8149_v39 = vld [vmem:[#allocation2 + $0xe0] sm:$0xff] }
 0x258   : > { %12334 = vst [vmem:[#allocation26_spill] sm:$0xff] %v8131_v2  ;;  %v8143_v32 = vpop.permute.xlu1 %2780  ;;  %v2514_v31 = vpop.f32.mrf.mxu2  ;;  %v1909_v29 = vsel %vm1877_vm6, 1, %v12072_v58 }
 0x259   : > { %12335 = vst [vmem:[#allocation80_spill] sm:$0xff] %v8135_v24  ;;  %v2596_v62 = vrot.slane %v2514_v31, 7  ;;  %v12343_v24 = vld [vmem:[#allocation32_spill] sm:$0xff] }
 0x25a   : > { %12339 = vst [vmem:[#allocation220_spill] sm:$0xff] %v8143_v32  ;;  %v8145_v33 = vpop.f32.mrf.mxu3  ;;  %5452 = vmatmul.msk.f32.gmra.mxu0 %vm655_vm0, %v8149_v39  ;;  %2002 = vperm.xlu0 %5619, %v1909_v29   ;;  %v8162_v31 = vld [vmem:[%s11505_s6 + $0x8] sm:$0xff]  ;;  %v12348_v32 = vld [vmem:[#allocation67_spill] sm:$0xff] }
 0x25b   : > { %12340 = vst [vmem:[#allocation221_spill] sm:$0xff] %v8145_v33  ;;  %v8147_v2 = vpop.f32.mrf.mxu1  ;;  %v8156_v50 = vsel %vm11997_vm10, %v2595_v0, %v2596_v62  ;;  %vm11919_vm8 = vcmp.lt.f32.partialorder %v8162_v31, 15.0  ;;  %v8165_v33 = vld [vmem:[#allocation2 + $0xd0] sm:$0xff]  ;;  %vm12349_vm6 = vcmp.ne.s32.totalorder %v12348_v32, 0 }
 0x25c   : > { %12341 = vst [vmem:[#allocation222_spill] sm:$0xff] %v8147_v2  ;;  %5382 = vmatmul.msk.f32.gmra.mxu2 %vm655_vm0, %v8009_v34  ;;  %vm2686_vm2 = vmand %vm11919_vm8, %vm12349_vm6  ;;  %vm2389_vm6 = vcmp.eq.s32.totalorder %v7683_v17, 1 }
 0x25d   : > { %12342 = vst [vmem:[#allocation223_spill] sm:$0xff] %v8156_v50  ;;  %3093 = vperm.xlu2 %5615, %v12343_v24   ;;  %v5669_v50 = vld [vmem:[#allocation2 + $0xb0] sm:$0xff] }
 0x25e   : > { %12344 = vst [vmem:[#allocation32_spill] sm:$0xff] %v8162_v31  ;;  %5351 = vmatmul.msk.f32.gmra.mxu1 %vm655_vm0, %v8165_v33  ;;  %3126 = vperm.xlu1 %5616, %v12168_v46   ;;  %v8177_v29 = vpop.f32.mrf.mxu0  ;;  %v11827_v46 = vrot.slane %v8147_v2, 7 }
 0x25f   : > { %v8171_v0 = vpop.permute.xlu0 %4512  ;;  %5413 = vmatmul.msk.f32.gmra.mxu3 %vm655_vm0, %v5669_v50  ;;  %v8175_v24 = vpop.permute.xlu2 %2783  ;;  %12347 = vst [vmem:[#allocation226_spill] sm:$0xff] %v8177_v29  ;;  %v8189_v50 = vld [vmem:[#allocation2 + $0xe8] sm:$0xff]  ;;  %v2718_v29 = vsel %vm2686_vm2, 1, %v12072_v58  ;;  %vm12357_vm2 = vcmp.lt.f32.partialorder %v6144_v28, 15.0 }
 0x260   : > { %12345 = vst [vmem:[#allocation224_spill] sm:$0xff] %v8171_v0  ;;  %v8183_v3 = vpop.permute.xlu1 %2789  ;;  %v2517_v57 = vpop.f32.mrf.mxu2  ;;  %vm2691_vm3 = vmand %vm12357_vm2, %vm1821_vm15  ;;  %vm12385_vm2 = vcmp.lt.f32.partialorder %v12107_v47, 15.0  ;;  %v8582_v47 = vld [vmem:[#allocation2 + $0x38] sm:$0xff] }
 0x261   : > { %12346 = vst [vmem:[#allocation225_spill] sm:$0xff] %v8175_v24  ;;  %v2597_v22 = vrot.slane %v2517_v57, 7  ;;  %v12353_v57 = vld [vmem:[#allocation38_spill] sm:$0xff] }
 0x262   : > { %12350 = vst [vmem:[#allocation67_spill] sm:$0xff] %v8183_v3  ;;  %v8185_v11 = vpop.f32.mrf.mxu3  ;;  %5453 = vmatmul.msk.f32.gmra.mxu0 %vm655_vm0, %v8189_v50  ;;  %2753 = vperm.xlu0 %5619, %v2718_v29   ;;  %v8208_v3 = vld [vmem:[#allocation2 + $0xd8] sm:$0xff] }
 0x263   : > { %12351 = vst [vmem:[#allocation227_spill] sm:$0xff] %v8185_v11  ;;  %v8187_v0 = vpop.f32.mrf.mxu1  ;;  %v8198_v24 = vsel %vm11997_vm10, %v2596_v62, %v2597_v22  ;;  %v5672_v29 = vld [vmem:[#allocation2 + $0xb8] sm:$0xff] }
 0x264   : > { %12352 = vst [vmem:[#allocation228_spill] sm:$0xff] %v8187_v0  ;;  %v11825_v32 = vrot.slane %v8187_v0, 7  ;;  %5383 = vmatmul.msk.f32.gmra.mxu2 %vm655_vm0, %v8125_v36 }
 0x265   : > { %3102 = vperm.xlu2 %5615, %v12353_v57  }
 0x266   : > { %v2270_v11 = vsel %vm11997_vm10, %v11827_v46, %v11825_v32  ;;  %5352 = vmatmul.msk.f32.gmra.mxu1 %vm655_vm0, %v8208_v3  ;;  %3135 = vperm.xlu1 %5616, %v12178_v54   ;;  %v8220_v0 = vpop.f32.mrf.mxu0 }
 0x267   : > { %v8214_v62 = vpop.permute.xlu0 %4521  ;;  %5414 = vmatmul.msk.f32.gmra.mxu3 %vm655_vm0, %v5672_v29  ;;  %v8218_v17 = vpop.permute.xlu2 %2792  ;;  %v2421_v57 = vsel %vm2389_vm6, %v2270_v11, 0.0  ;;  %v2723_v11 = vsel %vm2691_vm3, 1, %v12072_v58  ;;  %vm12367_vm3 = vcmp.lt.f32.partialorder %v12092_v1, 15.0 }
 0x268   : > { %12354 = vst [vmem:[#allocation38_spill] sm:$0xff] %v8214_v62  ;;  %v8223_v32 = vadd.f32 %v8101_v8, %v2421_v57  ;;  %v8229_v46 = vpop.permute.xlu1 %2798  ;;  %v2520_v62 = vpop.f32.mrf.mxu2  ;;  %v12362_v8 = vld [vmem:[#allocation44_spill] sm:$0xff]  ;;  %v12364_v57 = vld [vmem:[#allocation65_spill] sm:$0xff]  ;;  %vm2694_vm15 = vmand %vm12367_vm3, %vm1824_vm4  ;;  %vm12377_vm4 = vcmp.lt.f32.partialorder %v12099_v61, 15.0 }
 0x269   : > { %12355 = vst [vmem:[#allocation229_spill] sm:$0xff] %v8218_v17  ;;  %v2598_v2 = vrot.slane %v2520_v62, 7  ;;  %v8235_v17 = vld [vmem:[#allocation2 + $0xf0] sm:$0xff]  ;;  %vm2697_vm6 = vmand %vm12377_vm4, %vm1827_vm14  ;;  %vm2392_vm14 = vcmp.eq.s32.totalorder %v7731_v53, 1 }
 0x26a   : > { %12356 = vst [vmem:[#allocation230_spill] sm:$0xff] %v8223_v32  ;;  %v8231_v29 = vpop.f32.mrf.mxu3  ;;  %5454 = vmatmul.msk.f32.gmra.mxu0 %vm655_vm0, %v8235_v17  ;;  %2768 = vperm.xlu0 %5619, %v2723_v11   ;;  %vm2700_vm3 = vmand %vm12385_vm2, %vm1830_vm12  ;;  %vm12395_vm12 = vcmp.lt.f32.partialorder %v12290_v14, 15.0 }
 0x26b   : > { %12358 = vst [vmem:[#allocation231_spill] sm:$0xff] %v8229_v46  ;;  %v8233_v54 = vpop.f32.mrf.mxu1  ;;  %v8242_v43 = vsel %vm11997_vm10, %v2597_v22, %v2598_v2 }
 0x26c   : > { %12359 = vst [vmem:[#allocation232_spill] sm:$0xff] %v8231_v29  ;;  %5384 = vmatmul.msk.f32.gmra.mxu2 %vm655_vm0, %v8165_v33 }
 0x26d   : > { %12360 = vst [vmem:[#allocation233_spill] sm:$0xff] %v8233_v54  ;;  %3111 = vperm.xlu2 %5615, %v12362_v8  }
 0x26e   : > { %12361 = vst [vmem:[#allocation234_spill] sm:$0xff] %v8242_v43  ;;  %5353 = vmatmul.msk.f32.gmra.mxu1 %vm655_vm0, %v8149_v39  ;;  %3144 = vperm.xlu1 %5616, %v12364_v57   ;;  %v8256_v22 = vpop.f32.mrf.mxu0  ;;  %v2726_v57 = vsel %vm2694_vm15, 1, %v12072_v58  ;;  %vm2703_vm15 = vmand %vm12395_vm12, %vm1833_vm9  ;;  %vm12405_vm9 = vcmp.lt.f32.partialorder %v12300_v20, 15.0  ;;  %v12413_v20 = vld [vmem:[#allocation120_spill] sm:$0xff]  ;;  %v8703_v43 = vld [vmem:[#allocation2 + $0x50] sm:$0xff] }
 0x26f   : > { %v8249_v62 = vpop.permute.xlu0 %4530  ;;  %5415 = vmatmul.msk.f32.gmra.mxu3 %vm655_vm0, %v8009_v34  ;;  %v8254_v32 = vpop.permute.xlu2 %2801  ;;  %12366 = vst [vmem:[#allocation235_spill] sm:$0xff] %v8256_v22  ;;  %v8268_v34 = vld [vmem:[#allocation2 + $0xf8] sm:$0xff]  ;;  %vm2706_vm4 = vmand %vm12405_vm9, %vm1836_vm7  ;;  %vm2395_vm7 = vcmp.eq.s32.totalorder %v7779_v6, 1  ;;  %vm12414_vm2 = vcmp.lt.f32.partialorder %v12413_v20, 15.0 }
 0x270   : > { %12363 = vst [vmem:[#allocation44_spill] sm:$0xff] %v8249_v62  ;;  %v8262_v11 = vpop.permute.xlu1 %2807  ;;  %v2523_v8 = vpop.f32.mrf.mxu2  ;;  %v12372_v22 = vld [vmem:[#allocation50_spill] sm:$0xff] }
 0x271   : > { %12365 = vst [vmem:[#allocation65_spill] sm:$0xff] %v8254_v32  ;;  %v2599_v29 = vrot.slane %v2523_v8, 7 }
 0x272   : > { %12368 = vst [vmem:[#allocation236_spill] sm:$0xff] %v8262_v11  ;;  %v8264_v54 = vpop.f32.mrf.mxu3  ;;  %5455 = vmatmul.msk.f32.gmra.mxu0 %vm655_vm0, %v8268_v34  ;;  %2777 = vperm.xlu0 %5619, %v2726_v57  }
 0x273   : > { %12369 = vst [vmem:[#allocation237_spill] sm:$0xff] %v8264_v54  ;;  %v8266_v62 = vpop.f32.mrf.mxu1  ;;  %v8275_v40 = vsel %vm11997_vm10, %v2598_v2, %v2599_v29  ;;  %v12374_v54 = vld [vmem:[#allocation71_spill] sm:$0xff] }
 0x274   : > { %12370 = vst [vmem:[#allocation238_spill] sm:$0xff] %v8266_v62  ;;  %5385 = vmatmul.msk.f32.gmra.mxu2 %vm655_vm0, %v8208_v3 }
 0x275   : > { %12371 = vst [vmem:[#allocation239_spill] sm:$0xff] %v8275_v40  ;;  %3120 = vperm.xlu2 %5615, %v12372_v22   ;;  %v8346_v40 = vld [vmem:[#allocation2 + $0x8] sm:$0xff] }
 0x276   : > { %5354 = vmatmul.msk.f32.gmra.mxu1 %vm655_vm0, %v8189_v50  ;;  %3543 = vperm.xlu1 %5616, %v12374_v54   ;;  %v8289_v2 = vpop.f32.mrf.mxu0 }
 0x277   : > { %v8282_v8 = vpop.permute.xlu0 %4539  ;;  %5416 = vmatmul.msk.f32.gmra.mxu3 %vm655_vm0, %v8125_v36  ;;  %v8287_v11 = vpop.permute.xlu2 %2810  ;;  %12376 = vst [vmem:[#allocation241_spill] sm:$0xff] %v8289_v2  ;;  %v8301_v36 = vld [vmem:[#allocation2] sm:$0xff]  ;;  %v11835_v2 = vrot.slane %v8266_v62, 7 }
 0x278   : > { %12373 = vst [vmem:[#allocation50_spill] sm:$0xff] %v8282_v8  ;;  %v8295_v22 = vpop.permute.xlu1 %2816  ;;  %v2526_v57 = vpop.f32.mrf.mxu2 }
 0x279   : > { %12375 = vst [vmem:[#allocation240_spill] sm:$0xff] %v8287_v11  ;;  %v2600_v32 = vrot.slane %v2526_v57, 7  ;;  %v2729_v11 = vsel %vm2697_vm6, 1, %v12072_v58  ;;  %v12381_v57 = vld [vmem:[#allocation56_spill] sm:$0xff]  ;;  %vm12410_vm6 = vcmp.lt.f32.partialorder %v12312_v9, 15.0 }
 0x27a   : > { %12378 = vst [vmem:[#allocation242_spill] sm:$0xff] %v8295_v22  ;;  %v8297_v46 = vpop.f32.mrf.mxu3  ;;  %5556 = vmatmul.msk.f32.vlgmr.msra.gmra.mxu0 %vm655_vm0, %v8301_v36  ;;  %2786 = vperm.xlu0 %5619, %v2729_v11  }
 0x27b   : > { %v8299_v8 = vpop.f32.mrf.mxu1  ;;  %v8310_v22 = vsel %vm11997_vm10, %v2599_v29, %v2600_v32  ;;  %v12382_v29 = vld [vmem:[#allocation73_spill] sm:$0xff] }
 0x27c   : > { %12379 = vst [vmem:[#allocation243_spill] sm:$0xff] %v8299_v8  ;;  %v11834_v27 = vrot.slane %v8299_v8, 7  ;;  %5386 = vmatmul.msk.f32.gmra.mxu2 %vm655_vm0, %v8149_v39 }
 0x27d   : > { %12380 = vst [vmem:[#allocation244_spill] sm:$0xff] %v8310_v22  ;;  %3129 = vperm.xlu2 %5615, %v12381_v57  }
 0x27e   : > { %v2267_v54 = vsel %vm11997_vm10, %v11835_v2, %v11834_v27  ;;  %5355 = vmatmul.msk.f32.gmra.mxu1 %vm655_vm0, %v8235_v17  ;;  %3552 = vperm.xlu1 %5616, %v12382_v29   ;;  %v8331_v8 = vpop.f32.mrf.mxu0 }
 0x27f   : > { %5417 = vmatmul.msk.f32.gmra.mxu3 %vm655_vm0, %v8165_v33  ;;  %v8327_v11 = vpop.permute.xlu2 %2819  ;;  %v8329_v53 = vpop.permute.xlu0 %1912  ;;  %v2424_v57 = vsel %vm2392_vm14, %v2267_v54, 0.0  ;;  %v12390_v54 = vld [vmem:[#allocation62_spill] sm:$0xff]  ;;  %vm2709_vm14 = vmand %vm12410_vm6, %vm1839_vm5  ;;  %vm12421_vm5 = vcmp.lt.f32.partialorder %v12325_v13, 15.0  ;;  %v12436_v13 = vld [vmem:[#allocation117_spill] sm:$0xff] }
 0x280   : > { %12383 = vst [vmem:[#allocation56_spill] sm:$0xff] %v8327_v11  ;;  %v8334_v27 = vadd.f32 %v8220_v0, %v2424_v57  ;;  %v8340_v2 = vpop.permute.xlu1 %2825  ;;  %v2529_v33 = vpop.f32.mrf.mxu2  ;;  %v2732_v0 = vsel %vm2700_vm3, 1, %v12072_v58  ;;  %v12391_v57 = vld [vmem:[#allocation75_spill] sm:$0xff]  ;;  %v2741_v12 = vsel %vm2709_vm14, 1, %v12072_v58  ;;  %vm2712_vm3 = vmand %vm12421_vm5, %vm1842_vm13  ;;  %vm12430_vm13 = vcmp.lt.f32.partialorder %v12337_v30, 15.0 }
 0x281   : > { %12386 = vst [vmem:[#allocation246_spill] sm:$0xff] %v8340_v2  ;;  %v2601_v62 = vrot.slane %v2529_v33, 7  ;;  %vm2715_vm12 = vmand %vm12430_vm13, %vm1845_vm1  ;;  %vm2398_vm1 = vcmp.eq.s32.totalorder %v7845_v4, 1 }
 0x282   : > { %12384 = vst [vmem:[#allocation245_spill] sm:$0xff] %v8334_v27  ;;  %v8342_v29 = vpop.f32.mrf.mxu3  ;;  %5557 = vmatmul.msk.f32.gmra.mxu0 %vm655_vm0, %v8346_v40  ;;  %2795 = vperm.xlu0 %5619, %v2732_v0   ;;  %v2747_v19 = vsel %vm2715_vm12, 1, %v12072_v58 }
 0x283   : > { %12387 = vst [vmem:[#allocation247_spill] sm:$0xff] %v8342_v29  ;;  %v8344_v11 = vpop.f32.mrf.mxu1  ;;  %v8353_v44 = vsel %vm11997_vm10, %v2600_v32, %v2601_v62 }
 0x284   : > { %12388 = vst [vmem:[#allocation248_spill] sm:$0xff] %v8344_v11  ;;  %5387 = vmatmul.msk.f32.gmra.mxu2 %vm655_vm0, %v8189_v50  ;;  %v8379_v11 = vld [vmem:[#allocation2 + $0x10] sm:$0xff] }
 0x285   : > { %12389 = vst [vmem:[#allocation249_spill] sm:$0xff] %v8353_v44  ;;  %3138 = vperm.xlu2 %5615, %v12390_v54  }
 0x286   : > { %5356 = vmatmul.msk.f32.gmra.mxu1 %vm655_vm0, %v8268_v34  ;;  %3561 = vperm.xlu1 %5616, %v12391_v57   ;;  %v8367_v32 = vpop.f32.mrf.mxu0 }
 0x287   : > { %5418 = vmatmul.msk.f32.gmra.mxu3 %vm655_vm0, %v8208_v3  ;;  %v8363_v33 = vpop.permute.xlu2 %2828  ;;  %v8365_v27 = vpop.permute.xlu0 %1921  ;;  %12394 = vst [vmem:[#allocation251_spill] sm:$0xff] %v8367_v32  ;;  %v2735_v32 = vsel %vm2703_vm15, 1, %v12072_v58 }
 0x288   : > { %12392 = vst [vmem:[#allocation62_spill] sm:$0xff] %v8363_v33  ;;  %v8373_v0 = vpop.permute.xlu1 %2834  ;;  %v2532_v54 = vpop.f32.mrf.mxu2 }
 0x289   : > { %12393 = vst [vmem:[#allocation250_spill] sm:$0xff] %v8365_v27  ;;  %v2602_v2 = vrot.slane %v2532_v54, 7  ;;  %v12400_v27 = vld [vmem:[#allocation66_spill] sm:$0xff]  ;;  %v12401_v54 = vld [vmem:[#allocation77_spill] sm:$0xff] }
 0x28a   : > { %12396 = vst [vmem:[#allocation252_spill] sm:$0xff] %v8373_v0  ;;  %v8375_v29 = vpop.f32.mrf.mxu3  ;;  %5558 = vmatmul.msk.f32.gmra.mxu0 %vm655_vm0, %v8379_v11  ;;  %2804 = vperm.xlu0 %5619, %v2735_v32  }
 0x28b   : > { %12397 = vst [vmem:[#allocation253_spill] sm:$0xff] %v8375_v29  ;;  %v8377_v3 = vpop.f32.mrf.mxu1  ;;  %v8386_v18 = vsel %vm11997_vm10, %v2601_v62, %v2602_v2 }
 0x28c   : > { %12398 = vst [vmem:[#allocation254_spill] sm:$0xff] %v8377_v3  ;;  %5388 = vmatmul.msk.f32.gmra.mxu2 %vm655_vm0, %v8235_v17  ;;  %v11844_v51 = vrot.slane %v8377_v3, 7 }
 0x28d   : > { %12399 = vst [vmem:[#allocation255_spill] sm:$0xff] %v8386_v18  ;;  %3147 = vperm.xlu2 %5615, %v12400_v27  }
 0x28e   : > { %5457 = vmatmul.msk.f32.vlgmr.msra.gmra.mxu1 %vm655_vm0, %v8301_v36  ;;  %3570 = vperm.xlu1 %5616, %v12401_v54   ;;  %v8400_v62 = vpop.f32.mrf.mxu0 }
 0x28f   : > { %5419 = vmatmul.msk.f32.gmra.mxu3 %vm655_vm0, %v8149_v39  ;;  %v8396_v0 = vpop.permute.xlu2 %2837  ;;  %v8398_v29 = vpop.permute.xlu0 %1930  ;;  %12404 = vst [vmem:[#allocation257_spill] sm:$0xff] %v8400_v62  ;;  %v8413_v39 = vsel %vm11919_vm8, 1, %v12072_v58 }
 0x290   : > { %12402 = vst [vmem:[#allocation66_spill] sm:$0xff] %v8396_v0  ;;  %v8406_v27 = vpop.permute.xlu1 %2843  ;;  %v2535_v32 = vpop.f32.mrf.mxu2 }
 0x291   : > { %12403 = vst [vmem:[#allocation256_spill] sm:$0xff] %v8398_v29  ;;  %v2603_v33 = vrot.slane %v2535_v32, 7  ;;  %v8417_v29 = vld [vmem:[#allocation2 + $0x18] sm:$0xff]  ;;  %v2738_v32 = vsel %vm2706_vm4, 1, %v12072_v58 }
 0x292   : > { %v8408_v57 = vpop.f32.mrf.mxu3  ;;  %5559 = vmatmul.msk.f32.gmra.mxu0 %vm655_vm0, %v8417_v29  ;;  %2813 = vperm.xlu0 %5619, %v2738_v32  }
 0x293   : > { %v8415_v0 = vpop.f32.mrf.mxu1  ;;  %v8426_v54 = vsel %vm11997_vm10, %v2602_v2, %v2603_v33  ;;  %v12407_v2 = vld [vmem:[#allocation79_spill] sm:$0xff] }
 0x294   : > { %12406 = vst [vmem:[#allocation258_spill] sm:$0xff] %v8415_v0  ;;  %v11843_v62 = vrot.slane %v8415_v0, 7  ;;  %5389 = vmatmul.msk.f32.gmra.mxu2 %vm655_vm0, %v8268_v34 }
 0x295   : > { %3546 = vperm.xlu2 %5615, %v8413_v39  }
 0x296   : > { %v2264_v31 = vsel %vm11997_vm10, %v11844_v51, %v11843_v62  ;;  %5458 = vmatmul.msk.f32.gmra.mxu1 %vm655_vm0, %v8346_v40  ;;  %3579 = vperm.xlu1 %5616, %v12407_v2   ;;  %v8447_v3 = vpop.f32.mrf.mxu0 }
 0x297   : > { %5420 = vmatmul.msk.f32.gmra.mxu3 %vm655_vm0, %v8189_v50  ;;  %v8443_v32 = vpop.permute.xlu2 %3057  ;;  %v8445_v6 = vpop.permute.xlu0 %1939  ;;  %v2427_v0 = vsel %vm2395_vm7, %v2264_v31, 0.0  ;;  %v8463_v31 = vsel %vm12414_vm2, 1, %v12072_v58  ;;  %vm2401_vm2 = vcmp.eq.s32.totalorder %v7898_v15, 1 }
 0x298   : > { %12408 = vst [vmem:[#allocation259_spill] sm:$0xff] %v8445_v6  ;;  %v8450_v62 = vadd.f32 %v8331_v8, %v2427_v0  ;;  %v8456_v51 = vpop.permute.xlu1 %3063  ;;  %v2538_v50 = vpop.f32.mrf.mxu2  ;;  %v8467_v8 = vld [vmem:[#allocation2 + $0x20] sm:$0xff] }
 0x299   : > { %12411 = vst [vmem:[#allocation261_spill] sm:$0xff] %v8456_v51  ;;  %v2604_v18 = vrot.slane %v2538_v50, 7  ;;  %v12417_v50 = vld [vmem:[#allocation83_spill] sm:$0xff] }
 0x29a   : > { %12409 = vst [vmem:[#allocation260_spill] sm:$0xff] %v8450_v62  ;;  %v8458_v2 = vpop.f32.mrf.mxu3  ;;  %5560 = vmatmul.msk.f32.gmra.mxu0 %vm655_vm0, %v8467_v8  ;;  %2822 = vperm.xlu0 %5619, %v2741_v12  }
 0x29b   : > { %12412 = vst [vmem:[#allocation262_spill] sm:$0xff] %v8458_v2  ;;  %v8465_v6 = vpop.f32.mrf.mxu1  ;;  %v8474_v0 = vsel %vm11997_vm10, %v2603_v33, %v2604_v18 }
 0x29c   : > { %12415 = vst [vmem:[#allocation263_spill] sm:$0xff] %v8465_v6  ;;  %5490 = vmatmul.msk.f32.vlgmr.msra.gmra.mxu2 %vm655_vm0, %v8301_v36 }
 0x29d   : > { %12416 = vst [vmem:[#allocation264_spill] sm:$0xff] %v8474_v0  ;;  %3555 = vperm.xlu2 %5615, %v8463_v31  }
 0x29e   : > { %5459 = vmatmul.msk.f32.gmra.mxu1 %vm655_vm0, %v8379_v11  ;;  %3588 = vperm.xlu1 %5616, %v12417_v50   ;;  %v8488_v33 = vpop.f32.mrf.mxu0  ;;  %v8500_v50 = vld [vmem:[#allocation2 + $0x28] sm:$0xff] }
 0x29f   : > { %5421 = vmatmul.msk.f32.gmra.mxu3 %vm655_vm0, %v8235_v17  ;;  %v8484_v62 = vpop.permute.xlu2 %3066  ;;  %v8486_v20 = vpop.permute.xlu0 %1948  ;;  %12420 = vst [vmem:[#allocation267_spill] sm:$0xff] %v8488_v33  ;;  %v2744_v33 = vsel %vm2712_vm3, 1, %v12072_v58 }
 0x2a0   : > { %12418 = vst [vmem:[#allocation265_spill] sm:$0xff] %v8484_v62  ;;  %v8494_v12 = vpop.permute.xlu1 %3072  ;;  %v2541_v6 = vpop.f32.mrf.mxu2  ;;  %v12426_v62 = vld [vmem:[#allocation111_spill] sm:$0xff] }
 0x2a1   : > { %12419 = vst [vmem:[#allocation266_spill] sm:$0xff] %v8486_v20  ;;  %v2605_v2 = vrot.slane %v2541_v6, 7  ;;  %v12427_v6 = vld [vmem:[#allocation86_spill] sm:$0xff] }
 0x2a2   : > { %12422 = vst [vmem:[#allocation268_spill] sm:$0xff] %v8494_v12  ;;  %v8496_v51 = vpop.f32.mrf.mxu3  ;;  %5561 = vmatmul.msk.f32.gmra.mxu0 %vm655_vm0, %v8500_v50  ;;  %2831 = vperm.xlu0 %5619, %v2744_v33  }
 0x2a3   : > { %12423 = vst [vmem:[#allocation269_spill] sm:$0xff] %v8496_v51  ;;  %v8498_v17 = vpop.f32.mrf.mxu1  ;;  %v8507_v38 = vsel %vm11997_vm10, %v2604_v18, %v2605_v2 }
 0x2a4   : > { %12424 = vst [vmem:[#allocation270_spill] sm:$0xff] %v8498_v17  ;;  %5491 = vmatmul.msk.f32.gmra.mxu2 %vm655_vm0, %v8346_v40  ;;  %v11857_v30 = vrot.slane %v8498_v17, 7 }
 0x2a5   : > { %12425 = vst [vmem:[#allocation271_spill] sm:$0xff] %v8507_v38  ;;  %3564 = vperm.xlu2 %5615, %v12426_v62  }
 0x2a6   : > { %5460 = vmatmul.msk.f32.gmra.mxu1 %vm655_vm0, %v8417_v29  ;;  %3597 = vperm.xlu1 %5616, %v12427_v6   ;;  %v8525_v18 = vpop.f32.mrf.mxu0  ;;  %v8533_v6 = vld [vmem:[#allocation2 + $0x30] sm:$0xff] }
 0x2a7   : > { %5422 = vmatmul.msk.f32.gmra.mxu3 %vm655_vm0, %v8268_v34  ;;  %v8517_v12 = vpop.permute.xlu2 %3075  ;;  %v8519_v51 = vpop.permute.xlu0 %1957  ;;  %12431 = vst [vmem:[#allocation273_spill] sm:$0xff] %v8525_v18 }
 0x2a8   : > { %12428 = vst [vmem:[#allocation111_spill] sm:$0xff] %v8517_v12  ;;  %v8527_v33 = vpop.permute.xlu1 %3081  ;;  %v2544_v20 = vpop.f32.mrf.mxu2  ;;  %v12434_v12 = vld [vmem:[#allocation124_spill] sm:$0xff] }
 0x2a9   : > { %12429 = vst [vmem:[#allocation272_spill] sm:$0xff] %v8519_v51  ;;  %v2606_v38 = vrot.slane %v2544_v20, 7 }
 0x2aa   : > { %12432 = vst [vmem:[#allocation274_spill] sm:$0xff] %v8527_v33  ;;  %v8529_v0 = vpop.f32.mrf.mxu3  ;;  %5562 = vmatmul.msk.f32.gmra.mxu0 %vm655_vm0, %v8533_v6  ;;  %v12435_v33 = vld [vmem:[#allocation116_spill] sm:$0xff]  ;;  %2840 = vperm.xlu0 %5619, %v2747_v19  }
 0x2ab   : > { %v8531_v34 = vpop.f32.mrf.mxu1  ;;  %v8543_v20 = vsel %vm11997_vm10, %v2605_v2, %v2606_v38  ;;  %v12437_v2 = vld [vmem:[#allocation90_spill] sm:$0xff] }
 0x2ac   : > { %12433 = vst [vmem:[#allocation275_spill] sm:$0xff] %v8531_v34  ;;  %v11856_v18 = vrot.slane %v8531_v34, 7  ;;  %5492 = vmatmul.msk.f32.gmra.mxu2 %vm655_vm0, %v8379_v11  ;;  %v12439_v34 = vrot.slane %v12434_v12, 7 }
 0x2ad   : > { %3573 = vperm.xlu2 %5615, %v12435_v33  }
 0x2ae   : > { %v2261_v51 = vsel %vm11997_vm10, %v11857_v30, %v11856_v18  ;;  %5461 = vmatmul.msk.f32.gmra.mxu1 %vm655_vm0, %v8467_v8  ;;  %3606 = vperm.xlu1 %5616, %v12437_v2   ;;  %v12440_v18 = vrot.slane %v12436_v13, 7  ;;  %v8571_v17 = vpop.f32.mrf.mxu0  ;;  %v12442_v2 = vld [vmem:[#allocation29_spill] sm:$0xff] }
 0x2af   : > { %5523 = vmatmul.msk.f32.vlgmr.msra.gmra.mxu3 %vm655_vm0, %v8301_v36  ;;  %v8561_v19 = vpop.permute.xlu2 %3084  ;;  %v8563_v4 = vpop.permute.xlu0 %1966  ;;  %v2430_v9 = vsel %vm2398_vm1, %v2261_v51, 0.0  ;;  %vm2018_vm15 = vcmp.eq.s32.totalorder %v12442_v2, 1 }
 0x2b0   : > { %12438 = vst [vmem:[#allocation116_spill] sm:$0xff] %v8561_v19  ;;  %v1677_v30 = vsel %vm11997_vm10, %v12440_v18, %v12439_v34  ;;  %v8574_v44 = vadd.f32 %v8447_v3, %v2430_v9  ;;  %v3091_v36 = vpop.permute.xlu1 %3090  ;;  %v2547_v14 = vpop.f32.mrf.mxu2  ;;  %v11866_v9 = vrot.slane %v7496_v45, 7  ;;  %v8621_v45 = vld [vmem:[#allocation2 + $0x40] sm:$0xff]  ;;  %vm2025_vm5 = vcmp.eq.s32.totalorder %v8563_v4, 1 }
 0x2b1   : > { %vm3163_vm9 = vcmp.eq.s32.totalorder %v3091_v36, 1  ;;  %v2607_v19 = vrot.slane %v2547_v14, 7  ;;  %v2050_v51 = vsel %vm2018_vm15, %v1677_v30, 0.0  ;;  %v12446_v14 = vld [vmem:[#allocation123_spill] sm:$0xff]  ;;  %v12447_v30 = vld [vmem:[#allocation5_spill] sm:$0xff] }
 0x2b2   : > { %12441 = vst [vmem:[#allocation276_spill] sm:$0xff] %v8574_v44  ;;  %v8577_v22 = vpop.f32.mrf.mxu3  ;;  %v3195_v12 = vsel %vm3163_vm9, %v8297_v46, 0.0  ;;  %5563 = vmatmul.msk.f32.gmra.mxu0 %vm655_vm0, %v8582_v47  ;;  %3060 = vperm.xlu0 %5619, %v12447_v30   ;;  %v12448_v46 = vld [vmem:[#allocation138_spill] sm:$0xff] }
 0x2b3   : > { %v8580_v13 = vpop.f32.mrf.mxu1  ;;  %v8587_v3 = vadd.f32 %v3195_v12, %v2050_v51  ;;  %v8591_v18 = vsel %vm11997_vm10, %v2606_v38, %v2607_v19  ;;  %v11865_v34 = vrot.slane %v12448_v46, 7  ;;  %v12449_v12 = vld [vmem:[#allocation93_spill] sm:$0xff] }
 0x2b4   : > { %12443 = vst [vmem:[#allocation29_spill] sm:$0xff] %v8580_v13  ;;  %5493 = vmatmul.msk.f32.gmra.mxu2 %vm655_vm0, %v8417_v29  ;;  %v12452_v13 = vld [vmem:[#allocation35_spill] sm:$0xff] }
 0x2b5   : > { %12444 = vst [vmem:[#allocation277_spill] sm:$0xff] %v8587_v3  ;;  %3582 = vperm.xlu2 %5615, %v12446_v14   ;;  %v1674_v36 = vsel %vm11997_vm10, %v11865_v34, %v11866_v9  ;;  %vm2021_vm4 = vcmp.eq.s32.totalorder %v12452_v13, 1  ;;  %v1635_v34 = vrot.slane %v7658_v52, 7  ;;  %v12459_v52 = vld [vmem:[#allocation97_spill] sm:$0xff] }
 0x2b6   : > { %12445 = vst [vmem:[#allocation278_spill] sm:$0xff] %v8591_v18  ;;  %5462 = vmatmul.msk.f32.gmra.mxu1 %vm655_vm0, %v8500_v50  ;;  %3615 = vperm.xlu1 %5616, %v12449_v12   ;;  %v8613_v51 = vpop.f32.mrf.mxu0  ;;  %v2053_v12 = vsel %vm2021_vm4, %v1674_v36, 0.0  ;;  %v12458_v36 = vld [vmem:[#allocation10_spill] sm:$0xff] }
 0x2b7   : > { %5524 = vmatmul.msk.f32.gmra.mxu3 %vm655_vm0, %v8346_v40  ;;  %v8603_v2 = vpop.permute.xlu2 %3093  ;;  %v8605_v38 = vpop.permute.xlu0 %1975  ;;  %12451 = vst [vmem:[#allocation5_spill] sm:$0xff] %v8613_v51 }
 0x2b8   : > { %12450 = vst [vmem:[#allocation123_spill] sm:$0xff] %v8603_v2  ;;  %v3100_v30 = vpop.permute.xlu1 %3099  ;;  %v2550_v44 = vpop.f32.mrf.mxu2  ;;  %vm2028_vm1 = vcmp.eq.s32.totalorder %v8605_v38, 1 }
 0x2b9   : > { %vm3166_vm7 = vcmp.eq.s32.totalorder %v3100_v30, 1  ;;  %v2608_v40 = vrot.slane %v2550_v44, 7  ;;  %v12457_v44 = vld [vmem:[#allocation129_spill] sm:$0xff] }
 0x2ba   : > { %v8616_v3 = vpop.f32.mrf.mxu3  ;;  %v3198_v2 = vsel %vm3166_vm7, %v8408_v57, 0.0  ;;  %5564 = vmatmul.msk.f32.gmra.mxu0 %vm655_vm0, %v8621_v45  ;;  %3069 = vperm.xlu0 %5619, %v12458_v36   ;;  %v11868_v57 = vrot.slane %v7602_v5, 7  ;;  %vm2404_vm7 = vcmp.eq.s32.totalorder %v7956_v48, 1 }
 0x2bb   : > { %12453 = vst [vmem:[#allocation35_spill] sm:$0xff] %v8616_v3  ;;  %v8619_v18 = vpop.f32.mrf.mxu1  ;;  %v8626_v9 = vadd.f32 %v3198_v2, %v2053_v12  ;;  %v8630_v13 = vsel %vm11997_vm10, %v2607_v19, %v2608_v40  ;;  %v8656_v3 = vld [vmem:[#allocation2 + $0x48] sm:$0xff] }
 0x2bc   : > { %12454 = vst [vmem:[#allocation279_spill] sm:$0xff] %v8619_v18  ;;  %5494 = vmatmul.msk.f32.gmra.mxu2 %vm655_vm0, %v8467_v8  ;;  %v1671_v2 = vsel %vm11997_vm10, %v11868_v57, %v1635_v34  ;;  %v11871_v57 = vrot.slane %v8619_v18, 7 }
 0x2bd   : > { %12455 = vst [vmem:[#allocation280_spill] sm:$0xff] %v8626_v9  ;;  %3591 = vperm.xlu2 %5615, %v12457_v44   ;;  %v12462_v9 = vld [vmem:[#allocation106_spill] sm:$0xff] }
 0x2be   : > { %12456 = vst [vmem:[#allocation281_spill] sm:$0xff] %v8630_v13  ;;  %5463 = vmatmul.msk.f32.gmra.mxu1 %vm655_vm0, %v8533_v6  ;;  %3624 = vperm.xlu1 %5616, %v12459_v52   ;;  %v8650_v30 = vpop.f32.mrf.mxu0  ;;  %vm2024_vm6 = vcmp.eq.s32.totalorder %v12462_v9, 1 }
 0x2bf   : > { %5525 = vmatmul.msk.f32.gmra.mxu3 %vm655_vm0, %v8379_v11  ;;  %v8642_v12 = vpop.permute.xlu2 %3102  ;;  %v8644_v19 = vpop.permute.xlu0 %1984  ;;  %12461 = vst [vmem:[#allocation10_spill] sm:$0xff] %v8650_v30  ;;  %v2056_v13 = vsel %vm2024_vm6, %v1671_v2, 0.0  ;;  %v12468_v2 = vld [vmem:[#allocation136_spill] sm:$0xff] }
 0x2c0   : > { %12460 = vst [vmem:[#allocation129_spill] sm:$0xff] %v8642_v12  ;;  %v3109_v36 = vpop.permute.xlu1 %3108  ;;  %v2553_v51 = vpop.f32.mrf.mxu2  ;;  %vm2031_vm6 = vcmp.eq.s32.totalorder %v8644_v19, 1 }
 0x2c1   : > { %vm3169_vm14 = vcmp.eq.s32.totalorder %v3109_v36, 1  ;;  %v2609_v46 = vrot.slane %v2553_v51, 7  ;;  %v12465_v51 = vld [vmem:[#allocation137_spill] sm:$0xff]  ;;  %v12469_v36 = vrot.slane %v12468_v2, 7 }
 0x2c2   : > { %v3014_v11 = vpop.f32.mrf.mxu3  ;;  %v3201_v52 = vsel %vm3169_vm14, %v8529_v0, 0.0  ;;  %5565 = vmatmul.msk.f32.gmra.mxu0 %vm655_vm0, %v8656_v3  ;;  %v12466_v0 = vld [vmem:[#allocation16_spill] sm:$0xff] }
 0x2c3   : > { %v8654_v12 = vpop.f32.mrf.mxu1  ;;  %v8661_v30 = vadd.f32 %v3201_v52, %v2056_v13  ;;  %v8666_v9 = vsel %vm11997_vm10, %v2608_v40, %v2609_v46  ;;  %3078 = vperm.xlu0 %5619, %v12466_v0   ;;  %v12467_v40 = vld [vmem:[#allocation100_spill] sm:$0xff]  ;;  %v1670_v0 = vsel %vm11997_vm10, %v1635_v34, %v12469_v36 }
 0x2c4   : > { %12463 = vst [vmem:[#allocation106_spill] sm:$0xff] %v8654_v12  ;;  %v11870_v5 = vrot.slane %v8654_v12, 7  ;;  %5495 = vmatmul.msk.f32.gmra.mxu2 %vm655_vm0, %v8500_v50  ;;  %v2057_v12 = vsel %vm2025_vm5, %v1670_v0, 0.0 }
 0x2c5   : > { %12464 = vst [vmem:[#allocation282_spill] sm:$0xff] %v8661_v30  ;;  %3600 = vperm.xlu2 %5615, %v12465_v51  }
 0x2c6   : > { %v2258_v13 = vsel %vm11997_vm10, %v11871_v57, %v11870_v5  ;;  %5464 = vmatmul.msk.f32.gmra.mxu1 %vm655_vm0, %v8582_v47  ;;  %3633 = vperm.xlu1 %5616, %v12467_v40   ;;  %v8691_v5 = vpop.f32.mrf.mxu0  ;;  %v12471_v40 = vld [vmem:[#allocation47_spill] sm:$0xff] }
 0x2c7   : > { %5526 = vmatmul.msk.f32.gmra.mxu3 %vm655_vm0, %v8417_v29  ;;  %v3112_v15 = vpop.permute.xlu2 %3111  ;;  %v8685_v4 = vpop.permute.xlu0 %1993  ;;  %v2433_v52 = vsel %vm2401_vm2, %v2258_v13, 0.0  ;;  %vm2027_vm13 = vcmp.eq.s32.totalorder %v12471_v40, 1 }
 0x2c8   : > { %vm3170_vm3 = vcmp.eq.s32.totalorder %v3112_v15, 1  ;;  %v8694_v57 = vadd.f32 %v8571_v17, %v2433_v52  ;;  %v3118_v18 = vpop.permute.xlu1 %3117  ;;  %v2556_v30 = vpop.f32.mrf.mxu2  ;;  %v2059_v34 = vsel %vm2027_vm13, %v7559_v60, 0.0 }
 0x2c9   : > { %v3202_v29 = vsel %vm3170_vm3, %v8577_v22, 0.0  ;;  %vm3172_vm12 = vcmp.eq.s32.totalorder %v3118_v18, 1  ;;  %v2610_v2 = vrot.slane %v2556_v30, 7  ;;  %v12475_v18 = vld [vmem:[#allocation143_spill] sm:$0xff] }
 0x2ca   : > { %12470 = vst [vmem:[#allocation137_spill] sm:$0xff] %v8694_v57  ;;  %v8698_v13 = vadd.f32 %v3202_v29, %v2057_v12  ;;  %v3017_v61 = vpop.f32.mrf.mxu3  ;;  %v3204_v15 = vsel %vm3172_vm12, %v3014_v11, 0.0  ;;  %5566 = vmatmul.msk.f32.gmra.mxu0 %vm655_vm0, %v8703_v43  ;;  %v12476_v12 = vld [vmem:[#allocation22_spill] sm:$0xff]  ;;  %v12478_v11 = vld [vmem:[#allocation160_spill] sm:$0xff]  ;;  %v12486_v57 = vld [vmem:[#allocation53_spill] sm:$0xff]  ;;  %vm2407_vm12 = vcmp.eq.s32.totalorder %v7991_v63, 1 }
 0x2cb   : > { %v8701_v36 = vpop.f32.mrf.mxu1  ;;  %v8707_v17 = vadd.f32 %v3204_v15, %v2059_v34  ;;  %v8711_v22 = vsel %vm11997_vm10, %v2609_v46, %v2610_v2  ;;  %3087 = vperm.xlu0 %5619, %v12476_v12   ;;  %v2060_v38 = vsel %vm2028_vm1, %v12478_v11, 0.0  ;;  %v8735_v12 = vld [vmem:[#allocation2 + $0x58] sm:$0xff]  ;;  %vm2030_vm9 = vcmp.eq.s32.totalorder %v12486_v57, 1 }
 0x2cc   : > { %12472 = vst [vmem:[#allocation16_spill] sm:$0xff] %v8698_v13  ;;  %5496 = vmatmul.msk.f32.gmra.mxu2 %vm655_vm0, %v8533_v6  ;;  %v12482_v11 = vld [vmem:[#allocation150_spill] sm:$0xff]  ;;  %v8763_v13 = vld [vmem:[#allocation2 + $0x60] sm:$0xff]  ;;  %vm2034_vm1 = vcmp.eq.s32.totalorder %v8685_v4, 1 }
 0x2cd   : > { %12473 = vst [vmem:[#allocation136_spill] sm:$0xff] %v8701_v36  ;;  %3609 = vperm.xlu2 %5615, %v12475_v18  }
 0x2ce   : > { %12474 = vst [vmem:[#allocation47_spill] sm:$0xff] %v8707_v17  ;;  %5465 = vmatmul.msk.f32.gmra.mxu1 %vm655_vm0, %v8621_v45  ;;  %3916 = vrot.lane.b32.xlu1 %v8413_v39, %s5717_s26  ;;  %v2062_v17 = vsel %vm2030_vm9, %v7714_v10, 0.0  ;;  %v12490_v10 = vld [vmem:[#allocation34_spill] sm:$0xff] }
 0x2cf   : > { %5527 = vmatmul.msk.f32.gmra.mxu3 %vm655_vm0, %v8467_v8  ;;  %v3121_v60 = vpop.permute.xlu2 %3120  ;;  %v8722_v30 = vpop.permute.xlu0 %2002 }
 0x2d0   : > { %vm3173_vm15 = vcmp.eq.s32.totalorder %v3121_v60, 1  ;;  %v8726_v46 = vpop.f32.mrf.mxu0  ;;  %v3127_v40 = vpop.permute.xlu1 %3126 }
 0x2d1   : > { %12477 = vst [vmem:[#allocation143_spill] sm:$0xff] %v8726_v46  ;;  %v3205_v52 = vsel %vm3173_vm15, %v3017_v61, 0.0  ;;  %v2559_v0 = vpop.f32.mrf.mxu2  ;;  %v12483_v61 = vld [vmem:[#allocation28_spill] sm:$0xff]  ;;  %vm3175_vm4 = vcmp.eq.s32.totalorder %v3127_v40, 1  ;;  %v12489_v40 = vld [vmem:[#allocation158_spill] sm:$0xff] }
 0x2d2   : > { %v8729_v29 = vadd.f32 %v3205_v52, %v2060_v38  ;;  %v2611_v34 = vrot.slane %v2559_v0, 7  ;;  %v8731_v15 = vpop.f32.mrf.mxu3  ;;  %5567 = vmatmul.msk.f32.gmra.mxu0 %vm655_vm0, %v8735_v12 }
 0x2d3   : > { %v8733_v8 = vpop.f32.mrf.mxu1  ;;  %3096 = vperm.xlu0 %5619, %v12483_v61  }
 0x2d4   : > { %12479 = vst [vmem:[#allocation22_spill] sm:$0xff] %v8729_v29  ;;  %v8741_v60 = vsel %vm11997_vm10, %v2610_v2, %v2611_v34  ;;  %5497 = vmatmul.msk.f32.gmra.mxu2 %vm655_vm0, %v8582_v47 }
 0x2d5   : > { %12480 = vst [vmem:[#allocation160_spill] sm:$0xff] %v8733_v8  ;;  %3618 = vperm.xlu2 %5615, %v12482_v11  }
 0x2d6   : > { %12481 = vst [vmem:[#allocation283_spill] sm:$0xff] %v8741_v60  ;;  %5466 = vmatmul.msk.f32.gmra.mxu1 %vm655_vm0, %v8656_v3  ;;  %3922 = vrot.lane.b32.xlu1 %v8463_v31, %s5717_s26 }
 0x2d7   : > { %5528 = vmatmul.msk.f32.gmra.mxu3 %vm655_vm0, %v8500_v50  ;;  %v3130_v38 = vpop.permute.xlu2 %3129  ;;  %v8751_v52 = vpop.permute.xlu0 %2753 }
 0x2d8   : > { %12484 = vst [vmem:[#allocation150_spill] sm:$0xff] %v8751_v52  ;;  %v8755_v2 = vpop.f32.mrf.mxu0  ;;  %v8757_v0 = vpop.permute.xlu1 %3135  ;;  %v11877_v52 = vrot.slane %v8733_v8, 7  ;;  %vm3176_vm14 = vcmp.eq.s32.totalorder %v3130_v38, 1 }
 0x2d9   : > { %12485 = vst [vmem:[#allocation28_spill] sm:$0xff] %v8755_v2  ;;  %v2562_v61 = vpop.f32.mrf.mxu2  ;;  %vm3178_vm3 = vcmp.eq.s32.totalorder %v8757_v0, 1 }
 0x2da   : > { %v2612_v46 = vrot.slane %v2562_v61, 7  ;;  %v3023_v36 = vpop.f32.mrf.mxu3  ;;  %5568 = vmatmul.msk.f32.gmra.mxu0 %vm655_vm0, %v8763_v13 }
 0x2db   : > { %v3207_v29 = vsel %vm3175_vm4, %v3023_v36, 0.0  ;;  %v8761_v50 = vpop.f32.mrf.mxu1  ;;  %3105 = vperm.xlu0 %5619, %v12490_v10  }
 0x2dc   : > { %12487 = vst [vmem:[#allocation53_spill] sm:$0xff] %v8761_v50  ;;  %v8768_v2 = vadd.f32 %v3207_v29, %v2062_v17  ;;  %v11876_v60 = vrot.slane %v8761_v50, 7  ;;  %v8773_v57 = vsel %vm11997_vm10, %v2611_v34, %v2612_v46  ;;  %5498 = vmatmul.msk.f32.gmra.mxu2 %vm655_vm0, %v8621_v45  ;;  %v2063_v50 = vsel %vm2031_vm6, %v7761_v49, 0.0 }
 0x2dd   : > { %3627 = vperm.xlu2 %5615, %v12489_v40  }
 0x2de   : > { %12488 = vst [vmem:[#allocation284_spill] sm:$0xff] %v8768_v2  ;;  %v2255_v36 = vsel %vm11997_vm10, %v11877_v52, %v11876_v60  ;;  %5467 = vmatmul.msk.f32.gmra.mxu1 %vm655_vm0, %v8703_v43  ;;  %3928 = vrot.lane.b32.xlu1 %v12426_v62, %s5717_s26  ;;  %v8807_v62 = vld [vmem:[#allocation2 + $0x68] sm:$0xff] }
 0x2df   : > { %5529 = vmatmul.msk.f32.gmra.mxu3 %vm655_vm0, %v8533_v6  ;;  %v8790_v17 = vpop.permute.xlu2 %3138  ;;  %v8792_v29 = vpop.permute.xlu0 %2768  ;;  %v2436_v48 = vsel %vm2404_vm7, %v2255_v36, 0.0 }
 0x2e0   : > { %v8797_v34 = vpop.f32.mrf.mxu0  ;;  %v8800_v61 = vadd.f32 %v8691_v5, %v2436_v48  ;;  %v8802_v10 = vpop.permute.xlu1 %3144  ;;  %vm3179_vm9 = vcmp.eq.s32.totalorder %v8790_v17, 1 }
 0x2e1   : > { %v2565_v60 = vpop.f32.mrf.mxu2 }
 0x2e2   : > { %12491 = vst [vmem:[#allocation158_spill] sm:$0xff] %v8800_v61  ;;  %v2613_v6 = vrot.slane %v2565_v60, 7  ;;  %v3026_v52 = vpop.f32.mrf.mxu3  ;;  %5569 = vmatmul.msk.f32.gmra.mxu0 %vm655_vm0, %v8807_v62  ;;  %v12495_v60 = vld [vmem:[#allocation40_spill] sm:$0xff]  ;;  %v12501_v61 = vld [vmem:[#allocation46_spill] sm:$0xff] }
 0x2e3   : > { %v3208_v8 = vsel %vm3176_vm14, %v3026_v52, 0.0  ;;  %v8805_v2 = vpop.f32.mrf.mxu1  ;;  %3114 = vperm.xlu0 %5619, %v12495_v60   ;;  %v8839_v60 = vld [vmem:[#allocation2 + $0x70] sm:$0xff] }
 0x2e4   : > { %12492 = vst [vmem:[#allocation34_spill] sm:$0xff] %v8805_v2  ;;  %v8811_v19 = vadd.f32 %v3208_v8, %v2063_v50  ;;  %v8815_v5 = vsel %vm11997_vm10, %v2612_v46, %v2613_v6  ;;  %5499 = vmatmul.msk.f32.gmra.mxu2 %vm655_vm0, %v8656_v3 }
 0x2e5   : > { %12494 = vst [vmem:[#allocation286_spill] sm:$0xff] %v8815_v5  ;;  %3636 = vperm.xlu2 %5615, %v7652_v56  }
 0x2e6   : > { %12493 = vst [vmem:[#allocation285_spill] sm:$0xff] %v8811_v19  ;;  %5468 = vmatmul.msk.f32.gmra.mxu1 %vm655_vm0, %v8735_v12  ;;  %3934 = vrot.lane.b32.xlu1 %v12435_v33, %s5717_s26  ;;  %v12500_v33 = vld [vmem:[#allocation105_spill] sm:$0xff]  ;;  %v12505_v19 = vld [vmem:[#allocation59_spill] sm:$0xff] }
 0x2e7   : > { %5530 = vmatmul.msk.f32.gmra.mxu3 %vm655_vm0, %v8582_v47  ;;  %v8825_v49 = vpop.permute.xlu2 %3147  ;;  %v8827_v8 = vpop.permute.xlu0 %2777  ;;  %vm2033_vm5 = vcmp.eq.s32.totalorder %v12505_v19, 1 }
 0x2e8   : > { %v8831_v46 = vpop.f32.mrf.mxu0  ;;  %v8833_v38 = vpop.permute.xlu1 %3543 }
 0x2e9   : > { %12496 = vst [vmem:[#allocation40_spill] sm:$0xff] %v8831_v46  ;;  %v2568_v52 = vpop.f32.mrf.mxu2 }
 0x2ea   : > { %12497 = vst [vmem:[#allocation287_spill] sm:$0xff] %v8833_v38  ;;  %v2614_v50 = vrot.slane %v2568_v52, 7  ;;  %v8835_v36 = vpop.f32.mrf.mxu3  ;;  %5570 = vmatmul.msk.f32.gmra.mxu0 %vm655_vm0, %v8839_v60 }
 0x2eb   : > { %v8837_v48 = vpop.f32.mrf.mxu1  ;;  %3123 = vperm.xlu0 %5619, %v12501_v61  }
 0x2ec   : > { %12498 = vst [vmem:[#allocation288_spill] sm:$0xff] %v8837_v48  ;;  %v8845_v47 = vsel %vm11997_vm10, %v2613_v6, %v2614_v50  ;;  %5500 = vmatmul.msk.f32.gmra.mxu2 %vm655_vm0, %v8703_v43 }
 0x2ed   : > { %12499 = vst [vmem:[#allocation289_spill] sm:$0xff] %v8845_v47  ;;  %3918 = vrot.lane.b32.xlu2 %v12500_v33, %s5717_s26 }
 0x2ee   : > { %5469 = vmatmul.msk.f32.gmra.mxu1 %vm655_vm0, %v8763_v13  ;;  %3940 = vrot.lane.b32.xlu1 %v12446_v14, %s5717_s26  ;;  %v2065_v14 = vsel %vm2033_vm5, %v7821_v16, 0.0  ;;  %v12510_v16 = vld [vmem:[#allocation52_spill] sm:$0xff]  ;;  %vm3181_vm5 = vcmp.eq.s32.totalorder %v8802_v10, 1 }
 0x2ef   : > { %5531 = vmatmul.msk.f32.gmra.mxu3 %vm655_vm0, %v8621_v45  ;;  %v8856_v52 = vpop.permute.xlu2 %3546  ;;  %v2787_v38 = vpop.permute.xlu0 %2786 }
 0x2f0   : > { %12502 = vst [vmem:[#allocation105_spill] sm:$0xff] %v8856_v52  ;;  %vm2857_vm2 = vcmp.eq.s32.totalorder %v2787_v38, 1  ;;  %v8860_v6 = vpop.f32.mrf.mxu0  ;;  %v8862_v46 = vpop.permute.xlu1 %3552  ;;  %v12506_v52 = vld [vmem:[#allocation145_spill] sm:$0xff] }
 0x2f1   : > { %12503 = vst [vmem:[#allocation46_spill] sm:$0xff] %v8860_v6  ;;  %v2571_v61 = vpop.f32.mrf.mxu2  ;;  %v8865_v2 = vsel %vm2857_vm2, %v8426_v54, 0.0  ;;  %vm12507_vm13 = vcmp.lt.f32.partialorder %v12506_v52, 15.0  ;;  %v11882_v54 = vrot.slane %v8837_v48, 7  ;;  %v12529_v52 = vld [vmem:[#allocation131_spill] sm:$0xff] }
 0x2f2   : > { %12504 = vst [vmem:[#allocation290_spill] sm:$0xff] %v8862_v46  ;;  %v2615_v45 = vrot.slane %v2571_v61, 7  ;;  %v3032_v47 = vpop.f32.mrf.mxu3  ;;  %v8872_v5 = vsel %vm12507_vm13, 1, %v12072_v58  ;;  %v8877_v46 = vld [vmem:[#allocation2 + $0x78] sm:$0xff]  ;;  %vm2036_vm2 = vcmp.eq.s32.totalorder %v12529_v52, 1 }
 0x2f3   : > { %v3210_v38 = vsel %vm3178_vm3, %v3032_v47, 0.0  ;;  %v8875_v6 = vpop.f32.mrf.mxu1  ;;  %5571 = vmatmul.msk.f32.gmra.mxu0 %vm655_vm0, %v8877_v46  ;;  %3132 = vperm.xlu0 %5619, %v12510_v16   ;;  %vm2037_vm3 = vcmp.eq.s32.totalorder %v8722_v30, 1 }
 0x2f4   : > { %12508 = vst [vmem:[#allocation59_spill] sm:$0xff] %v8875_v6  ;;  %v8882_v0 = vadd.f32 %v3210_v38, %v2065_v14  ;;  %v11881_v19 = vrot.slane %v8875_v6, 7  ;;  %v8887_v61 = vsel %vm11997_vm10, %v2614_v50, %v2615_v45  ;;  %5501 = vmatmul.msk.f32.gmra.mxu2 %vm655_vm0, %v8735_v12  ;;  %v2069_v30 = vsel %vm2037_vm3, %v7766_v25, 0.0 }
 0x2f5   : > { %3924 = vrot.lane.b32.xlu2 %v8872_v5, %s5717_s26  ;;  %vm12554_vm3 = vcmp.lt.f32.partialorder %v7884_v26, 15.0 }
 0x2f6   : > { %12509 = vst [vmem:[#allocation291_spill] sm:$0xff] %v8882_v0  ;;  %v2252_v47 = vsel %vm11997_vm10, %v11882_v54, %v11881_v19  ;;  %5470 = vmatmul.msk.f32.gmra.mxu1 %vm655_vm0, %v8807_v62  ;;  %3946 = vrot.lane.b32.xlu1 %v12457_v44, %s5717_s26  ;;  %v12514_v44 = vld [vmem:[#allocation152_spill] sm:$0xff] }
 0x2f7   : > { %5532 = vmatmul.msk.f32.gmra.mxu3 %vm655_vm0, %v8656_v3  ;;  %v8905_v50 = vpop.permute.xlu2 %3555  ;;  %v2796_v14 = vpop.permute.xlu0 %2795  ;;  %v2439_v63 = vsel %vm2407_vm12, %v2252_v47, 0.0  ;;  %vm12515_vm4 = vcmp.lt.f32.partialorder %v12514_v44, 15.0  ;;  %v12516_v47 = vld [vmem:[#allocation161_spill] sm:$0xff]  ;;  %vm3182_vm12 = vcmp.eq.s32.totalorder %v8825_v49, 1 }
 0x2f8   : > { %12511 = vst [vmem:[#allocation52_spill] sm:$0xff] %v8905_v50  ;;  %vm2860_vm15 = vcmp.eq.s32.totalorder %v2796_v14, 1  ;;  %v8910_v38 = vpop.f32.mrf.mxu0  ;;  %v8913_v16 = vadd.f32 %v8797_v34, %v2439_v63  ;;  %v8915_v19 = vpop.permute.xlu1 %3561  ;;  %v8924_v4 = vsel %vm12515_vm4, 1, %v12072_v58  ;;  %v2066_v14 = vsel %vm2034_vm1, %v12516_v47, 0.0  ;;  %v8929_v63 = vld [vmem:[#allocation2 + $0x80] sm:$0xff] }
 0x2f9   : > { %12512 = vst [vmem:[#allocation292_spill] sm:$0xff] %v8910_v38  ;;  %v2574_v54 = vpop.f32.mrf.mxu2  ;;  %v8918_v3 = vsel %vm2860_vm15, %v8543_v20, 0.0  ;;  %vm12533_vm1 = vcmp.lt.f32.partialorder %v7723_v7, 15.0  ;;  %vm2007_vm4 = vcmp.eq.s32.totalorder %v8329_v53, 1 }
 0x2fa   : > { %12513 = vst [vmem:[#allocation293_spill] sm:$0xff] %v8913_v16  ;;  %v2616_v50 = vrot.slane %v2574_v54, 7  ;;  %v3035_v6 = vpop.f32.mrf.mxu3  ;;  %v12520_v54 = vld [vmem:[#allocation58_spill] sm:$0xff] }
 0x2fb   : > { %v3211_v38 = vsel %vm3179_vm9, %v3035_v6, 0.0  ;;  %v8927_v34 = vpop.f32.mrf.mxu1  ;;  %5572 = vmatmul.msk.f32.gmra.mxu0 %vm655_vm0, %v8929_v63  ;;  %3141 = vperm.xlu0 %5619, %v12520_v54   ;;  %vm12539_vm9 = vcmp.lt.f32.partialorder %v7771_v23, 15.0 }
 0x2fc   : > { %12517 = vst [vmem:[#allocation161_spill] sm:$0xff] %v8927_v34  ;;  %v8933_v20 = vadd.f32 %v3211_v38, %v2066_v14  ;;  %v8937_v17 = vsel %vm11997_vm10, %v2615_v45, %v2616_v50  ;;  %5502 = vmatmul.msk.f32.gmra.mxu2 %vm655_vm0, %v8763_v13 }
 0x2fd   : > { %12519 = vst [vmem:[#allocation295_spill] sm:$0xff] %v8937_v17  ;;  %3930 = vrot.lane.b32.xlu2 %v8924_v4, %s5717_s26 }
 0x2fe   : > { %12518 = vst [vmem:[#allocation294_spill] sm:$0xff] %v8933_v20  ;;  %5471 = vmatmul.msk.f32.gmra.mxu1 %vm655_vm0, %v8839_v60  ;;  %3952 = vrot.lane.b32.xlu1 %v12465_v51, %s5717_s26  ;;  %v8968_v51 = vld [vmem:[#allocation2 + $0x88] sm:$0xff]  ;;  %v9001_v20 = vsel %vm11917_vm11, 1, %v12072_v58 }
 0x2ff   : > { %5533 = vmatmul.msk.f32.gmra.mxu3 %vm655_vm0, %v8703_v43  ;;  %v8948_v6 = vpop.permute.xlu2 %3564  ;;  %v2805_v38 = vpop.permute.xlu0 %2804  ;;  %v12522_v43 = vld [vmem:[#allocation162_spill] sm:$0xff] }
 0x300   : > { %vm2863_vm7 = vcmp.eq.s32.totalorder %v2805_v38, 1  ;;  %v8952_v45 = vpop.f32.mrf.mxu0  ;;  %v8954_v47 = vpop.permute.xlu1 %3570  ;;  %vm12523_vm6 = vcmp.lt.f32.partialorder %v12522_v43, 15.0 }
 0x301   : > { %12521 = vst [vmem:[#allocation58_spill] sm:$0xff] %v8952_v45  ;;  %v2577_v14 = vpop.f32.mrf.mxu2  ;;  %v8957_v54 = vsel %vm2863_vm7, %v8666_v9, 0.0  ;;  %v8964_v48 = vsel %vm12523_vm6, 1, %v12072_v58  ;;  %v12526_v9 = vld [vmem:[#allocation64_spill] sm:$0xff]  ;;  %vm3152_vm6 = vcmp.eq.s32.totalorder %v8443_v32, 1 }
 0x302   : > { %v2617_v16 = vrot.slane %v2577_v14, 7  ;;  %v8959_v34 = vpop.f32.mrf.mxu3 }
 0x303   : > { %v8966_v44 = vpop.f32.mrf.mxu1  ;;  %5573 = vmatmul.msk.f32.gmra.mxu0 %vm655_vm0, %v8968_v51  ;;  %3150 = vperm.xlu0 %5619, %v12526_v9  }
 0x304   : > { %12524 = vst [vmem:[#allocation296_spill] sm:$0xff] %v8966_v44  ;;  %v8974_v38 = vsel %vm11997_vm10, %v2616_v50, %v2617_v16  ;;  %5503 = vmatmul.msk.f32.gmra.mxu2 %vm655_vm0, %v8807_v62 }
 0x305   : > { %12525 = vst [vmem:[#allocation297_spill] sm:$0xff] %v8974_v38  ;;  %3936 = vrot.lane.b32.xlu2 %v8964_v48, %s5717_s26  ;;  %v9006_v38 = vld [vmem:[#allocation2 + $0x90] sm:$0xff] }
 0x306   : > { %5472 = vmatmul.msk.f32.gmra.mxu1 %vm655_vm0, %v8877_v46  ;;  %3958 = vrot.lane.b32.xlu1 %v12475_v18, %s5717_s26  ;;  %v2068_v18 = vsel %vm2036_vm2, %v7718_v35, 0.0 }
 0x307   : > { %5534 = vmatmul.msk.f32.gmra.mxu3 %vm655_vm0, %v8735_v12  ;;  %v8985_v14 = vpop.permute.xlu2 %3573  ;;  %v2814_v45 = vpop.permute.xlu0 %2813 }
 0x308   : > { %vm2866_vm14 = vcmp.eq.s32.totalorder %v2814_v45, 1  ;;  %v8989_v50 = vpop.f32.mrf.mxu0  ;;  %v8991_v43 = vpop.permute.xlu1 %3579 }
 0x309   : > { %12527 = vst [vmem:[#allocation64_spill] sm:$0xff] %v8989_v50  ;;  %v2580_v9 = vpop.f32.mrf.mxu2  ;;  %v8994_v44 = vsel %vm2866_vm14, %v8773_v57, 0.0  ;;  %vm12546_vm14 = vcmp.lt.f32.partialorder %v7835_v42, 15.0 }
 0x30a   : > { %12528 = vst [vmem:[#allocation298_spill] sm:$0xff] %v8994_v44  ;;  %v2618_v12 = vrot.slane %v2580_v9, 7  ;;  %v3041_v0 = vpop.f32.mrf.mxu3  ;;  %v9120_v23 = vsel %vm12546_vm14, 1, %v12072_v58  ;;  %v12601_v44 = vld [vmem:[#allocation199_spill] sm:$0xff] }
 0x30b   : > { %v3213_v45 = vsel %vm3181_vm5, %v3041_v0, 0.0  ;;  %v9004_v50 = vpop.f32.mrf.mxu1  ;;  %5574 = vmatmul.msk.f32.gmra.mxu0 %vm655_vm0, %v9006_v38  ;;  %3549 = vperm.xlu0 %5619, %v12500_v33   ;;  %12547 = vst [vmem:[#allocation311_spill] sm:$0xff] %v9120_v23 }
 0x30c   : > { %v9010_v57 = vadd.f32 %v3213_v45, %v2068_v18  ;;  %v2623_v10 = vsel %vm11997_vm10, %v2617_v16, %v2618_v12  ;;  %5504 = vmatmul.msk.f32.gmra.mxu2 %vm655_vm0, %v8839_v60  ;;  %v9039_v45 = vsel %vm12533_vm1, 1, %v12072_v58 }
 0x30d   : > { %3942 = vrot.lane.b32.xlu2 %v9001_v20, %s5717_s26  ;;  %12534 = vst [vmem:[#allocation301_spill] sm:$0xff] %v9039_v45 }
 0x30e   : > { %12530 = vst [vmem:[#allocation131_spill] sm:$0xff] %v9010_v57  ;;  %5473 = vmatmul.msk.f32.gmra.mxu1 %vm655_vm0, %v8929_v63  ;;  %3964 = vrot.lane.b32.xlu1 %v12482_v11, %s5717_s26  ;;  %v9082_v57 = vld [vmem:[#allocation2 + $0xa0] sm:$0xff] }
 0x30f   : > { %5535 = vmatmul.msk.f32.gmra.mxu3 %vm655_vm0, %v8763_v13  ;;  %v9023_v35 = vpop.permute.xlu2 %3582  ;;  %v2823_v52 = vpop.permute.xlu0 %2822 }
 0x310   : > { %vm2869_vm13 = vcmp.eq.s32.totalorder %v2823_v52, 1  ;;  %v9028_v0 = vpop.f32.mrf.mxu0  ;;  %v9030_v33 = vpop.permute.xlu1 %3588 }
 0x311   : > { %12531 = vst [vmem:[#allocation299_spill] sm:$0xff] %v9028_v0  ;;  %v2583_v16 = vpop.f32.mrf.mxu2  ;;  %v9033_v9 = vsel %vm2869_vm13, %v8887_v61, 0.0  ;;  %v9044_v0 = vld [vmem:[#allocation2 + $0x98] sm:$0xff]  ;;  %vm3881_vm13 = vcmp.lt.s32.totalorder %v7472_v41, 7 }
 0x312   : > { %12532 = vst [vmem:[#allocation300_spill] sm:$0xff] %v9033_v9  ;;  %v2619_v13 = vrot.slane %v2583_v16, 7  ;;  %v3044_v18 = vpop.f32.mrf.mxu3 }
 0x313   : > { %v3214_v11 = vsel %vm3182_vm12, %v3044_v18, 0.0  ;;  %v9042_v52 = vpop.f32.mrf.mxu1  ;;  %5575 = vmatmul.msk.f32.gmra.mxu0 %vm655_vm0, %v9044_v0  ;;  %3558 = vperm.xlu0 %5619, %v8872_v5  }
 0x314   : > { %v9048_v61 = vadd.f32 %v3214_v11, %v2069_v30  ;;  %v9052_v49 = vsel %vm11997_vm10, %v2618_v12, %v2619_v13  ;;  %5505 = vmatmul.msk.f32.gmra.mxu2 %vm655_vm0, %v8877_v46 }
 0x315   : > { %12536 = vst [vmem:[#allocation303_spill] sm:$0xff] %v9052_v49  ;;  %3948 = vrot.lane.b32.xlu2 %v9039_v45, %s5717_s26 }
 0x316   : > { %12535 = vst [vmem:[#allocation302_spill] sm:$0xff] %v9048_v61  ;;  %5474 = vmatmul.msk.f32.gmra.mxu1 %vm655_vm0, %v8968_v51  ;;  %3970 = vrot.lane.b32.xlu1 %v12489_v40, %s5717_s26  ;;  %v12542_v40 = vrot.slane %v7863_v55, 7 }
 0x317   : > { %5536 = vmatmul.msk.f32.gmra.mxu3 %vm655_vm0, %v8807_v62  ;;  %v9063_v25 = vpop.permute.xlu2 %3591  ;;  %v2832_v16 = vpop.permute.xlu0 %2831  ;;  %v9078_v62 = vsel %vm12539_vm9, 1, %v12072_v58 }
 0x318   : > { %vm2872_vm15 = vcmp.eq.s32.totalorder %v2832_v16, 1  ;;  %v9067_v12 = vpop.f32.mrf.mxu0  ;;  %v9069_v18 = vpop.permute.xlu1 %3597  ;;  %12540 = vst [vmem:[#allocation306_spill] sm:$0xff] %v9078_v62 }
 0x319   : > { %12537 = vst [vmem:[#allocation304_spill] sm:$0xff] %v9067_v12  ;;  %v2586_v30 = vpop.f32.mrf.mxu2  ;;  %v9071_v11 = vsel %vm2872_vm15, %v2623_v10, 0.0  ;;  %v9125_v12 = vld [vmem:[#allocation2 + $0xa8] sm:$0xff] }
 0x31a   : > { %12538 = vst [vmem:[#allocation305_spill] sm:$0xff] %v9071_v11  ;;  %v2620_v7 = vrot.slane %v2586_v30, 7  ;;  %v9073_v21 = vpop.f32.mrf.mxu3 }
 0x31b   : > { %v9080_v61 = vpop.f32.mrf.mxu1  ;;  %5576 = vmatmul.msk.f32.gmra.mxu0 %vm655_vm0, %v9082_v57  ;;  %3567 = vperm.xlu0 %5619, %v8924_v4  }
 0x31c   : > { %12541 = vst [vmem:[#allocation307_spill] sm:$0xff] %v9080_v61  ;;  %v2652_v10 = vsel %vm11997_vm10, %v2620_v7, %v12542_v40  ;;  %v9092_v16 = vsel %vm11997_vm10, %v2619_v13, %v2620_v7  ;;  %5506 = vmatmul.msk.f32.gmra.mxu2 %vm655_vm0, %v8929_v63 }
 0x31d   : > { %12543 = vst [vmem:[#allocation308_spill] sm:$0xff] %v9092_v16  ;;  %3954 = vrot.lane.b32.xlu2 %v9078_v62, %s5717_s26  ;;  %v9151_v16 = vsel %vm12554_vm3, 1, %v12072_v58 }
 0x31e   : > { %5475 = vmatmul.msk.f32.gmra.mxu1 %vm655_vm0, %v9006_v38  ;;  %3976 = vrot.lane.b32.xlu1 %v7652_v56, %s5717_s26  ;;  %v2039_v56 = vsel %vm2007_vm4, %v7879_v59, 0.0 }
 0x31f   : > { %5537 = vmatmul.msk.f32.gmra.mxu3 %vm655_vm0, %v8839_v60  ;;  %v9103_v55 = vpop.permute.xlu2 %3600  ;;  %v2841_v30 = vpop.permute.xlu0 %2840 }
 0x320   : > { %vm2875_vm7 = vcmp.eq.s32.totalorder %v2841_v30, 1  ;;  %v9108_v7 = vpop.f32.mrf.mxu0  ;;  %v9110_v13 = vpop.permute.xlu1 %3606 }
 0x321   : > { %12544 = vst [vmem:[#allocation309_spill] sm:$0xff] %v9108_v7  ;;  %v9112_v40 = vpop.f32.mrf.mxu2  ;;  %v9114_v61 = vsel %vm2875_vm7, %v2652_v10, 0.0 }
 0x322   : > { %12545 = vst [vmem:[#allocation310_spill] sm:$0xff] %v9112_v40  ;;  %v3050_v60 = vpop.f32.mrf.mxu3  ;;  %v11896_v42 = vrot.slane %v9112_v40, 1  ;;  %v12562_v40 = vld [vmem:[#allocation198_spill] sm:$0xff] }
 0x323   : > { %v3184_v53 = vsel %vm3152_vm6, %v3050_v60, 0.0  ;;  %v9123_v30 = vpop.f32.mrf.mxu1  ;;  %5577 = vmatmul.msk.f32.gmra.mxu0 %vm655_vm0, %v9125_v12  ;;  %3576 = vperm.xlu0 %5619, %v8964_v48   ;;  %vm12563_vm12 = vcmp.lt.f32.partialorder %v12562_v40, 15.0  ;;  %vm2876_vm6 = vcmp.eq.s32.totalorder %v8406_v27, 1  ;;  %v12580_v27 = vld [vmem:[#allocation197_spill] sm:$0xff] }
 0x324   : > { %12548 = vst [vmem:[#allocation312_spill] sm:$0xff] %v9123_v30  ;;  %v9129_v10 = vadd.f32 %v3184_v53, %v2039_v56  ;;  %5507 = vmatmul.msk.f32.gmra.mxu2 %vm655_vm0, %v8968_v51  ;;  %v12553_v30 = vld [vmem:[#allocation84_spill] sm:$0xff]  ;;  %v9191_v11 = vsel %vm12563_vm12, 1, %v12072_v58  ;;  %vm12591_vm12 = vcmp.ge.f32.partialorder %v6144_v28, 1.0 }
 0x325   : > { %3960 = vrot.lane.b32.xlu2 %v9120_v23, %s5717_s26  ;;  %vm2008_vm5 = vcmp.eq.s32.totalorder %v12553_v30, 1  ;;  %12555 = vst [vmem:[#allocation84_spill] sm:$0xff] %v9151_v16 }
 0x326   : > { %12549 = vst [vmem:[#allocation313_spill] sm:$0xff] %v9129_v10  ;;  %5476 = vmatmul.msk.f32.gmra.mxu1 %vm655_vm0, %v9044_v0 }
 0x327   : > { %5538 = vmatmul.msk.f32.gmra.mxu3 %vm655_vm0, %v8877_v46  ;;  %v9140_v59 = vpop.permute.xlu2 %3609  ;;  %v3061_v32 = vpop.permute.xlu0 %3060  ;;  %v2040_v46 = vsel %vm2008_vm5, %v7944_v37, 0.0  ;;  %12564 = vst [vmem:[#allocation323_spill] sm:$0xff] %v9191_v11 }
 0x328   : > { %12550 = vst [vmem:[#allocation314_spill] sm:$0xff] %v9140_v59  ;;  %vm3153_vm2 = vcmp.eq.s32.totalorder %v3061_v32, 1  ;;  %v9142_v60 = vpop.f32.mrf.mxu0  ;;  %v9144_v56 = vpop.permute.xlu1 %3615 }
 0x329   : > { %12551 = vst [vmem:[#allocation315_spill] sm:$0xff] %v9142_v60  ;;  %v3756_v53 = vpop.f32.mrf.mxu2  ;;  %v9156_v60 = vld [vmem:[#allocation2 + $0xb0] sm:$0xff] }
 0x32a   : > { %12552 = vst [vmem:[#allocation316_spill] sm:$0xff] %v9144_v56  ;;  %v3053_v7 = vpop.f32.mrf.mxu3  ;;  %v3850_v10 = vrot.slane %v3756_v53, 1 }
 0x32b   : > { %v3185_v49 = vsel %vm3153_vm2, %v3053_v7, 0.0  ;;  %v9154_v32 = vpop.f32.mrf.mxu1  ;;  %5578 = vmatmul.msk.f32.gmra.mxu0 %vm655_vm0, %v9156_v60  ;;  %3585 = vperm.xlu0 %5619, %v9001_v20  }
 0x32c   : > { %v9161_v30 = vadd.f32 %v3185_v49, %v2040_v46  ;;  %v9167_v53 = vsel %vm3881_vm13, %v11896_v42, %v3850_v10  ;;  %5508 = vmatmul.msk.f32.gmra.mxu2 %vm655_vm0, %v9006_v38 }
 0x32d   : > { %3966 = vrot.lane.b32.xlu2 %v9151_v16, %s5717_s26 }
 0x32e   : > { %12556 = vst [vmem:[#allocation317_spill] sm:$0xff] %v9161_v30  ;;  %5477 = vmatmul.msk.f32.gmra.mxu1 %vm655_vm0, %v9082_v57 }
 0x32f   : > { %5539 = vmatmul.msk.f32.gmra.mxu3 %vm655_vm0, %v8929_v63  ;;  %v9178_v37 = vpop.permute.xlu2 %3618  ;;  %v9180_v49 = vpop.permute.xlu0 %3069  ;;  %v9195_v63 = vld [vmem:[#allocation2 + $0xb8] sm:$0xff] }
 0x330   : > { %12557 = vst [vmem:[#allocation318_spill] sm:$0xff] %v9178_v37  ;;  %v9182_v7 = vpop.f32.mrf.mxu0  ;;  %v9184_v46 = vpop.permute.xlu1 %3624 }
 0x331   : > { %12558 = vst [vmem:[#allocation319_spill] sm:$0xff] %v9180_v49  ;;  %v3759_v42 = vpop.f32.mrf.mxu2 }
 0x332   : > { %12559 = vst [vmem:[#allocation320_spill] sm:$0xff] %v9182_v7  ;;  %v3851_v26 = vrot.slane %v3759_v42, 1  ;;  %v9186_v30 = vpop.f32.mrf.mxu3  ;;  %v12566_v42 = vld [vmem:[#allocation126_spill] sm:$0xff] }
 0x333   : > { %12560 = vst [vmem:[#allocation321_spill] sm:$0xff] %v9184_v46  ;;  %v9193_v17 = vpop.f32.mrf.mxu1  ;;  %5579 = vmatmul.msk.f32.gmra.mxu0 %vm655_vm0, %v9195_v63  ;;  %3594 = vperm.xlu0 %5619, %v9039_v45   ;;  %vm11943_vm1 = vcmp.ne.s32.totalorder %v12566_v42, 0  ;;  %v12570_v46 = vld [vmem:[#allocation4_spill] sm:$0xff]  ;;  %v11903_v45 = vrot.slane %v9186_v30, 1 }
 0x334   : > { %12561 = vst [vmem:[#allocation322_spill] sm:$0xff] %v9186_v30  ;;  %v9201_v7 = vsel %vm3881_vm13, %v3850_v10, %v3851_v26  ;;  %5509 = vmatmul.msk.f32.gmra.mxu2 %vm655_vm0, %v9044_v0  ;;  %vm12571_vm15 = vcmp.ge.f32.partialorder %v12570_v46, 1.0 }
 0x335   : > { %12565 = vst [vmem:[#allocation324_spill] sm:$0xff] %v9193_v17  ;;  %3972 = vrot.lane.b32.xlu2 %v9191_v11, %s5717_s26  ;;  %vm4010_vm9 = vmand %vm12571_vm15, %vm11943_vm1 }
 0x336   : > { %5478 = vmatmul.msk.f32.gmra.mxu1 %vm655_vm0, %v9125_v12  ;;  %v4042_v42 = vsel %vm4010_vm9, 1, %v12072_v58 }
 0x337   : > { %5540 = vmatmul.msk.f32.gmra.mxu3 %vm655_vm0, %v8968_v51  ;;  %v9213_v17 = vpop.permute.xlu2 %3627  ;;  %v9215_v10 = vpop.permute.xlu0 %3078 }
 0x338   : > { %12567 = vst [vmem:[#allocation325_spill] sm:$0xff] %v9213_v17  ;;  %v9217_v40 = vpop.f32.mrf.mxu0  ;;  %v3634_v37 = vpop.permute.xlu1 %3633 }
 0x339   : > { %12568 = vst [vmem:[#allocation326_spill] sm:$0xff] %v9215_v10  ;;  %v3762_v9 = vpop.f32.mrf.mxu2  ;;  %vm3668_vm4 = vcmp.eq.s32.totalorder %v3634_v37, 1  ;;  %v9227_v10 = vld [vmem:[#allocation2 + $0xc0] sm:$0xff]  ;;  %v12576_v37 = vld [vmem:[#allocation133_spill] sm:$0xff] }
 0x33a   : > { %12569 = vst [vmem:[#allocation327_spill] sm:$0xff] %v9217_v40  ;;  %v3852_v56 = vrot.slane %v3762_v9, 1  ;;  %v4288_v49 = vpop.f32.mrf.mxu3  ;;  %v3700_v51 = vsel %vm3668_vm4, %v9004_v50, 0.0  ;;  %vm11922_vm7 = vcmp.ne.s32.totalorder %v12576_v37, 0  ;;  %v9269_v37 = vld [vmem:[#allocation2 + $0xc8] sm:$0xff] }
 0x33b   : > { %v4382_v59 = vrot.slane %v4288_v49, 1  ;;  %v9225_v17 = vpop.f32.mrf.mxu1  ;;  %5580 = vmatmul.msk.f32.gmra.mxu0 %vm655_vm0, %v9227_v10  ;;  %v9232_v46 = vadd.f32 %v3700_v51, %v9114_v61  ;;  %3603 = vperm.xlu0 %5619, %v9078_v62   ;;  %v2908_v51 = vsel %vm2876_vm6, %v12580_v27, 0.0  ;;  %v12586_v27 = vld [vmem:[#allocation177_spill] sm:$0xff]  ;;  %vm2851_vm6 = vcmp.eq.s32.totalorder %v8792_v29, 1 }
 0x33c   : > { %12572 = vst [vmem:[#allocation328_spill] sm:$0xff] %v9225_v17  ;;  %v9237_v9 = vsel %vm3881_vm13, %v3851_v26, %v3852_v56  ;;  %5510 = vmatmul.msk.f32.gmra.mxu2 %vm655_vm0, %v9082_v57 }
 0x33d   : > { %12573 = vst [vmem:[#allocation329_spill] sm:$0xff] %v9232_v46  ;;  %4075 = vperm.xlu2 %5615, %v4042_v42   ;;  %v9244_v50 = vsel %vm3881_vm13, %v11903_v45, %v4382_v59  ;;  %v12578_v42 = vld [vmem:[#allocation9_spill] sm:$0xff]  ;;  %v11908_v45 = vrot.slane %v9217_v40, 1 }
 0x33e   : > { %12574 = vst [vmem:[#allocation330_spill] sm:$0xff] %v9237_v9  ;;  %5479 = vmatmul.msk.f32.gmra.mxu1 %vm655_vm0, %v9156_v60  ;;  %vm12579_vm2 = vcmp.ge.f32.partialorder %v12578_v42, 1.0 }
 0x33f   : > { %12575 = vst [vmem:[#allocation331_spill] sm:$0xff] %v9244_v50  ;;  %5541 = vmatmul.msk.f32.gmra.mxu3 %vm655_vm0, %v9006_v38  ;;  %v3637_v26 = vpop.permute.xlu2 %3636  ;;  %v9254_v61 = vpop.permute.xlu0 %3087  ;;  %vm4013_vm5 = vmand %vm12579_vm2, %vm11922_vm7 }
 0x340   : > { %12577 = vst [vmem:[#allocation332_spill] sm:$0xff] %v9254_v61  ;;  %vm3669_vm14 = vcmp.eq.s32.totalorder %v3637_v26, 1  ;;  %v4683_v49 = vpop.f32.mrf.mxu0  ;;  %v9263_v50 = vpop.permute.xlu1 %3916 }
 0x341   : > { %v3701_v46 = vsel %vm3669_vm14, %v9042_v52, 0.0  ;;  %v3765_v17 = vpop.f32.mrf.mxu2  ;;  %v4761_v30 = vrot.slane %v4683_v49, 1  ;;  %12581 = vst [vmem:[#allocation197_spill] sm:$0xff] %v9263_v50  ;;  %v4045_v49 = vsel %vm4013_vm5, 1, %v12072_v58 }
 0x342   : > { %v9265_v38 = vadd.f32 %v3701_v46, %v2908_v51  ;;  %v3853_v61 = vrot.slane %v3765_v17, 1  ;;  %v4291_v26 = vpop.f32.mrf.mxu3  ;;  %v12585_v46 = vld [vmem:[#allocation139_spill] sm:$0xff]  ;;  %v11910_v51 = vrot.slane %v12586_v27, 7  ;;  %v12598_v27 = vld [vmem:[#allocation146_spill] sm:$0xff] }
 0x343   : > { %v4383_v9 = vrot.slane %v4291_v26, 1  ;;  %v9267_v62 = vpop.f32.mrf.mxu1  ;;  %5581 = vmatmul.msk.f32.gmra.mxu0 %vm655_vm0, %v9269_v37  ;;  %v9277_v52 = vsel %vm3881_vm13, %v11908_v45, %v4761_v30  ;;  %vm11921_vm3 = vcmp.ne.s32.totalorder %v12585_v46, 0  ;;  %3612 = vperm.xlu0 %5619, %v9120_v23   ;;  %v12588_v45 = vld [vmem:[#allocation182_spill] sm:$0xff]  ;;  %vm11920_vm5 = vcmp.ne.s32.totalorder %v12598_v27, 0 }
 0x344   : > { %12582 = vst [vmem:[#allocation333_spill] sm:$0xff] %v9265_v38  ;;  %v9282_v17 = vsel %vm3881_vm13, %v3852_v56, %v3853_v61  ;;  %5511 = vmatmul.msk.f32.gmra.mxu2 %vm655_vm0, %v9125_v12  ;;  %v12589_v56 = vrot.slane %v12588_v45, 7  ;;  %vm9311_vm15 = vmand %vm12591_vm12, %vm11921_vm3  ;;  %vm3644_vm12 = vcmp.eq.s32.totalorder %v8915_v19, 1  ;;  %v12600_v19 = vld [vmem:[#allocation172_spill] sm:$0xff]  ;;  %v12606_v38 = vld [vmem:[#allocation13_spill] sm:$0xff] }
 0x345   : > { %12583 = vst [vmem:[#allocation334_spill] sm:$0xff] %v9277_v52  ;;  %4084 = vperm.xlu2 %5615, %v4045_v49   ;;  %v9289_v26 = vsel %vm3881_vm13, %v4382_v59, %v4383_v9  ;;  %v12594_v52 = vld [vmem:[#allocation140_spill] sm:$0xff] }
 0x346   : > { %12584 = vst [vmem:[#allocation335_spill] sm:$0xff] %v9282_v17  ;;  %5480 = vmatmul.msk.f32.gmra.mxu1 %vm655_vm0, %v9195_v63  ;;  %v2279_v40 = vsel %vm11997_vm10, %v11910_v51, %v12589_v56  ;;  %vm2380_vm4 = vcmp.eq.s32.totalorder %v12594_v52, 1  ;;  %v9327_v17 = vld [vmem:[#allocation2 + $0xd0] sm:$0xff] }
 0x347   : > { %12587 = vst [vmem:[#allocation336_spill] sm:$0xff] %v9289_v26  ;;  %5542 = vmatmul.msk.f32.gmra.mxu3 %vm655_vm0, %v9044_v0  ;;  %v9303_v49 = vpop.permute.xlu2 %3918  ;;  %v9305_v59 = vpop.permute.xlu0 %3096  ;;  %v12595_v0 = vld [vmem:[#allocation8_spill] sm:$0xff] }
 0x348   : > { %12590 = vst [vmem:[#allocation182_spill] sm:$0xff] %v9305_v59  ;;  %vm3980_vm9 = vcmp.ne.s32.totalorder %v9303_v49, 0  ;;  %v4686_v45 = vpop.f32.mrf.mxu0  ;;  %vm12596_vm14 = vcmp.ge.f32.partialorder %v12595_v0, 1.0  ;;  %v9322_v26 = vpop.permute.xlu1 %3922  ;;  %v2412_v59 = vsel %vm2380_vm4, %v2279_v40, 0.0  ;;  %v2883_v40 = vsel %vm2851_vm6, %v8198_v24, 0.0 }
 0x349   : > { %vm4012_vm2 = vmand %vm12596_vm14, %vm3980_vm9  ;;  %v3768_v56 = vpop.f32.mrf.mxu2  ;;  %v4762_v51 = vrot.slane %v4686_v45, 1  ;;  %12597 = vst [vmem:[#allocation140_spill] sm:$0xff] %v9322_v26  ;;  %vm4543_vm4 = vcmp.eq.s32.totalorder %v12601_v44, 1 }
 0x34a   : > { %v4044_v28 = vsel %vm4012_vm2, 1, %v12072_v58  ;;  %v3854_v46 = vrot.slane %v3768_v56, 1  ;;  %v4294_v42 = vpop.f32.mrf.mxu3  ;;  %v3365_v56 = vadd.f32 %v12600_v19, %v2412_v59  ;;  %vm12607_vm2 = vcmp.ge.f32.partialorder %v12606_v38, 1.0  ;;  %v12610_v38 = vld [vmem:[#allocation234_spill] sm:$0xff] }
 0x34b   : > { %v4384_v23 = vrot.slane %v4294_v42, 1  ;;  %v3438_v52 = vpop.f32.mrf.mxu1  ;;  %4081 = vperm.xlu1 %5616, %v4044_v28   ;;  %5582 = vmatmul.msk.f32.gmra.mxu0 %vm655_vm0, %v9327_v17  ;;  %v9333_v45 = vsel %vm3881_vm13, %v4761_v30, %v4762_v51  ;;  %v4048_v42 = vsel %vm9311_vm15, 1, %v12072_v58  ;;  %vm12603_vm15 = vcmp.ge.f32.partialorder %v12092_v1, 1.0 }
 0x34c   : > { %12599 = vst [vmem:[#allocation8_spill] sm:$0xff] %v9333_v45  ;;  %v3676_v0 = vsel %vm3644_vm12, %v3438_v52, 0.0  ;;  %v9343_v28 = vsel %vm3881_vm13, %v3853_v61, %v3854_v46  ;;  %3621 = vperm.xlu0 %5619, %v9151_v16   ;;  %5512 = vmatmul.msk.f32.gmra.mxu2 %vm655_vm0, %v9156_v60  ;;  %vm4019_vm6 = vmand %vm12603_vm15, %vm11920_vm5  ;;  %vm3645_vm15 = vcmp.eq.s32.totalorder %v8948_v6, 1  ;;  %v12611_v6 = vld [vmem:[#allocation154_spill] sm:$0xff] }
 0x34d   : > { %v4441_v30 = vsel %vm3881_vm13, %v4383_v9, %v4384_v23  ;;  %v9349_v45 = vadd.f32 %v3676_v0, %v2883_v40  ;;  %4093 = vperm.xlu2 %5615, %v4048_v42   ;;  %v4051_v19 = vsel %vm4019_vm6, 1, %v12072_v58  ;;  %vm11930_vm6 = vcmp.ne.s32.totalorder %v9263_v50, 0 }
 0x34e   : > { %v4575_v24 = vsel %vm4543_vm4, %v4441_v30, 0.0  ;;  %5481 = vmatmul.msk.f32.gmra.mxu1 %vm655_vm0, %v9227_v10 }
 0x34f   : > { %12602 = vst [vmem:[#allocation172_spill] sm:$0xff] %v9349_v45  ;;  %5543 = vmatmul.msk.f32.gmra.mxu3 %vm655_vm0, %v9082_v57  ;;  %v9362_v29 = vpop.permute.xlu2 %3924  ;;  %v9364_v44 = vpop.permute.xlu0 %3105  ;;  %v9366_v9 = vadd.f32 %v4575_v24, %v3365_v56  ;;  %v12608_v56 = vld [vmem:[#allocation216_spill] sm:$0xff]  ;;  %v9379_v45 = vld [vmem:[#allocation2 + $0xd8] sm:$0xff] }
 0x350   : > { %12604 = vst [vmem:[#allocation199_spill] sm:$0xff] %v9362_v29  ;;  %vm11918_vm14 = vcmp.ne.s32.totalorder %v9362_v29, 0  ;;  %v4689_v61 = vpop.f32.mrf.mxu0  ;;  %v9373_v40 = vpop.permute.xlu1 %3928  ;;  %vm2852_vm4 = vcmp.eq.s32.totalorder %v12608_v56, 1  ;;  %v12617_v56 = vld [vmem:[#allocation107_spill] sm:$0xff] }
 0x351   : > { %12605 = vst [vmem:[#allocation337_spill] sm:$0xff] %v9364_v44  ;;  %vm4015_vm12 = vmand %vm12607_vm2, %vm11918_vm14  ;;  %v3771_v59 = vpop.f32.mrf.mxu2  ;;  %v4763_v52 = vrot.slane %v4689_v61, 1  ;;  %vm11932_vm2 = vcmp.ne.s32.totalorder %v12611_v6, 0 }
 0x352   : > { %v4047_v57 = vsel %vm4015_vm12, 1, %v12072_v58  ;;  %v3855_v0 = vrot.slane %v3771_v59, 1  ;;  %v4297_v42 = vpop.f32.mrf.mxu3  ;;  %v2884_v59 = vsel %vm2852_vm4, %v12610_v38, 0.0  ;;  %v12622_v38 = vld [vmem:[#allocation19_spill] sm:$0xff] }
 0x353   : > { %v4385_v30 = vrot.slane %v4297_v42, 1  ;;  %v3441_v24 = vpop.f32.mrf.mxu1  ;;  %4090 = vperm.xlu1 %5616, %v4047_v57   ;;  %5583 = vmatmul.msk.f32.gmra.mxu0 %vm655_vm0, %v9379_v45  ;;  %v9385_v61 = vsel %vm3881_vm13, %v4762_v51, %v4763_v52  ;;  %vm12623_vm3 = vcmp.ge.f32.partialorder %v12622_v38, 1.0  ;;  %v9437_v38 = vld [vmem:[#allocation2 + $0xe0] sm:$0xff] }
 0x354   : > { %12609 = vst [vmem:[#allocation13_spill] sm:$0xff] %v9385_v61  ;;  %v3677_v29 = vsel %vm3645_vm15, %v3441_v24, 0.0  ;;  %v9391_v42 = vsel %vm3881_vm13, %v3854_v46, %v3855_v0  ;;  %3630 = vperm.xlu0 %5619, %v9191_v11   ;;  %5513 = vmatmul.msk.f32.gmra.mxu2 %vm655_vm0, %v9195_v63  ;;  %vm2026_vm15 = vcmp.eq.s32.totalorder %v12617_v56, 1  ;;  %v12625_v61 = vld [vmem:[#allocation35_spill] sm:$0xff] }
 0x355   : > { %v9394_v57 = vadd.f32 %v3677_v29, %v2884_v59  ;;  %4102 = vperm.xlu2 %5615, %v4051_v19   ;;  %v9399_v51 = vsel %vm3881_vm13, %v4384_v23, %v4385_v30  ;;  %v12615_v19 = vld [vmem:[#allocation3_spill] sm:$0xff] }
 0x356   : > { %12613 = vst [vmem:[#allocation234_spill] sm:$0xff] %v9399_v51  ;;  %5482 = vmatmul.msk.f32.gmra.mxu1 %vm655_vm0, %v9269_v37  ;;  %vm12616_vm12 = vcmp.ge.f32.partialorder %v12615_v19, 1.0  ;;  %v12618_v23 = vld [vmem:[#allocation27_spill] sm:$0xff]  ;;  %v12624_v19 = vld [vmem:[#allocation144_spill] sm:$0xff] }
 0x357   : > { %12612 = vst [vmem:[#allocation216_spill] sm:$0xff] %v9394_v57  ;;  %5544 = vmatmul.msk.f32.gmra.mxu3 %vm655_vm0, %v9125_v12  ;;  %v9407_v46 = vpop.permute.xlu2 %3930  ;;  %v3115_v29 = vpop.permute.xlu0 %3114  ;;  %vm4011_vm4 = vmand %vm12616_vm12, %vm11930_vm6  ;;  %vm12619_vm11 = vcmp.ge.f32.partialorder %v12618_v23, 1.0  ;;  %v2058_v56 = vsel %vm2026_vm15, %v12624_v19, 0.0  ;;  %v12636_v19 = vld [vmem:[#allocation33_spill] sm:$0xff] }
 0x358   : > { %12614 = vst [vmem:[#allocation338_spill] sm:$0xff] %v9407_v46  ;;  %vm9418_vm14 = vmand %vm12619_vm11, %vm11932_vm2  ;;  %vm11929_vm8 = vcmp.ne.s32.totalorder %v9407_v46, 0  ;;  %vm3171_vm5 = vcmp.eq.s32.totalorder %v3115_v29, 1  ;;  %v4692_v12 = vpop.f32.mrf.mxu0  ;;  %v4043_v29 = vsel %vm4011_vm4, 1, %v12072_v58  ;;  %v9433_v6 = vpop.permute.xlu1 %3934  ;;  %vm11931_vm11 = vcmp.ne.s32.totalorder %v9322_v26, 0 }
 0x359   : > { %vm4018_vm7 = vmand %vm12623_vm3, %vm11929_vm8  ;;  %v3774_v59 = vpop.f32.mrf.mxu2  ;;  %v3203_v57 = vsel %vm3171_vm5, %v12625_v61, 0.0  ;;  %v4764_v51 = vrot.slane %v4692_v12, 1  ;;  %vm12637_vm12 = vcmp.ge.f32.partialorder %v12636_v19, 1.0 }
 0x35a   : > { %v4050_v44 = vsel %vm4018_vm7, 1, %v12072_v58  ;;  %v3856_v11 = vrot.slane %v3774_v59, 1  ;;  %v4300_v50 = vpop.f32.mrf.mxu3  ;;  %v9430_v23 = vadd.f32 %v3203_v57, %v2058_v56  ;;  %v4054_v57 = vsel %vm9418_vm14, 1, %v12072_v58  ;;  %v12632_v59 = vld [vmem:[#allocation6_spill] sm:$0xff] }
 0x35b   : > { %v4386_v46 = vrot.slane %v4300_v50, 1  ;;  %v9435_v1 = vpop.f32.mrf.mxu1  ;;  %4099 = vperm.xlu1 %5616, %v4050_v44   ;;  %5584 = vmatmul.msk.f32.gmra.mxu0 %vm655_vm0, %v9437_v38  ;;  %v9443_v61 = vsel %vm3881_vm13, %v4763_v52, %v4764_v51  ;;  %v12628_v44 = vld [vmem:[#allocation163_spill] sm:$0xff]  ;;  %v12630_v52 = vld [vmem:[#allocation112_spill] sm:$0xff]  ;;  %vm12633_vm5 = vcmp.ge.f32.partialorder %v12632_v59, 1.0  ;;  %v12642_v59 = vld [vmem:[#allocation25_spill] sm:$0xff] }
 0x35c   : > { %12626 = vst [vmem:[#allocation3_spill] sm:$0xff] %v9430_v23  ;;  %v9451_v50 = vsel %vm3881_vm13, %v3855_v0, %v3856_v11  ;;  %vm11942_vm7 = vcmp.ne.s32.totalorder %v12628_v44, 0  ;;  %4078 = vperm.xlu0 %5619, %v4043_v29   ;;  %5514 = vmatmul.msk.f32.gmra.mxu2 %vm655_vm0, %v9227_v10  ;;  %vm2029_vm3 = vcmp.eq.s32.totalorder %v12630_v52, 1  ;;  %vm9471_vm14 = vmand %vm12633_vm5, %vm11931_vm11  ;;  %v12641_v52 = vld [vmem:[#allocation170_spill] sm:$0xff]  ;;  %vm2854_vm5 = vcmp.eq.s32.totalorder %v8827_v8, 1  ;;  %v12649_v8 = vld [vmem:[#allocation39_spill] sm:$0xff] }
 0x35d   : > { %12627 = vst [vmem:[#allocation107_spill] sm:$0xff] %v9443_v61  ;;  %4111 = vperm.xlu2 %5615, %v4054_v57   ;;  %v9456_v12 = vsel %vm3881_vm13, %v4385_v30, %v4386_v46  ;;  %vm9479_vm4 = vmand %vm12637_vm12, %vm11942_vm7  ;;  %vm11941_vm6 = vcmp.ne.s32.totalorder %v12641_v52, 0  ;;  %vm12643_vm11 = vcmp.ge.f32.partialorder %v12642_v59, 1.0  ;;  %v9499_v59 = vld [vmem:[#allocation2 + $0xe8] sm:$0xff] }
 0x35e   : > { %12629 = vst [vmem:[#allocation19_spill] sm:$0xff] %v9456_v12  ;;  %5483 = vmatmul.msk.f32.gmra.mxu1 %vm655_vm0, %v9327_v17 }
 0x35f   : > { %5545 = vmatmul.msk.f32.gmra.mxu3 %vm655_vm0, %v9156_v60  ;;  %v9465_v0 = vpop.permute.xlu2 %3936  ;;  %v3124_v24 = vpop.permute.xlu0 %3123  ;;  %v12640_v60 = vld [vmem:[#allocation167_spill] sm:$0xff] }
 0x360   : > { %12631 = vst [vmem:[#allocation144_spill] sm:$0xff] %v9465_v0  ;;  %vm11937_vm15 = vcmp.ne.s32.totalorder %v9465_v0, 0  ;;  %v2061_v29 = vsel %vm2029_vm3, %v12640_v60, 0.0  ;;  %vm3174_vm8 = vcmp.eq.s32.totalorder %v3124_v24, 1  ;;  %v4695_v57 = vpop.f32.mrf.mxu0  ;;  %v4046_v24 = vsel %vm9471_vm14, 1, %v12072_v58 }
 0x361   : > { %vm4021_vm2 = vmand %vm12643_vm11, %vm11937_vm15  ;;  %v3777_v61 = vpop.f32.mrf.mxu2  ;;  %v3206_v23 = vsel %vm3174_vm8, %v8731_v15, 0.0  ;;  %v4765_v12 = vrot.slane %v4695_v57, 1  ;;  %vm3647_vm3 = vcmp.eq.s32.totalorder %v8954_v47, 1  ;;  %v4057_v15 = vsel %vm9479_vm4, 1, %v12072_v58  ;;  %v9514_v47 = vpop.permute.xlu1 %3940  ;;  %v12655_v57 = vld [vmem:[#allocation12_spill] sm:$0xff] }
 0x362   : > { %v4053_v26 = vsel %vm4021_vm2, 1, %v12072_v58  ;;  %v3857_v19 = vrot.slane %v3777_v61, 1  ;;  %v4303_v44 = vpop.f32.mrf.mxu3  ;;  %v9493_v60 = vadd.f32 %v3206_v23, %v2061_v29  ;;  %v12646_v61 = vld [vmem:[#allocation244_spill] sm:$0xff]  ;;  %vm3985_vm8 = vcmp.ne.s32.totalorder %v9373_v40, 0 }
 0x363   : > { %v4387_v27 = vrot.slane %v4303_v44, 1  ;;  %v3447_v16 = vpop.f32.mrf.mxu1  ;;  %4108 = vperm.xlu1 %5616, %v4053_v26   ;;  %5585 = vmatmul.msk.f32.gmra.mxu0 %vm655_vm0, %v9499_v59  ;;  %v9508_v23 = vsel %vm3881_vm13, %v4764_v51, %v4765_v12  ;;  %v2886_v44 = vsel %vm2854_vm5, %v12646_v61, 0.0  ;;  %vm12650_vm2 = vcmp.ge.f32.partialorder %v12649_v8, 1.0 }
 0x364   : > { %12644 = vst [vmem:[#allocation35_spill] sm:$0xff] %v9493_v60  ;;  %v3679_v30 = vsel %vm3647_vm3, %v3447_v16, 0.0  ;;  %v9518_v26 = vsel %vm3881_vm13, %v3856_v11, %v3857_v19  ;;  %4087 = vperm.xlu0 %5619, %v4046_v24   ;;  %vm9530_vm11 = vmand %vm12650_vm2, %vm11941_vm6  ;;  %5515 = vmatmul.msk.f32.gmra.mxu2 %vm655_vm0, %v9269_v37  ;;  %v12653_v11 = vld [vmem:[#allocation118_spill] sm:$0xff]  ;;  %vm12656_vm12 = vcmp.ge.f32.partialorder %v12655_v57, 1.0  ;;  %v12657_v24 = vld [vmem:[#allocation183_spill] sm:$0xff] }
 0x365   : > { %12645 = vst [vmem:[#allocation112_spill] sm:$0xff] %v9508_v23  ;;  %v9520_v29 = vadd.f32 %v3679_v30, %v2886_v44  ;;  %4120 = vperm.xlu2 %5615, %v4057_v15   ;;  %v9524_v51 = vsel %vm3881_vm13, %v4386_v46, %v4387_v27  ;;  %vm2032_vm14 = vcmp.eq.s32.totalorder %v12653_v11, 1  ;;  %vm4017_vm4 = vmand %vm12656_vm12, %vm3985_vm8  ;;  %v12658_v44 = vld [vmem:[#allocation206_spill] sm:$0xff]  ;;  %v12659_v11 = vld [vmem:[#allocation31_spill] sm:$0xff]  ;;  %v4060_v57 = vsel %vm9530_vm11, 1, %v12072_v58 }
 0x366   : > { %12648 = vst [vmem:[#allocation167_spill] sm:$0xff] %v9524_v51  ;;  %5484 = vmatmul.msk.f32.gmra.mxu1 %vm655_vm0, %v9379_v45  ;;  %v2064_v15 = vsel %vm2032_vm14, %v12657_v24, 0.0  ;;  %vm12660_vm2 = vcmp.ge.f32.partialorder %v12659_v11, 1.0  ;;  %v4049_v30 = vsel %vm4017_vm4, 1, %v12072_v58  ;;  %vm3648_vm12 = vcmp.eq.s32.totalorder %v8985_v14, 1  ;;  %v12666_v14 = vld [vmem:[#allocation175_spill] sm:$0xff] }
 0x367   : > { %12647 = vst [vmem:[#allocation6_spill] sm:$0xff] %v9520_v29  ;;  %5546 = vmatmul.msk.f32.gmra.mxu3 %vm655_vm0, %v9195_v63  ;;  %v9541_v46 = vpop.permute.xlu2 %3942  ;;  %v3133_v56 = vpop.permute.xlu0 %3132  ;;  %vm11947_vm11 = vcmp.ne.s32.totalorder %v12666_v14, 0 }
 0x368   : > { %12654 = vst [vmem:[#allocation25_spill] sm:$0xff] %v9541_v46  ;;  %vm11940_vm5 = vcmp.ne.s32.totalorder %v9541_v46, 0  ;;  %vm3177_vm3 = vcmp.eq.s32.totalorder %v3133_v56, 1  ;;  %v4698_v61 = vpop.f32.mrf.mxu0  ;;  %v12662_v46 = vld [vmem:[#allocation220_spill] sm:$0xff] }
 0x369   : > { %vm4024_vm15 = vmand %vm12660_vm2, %vm11940_vm5  ;;  %v3780_v63 = vpop.f32.mrf.mxu2  ;;  %v3209_v29 = vsel %vm3177_vm3, %v8835_v36, 0.0  ;;  %v4766_v23 = vrot.slane %v4698_v61, 1  ;;  %vm2855_vm14 = vcmp.eq.s32.totalorder %v12662_v46, 1  ;;  %v9564_v36 = vld [vmem:[#allocation2 + $0xf0] sm:$0xff] }
 0x36a   : > { %v4056_v51 = vsel %vm4024_vm15, 1, %v12072_v58  ;;  %v3858_v24 = vrot.slane %v3780_v63, 1  ;;  %v4306_v56 = vpop.f32.mrf.mxu3  ;;  %v9559_v0 = vadd.f32 %v3209_v29, %v2064_v15  ;;  %v12664_v29 = vld [vmem:[#allocation249_spill] sm:$0xff]  ;;  %vm3988_vm15 = vcmp.ne.s32.totalorder %v9433_v6, 0 }
 0x36b   : > { %v4388_v11 = vrot.slane %v4306_v56, 1  ;;  %v3450_v60 = vpop.f32.mrf.mxu1  ;;  %4117 = vperm.xlu1 %5616, %v4056_v51   ;;  %5586 = vmatmul.msk.f32.gmra.mxu0 %vm655_vm0, %v9564_v36  ;;  %v9570_v16 = vsel %vm3881_vm13, %v4765_v12, %v4766_v23  ;;  %v2887_v15 = vsel %vm2855_vm14, %v12664_v29, 0.0  ;;  %v12669_v12 = vld [vmem:[#allocation211_spill] sm:$0xff] }
 0x36c   : > { %12661 = vst [vmem:[#allocation244_spill] sm:$0xff] %v9559_v0  ;;  %v3680_v61 = vsel %vm3648_vm12, %v3450_v60, 0.0  ;;  %v9576_v46 = vsel %vm3881_vm13, %v3857_v19, %v3858_v24  ;;  %4096 = vperm.xlu0 %5619, %v4049_v30   ;;  %v12670_v56 = vrot.slane %v12669_v12, 7  ;;  %v12671_v60 = vrot.slane %v12658_v44, 7  ;;  %5516 = vmatmul.msk.f32.gmra.mxu2 %vm655_vm0, %v9327_v17  ;;  %v9595_v19 = vpop.permute.xlu1 %3946  ;;  %v12678_v12 = vld [vmem:[#allocation155_spill] sm:$0xff] }
 0x36d   : > { %12663 = vst [vmem:[#allocation118_spill] sm:$0xff] %v9570_v16  ;;  %v9579_v51 = vadd.f32 %v3680_v61, %v2887_v15  ;;  %4129 = vperm.xlu2 %5615, %v4060_v57   ;;  %v9583_v63 = vsel %vm3881_vm13, %v4387_v27, %v4388_v11  ;;  %v12673_v57 = vld [vmem:[#allocation18_spill] sm:$0xff]  ;;  %v12677_v61 = vld [vmem:[#allocation125_spill] sm:$0xff]  ;;  %vm2385_vm14 = vcmp.eq.s32.totalorder %v12678_v12, 1  ;;  %v12685_v12 = vld [vmem:[#allocation168_spill] sm:$0xff] }
 0x36e   : > { %12665 = vst [vmem:[#allocation12_spill] sm:$0xff] %v9576_v46  ;;  %v2274_v29 = vsel %vm11997_vm10, %v12671_v60, %v12670_v56  ;;  %5485 = vmatmul.msk.f32.gmra.mxu1 %vm655_vm0, %v9437_v38  ;;  %vm12674_vm4 = vcmp.ge.f32.partialorder %v12673_v57, 1.0  ;;  %vm2035_vm2 = vcmp.eq.s32.totalorder %v12677_v61, 1  ;;  %v12679_v56 = vld [vmem:[#allocation45_spill] sm:$0xff] }
 0x36f   : > { %12667 = vst [vmem:[#allocation183_spill] sm:$0xff] %v9579_v51  ;;  %5547 = vmatmul.msk.f32.gmra.mxu3 %vm655_vm0, %v9227_v10  ;;  %v9599_v27 = vpop.permute.xlu2 %3948  ;;  %v3142_v30 = vpop.permute.xlu0 %3141  ;;  %vm9605_vm3 = vmand %vm12674_vm4, %vm3988_vm15  ;;  %vm12680_vm12 = vcmp.ge.f32.partialorder %v12679_v56, 1.0  ;;  %v2417_v57 = vsel %vm2385_vm14, %v2274_v29, 0.0  ;;  %v12683_v16 = vld [vmem:[#allocation37_spill] sm:$0xff]  ;;  %v2067_v51 = vsel %vm2035_vm2, %v12685_v12, 0.0 }
 0x370   : > { %12668 = vst [vmem:[#allocation31_spill] sm:$0xff] %v9583_v63  ;;  %vm9615_vm5 = vmand %vm12680_vm12, %vm11947_vm11  ;;  %vm11948_vm6 = vcmp.ne.s32.totalorder %v9599_v27, 0  ;;  %vm3180_vm7 = vcmp.eq.s32.totalorder %v3142_v30, 1  ;;  %v4701_v60 = vpop.f32.mrf.mxu0  ;;  %vm12684_vm4 = vcmp.ge.f32.partialorder %v12683_v16, 1.0  ;;  %v4052_v29 = vsel %vm9605_vm3, 1, %v12072_v58  ;;  %v9634_v16 = vld [vmem:[#allocation2 + $0xf8] sm:$0xff] }
 0x371   : > { %12672 = vst [vmem:[#allocation220_spill] sm:$0xff] %v9599_v27  ;;  %vm4027_vm1 = vmand %vm12684_vm4, %vm11948_vm6  ;;  %v3783_v61 = vpop.f32.mrf.mxu2  ;;  %v3212_v14 = vsel %vm3180_vm7, %v8959_v34, 0.0  ;;  %v4767_v56 = vrot.slane %v4701_v60, 1  ;;  %v12690_v15 = vld [vmem:[#allocation201_spill] sm:$0xff] }
 0x372   : > { %v4059_v0 = vsel %vm4027_vm1, 1, %v12072_v58  ;;  %v3859_v63 = vrot.slane %v3783_v61, 1  ;;  %v4309_v8 = vpop.f32.mrf.mxu3  ;;  %v9627_v52 = vadd.f32 %v3212_v14, %v2067_v51  ;;  %v4063_v14 = vsel %vm9615_vm5, 1, %v12072_v58  ;;  %v12689_v51 = vld [vmem:[#allocation70_spill] sm:$0xff] }
 0x373   : > { %v4389_v30 = vrot.slane %v4309_v8, 1  ;;  %v9632_v27 = vpop.f32.mrf.mxu1  ;;  %4126 = vperm.xlu1 %5616, %v4059_v0   ;;  %5587 = vmatmul.msk.f32.gmra.mxu0 %vm655_vm0, %v9634_v16  ;;  %v9640_v34 = vsel %vm3881_vm13, %v4766_v23, %v4767_v56  ;;  %vm11959_vm1 = vcmp.ne.s32.totalorder %v9514_v47, 0  ;;  %v12688_v0 = vld [vmem:[#allocation179_spill] sm:$0xff]  ;;  %vm4548_vm3 = vcmp.eq.s32.totalorder %v12689_v51, 1 }
 0x374   : > { %12686 = vst [vmem:[#allocation249_spill] sm:$0xff] %v9627_v52  ;;  %v9648_v8 = vsel %vm3881_vm13, %v3858_v24, %v3859_v63  ;;  %vm11953_vm7 = vcmp.ne.s32.totalorder %v12688_v0, 0  ;;  %v3370_v60 = vadd.f32 %v12690_v15, %v2417_v57  ;;  %4105 = vperm.xlu0 %5619, %v4052_v29   ;;  %5517 = vmatmul.msk.f32.gmra.mxu2 %vm655_vm0, %v9379_v45  ;;  %v12692_v57 = vld [vmem:[#allocation24_spill] sm:$0xff]  ;;  %v9683_v15 = vpop.permute.xlu1 %3952 }
 0x375   : > { %12687 = vst [vmem:[#allocation211_spill] sm:$0xff] %v9640_v34  ;;  %v4436_v23 = vsel %vm3881_vm13, %v4388_v11, %v4389_v30  ;;  %4138 = vperm.xlu2 %5615, %v4063_v14   ;;  %vm12693_vm5 = vcmp.ge.f32.partialorder %v12692_v57, 1.0  ;;  %v12696_v29 = vld [vmem:[#allocation132_spill] sm:$0xff]  ;;  %v12697_v14 = vld [vmem:[#allocation51_spill] sm:$0xff] }
 0x376   : > { %v4580_v61 = vsel %vm4548_vm3, %v4436_v23, 0.0  ;;  %5486 = vmatmul.msk.f32.gmra.mxu1 %vm655_vm0, %v9499_v59  ;;  %vm9667_vm2 = vmand %vm12693_vm5, %vm11959_vm1  ;;  %vm2038_vm14 = vcmp.eq.s32.totalorder %v12696_v29, 1  ;;  %vm12698_vm12 = vcmp.ge.f32.partialorder %v12697_v14, 1.0 }
 0x377   : > { %5548 = vmatmul.msk.f32.gmra.mxu3 %vm655_vm0, %v9269_v37  ;;  %v9661_v24 = vpop.permute.xlu2 %3954  ;;  %v3151_v10 = vpop.permute.xlu0 %3150  ;;  %v9671_v12 = vadd.f32 %v4580_v61, %v3370_v60  ;;  %vm9678_vm4 = vmand %vm12698_vm12, %vm11953_vm7  ;;  %v12701_v60 = vld [vmem:[#allocation43_spill] sm:$0xff]  ;;  %v12703_v61 = vld [vmem:[#allocation184_spill] sm:$0xff] }
 0x378   : > { %12691 = vst [vmem:[#allocation18_spill] sm:$0xff] %v9661_v24  ;;  %vm11954_vm3 = vcmp.ne.s32.totalorder %v9661_v24, 0  ;;  %vm3183_vm11 = vcmp.eq.s32.totalorder %v3151_v10, 1  ;;  %v4704_v51 = vpop.f32.mrf.mxu0  ;;  %vm12702_vm5 = vcmp.ge.f32.partialorder %v12701_v60, 1.0  ;;  %v2070_v57 = vsel %vm2038_vm14, %v12703_v61, 0.0  ;;  %v12705_v24 = vld [vmem:[#allocation186_spill] sm:$0xff] }
 0x379   : > { %vm4030_vm6 = vmand %vm12702_vm5, %vm11954_vm3  ;;  %v3786_v23 = vpop.f32.mrf.mxu2  ;;  %v3215_v29 = vsel %vm3183_vm11, %v9073_v21, 0.0  ;;  %v4768_v34 = vrot.slane %v4704_v51, 1  ;;  %v4055_v10 = vsel %vm9667_vm2, 1, %v12072_v58  ;;  %vm11952_vm12 = vcmp.ne.s32.totalorder %v12705_v24, 0  ;;  %v12717_v37 = vld [vmem:[#allocation11_spill] sm:$0xff] }
 0x37a   : > { %v4062_v14 = vsel %vm4030_vm6, 1, %v12072_v58  ;;  %v3860_v0 = vrot.slane %v3786_v23, 1  ;;  %v4312_v52 = vpop.f32.mrf.mxu3  ;;  %v9692_v46 = vadd.f32 %v3215_v29, %v2070_v57  ;;  %vm3650_vm5 = vcmp.eq.s32.totalorder %v8991_v43, 1  ;;  %v12718_v29 = vld [vmem:[#allocation218_spill] sm:$0xff] }
 0x37b   : > { %v4390_v60 = vrot.slane %v4312_v52, 1  ;;  %v3456_v44 = vpop.f32.mrf.mxu1  ;;  %4135 = vperm.xlu1 %5616, %v4062_v14   ;;  %v9701_v21 = vsel %vm3881_vm13, %v4767_v56, %v4768_v34  ;;  %v4066_v23 = vsel %vm9678_vm4, 1, %v12072_v58  ;;  %vm11958_vm6 = vcmp.ne.s32.totalorder %v9595_v19, 0  ;;  %v12715_v14 = vld [vmem:[#allocation30_spill] sm:$0xff]  ;;  %v12724_v56 = vld [vmem:[#allocation264_spill] sm:$0xff] }
 0x37c   : > { %12704 = vst [vmem:[#allocation125_spill] sm:$0xff] %v9692_v46  ;;  %v3682_v51 = vsel %vm3650_vm5, %v3456_v44, 0.0  ;;  %v9709_v11 = vsel %vm3881_vm13, %v3859_v63, %v3860_v0  ;;  %4114 = vperm.xlu0 %5619, %v4055_v10   ;;  %v12709_v44 = vld [vmem:[#allocation57_spill] sm:$0xff]  ;;  %5518 = vmatmul.msk.f32.gmra.mxu2 %vm655_vm0, %v9437_v38  ;;  %vm12716_vm4 = vcmp.ge.f32.partialorder %v12715_v14, 1.0 }
 0x37d   : > { %12706 = vst [vmem:[#allocation155_spill] sm:$0xff] %v9701_v21  ;;  %v9712_v52 = vadd.f32 %v3682_v51, %v8865_v2  ;;  %4147 = vperm.xlu2 %5615, %v4066_v23   ;;  %v9716_v43 = vsel %vm3881_vm13, %v4389_v30, %v4390_v60  ;;  %vm12710_vm11 = vcmp.ge.f32.partialorder %v12709_v44, 1.0  ;;  %v12713_v2 = vld [vmem:[#allocation209_spill] sm:$0xff]  ;;  %vm4026_vm5 = vmand %vm12716_vm4, %vm11958_vm6  ;;  %v9754_v44 = vpop.permute.xlu1 %3958 }
 0x37e   : > { %12708 = vst [vmem:[#allocation168_spill] sm:$0xff] %v9716_v43  ;;  %vm9722_vm2 = vmand %vm12710_vm11, %vm11952_vm12  ;;  %5487 = vmatmul.msk.f32.gmra.mxu1 %vm655_vm0, %v9564_v36  ;;  %vm2847_vm14 = vcmp.eq.s32.totalorder %v12713_v2, 1  ;;  %v12719_v51 = vld [vmem:[#allocation49_spill] sm:$0xff]  ;;  %v4058_v10 = vsel %vm4026_vm5, 1, %v12072_v58 }
 0x37f   : > { %12707 = vst [vmem:[#allocation37_spill] sm:$0xff] %v9712_v52  ;;  %5549 = vmatmul.msk.f32.gmra.mxu3 %vm655_vm0, %v9327_v17  ;;  %v9733_v63 = vpop.permute.xlu2 %3960  ;;  %v3550_v30 = vpop.permute.xlu0 %3549  ;;  %v2879_v61 = vsel %vm2847_vm14, %v12717_v37, 0.0  ;;  %vm12720_vm7 = vcmp.ge.f32.partialorder %v12719_v51, 1.0  ;;  %v4069_v14 = vsel %vm9722_vm2, 1, %v12072_v58  ;;  %v12722_v51 = vld [vmem:[#allocation67_spill] sm:$0xff] }
 0x380   : > { %12714 = vst [vmem:[#allocation70_spill] sm:$0xff] %v9733_v63  ;;  %vm11957_vm11 = vcmp.ne.s32.totalorder %v9733_v63, 0  ;;  %vm3640_vm12 = vcmp.eq.s32.totalorder %v3550_v30, 1  ;;  %v4707_v57 = vpop.f32.mrf.mxu0 }
 0x381   : > { %vm4033_vm3 = vmand %vm12720_vm7, %vm11957_vm11  ;;  %v3789_v17 = vpop.f32.mrf.mxu2  ;;  %v3672_v23 = vsel %vm3640_vm12, %v9154_v32, 0.0  ;;  %v4769_v2 = vrot.slane %v4707_v57, 1  ;;  %vm2858_vm7 = vcmp.eq.s32.totalorder %v12722_v51, 1  ;;  %vm3651_vm12 = vcmp.eq.s32.totalorder %v9023_v35, 1 }
 0x382   : > { %v4065_v52 = vsel %vm4033_vm3, 1, %v12072_v58  ;;  %v3861_v37 = vrot.slane %v3789_v17, 1  ;;  %v4315_v30 = vpop.f32.mrf.mxu3  ;;  %v9751_v21 = vadd.f32 %v3672_v23, %v2879_v61  ;;  %v2890_v57 = vsel %vm2858_vm7, %v12724_v56, 0.0  ;;  %v12725_v23 = vld [vmem:[#allocation191_spill] sm:$0xff]  ;;  %v12735_v56 = vld [vmem:[#allocation164_spill] sm:$0xff] }
 0x383   : > { %v4391_v24 = vrot.slane %v4315_v30, 1  ;;  %v3459_v63 = vpop.f32.mrf.mxu1  ;;  %4144 = vperm.xlu1 %5616, %v4065_v52   ;;  %v9760_v32 = vsel %vm3881_vm13, %v4768_v34, %v4769_v2  ;;  %vm11960_vm3 = vcmp.ne.s32.totalorder %v9683_v15, 0  ;;  %vm11968_vm2 = vcmp.ne.s32.totalorder %v12725_v23, 0  ;;  %v12727_v34 = vld [vmem:[#allocation222_spill] sm:$0xff] }
 0x384   : > { %12721 = vst [vmem:[#allocation201_spill] sm:$0xff] %v9751_v21  ;;  %v3683_v17 = vsel %vm3651_vm12, %v3459_v63, 0.0  ;;  %v9766_v61 = vsel %vm3881_vm13, %v3860_v0, %v3861_v37  ;;  %4123 = vperm.xlu0 %5619, %v4058_v10   ;;  %v12728_v52 = vrot.slane %v12727_v34, 7  ;;  %v12729_v63 = vrot.slane %v12718_v29, 7  ;;  %5519 = vmatmul.msk.f32.gmra.mxu2 %vm655_vm0, %v9499_v59  ;;  %v12731_v10 = vld [vmem:[#allocation36_spill] sm:$0xff] }
 0x385   : > { %12723 = vst [vmem:[#allocation24_spill] sm:$0xff] %v9760_v32  ;;  %v9769_v30 = vadd.f32 %v3683_v17, %v2890_v57  ;;  %4156 = vperm.xlu2 %5615, %v4069_v14   ;;  %v9773_v35 = vsel %vm3881_vm13, %v4390_v60, %v4391_v24  ;;  %vm12732_vm14 = vcmp.ge.f32.partialorder %v12731_v10, 1.0  ;;  %vm2388_vm5 = vcmp.eq.s32.totalorder %v12735_v56, 1  ;;  %v12736_v57 = vld [vmem:[#allocation63_spill] sm:$0xff]  ;;  %v12748_v14 = vld [vmem:[#allocation212_spill] sm:$0xff] }
 0x386   : > { %v2271_v51 = vsel %vm11997_vm10, %v12729_v63, %v12728_v52  ;;  %5488 = vmatmul.msk.f32.gmra.mxu1 %vm655_vm0, %v9634_v16  ;;  %vm9793_vm4 = vmand %vm12732_vm14, %vm11960_vm3  ;;  %vm12737_vm7 = vcmp.ge.f32.partialorder %v12736_v57, 1.0  ;;  %v12742_v63 = vld [vmem:[#allocation55_spill] sm:$0xff] }
 0x387   : > { %12726 = vst [vmem:[#allocation132_spill] sm:$0xff] %v9769_v30  ;;  %5550 = vmatmul.msk.f32.gmra.mxu3 %vm655_vm0, %v9379_v45  ;;  %v9787_v0 = vpop.permute.xlu2 %3966  ;;  %v3559_v60 = vpop.permute.xlu0 %3558  ;;  %vm9802_vm12 = vmand %vm12737_vm7, %vm11968_vm2  ;;  %v12740_v45 = vld [vmem:[#allocation76_spill] sm:$0xff]  ;;  %v2420_v52 = vsel %vm2388_vm5, %v2271_v51, 0.0  ;;  %vm12743_vm14 = vcmp.ge.f32.partialorder %v12742_v63, 1.0  ;;  %v12744_v56 = vld [vmem:[#allocation223_spill] sm:$0xff]  ;;  %v4061_v51 = vsel %vm9793_vm4, 1, %v12072_v58 }
 0x388   : > { %12730 = vst [vmem:[#allocation43_spill] sm:$0xff] %v9787_v0  ;;  %vm2850_vm11 = vcmp.eq.s32.totalorder %v12740_v45, 1  ;;  %vm11973_vm6 = vcmp.ne.s32.totalorder %v9787_v0, 0  ;;  %vm3643_vm1 = vcmp.eq.s32.totalorder %v3559_v60, 1  ;;  %v9808_v34 = vpop.f32.mrf.mxu0 }
 0x389   : > { %12741 = vst [vmem:[#allocation184_spill] sm:$0xff] %v9808_v34  ;;  %vm4036_vm3 = vmand %vm12743_vm14, %vm11973_vm6  ;;  %v3792_v10 = vpop.f32.mrf.mxu2  ;;  %v2882_v32 = vsel %vm2850_vm11, %v12744_v56, 0.0  ;;  %v3675_v30 = vsel %vm3643_vm1, %v9267_v62, 0.0  ;;  %v11963_v57 = vrot.slane %v9808_v34, 1  ;;  %vm4000_vm1 = vcmp.ne.s32.totalorder %v9754_v44, 0  ;;  %v12943_v44 = vld [vmem:[#allocation177_spill] sm:$0xff] }
 0x38a   : > { %v4068_v45 = vsel %vm4036_vm3, 1, %v12072_v58  ;;  %v3862_v23 = vrot.slane %v3792_v10, 1  ;;  %v4318_v21 = vpop.f32.mrf.mxu3  ;;  %v9818_v60 = vadd.f32 %v3675_v30, %v2882_v32  ;;  %v4072_v10 = vsel %vm9802_vm12, 1, %v12072_v58  ;;  %v9835_v32 = vpop.permute.xlu1 %3964  ;;  %v12747_v30 = vld [vmem:[#allocation7_spill] sm:$0xff] }
 0x38b   : > { %v4392_v0 = vrot.slane %v4318_v21, 1  ;;  %v9823_v63 = vpop.f32.mrf.mxu1  ;;  %4153 = vperm.xlu1 %5616, %v4068_v45   ;;  %v9829_v62 = vsel %vm3881_vm13, %v4769_v2, %v11963_v57  ;;  %vm4551_vm11 = vcmp.eq.s32.totalorder %v12747_v30, 1  ;;  %v3373_v56 = vadd.f32 %v12748_v14, %v2420_v52  ;;  %v12750_v30 = vld [vmem:[#allocation42_spill] sm:$0xff]  ;;  %v12756_v14 = vld [vmem:[#allocation239_spill] sm:$0xff] }
 0x38c   : > { %12745 = vst [vmem:[#allocation209_spill] sm:$0xff] %v9818_v60  ;;  %v9839_v21 = vsel %vm3881_vm13, %v3861_v37, %v3862_v23  ;;  %4132 = vperm.xlu0 %5619, %v4061_v51   ;;  %5520 = vmatmul.msk.f32.gmra.mxu2 %vm655_vm0, %v9564_v36  ;;  %vm12751_vm3 = vcmp.ge.f32.partialorder %v12750_v30, 1.0 }
 0x38d   : > { %12746 = vst [vmem:[#allocation30_spill] sm:$0xff] %v9829_v62  ;;  %v4433_v2 = vsel %vm3881_vm13, %v4391_v24, %v4392_v0  ;;  %4165 = vperm.xlu2 %5615, %v4072_v10   ;;  %vm4032_vm4 = vmand %vm12751_vm3, %vm4000_vm1  ;;  %v12752_v24 = vld [vmem:[#allocation80_spill] sm:$0xff]  ;;  %vm3653_vm3 = vcmp.eq.s32.totalorder %v9030_v33, 1 }
 0x38e   : > { %v4583_v45 = vsel %vm4551_vm11, %v4433_v2, 0.0  ;;  %vm2853_vm5 = vcmp.eq.s32.totalorder %v12752_v24, 1 }
 0x38f   : > { %5551 = vmatmul.msk.f32.gmra.mxu3 %vm655_vm0, %v9437_v38  ;;  %v9849_v17 = vpop.permute.xlu2 %3972  ;;  %v3568_v37 = vpop.permute.xlu0 %3567  ;;  %v9855_v52 = vadd.f32 %v4583_v45, %v3373_v56  ;;  %v12754_v38 = vld [vmem:[#allocation61_spill] sm:$0xff]  ;;  %v2885_v2 = vsel %vm2853_vm5, %v12756_v14, 0.0 }
 0x390   : > { %12749 = vst [vmem:[#allocation11_spill] sm:$0xff] %v9849_v17  ;;  %vm11967_vm7 = vcmp.ne.s32.totalorder %v9849_v17, 0  ;;  %vm3646_vm12 = vcmp.eq.s32.totalorder %v3568_v37, 1  ;;  %v9859_v51 = vpop.f32.mrf.mxu0  ;;  %vm12755_vm14 = vcmp.ge.f32.partialorder %v12754_v38, 1.0  ;;  %v4064_v37 = vsel %vm4032_vm4, 1, %v12072_v58  ;;  %v12768_v17 = vld [vmem:[#allocation231_spill] sm:$0xff] }
 0x391   : > { %12753 = vst [vmem:[#allocation218_spill] sm:$0xff] %v9859_v51  ;;  %vm4039_vm11 = vmand %vm12755_vm14, %vm11967_vm7  ;;  %v3795_v10 = vpop.f32.mrf.mxu2  ;;  %v3678_v30 = vsel %vm3646_vm12, %v9435_v1, 0.0  ;;  %vm4003_vm14 = vcmp.ne.s32.totalorder %v9835_v32, 0  ;;  %v13001_v32 = vld [vmem:[#allocation163_spill] sm:$0xff] }
 0x392   : > { %v4071_v56 = vsel %vm4039_vm11, 1, %v12072_v58  ;;  %v3863_v45 = vrot.slane %v3795_v10, 1  ;;  %v4321_v57 = vpop.f32.mrf.mxu3  ;;  %v9868_v24 = vadd.f32 %v3678_v30, %v2885_v2  ;;  %v12759_v10 = vmov 1   ;;  %v9888_v33 = vpop.permute.xlu1 %3970 }
 0x393   : > { %v4393_v60 = vrot.slane %v4321_v57, 1  ;;  %v3465_v62 = vpop.f32.mrf.mxu1  ;;  %4162 = vperm.xlu1 %5616, %v4071_v56   ;;  %v12762_v57 = vld [vmem:[#allocation48_spill] sm:$0xff]  ;;  %v12766_v56 = vld [vmem:[#allocation255_spill] sm:$0xff] }
 0x394   : > { %12757 = vst [vmem:[#allocation49_spill] sm:$0xff] %v9868_v24  ;;  %v3685_v38 = vsel %vm3653_vm3, %v3465_v62, 0.0  ;;  %v9875_v14 = vsel %vm3881_vm13, %v3862_v23, %v3863_v45  ;;  %4141 = vperm.xlu0 %5619, %v4064_v37   ;;  %5521 = vmatmul.msk.f32.gmra.mxu2 %vm655_vm0, %v9634_v16  ;;  %vm12763_vm4 = vcmp.ge.f32.partialorder %v12762_v57, 1.0  ;;  %vm2861_vm3 = vcmp.eq.s32.totalorder %v12768_v17, 1  ;;  %v12772_v17 = vld [vmem:[#allocation233_spill] sm:$0xff] }
 0x395   : > { %v9878_v1 = vadd.f32 %v3685_v38, %v8918_v3  ;;  %5618 = vset.pattern.permute.xlu2 %v12759_v10  ;;  %v9883_v2 = vsel %vm3881_vm13, %v4392_v0, %v4393_v60  ;;  %vm4035_vm5 = vmand %vm12763_vm4, %vm4003_vm14  ;;  %v12764_v0 = vld [vmem:[#allocation225_spill] sm:$0xff]  ;;  %vm3654_vm4 = vcmp.eq.s32.totalorder %v9063_v25, 1 }
 0x396   : > { %12760 = vst [vmem:[#allocation264_spill] sm:$0xff] %v9883_v2  ;;  %4449 = vperm.xlu2 %5618, %v8413_v39   ;;  %vm2856_vm12 = vcmp.eq.s32.totalorder %v12764_v0, 1  ;;  %v11969_v39 = vrot.slane %v9859_v51, 1  ;;  %v4067_v57 = vsel %vm4035_vm5, 1, %v12072_v58  ;;  %vm11982_vm5 = vcmp.ne.s32.totalorder %v9888_v33, 0  ;;  %v12794_v51 = vld [vmem:[#allocation116_spill] sm:$0xff] }
 0x397   : > { %12758 = vst [vmem:[#allocation67_spill] sm:$0xff] %v9878_v1  ;;  %5552 = vmatmul.msk.f32.gmra.mxu3 %vm655_vm0, %v9499_v59  ;;  %v9892_v23 = vpop.permute.xlu2 %4075  ;;  %v3577_v3 = vpop.permute.xlu0 %3576  ;;  %v2888_v37 = vsel %vm2856_vm12, %v12766_v56, 0.0 }
 0x398   : > { %12761 = vst [vmem:[#allocation222_spill] sm:$0xff] %v9892_v23  ;;  %vm3649_vm11 = vcmp.eq.s32.totalorder %v3577_v3, 1  ;;  %v9899_v62 = vpop.f32.mrf.mxu0  ;;  %v12839_v23 = vld [vmem:[#allocation283_spill] sm:$0xff] }
 0x399   : > { %12765 = vst [vmem:[#allocation36_spill] sm:$0xff] %v9899_v62  ;;  %v3798_v30 = vpop.f32.mrf.mxu2  ;;  %v3681_v59 = vsel %vm3649_vm11, %v9632_v27, 0.0  ;;  %v11966_v38 = vrot.slane %v9899_v62, 1 }
 0x39a   : > { %v3864_v24 = vrot.slane %v3798_v30, 1  ;;  %v4324_v1 = vpop.f32.mrf.mxu3  ;;  %v9905_v34 = vadd.f32 %v3681_v59, %v2888_v37  ;;  %v12770_v30 = vld [vmem:[#allocation278_spill] sm:$0xff]  ;;  %v12771_v59 = vld [vmem:[#allocation71_spill] sm:$0xff] }
 0x39b   : > { %v4394_v3 = vrot.slane %v4324_v1, 1  ;;  %v3468_v0 = vpop.f32.mrf.mxu1  ;;  %5617 = vset.pattern.permute.xlu1 %v12759_v10  ;;  %v9917_v27 = vsel %vm3881_vm13, %v11969_v39, %v11966_v38  ;;  %v2893_v56 = vsel %vm2861_vm3, %v12770_v30, 0.0  ;;  %v11970_v1 = vrot.slane %v12772_v17, 7 }
 0x39c   : > { %12767 = vst [vmem:[#allocation164_spill] sm:$0xff] %v9905_v34  ;;  %v3686_v37 = vsel %vm3654_vm4, %v3468_v0, 0.0  ;;  %4446 = vperm.xlu1 %5617, %v12771_v59   ;;  %v9924_v25 = vsel %vm3881_vm13, %v3863_v45, %v3864_v24  ;;  %4150 = vperm.xlu0 %5619, %v4067_v57   ;;  %v12774_v0 = vld [vmem:[#allocation238_spill] sm:$0xff] }
 0x39d   : > { %12769 = vst [vmem:[#allocation76_spill] sm:$0xff] %v9917_v27  ;;  %v9927_v10 = vadd.f32 %v3686_v37, %v2893_v56  ;;  %v9931_v38 = vsel %vm3881_vm13, %v4393_v60, %v4394_v3  ;;  %v12775_v30 = vrot.slane %v12774_v0, 7  ;;  %v12776_v57 = vld [vmem:[#allocation54_spill] sm:$0xff]  ;;  %v12778_v60 = vld [vmem:[#allocation229_spill] sm:$0xff]  ;;  %v12780_v37 = vld [vmem:[#allocation171_spill] sm:$0xff]  ;;  %v9955_v27 = vpop.permute.xlu1 %3976 }
 0x39e   : > { %4458 = vperm.xlu2 %5618, %v8463_v31   ;;  %vm12777_vm12 = vcmp.ge.f32.partialorder %v12776_v57, 1.0  ;;  %vm2859_vm3 = vcmp.eq.s32.totalorder %v12778_v60, 1  ;;  %vm2391_vm2 = vcmp.eq.s32.totalorder %v12780_v37, 1  ;;  %v12784_v37 = vld [vmem:[#allocation73_spill] sm:$0xff] }
 0x39f   : > { %12773 = vst [vmem:[#allocation55_spill] sm:$0xff] %v9927_v10  ;;  %v2268_v59 = vsel %vm11997_vm10, %v11970_v1, %v12775_v30  ;;  %5553 = vmatmul.msk.f32.gmra.mxu3 %vm655_vm0, %v9564_v36  ;;  %v4085_v45 = vpop.permute.xlu2 %4084  ;;  %v3586_v56 = vpop.permute.xlu0 %3585  ;;  %vm4038_vm11 = vmand %vm12777_vm12, %vm11982_vm5  ;;  %v12782_v36 = vld [vmem:[#allocation271_spill] sm:$0xff]  ;;  %vm11980_vm12 = vcmp.ne.s32.totalorder %v9955_v27, 0 }
 0x3a0   : > { %vm4173_vm4 = vcmp.eq.s32.totalorder %v4085_v45, 1  ;;  %vm3652_vm7 = vcmp.eq.s32.totalorder %v3586_v56, 1  ;;  %v9947_v31 = vpop.f32.mrf.mxu0  ;;  %v2891_v39 = vsel %vm2859_vm3, %v12782_v36, 0.0  ;;  %v2423_v57 = vsel %vm2391_vm2, %v2268_v59, 0.0  ;;  %v12786_v36 = vld [vmem:[#allocation226_spill] sm:$0xff] }
 0x3a1   : > { %12779 = vst [vmem:[#allocation223_spill] sm:$0xff] %v9947_v31  ;;  %v9951_v0 = vsel %vm4173_vm4, %v9201_v7, 0.0  ;;  %v3801_v30 = vpop.f32.mrf.mxu2  ;;  %v3684_v1 = vsel %vm3652_vm7, %v9823_v63, 0.0  ;;  %v4070_v45 = vsel %vm4038_vm11, 1, %v12072_v58  ;;  %v12785_v63 = vld [vmem:[#allocation14_spill] sm:$0xff]  ;;  %v3376_v59 = vadd.f32 %v12786_v36, %v2423_v57  ;;  %v12790_v57 = vld [vmem:[#allocation65_spill] sm:$0xff] }
 0x3a2   : > { %12781 = vst [vmem:[#allocation7_spill] sm:$0xff] %v9951_v0  ;;  %v3865_v34 = vrot.slane %v3801_v30, 1  ;;  %v4327_v62 = vpop.f32.mrf.mxu3  ;;  %v9957_v60 = vadd.f32 %v3684_v1, %v2891_v39  ;;  %vm4554_vm7 = vcmp.eq.s32.totalorder %v12785_v63, 1  ;;  %v12787_v30 = vld [vmem:[#allocation75_spill] sm:$0xff]  ;;  %vm2862_vm3 = vcmp.eq.s32.totalorder %v12790_v57, 1  ;;  %v12796_v36 = vld [vmem:[#allocation142_spill] sm:$0xff] }
 0x3a3   : > { %v4395_v56 = vrot.slane %v4327_v62, 1  ;;  %v3471_v31 = vpop.f32.mrf.mxu1  ;;  %v11975_v2 = vrot.slane %v12796_v36, 7  ;;  %v12838_v0 = vld [vmem:[#allocation272_spill] sm:$0xff] }
 0x3a4   : > { %12783 = vst [vmem:[#allocation212_spill] sm:$0xff] %v9957_v60  ;;  %4455 = vperm.xlu1 %5617, %v12784_v37   ;;  %v9964_v7 = vsel %vm3881_vm13, %v3864_v24, %v3865_v34  ;;  %4159 = vperm.xlu0 %5619, %v4070_v45   ;;  %v12788_v24 = vld [vmem:[#allocation60_spill] sm:$0xff]  ;;  %v12792_v45 = vld [vmem:[#allocation149_spill] sm:$0xff]  ;;  %vm2022_vm5 = vcmp.eq.s32.totalorder %v12838_v0, 1 }
 0x3a5   : > { %v4430_v39 = vsel %vm3881_vm13, %v4394_v3, %v4395_v56  ;;  %vm12789_vm2 = vcmp.ge.f32.partialorder %v12788_v24, 1.0 }
 0x3a6   : > { %v4586_v1 = vsel %vm4554_vm7, %v4430_v39, 0.0  ;;  %4464 = vperm.xlu2 %5618, %v12787_v30   ;;  %vm4041_vm11 = vmand %vm12789_vm2, %vm11980_vm12  ;;  %v12793_v30 = vld [vmem:[#allocation281_spill] sm:$0xff]  ;;  %vm3656_vm7 = vcmp.eq.s32.totalorder %v9069_v18, 1 }
 0x3a7   : > { %5554 = vmatmul.msk.f32.gmra.mxu3 %vm655_vm0, %v9634_v16  ;;  %v4094_v62 = vpop.permute.xlu2 %4093  ;;  %v3595_v37 = vpop.permute.xlu0 %3594  ;;  %v9977_v63 = vadd.f32 %v4586_v1, %v3376_v59  ;;  %v2894_v60 = vsel %vm2862_vm3, %v12793_v30, 0.0  ;;  %vm3161_vm0 = vcmp.eq.s32.totalorder %v12794_v51, 1  ;;  %v12802_v30 = vld [vmem:[#allocation77_spill] sm:$0xff] }
 0x3a8   : > { %vm4176_vm4 = vcmp.eq.s32.totalorder %v4094_v62, 1  ;;  %vm3655_vm6 = vcmp.eq.s32.totalorder %v3595_v37, 1  ;;  %v9980_v3 = vpop.f32.mrf.mxu0  ;;  %v4073_v62 = vsel %vm4041_vm11, 1, %v12072_v58 }
 0x3a9   : > { %12791 = vst [vmem:[#allocation42_spill] sm:$0xff] %v9980_v3  ;;  %v9984_v39 = vsel %vm4176_vm4, %v9343_v28, 0.0  ;;  %v3804_v16 = vpop.f32.mrf.mxu2  ;;  %v3687_v10 = vsel %vm3655_vm6, %v3471_v31, 0.0  ;;  %v12797_v28 = vld [vmem:[#allocation259_spill] sm:$0xff]  ;;  %v12798_v31 = vld [vmem:[#allocation232_spill] sm:$0xff] }
 0x3aa   : > { %v3866_v24 = vrot.slane %v3804_v16, 1  ;;  %v4330_v59 = vpop.f32.mrf.mxu3  ;;  %v9988_v1 = vadd.f32 %v3687_v10, %v2894_v60  ;;  %vm2016_vm2 = vcmp.eq.s32.totalorder %v12797_v28, 1  ;;  %v3193_v10 = vsel %vm3161_vm0, %v12798_v31, 0.0 }
 0x3ab   : > { %v4396_v37 = vrot.slane %v4330_v59, 1  ;;  %v3474_v57 = vpop.f32.mrf.mxu1  ;;  %v12801_v16 = vrot.slane %v12792_v45, 7 }
 0x3ac   : > { %12795 = vst [vmem:[#allocation80_spill] sm:$0xff] %v9988_v1  ;;  %v3688_v43 = vsel %vm3656_vm7, %v3474_v57, 0.0  ;;  %4461 = vperm.xlu1 %5617, %v8872_v5   ;;  %v9997_v51 = vsel %vm3881_vm13, %v3865_v34, %v3866_v24  ;;  %4168 = vperm.xlu0 %5619, %v4073_v62   ;;  %v12806_v1 = vld [vmem:[#allocation104_spill] sm:$0xff] }
 0x3ad   : > { %v10001_v60 = vadd.f32 %v3688_v43, %v8957_v54  ;;  %v10005_v18 = vsel %vm3881_vm13, %v4395_v56, %v4396_v37  ;;  %v1679_v5 = vsel %vm11997_vm10, %v11975_v2, %v12801_v16  ;;  %v12803_v54 = vld [vmem:[#allocation103_spill] sm:$0xff]  ;;  %v12805_v56 = vld [vmem:[#allocation130_spill] sm:$0xff]  ;;  %vm12807_vm11 = vcmp.lt.f32.partialorder %v12806_v1, 15.0 }
 0x3ae   : > { %12800 = vst [vmem:[#allocation239_spill] sm:$0xff] %v10005_v18  ;;  %4473 = vperm.xlu2 %5618, %v12802_v30   ;;  %v2048_v34 = vsel %vm2016_vm2, %v1679_v5, 0.0  ;;  %vm4818_vm3 = vmand %vm12807_vm11, %vm3980_vm9  ;;  %v11979_v16 = vrot.slane %v9980_v3, 1  ;;  %v12810_v43 = vld [vmem:[#allocation266_spill] sm:$0xff]  ;;  %vm3657_vm2 = vcmp.eq.s32.totalorder %v9103_v55, 1 }
 0x3af   : > { %12799 = vst [vmem:[#allocation61_spill] sm:$0xff] %v10001_v60  ;;  %v4103_v59 = vpop.permute.xlu2 %4102  ;;  %v10014_v57 = vpop.permute.xlu0 %3603  ;;  %v3225_v62 = vadd.f32 %v3193_v10, %v2048_v34  ;;  %v12808_v60 = vld [vmem:[#allocation236_spill] sm:$0xff]  ;;  %v12809_v10 = vld [vmem:[#allocation123_spill] sm:$0xff]  ;;  %vm2019_vm7 = vcmp.eq.s32.totalorder %v12810_v43, 1 }
 0x3b0   : > { %vm4179_vm6 = vcmp.eq.s32.totalorder %v4103_v59, 1  ;;  %v10017_v28 = vpop.f32.mrf.mxu0  ;;  %vm2864_vm4 = vcmp.eq.s32.totalorder %v12808_v60, 1  ;;  %vm3164_vm0 = vcmp.eq.s32.totalorder %v12809_v10, 1  ;;  %v4850_v60 = vsel %vm4818_vm3, 1, %v12072_v58  ;;  %v12813_v10 = vld [vmem:[#allocation247_spill] sm:$0xff] }
 0x3b1   : > { %12804 = vst [vmem:[#allocation48_spill] sm:$0xff] %v10017_v28  ;;  %v4211_v5 = vsel %vm4179_vm6, %v9518_v26, 0.0  ;;  %v3807_v30 = vpop.f32.mrf.mxu2  ;;  %v11978_v2 = vrot.slane %v10017_v28, 1  ;;  %v3196_v28 = vsel %vm3164_vm0, %v12813_v10, 0.0  ;;  %v12832_v10 = vld [vmem:[#allocation240_spill] sm:$0xff] }
 0x3b2   : > { %v10029_v34 = vadd.f32 %v4211_v5, %v3225_v62  ;;  %v3867_v59 = vrot.slane %v3807_v30, 1  ;;  %v4333_v31 = vpop.f32.mrf.mxu3  ;;  %v2896_v62 = vsel %vm2864_vm4, %v8711_v22, 0.0  ;;  %v12816_v22 = vrot.slane %v12803_v54, 7 }
 0x3b3   : > { %v4397_v49 = vrot.slane %v4333_v31, 1  ;;  %v3477_v1 = vpop.f32.mrf.mxu1  ;;  %v10039_v26 = vsel %vm3881_vm13, %v11979_v16, %v11978_v2  ;;  %v12812_v31 = vld [vmem:[#allocation248_spill] sm:$0xff]  ;;  %vm2865_vm0 = vcmp.eq.s32.totalorder %v12832_v10, 1 }
 0x3b4   : > { %12811 = vst [vmem:[#allocation225_spill] sm:$0xff] %v10039_v26  ;;  %v3689_v5 = vsel %vm3657_vm2, %v3477_v1, 0.0  ;;  %4470 = vperm.xlu1 %5617, %v8924_v4   ;;  %v10046_v55 = vsel %vm3881_vm13, %v3866_v24, %v3867_v59  ;;  %4887 = vperm.xlu0 %5619, %v4850_v60   ;;  %v12817_v1 = vld [vmem:[#allocation195_spill] sm:$0xff]  ;;  %v12819_v24 = vrot.slane %v12805_v56, 7  ;;  %v12820_v26 = vld [vmem:[#allocation124_spill] sm:$0xff] }
 0x3b5   : > { %v10050_v3 = vadd.f32 %v3689_v5, %v2896_v62  ;;  %v10054_v2 = vsel %vm3881_vm13, %v4396_v37, %v4397_v49  ;;  %v12818_v16 = vrot.slane %v12817_v1, 7  ;;  %v12821_v30 = vrot.slane %v12820_v26, 7  ;;  %v12822_v5 = vld [vmem:[#allocation79_spill] sm:$0xff]  ;;  %v12823_v60 = vld [vmem:[#allocation88_spill] sm:$0xff] }
 0x3b6   : > { %12815 = vst [vmem:[#allocation231_spill] sm:$0xff] %v10054_v2  ;;  %4482 = vperm.xlu2 %5618, %v12822_v5   ;;  %vm2009_vm9 = vcmp.eq.s32.totalorder %v12823_v60, 1  ;;  %v12824_v37 = vld [vmem:[#allocation151_spill] sm:$0xff]  ;;  %v12827_v1 = vrot.slane %v12812_v31, 7 }
 0x3b7   : > { %12814 = vst [vmem:[#allocation255_spill] sm:$0xff] %v10050_v3  ;;  %v1686_v4 = vsel %vm11997_vm10, %v12818_v16, %v12816_v22  ;;  %v1676_v62 = vsel %vm11997_vm10, %v12821_v30, %v12819_v24  ;;  %v12825_v3 = vld [vmem:[#allocation254_spill] sm:$0xff]  ;;  %v4112_v26 = vpop.permute.xlu2 %4111  ;;  %v10079_v46 = vpop.permute.xlu0 %3612  ;;  %v12828_v30 = vld [vmem:[#allocation176_spill] sm:$0xff]  ;;  %v12829_v24 = vld [vmem:[#allocation261_spill] sm:$0xff] }
 0x3b8   : > { %v12826_v18 = vrot.slane %v12825_v3, 7  ;;  %v2051_v22 = vsel %vm2019_vm7, %v1676_v62, 0.0  ;;  %vm2394_vm6 = vcmp.eq.s32.totalorder %v12828_v30, 1  ;;  %vm3154_vm11 = vcmp.eq.s32.totalorder %v12829_v24, 1  ;;  %v10083_v60 = vpop.f32.mrf.mxu0  ;;  %v12831_v3 = vld [vmem:[#allocation20_spill] sm:$0xff]  ;;  %v12835_v30 = vld [vmem:[#allocation129_spill] sm:$0xff] }
 0x3b9   : > { %v3228_v5 = vadd.f32 %v3196_v28, %v2051_v22  ;;  %vm4182_vm3 = vcmp.eq.s32.totalorder %v4112_v26, 1  ;;  %12830 = vst [vmem:[#allocation278_spill] sm:$0xff] %v10083_v60  ;;  %vm4557_vm4 = vcmp.eq.s32.totalorder %v12831_v3, 1  ;;  %v2041_v2 = vsel %vm2009_vm9, %v1686_v4, 0.0  ;;  %v3810_v62 = vpop.f32.mrf.mxu2  ;;  %v12837_v24 = vld [vmem:[#allocation202_spill] sm:$0xff] }
 0x3ba   : > { %v2265_v16 = vsel %vm11997_vm10, %v12827_v1, %v12826_v18  ;;  %v12833_v18 = vld [vmem:[#allocation109_spill] sm:$0xff]  ;;  %v4214_v43 = vsel %vm4182_vm3, %v9709_v11, 0.0  ;;  %vm3167_vm12 = vcmp.eq.s32.totalorder %v12835_v30, 1  ;;  %v3868_v22 = vrot.slane %v3810_v62, 1  ;;  %v4336_v26 = vpop.f32.mrf.mxu3  ;;  %v12841_v30 = vld [vmem:[#allocation262_spill] sm:$0xff] }
 0x3bb   : > { %vm12834_vm7 = vcmp.lt.f32.partialorder %v12833_v18, 15.0  ;;  %v2426_v1 = vsel %vm2394_vm6, %v2265_v16, 0.0  ;;  %v10093_v28 = vadd.f32 %v4214_v43, %v3228_v5  ;;  %v3186_v60 = vsel %vm3154_vm11, %v12837_v24, 0.0  ;;  %v3480_v4 = vpop.f32.mrf.mxu1  ;;  %v12840_v43 = vld [vmem:[#allocation241_spill] sm:$0xff]  ;;  %v12848_v3 = vld [vmem:[#allocation114_spill] sm:$0xff] }
 0x3bc   : > { %vm4823_vm2 = vmand %vm12834_vm7, %vm3985_vm8  ;;  %vm3658_vm9 = vcmp.eq.s32.totalorder %v10014_v57, 1  ;;  %v4398_v40 = vrot.slane %v4336_v26, 1  ;;  %v2897_v11 = vsel %vm2865_vm0, %v12839_v23, 0.0  ;;  %4479 = vperm.xlu1 %5617, %v8964_v48   ;;  %v10105_v5 = vsel %vm3881_vm13, %v3867_v59, %v3868_v22 }
 0x3bd   : > { %12836 = vst [vmem:[#allocation71_spill] sm:$0xff] %v10093_v28  ;;  %v4855_v18 = vsel %vm4823_vm2, 1, %v12072_v58  ;;  %v3690_v16 = vsel %vm3658_vm9, %v3480_v4, 0.0  ;;  %v3379_v62 = vadd.f32 %v12840_v43, %v2426_v1  ;;  %v3199_v24 = vsel %vm3167_vm12, %v12841_v30, 0.0  ;;  %v4082_v28 = vpop.permute.xlu1 %4081  ;;  %v12844_v4 = vld [vmem:[#allocation68_spill] sm:$0xff]  ;;  %v12846_v43 = vld [vmem:[#allocation83_spill] sm:$0xff] }
 0x3be   : > { %v4427_v57 = vsel %vm3881_vm13, %v4397_v49, %v4398_v40  ;;  %v10111_v26 = vadd.f32 %v3690_v16, %v2897_v11  ;;  %4902 = vperm.xlu0 %5619, %v4855_v18   ;;  %v3218_v10 = vadd.f32 %v3186_v60, %v2041_v2  ;;  %v12843_v23 = vrot.slane %v12824_v37, 7  ;;  %4491 = vperm.xlu2 %5618, %v12846_v43   ;;  %v12856_v43 = vld [vmem:[#allocation86_spill] sm:$0xff] }
 0x3bf   : > { %v12845_v48 = vrot.slane %v12844_v4, 7  ;;  %v4589_v1 = vsel %vm4557_vm4, %v4427_v57, 0.0  ;;  %vm4172_vm8 = vcmp.eq.s32.totalorder %v4082_v28, 1  ;;  %v4121_v18 = vpop.permute.xlu2 %4120  ;;  %v10125_v2 = vpop.permute.xlu0 %3621  ;;  %vm12849_vm6 = vcmp.lt.f32.partialorder %v12848_v3, 15.0 }
 0x3c0   : > { %12842 = vst [vmem:[#allocation233_spill] sm:$0xff] %v10111_v26  ;;  %v4204_v11 = vsel %vm4172_vm8, %v9167_v53, 0.0  ;;  %v10127_v60 = vadd.f32 %v4589_v1, %v3379_v62  ;;  %vm4185_vm12 = vcmp.eq.s32.totalorder %v4121_v18, 1  ;;  %vm4826_vm11 = vmand %vm12849_vm6, %vm3988_vm15  ;;  %vm12862_vm0 = vcmp.ne.s32.totalorder %v9514_v47, 0  ;;  %v12867_v47 = vld [vmem:[#allocation16_spill] sm:$0xff] }
 0x3c1   : > { %v1673_v59 = vsel %vm11997_vm10, %v12845_v48, %v12843_v23  ;;  %v4236_v30 = vadd.f32 %v4204_v11, %v3218_v10  ;;  %v10129_v23 = vpop.f32.mrf.mxu0  ;;  %v4217_v0 = vsel %vm4185_vm12, %v9875_v14, 0.0  ;;  %v3813_v28 = vpop.f32.mrf.mxu2  ;;  %v4858_v6 = vsel %vm4826_vm11, 1, %v12072_v58 }
 0x3c2   : > { %v2054_v49 = vsel %vm2022_vm5, %v1673_v59, 0.0  ;;  %12847 = vst [vmem:[#allocation238_spill] sm:$0xff] %v10129_v23  ;;  %v3869_v62 = vrot.slane %v3813_v28, 1  ;;  %v10141_v4 = vpop.f32.mrf.mxu3  ;;  %vm3659_vm5 = vcmp.eq.s32.totalorder %v9110_v13, 1 }
 0x3c3   : > { %v3231_v16 = vadd.f32 %v3199_v24, %v2054_v49  ;;  %v10137_v53 = vadd.f32 %v9366_v9, %v4236_v30  ;;  %12852 = vst [vmem:[#allocation171_spill] sm:$0xff] %v10141_v4  ;;  %v11984_v24 = vrot.slane %v10141_v4, 1  ;;  %v3483_v10 = vpop.f32.mrf.mxu1  ;;  %v12853_v9 = vld [vmem:[#allocation298_spill] sm:$0xff]  ;;  %v12857_v49 = vld [vmem:[#allocation335_spill] sm:$0xff]  ;;  %v12948_v4 = vld [vmem:[#allocation85_spill] sm:$0xff] }
 0x3c4   : > { %v3691_v48 = vsel %vm3659_vm5, %v3483_v10, 0.0  ;;  %4488 = vperm.xlu1 %5617, %v9001_v20   ;;  %v3893_v14 = vsel %vm3881_vm13, %v3868_v22, %v3869_v62  ;;  %v12859_v22 = vld [vmem:[#allocation135_spill] sm:$0xff]  ;;  %v12860_v30 = vld [vmem:[#allocation274_spill] sm:$0xff]  ;;  %vm12881_vm5 = vcmp.ne.s32.totalorder %v9595_v19, 0 }
 0x3c5   : > { %12850 = vst [vmem:[#allocation54_spill] sm:$0xff] %v10137_v53  ;;  %v10139_v57 = vadd.f32 %v4217_v0, %v3231_v16  ;;  %v10150_v59 = vadd.f32 %v3691_v48, %v12853_v9  ;;  %v4091_v1 = vpop.permute.xlu1 %4090  ;;  %v10156_v13 = vsel %vm3881_vm13, %v4398_v40, %v11984_v24  ;;  %v11985_v16 = vrot.slane %v12859_v22, 7  ;;  %v12863_v40 = vld [vmem:[#allocation121_spill] sm:$0xff]  ;;  %v12865_v48 = vld [vmem:[#allocation95_spill] sm:$0xff]  ;;  %v12871_v24 = vld [vmem:[#allocation314_spill] sm:$0xff] }
 0x3c6   : > { %4911 = vperm.xlu0 %5619, %v4858_v6   ;;  %12855 = vst [vmem:[#allocation73_spill] sm:$0xff] %v10156_v13  ;;  %vm4175_vm15 = vcmp.eq.s32.totalorder %v4091_v1, 1  ;;  %4500 = vperm.xlu2 %5618, %v12856_v43   ;;  %vm3160_vm3 = vcmp.eq.s32.totalorder %v12860_v30, 1  ;;  %vm12864_vm7 = vcmp.lt.f32.partialorder %v12863_v40, 15.0  ;;  %v11988_v0 = vrot.slane %v10129_v23, 1  ;;  %v12869_v30 = vld [vmem:[#allocation242_spill] sm:$0xff] }
 0x3c7   : > { %12851 = vst [vmem:[#allocation229_spill] sm:$0xff] %v10139_v57  ;;  %v10160_v11 = vsel %vm4175_vm15, %v12857_v49, 0.0  ;;  %v4130_v20 = vpop.permute.xlu2 %4129  ;;  %v10162_v18 = vpop.permute.xlu0 %3630  ;;  %vm4829_vm2 = vmand %vm12864_vm7, %vm12862_vm0  ;;  %vm2015_vm9 = vcmp.eq.s32.totalorder %v12865_v48, 1  ;;  %v12866_v9 = vrot.slane %v12796_v36, 7  ;;  %vm2867_vm8 = vcmp.eq.s32.totalorder %v12869_v30, 1  ;;  %v12894_v13 = vld [vmem:[#allocation93_spill] sm:$0xff] }
 0x3c8   : > { %12854 = vst [vmem:[#allocation271_spill] sm:$0xff] %v10150_v59  ;;  %vm4188_vm4 = vcmp.eq.s32.totalorder %v4130_v20, 1  ;;  %vm3660_vm12 = vcmp.eq.s32.totalorder %v12871_v24, 1  ;;  %vm3661_vm7 = vcmp.eq.s32.totalorder %v10079_v46, 1  ;;  %v12893_v46 = vld [vmem:[#allocation122_spill] sm:$0xff]  ;;  %v12895_v53 = vld [vmem:[#allocation277_spill] sm:$0xff] }
 0x3c9   : > { %12858 = vst [vmem:[#allocation14_spill] sm:$0xff] %v10160_v11  ;;  %v10166_v3 = vpop.f32.mrf.mxu0  ;;  %v4220_v28 = vsel %vm4188_vm4, %v9997_v51, 0.0  ;;  %v3816_v10 = vpop.f32.mrf.mxu2  ;;  %v1680_v1 = vsel %vm11997_vm10, %v11985_v16, %v12866_v9  ;;  %v12870_v51 = vld [vmem:[#allocation227_spill] sm:$0xff]  ;;  %v12874_v16 = vld [vmem:[#allocation301_spill] sm:$0xff]  ;;  %v11991_v23 = vrot.slane %v12893_v46, 7  ;;  %v12951_v57 = vld [vmem:[#allocation4_spill] sm:$0xff] }
 0x3ca   : > { %12861 = vst [vmem:[#allocation226_spill] sm:$0xff] %v10166_v3  ;;  %v11987_v6 = vrot.slane %v10166_v3, 1  ;;  %v10183_v43 = vadd.f32 %v4220_v28, %v12867_v47  ;;  %v3870_v49 = vrot.slane %v3816_v10, 1  ;;  %v10185_v20 = vpop.f32.mrf.mxu3  ;;  %v3192_v40 = vsel %vm3160_vm3, %v12870_v51, 0.0  ;;  %v12873_v10 = vld [vmem:[#allocation286_spill] sm:$0xff] }
 0x3cb   : > { %v3486_v48 = vpop.f32.mrf.mxu1  ;;  %v4861_v28 = vsel %vm4829_vm2, 1, %v12072_v58  ;;  %v2899_v9 = vsel %vm2867_vm8, %v12873_v10, 0.0  ;;  %v2047_v24 = vsel %vm2015_vm9, %v1680_v1, 0.0  ;;  %v13016_v11 = vld [vmem:[#allocation166_spill] sm:$0xff] }
 0x3cc   : > { %12868 = vst [vmem:[#allocation75_spill] sm:$0xff] %v10183_v43  ;;  %v10196_v36 = vsel %vm3881_vm13, %v11988_v0, %v11987_v6  ;;  %v3692_v47 = vsel %vm3660_vm12, %v3486_v48, 0.0  ;;  %4497 = vperm.xlu1 %5617, %v12874_v16   ;;  %v10203_v30 = vsel %vm3881_vm13, %v3869_v62, %v3870_v49  ;;  %v3224_v3 = vadd.f32 %v3192_v40, %v2047_v24  ;;  %v12876_v6 = vld [vmem:[#allocation90_spill] sm:$0xff]  ;;  %v12877_v0 = vld [vmem:[#allocation115_spill] sm:$0xff]  ;;  %v12917_v43 = vld [vmem:[#allocation101_spill] sm:$0xff] }
 0x3cd   : > { %12872 = vst [vmem:[#allocation60_spill] sm:$0xff] %v10196_v36  ;;  %v10205_v51 = vadd.f32 %v3692_v47, %v2899_v9  ;;  %v4100_v26 = vpop.permute.xlu1 %4099  ;;  %v1622_v36 = vrot.slane %v12877_v0, 7  ;;  %v12880_v62 = vld [vmem:[#allocation110_spill] sm:$0xff]  ;;  %v12882_v9 = vld [vmem:[#allocation127_spill] sm:$0xff] }
 0x3ce   : > { %4920 = vperm.xlu0 %5619, %v4861_v28   ;;  %vm4178_vm6 = vcmp.eq.s32.totalorder %v4100_v26, 1  ;;  %4509 = vperm.xlu2 %5618, %v12876_v6   ;;  %v11989_v1 = vrot.slane %v12880_v62, 7  ;;  %vm12883_vm15 = vcmp.lt.f32.partialorder %v12882_v9, 15.0  ;;  %v12884_v6 = vld [vmem:[#allocation319_spill] sm:$0xff]  ;;  %v12885_v0 = vld [vmem:[#allocation22_spill] sm:$0xff] }
 0x3cf   : > { %12875 = vst [vmem:[#allocation65_spill] sm:$0xff] %v10205_v51  ;;  %v4210_v10 = vsel %vm4178_vm6, %v9451_v50, 0.0  ;;  %v4139_v48 = vpop.permute.xlu2 %4138  ;;  %v10210_v59 = vpop.permute.xlu0 %4078  ;;  %vm4832_vm3 = vmand %vm12883_vm15, %vm12881_vm5  ;;  %vm3156_vm4 = vcmp.eq.s32.totalorder %v12884_v6, 1  ;;  %v12890_v6 = vld [vmem:[#allocation210_spill] sm:$0xff] }
 0x3d0   : > { %12878 = vst [vmem:[#allocation149_spill] sm:$0xff] %v10210_v59  ;;  %v10212_v16 = vadd.f32 %v4210_v10, %v3224_v3  ;;  %vm4191_vm11 = vcmp.eq.s32.totalorder %v4139_v48, 1  ;;  %v12887_v3 = vld [vmem:[#allocation56_spill] sm:$0xff]  ;;  %v1684_v19 = vsel %vm11997_vm10, %v11989_v1, %v1622_v36  ;;  %v12888_v10 = vld [vmem:[#allocation289_spill] sm:$0xff]  ;;  %v12892_v1 = vld [vmem:[#allocation87_spill] sm:$0xff] }
 0x3d1   : > { %v4223_v26 = vsel %vm4191_vm11, %v3893_v14, 0.0  ;;  %v3819_v40 = vpop.f32.mrf.mxu2  ;;  %vm2868_vm0 = vcmp.eq.s32.totalorder %v12887_v3, 1  ;;  %v4864_v14 = vsel %vm4832_vm3, 1, %v12072_v58  ;;  %vm2011_vm2 = vcmp.eq.s32.totalorder %v12892_v1, 1  ;;  %v12899_v1 = vld [vmem:[#allocation128_spill] sm:$0xff] }
 0x3d2   : > { %12879 = vst [vmem:[#allocation281_spill] sm:$0xff] %v10212_v16  ;;  %v10221_v28 = vadd.f32 %v4223_v26, %v12885_v0  ;;  %v3871_v50 = vrot.slane %v3819_v40, 1  ;;  %v10223_v47 = vpop.f32.mrf.mxu3  ;;  %v2900_v48 = vsel %vm2868_vm0, %v12888_v10, 0.0  ;;  %v12889_v26 = vld [vmem:[#allocation306_spill] sm:$0xff]  ;;  %v3188_v0 = vsel %vm3156_vm4, %v12890_v6, 0.0 }
 0x3d3   : > { %v3489_v24 = vpop.f32.mrf.mxu1  ;;  %vm12900_vm11 = vcmp.ne.s32.totalorder %v9683_v15, 0  ;;  %v12906_v15 = vld [vmem:[#allocation316_spill] sm:$0xff] }
 0x3d4   : > { %12886 = vst [vmem:[#allocation116_spill] sm:$0xff] %v10221_v28  ;;  %v3693_v9 = vsel %vm3661_vm7, %v3489_v24, 0.0  ;;  %4506 = vperm.xlu1 %5617, %v12889_v26   ;;  %v10236_v40 = vsel %vm3881_vm13, %v3870_v49, %v3871_v50  ;;  %v2043_v24 = vsel %vm2011_vm2, %v1684_v19, 0.0  ;;  %vm3662_vm4 = vcmp.eq.s32.totalorder %v12906_v15, 1  ;;  %v12908_v15 = vld [vmem:[#allocation311_spill] sm:$0xff] }
 0x3d5   : > { %v10239_v3 = vadd.f32 %v3693_v9, %v2900_v48  ;;  %v4109_v51 = vpop.permute.xlu1 %4108  ;;  %v3220_v49 = vadd.f32 %v3188_v0, %v2043_v24  ;;  %v12897_v48 = vld [vmem:[#allocation17_spill] sm:$0xff]  ;;  %v11992_v9 = vrot.slane %v12899_v1, 7 }
 0x3d6   : > { %4929 = vperm.xlu0 %5619, %v4864_v14   ;;  %vm4181_vm9 = vcmp.eq.s32.totalorder %v4109_v51, 1  ;;  %4518 = vperm.xlu2 %5618, %v12894_v13   ;;  %vm2014_vm12 = vcmp.eq.s32.totalorder %v12897_v48, 1  ;;  %v12898_v14 = vld [vmem:[#allocation91_spill] sm:$0xff]  ;;  %v12901_v51 = vld [vmem:[#allocation134_spill] sm:$0xff] }
 0x3d7   : > { %12891 = vst [vmem:[#allocation142_spill] sm:$0xff] %v10239_v3  ;;  %v4213_v10 = vsel %vm4181_vm9, %v9648_v8, 0.0  ;;  %v4148_v26 = vpop.permute.xlu2 %4147  ;;  %v4088_v28 = vpop.permute.xlu0 %4087  ;;  %vm2012_vm6 = vcmp.eq.s32.totalorder %v12898_v14, 1  ;;  %vm12902_vm5 = vcmp.lt.f32.partialorder %v12901_v51, 15.0  ;;  %v12903_v8 = vld [vmem:[#allocation330_spill] sm:$0xff] }
 0x3d8   : > { %v10246_v16 = vadd.f32 %v4213_v10, %v12895_v53  ;;  %vm4174_vm8 = vcmp.eq.s32.totalorder %v4088_v28, 1  ;;  %vm4835_vm15 = vmand %vm12902_vm5, %vm12900_vm11  ;;  %v1683_v53 = vsel %vm11997_vm10, %v1622_v36, %v11991_v23  ;;  %v12904_v28 = vld [vmem:[#allocation326_spill] sm:$0xff]  ;;  %v12907_v10 = vrot.slane %v12859_v22, 7  ;;  %v12910_v23 = vld [vmem:[#allocation221_spill] sm:$0xff] }
 0x3d9   : > { %v10255_v13 = vpop.f32.mrf.mxu2  ;;  %v4206_v19 = vsel %vm4174_vm8, %v12903_v8, 0.0  ;;  %vm3159_vm3 = vcmp.eq.s32.totalorder %v12904_v28, 1  ;;  %vm4194_vm0 = vcmp.eq.s32.totalorder %v4148_v26, 1  ;;  %v12909_v22 = vld [vmem:[#allocation94_spill] sm:$0xff]  ;;  %v12913_v26 = vrot.slane %v10223_v47, 1 }
 0x3da   : > { %12896 = vst [vmem:[#allocation259_spill] sm:$0xff] %v10246_v16  ;;  %v3872_v6 = vrot.slane %v10255_v13, 1  ;;  %v10264_v0 = vpop.f32.mrf.mxu3  ;;  %v10266_v24 = vadd.f32 %v4206_v19, %v3220_v49  ;;  %v1681_v51 = vsel %vm11997_vm10, %v11992_v9, %v12907_v10  ;;  %v4867_v13 = vsel %vm4835_vm15, 1, %v12072_v58  ;;  %v12911_v10 = vld [vmem:[#allocation300_spill] sm:$0xff] }
 0x3db   : > { %12905 = vst [vmem:[#allocation232_spill] sm:$0xff] %v10264_v0  ;;  %v11993_v36 = vrot.slane %v10264_v0, 1  ;;  %v3492_v28 = vpop.f32.mrf.mxu1  ;;  %vm2017_vm7 = vcmp.eq.s32.totalorder %v12909_v22, 1  ;;  %v3191_v3 = vsel %vm3159_vm3, %v12910_v23, 0.0  ;;  %vm2023_vm8 = vcmp.eq.s32.totalorder %v12917_v43, 1  ;;  %v12918_v23 = vld [vmem:[#allocation97_spill] sm:$0xff] }
 0x3dc   : > { %v3890_v49 = vsel %vm3881_vm13, %v3871_v50, %v3872_v6  ;;  %v3694_v19 = vsel %vm3662_vm4, %v3492_v28, 0.0  ;;  %4515 = vperm.xlu1 %5617, %v12908_v15   ;;  %v12915_v28 = vld [vmem:[#allocation82_spill] sm:$0xff]  ;;  %vm2384_vm4 = vcmp.eq.s32.totalorder %v12948_v4, 1 }
 0x3dd   : > { %v4226_v16 = vsel %vm4194_vm0, %v3890_v49, 0.0  ;;  %v10284_v9 = vadd.f32 %v3694_v19, %v12911_v10  ;;  %v4118_v8 = vpop.permute.xlu1 %4117  ;;  %v10292_v50 = vsel %vm3881_vm13, %v12913_v26, %v11993_v36  ;;  %vm2379_vm2 = vcmp.eq.s32.totalorder %v12915_v28, 1  ;;  %v12916_v15 = vld [vmem:[#allocation98_spill] sm:$0xff]  ;;  %v12919_v49 = vld [vmem:[#allocation285_spill] sm:$0xff] }
 0x3de   : > { %4938 = vperm.xlu0 %5619, %v4867_v13   ;;  %12914 = vst [vmem:[#allocation103_spill] sm:$0xff] %v10292_v50  ;;  %vm2020_vm9 = vcmp.eq.s32.totalorder %v12916_v15, 1  ;;  %vm4184_vm11 = vcmp.eq.s32.totalorder %v4118_v8, 1  ;;  %4527 = vperm.xlu2 %5618, %v12918_v23   ;;  %v10299_v19 = vadd.f32 %v4226_v16, %v12919_v49  ;;  %v12921_v13 = vrot.slane %v12880_v62, 7  ;;  %v12925_v62 = vld [vmem:[#allocation138_spill] sm:$0xff] }
 0x3df   : > { %12912 = vst [vmem:[#allocation77_spill] sm:$0xff] %v10284_v9  ;;  %v12922_v10 = vrot.slane %v12803_v54, 7  ;;  %v10311_v36 = vsel %vm2012_vm6, %v1683_v53, 0.0  ;;  %v2046_v8 = vsel %vm2014_vm12, %v1681_v51, 0.0  ;;  %v4216_v23 = vsel %vm4184_vm11, %v9839_v21, 0.0  ;;  %v10316_v9 = vpop.permute.xlu2 %4156  ;;  %v4097_v16 = vpop.permute.xlu0 %4096  ;;  %v12930_v53 = vld [vmem:[#allocation173_spill] sm:$0xff] }
 0x3e0   : > { %12920 = vst [vmem:[#allocation130_spill] sm:$0xff] %v10299_v19  ;;  %v3223_v49 = vadd.f32 %v3191_v3, %v2046_v8  ;;  %v12926_v50 = vrot.slane %v12925_v62, 7  ;;  %v12927_v54 = vrot.slane %v12805_v56, 7  ;;  %vm4177_vm6 = vcmp.eq.s32.totalorder %v4097_v16, 1  ;;  %v12931_v51 = vld [vmem:[#allocation117_spill] sm:$0xff]  ;;  %v12934_v8 = vld [vmem:[#allocation159_spill] sm:$0xff] }
 0x3e1   : > { %v10307_v26 = vsel %vm11997_vm10, %v12922_v10, %v12921_v13  ;;  %12924 = vst [vmem:[#allocation236_spill] sm:$0xff] %v10311_v36  ;;  %v12928_v10 = vld [vmem:[#allocation280_spill] sm:$0xff]  ;;  %v11996_v48 = vrot.slane %v12930_v53, 7  ;;  %v12932_v19 = vrot.slane %v12931_v51, 7  ;;  %v12933_v21 = vrot.slane %v12792_v45, 7 }
 0x3e2   : > { %12923 = vst [vmem:[#allocation104_spill] sm:$0xff] %v10307_v26  ;;  %v1675_v13 = vsel %vm11997_vm10, %v12927_v54, %v12926_v50  ;;  %v10325_v14 = vadd.f32 %v4216_v23, %v12928_v10  ;;  %v12935_v62 = vrot.slane %v12934_v8, 7  ;;  %v12936_v56 = vrot.slane %v12824_v37, 7  ;;  %v12937_v23 = vld [vmem:[#allocation141_spill] sm:$0xff]  ;;  %v10348_v54 = vpop.f32.mrf.mxu2  ;;  %v12942_v10 = vld [vmem:[#allocation332_spill] sm:$0xff]  ;;  %v10354_v51 = vpop.f32.mrf.mxu3  ;;  %v12949_v37 = vld [vmem:[#allocation126_spill] sm:$0xff] }
 0x3e3   : > { %v1678_v3 = vsel %vm11997_vm10, %v12933_v21, %v12932_v19  ;;  %vm12938_vm12 = vcmp.lt.f32.partialorder %v12937_v23, 15.0  ;;  %v4209_v45 = vsel %vm4177_vm6, %v9391_v42, 0.0  ;;  %v12941_v19 = vld [vmem:[#allocation246_spill] sm:$0xff]  ;;  %vm3162_vm3 = vcmp.eq.s32.totalorder %v12942_v10, 1  ;;  %v12947_v42 = vld [vmem:[#allocation295_spill] sm:$0xff]  ;;  %v3495_v0 = vpop.f32.mrf.mxu1 }
 0x3e4   : > { %12929 = vst [vmem:[#allocation123_spill] sm:$0xff] %v10325_v14  ;;  %v1672_v50 = vsel %vm11997_vm10, %v12936_v56, %v12935_v62  ;;  %vm10344_vm5 = vmand %vm12938_vm12, %vm4000_vm1  ;;  %vm2870_vm15 = vcmp.eq.s32.totalorder %v12941_v19, 1  ;;  %v4241_v21 = vadd.f32 %v4209_v45, %v3223_v49  ;;  %v12944_v8 = vrot.slane %v12943_v44, 7  ;;  %v12945_v56 = vld [vmem:[#allocation196_spill] sm:$0xff]  ;;  %v12946_v14 = vld [vmem:[#allocation318_spill] sm:$0xff] }
 0x3e5   : > { %vm3663_vm1 = vcmp.eq.s32.totalorder %v12946_v14, 1  ;;  %v2902_v19 = vsel %vm2870_vm15, %v12947_v42, 0.0  ;;  %vm12950_vm0 = vcmp.ne.s32.totalorder %v12949_v37, 0  ;;  %vm12952_vm11 = vcmp.lt.f32.partialorder %v12951_v57, 15.0  ;;  %v12958_v57 = vld [vmem:[#allocation133_spill] sm:$0xff]  ;;  %v13017_v26 = vld [vmem:[#allocation170_spill] sm:$0xff] }
 0x3e6   : > { %v2280_v62 = vsel %vm11997_vm10, %v11996_v48, %v12944_v8  ;;  %vm10370_vm6 = vmand %vm12952_vm11, %vm12950_vm0  ;;  %v4870_v45 = vsel %vm10344_vm5, 1, %v12072_v58  ;;  %v10378_v44 = vadd.f32 %v9671_v12, %v4241_v21  ;;  %v3695_v14 = vsel %vm3663_vm1, %v3495_v0, 0.0  ;;  %v12956_v8 = vld [vmem:[#allocation84_spill] sm:$0xff]  ;;  %v12960_v48 = vld [vmem:[#allocation9_spill] sm:$0xff] }
 0x3e7   : > { %4524 = vperm.xlu1 %5617, %v12956_v8   ;;  %v12957_v42 = vrot.slane %v10348_v54, 1  ;;  %vm12959_vm12 = vcmp.ne.s32.totalorder %v12958_v57, 0  ;;  %vm12961_vm15 = vcmp.lt.f32.partialorder %v12960_v48, 15.0  ;;  %v12964_v12 = vrot.slane %v12899_v1, 7  ;;  %v12966_v21 = vld [vmem:[#allocation237_spill] sm:$0xff]  ;;  %4947 = vperm.xlu0 %5619, %v4870_v45   ;;  %v12968_v57 = vld [vmem:[#allocation139_spill] sm:$0xff]  ;;  %v4106_v43 = vpop.permute.xlu0 %4105 }
 0x3e8   : > { %12955 = vst [vmem:[#allocation266_spill] sm:$0xff] %v10378_v44  ;;  %vm10391_vm0 = vmand %vm12961_vm15, %vm12959_vm12  ;;  %v12965_v0 = vrot.slane %v12893_v46, 7  ;;  %v10408_v8 = vsel %vm2020_vm9, %v1675_v13, 0.0  ;;  %v10410_v48 = vadd.f32 %v3695_v14, %v2902_v19  ;;  %vm12969_vm5 = vcmp.ne.s32.totalorder %v12968_v57, 0  ;;  %v12970_v1 = vld [vmem:[#allocation15_spill] sm:$0xff]  ;;  %v12975_v13 = vld [vmem:[#allocation100_spill] sm:$0xff] }
 0x3e9   : > { %v10385_v37 = vsel %vm3881_vm13, %v3872_v6, %v12957_v42  ;;  %v3194_v6 = vsel %vm3162_vm3, %v12966_v21, 0.0  ;;  %v4127_v42 = vpop.permute.xlu1 %4126  ;;  %vm12971_vm1 = vcmp.lt.f32.partialorder %v12970_v1, 15.0  ;;  %v2049_v10 = vsel %vm2017_vm7, %v1678_v3, 0.0  ;;  %4536 = vperm.xlu2 %5618, %v12975_v13   ;;  %v12976_v19 = vld [vmem:[#allocation146_spill] sm:$0xff]  ;;  %v12978_v45 = vld [vmem:[#allocation21_spill] sm:$0xff]  ;;  %v10438_v3 = vpop.permute.xlu2 %4165  ;;  %v12985_v1 = vld [vmem:[#allocation27_spill] sm:$0xff] }
 0x3ea   : > { %v10401_v16 = vsel %vm11997_vm10, %v12965_v0, %v12964_v12  ;;  %12967 = vst [vmem:[#allocation248_spill] sm:$0xff] %v10410_v48  ;;  %vm10416_vm11 = vmand %vm12971_vm1, %vm12969_vm5  ;;  %v12974_v12 = vld [vmem:[#allocation147_spill] sm:$0xff]  ;;  %v10425_v15 = vsel %vm2023_vm8, %v1672_v50, 0.0  ;;  %vm4187_vm9 = vcmp.eq.s32.totalorder %v4127_v42, 1  ;;  %vm12977_vm3 = vcmp.ne.s32.totalorder %v12976_v19, 0  ;;  %v12983_v57 = vld [vmem:[#allocation154_spill] sm:$0xff] }
 0x3eb   : > { %vm2382_vm12 = vcmp.eq.s32.totalorder %v12974_v12, 1  ;;  %vm12979_vm15 = vcmp.lt.f32.partialorder %v12978_v45, 15.0  ;;  %v12982_v0 = vld [vmem:[#allocation203_spill] sm:$0xff]  ;;  %v4219_v22 = vsel %vm4187_vm9, %v9964_v7, 0.0  ;;  %v2411_v50 = vsel %vm2379_vm2, %v2280_v62, 0.0  ;;  %v12990_v19 = vld [vmem:[#allocation189_spill] sm:$0xff] }
 0x3ec   : > { %vm10432_vm5 = vmand %vm12979_vm15, %vm12977_vm3  ;;  %v2223_v21 = vrot.slane %v12982_v0, 7  ;;  %v10445_v42 = vsel %vm10370_vm6, 1, %v12072_v58  ;;  %vm12984_vm7 = vcmp.ne.s32.totalorder %v12983_v57, 0  ;;  %vm12986_vm8 = vcmp.lt.f32.partialorder %v12985_v1, 15.0  ;;  %v12992_v0 = vld [vmem:[#allocation282_spill] sm:$0xff]  ;;  %v12996_v44 = vld [vmem:[#allocation148_spill] sm:$0xff] }
 0x3ed   : > { %vm10451_vm1 = vmand %vm12986_vm8, %vm12984_vm7  ;;  %v12989_v7 = vrot.slane %v12945_v56, 7  ;;  %v12991_v45 = vrot.slane %v12990_v19, 7  ;;  %v3226_v62 = vadd.f32 %v3194_v6, %v2049_v10  ;;  %v10462_v49 = vadd.f32 %v4219_v22, %v12992_v0  ;;  %v12994_v48 = vld [vmem:[#allocation206_spill] sm:$0xff]  ;;  %v10476_v19 = vpop.f32.mrf.mxu2  ;;  %v13000_v6 = vld [vmem:[#allocation12_spill] sm:$0xff]  ;;  %v10500_v0 = vpop.f32.mrf.mxu3 }
 0x3ee   : > { %vm4180_vm2 = vcmp.eq.s32.totalorder %v4106_v43, 1  ;;  %v12995_v57 = vrot.slane %v12994_v48, 7  ;;  %vm12997_vm6 = vcmp.lt.f32.partialorder %v12996_v44, 15.0  ;;  %v10482_v22 = vsel %vm10391_vm0, 1, %v12072_v58  ;;  %v13003_v44 = vld [vmem:[#allocation33_spill] sm:$0xff] }
 0x3ef   : > { %v2277_v28 = vsel %vm11997_vm10, %v12991_v45, %v12989_v7  ;;  %12993 = vst [vmem:[#allocation247_spill] sm:$0xff] %v10462_v49  ;;  %vm10472_vm9 = vmand %vm12997_vm6, %vm4003_vm14  ;;  %v4212_v10 = vsel %vm4180_vm2, %v13000_v6, 0.0  ;;  %v10487_v48 = vsel %vm10416_vm11, 1, %v12072_v58  ;;  %vm13002_vm3 = vcmp.ne.s32.totalorder %v13001_v32, 0  ;;  %v13007_v7 = vld [vmem:[#allocation62_spill] sm:$0xff]  ;;  %v13009_v46 = vld [vmem:[#allocation197_spill] sm:$0xff]  ;;  %v4115_v32 = vpop.permute.xlu0 %4114 }
 0x3f0   : > { %v2275_v1 = vsel %vm11997_vm10, %v2223_v21, %v12995_v57  ;;  %vm13004_vm14 = vcmp.lt.f32.partialorder %v13003_v44, 15.0  ;;  %vm2871_vm7 = vcmp.eq.s32.totalorder %v13007_v7, 1  ;;  %v13008_v45 = vld [vmem:[#allocation182_spill] sm:$0xff]  ;;  %v3874_v23 = vrot.slane %v10476_v19, 1  ;;  %v13011_v6 = vld [vmem:[#allocation32_spill] sm:$0xff]  ;;  %v13015_v44 = vld [vmem:[#allocation297_spill] sm:$0xff]  ;;  %v3498_v7 = vpop.f32.mrf.mxu1 }
 0x3f1   : > { %vm10493_vm15 = vmand %vm13004_vm14, %vm13002_vm3  ;;  %vm3165_vm8 = vcmp.eq.s32.totalorder %v13008_v45, 1  ;;  %v4244_v57 = vadd.f32 %v4212_v10, %v3226_v62  ;;  %vm13010_vm0 = vcmp.ne.s32.totalorder %v13009_v46, 0  ;;  %vm13012_vm11 = vcmp.lt.f32.partialorder %v13011_v6, 15.0  ;;  %v13019_v62 = vld [vmem:[#allocation39_spill] sm:$0xff]  ;;  %v4136_v59 = vpop.permute.xlu1 %4135  ;;  %5621 = vset.pattern.permute.xlu2 %v12072_v58  ;;  %v13038_v10 = vld [vmem:[#allocation180_spill] sm:$0xff] }
 0x3f2   : > { %vm10506_vm2 = vmand %vm13012_vm11, %vm13010_vm0  ;;  %vm3664_vm6 = vcmp.eq.s32.totalorder %v10125_v2, 1  ;;  %v2903_v49 = vsel %vm2871_vm7, %v13015_v44, 0.0  ;;  %v3364_v36 = vadd.f32 %v13016_v11, %v2411_v50  ;;  %v2414_v19 = vsel %vm2382_vm12, %v2277_v28, 0.0  ;;  %v13023_v11 = vld [vmem:[#allocation323_spill] sm:$0xff]  ;;  %v13025_v50 = vld [vmem:[#allocation253_spill] sm:$0xff] }
 0x3f3   : > { %vm13018_vm3 = vcmp.ne.s32.totalorder %v13017_v26, 0  ;;  %vm13020_vm14 = vcmp.lt.f32.partialorder %v13019_v62, 15.0  ;;  %v4873_v2 = vsel %vm10472_vm9, 1, %v12072_v58  ;;  %v10527_v46 = vadd.f32 %v9855_v52, %v4244_v57  ;;  %4533 = vperm.xlu1 %5617, %v13023_v11  }
 0x3f4   : > { %vm10519_vm10 = vmand %vm13020_vm14, %vm13018_vm3  ;;  %v3696_v6 = vsel %vm3664_vm6, %v3498_v7, 0.0  ;;  %v13024_v12 = vrot.slane %v10348_v54, 1  ;;  %v3197_v28 = vsel %vm3165_vm8, %v13025_v50, 0.0  ;;  %4956 = vperm.xlu0 %5619, %v4873_v2   ;;  %v2416_v52 = vsel %vm2384_vm4, %v2275_v1, 0.0  ;;  %v13029_v7 = vld [vmem:[#allocation181_spill] sm:$0xff] }
 0x3f5   : > { %v10539_v44 = vadd.f32 %v3696_v6, %v2903_v49  ;;  %v10546_v57 = vsel %vm10432_vm5, 1, %v12072_v58  ;;  %v4849_v54 = vsel %vm10506_vm2, 1, %v12072_v58  ;;  %vm4190_vm12 = vcmp.eq.s32.totalorder %v4136_v59, 1  ;;  %v13037_v6 = vld [vmem:[#allocation193_spill] sm:$0xff] }
 0x3f6   : > { %v10534_v26 = vsel %vm3881_vm13, %v13024_v12, %v3874_v23  ;;  %v10555_v49 = vsel %vm10451_vm1, 1, %v12072_v58  ;;  %v10560_v4 = vsel %vm10493_vm15, 1, %v12072_v58  ;;  %v13027_v14 = vrot.slane %v12945_v56, 7  ;;  %4884 = vperm.xlu2 %5621, %v4849_v54   ;;  %v13031_v56 = vld [vmem:[#allocation156_spill] sm:$0xff]  ;;  %v13039_v12 = vld [vmem:[#allocation263_spill] sm:$0xff]  ;;  %v13040_v50 = vld [vmem:[#allocation321_spill] sm:$0xff] }
 0x3f7   : > { %13026 = vst [vmem:[#allocation195_spill] sm:$0xff] %v10539_v44  ;;  %vm13028_vm4 = vcmp.lt.s32.totalorder %v7472_v41, 1  ;;  %v4222_v45 = vsel %vm4190_vm12, %v10105_v5, 0.0  ;;  %v10570_v62 = vadd.f32 %v13029_v7, %v2414_v19  ;;  %v10575_v13 = vsel %vm10519_vm10, 1, %v12072_v58  ;;  %v13035_v5 = vld [vmem:[#allocation47_spill] sm:$0xff]  ;;  %v4450_v19 = vpop.permute.xlu2 %4449  ;;  %v13041_v59 = vld [vmem:[#allocation337_spill] sm:$0xff] }
 0x3f8   : > { %v10566_v1 = vsel %vm13028_vm4, %v13027_v14, %v2223_v21  ;;  %v3229_v43 = vadd.f32 %v3197_v28, %v10408_v8  ;;  %vm13030_vm5 = vcmp.ne.s32.totalorder %v9888_v33, 0  ;;  %vm13032_vm1 = vcmp.lt.f32.partialorder %v13031_v56, 15.0  ;;  %v10595_v33 = vpop.f32.mrf.mxu2  ;;  %v10600_v14 = vpop.f32.mrf.mxu3  ;;  %v13043_v7 = vld [vmem:[#allocation140_spill] sm:$0xff]  ;;  %vm13059_vm12 = vmmov %vm13028_vm4 }
 0x3f9   : > { %vm10582_vm9 = vmand %vm13032_vm1, %vm13030_vm5  ;;  %v10587_v2 = vadd.f32 %v4222_v45, %v13035_v5  ;;  %vm4183_vm15 = vcmp.eq.s32.totalorder %v4115_v32, 1  ;;  %v10590_v11 = vadd.f32 %v13037_v6, %v2416_v52  ;;  %vm2397_vm10 = vcmp.eq.s32.totalorder %v13038_v10, 1  ;;  %v13042_v52 = vld [vmem:[#allocation336_spill] sm:$0xff]  ;;  %v4145_v6 = vpop.permute.xlu1 %4144 }
 0x3fa   : > { %vm3665_vm7 = vcmp.eq.s32.totalorder %v13040_v50, 1  ;;  %v4215_v28 = vsel %vm4183_vm15, %v9766_v61, 0.0  ;;  %vm4542_vm8 = vcmp.eq.s32.totalorder %v4450_v19, 1  ;;  %vm3168_vm0 = vcmp.eq.s32.totalorder %v13041_v59, 1  ;;  %v13045_v56 = vld [vmem:[#allocation120_spill] sm:$0xff]  ;;  %v13051_v19 = vld [vmem:[#allocation305_spill] sm:$0xff] }
 0x3fb   : > { %13036 = vst [vmem:[#allocation124_spill] sm:$0xff] %v10587_v2  ;;  %v11998_v54 = vrot.slane %v10595_v33, 1  ;;  %v4247_v45 = vadd.f32 %v4215_v28, %v3229_v43  ;;  %v4574_v32 = vsel %vm4542_vm8, %v13042_v52, 0.0  ;;  %vm13044_vm11 = vcmp.ne.s32.totalorder %v13043_v7, 0  ;;  %v3501_v43 = vpop.f32.mrf.mxu1  ;;  %v13049_v28 = vld [vmem:[#allocation89_spill] sm:$0xff]  ;;  %5620 = vset.pattern.permute.xlu1 %v12072_v58  ;;  %v13057_v59 = vld [vmem:[#allocation215_spill] sm:$0xff] }
 0x3fc   : > { %vm13046_vm2 = vcmp.lt.f32.partialorder %v13045_v56, 15.0  ;;  %v4876_v61 = vsel %vm10582_vm9, 1, %v12072_v58  ;;  %v10616_v8 = vadd.f32 %v4574_v32, %v3364_v36  ;;  %vm2387_vm3 = vcmp.eq.s32.totalorder %v13049_v28, 1  ;;  %v13050_v36 = vld [vmem:[#allocation269_spill] sm:$0xff]  ;;  %4881 = vperm.xlu1 %5620, %v10445_v42   ;;  %vm13066_vm9 = vmmov %vm13059_vm12  ;;  %v13071_v44 = vld [vmem:[#allocation256_spill] sm:$0xff] }
 0x3fd   : > { %vm10607_vm6 = vmand %vm13046_vm2, %vm13044_vm11  ;;  %vm4197_vm14 = vcmp.eq.s32.totalorder %v10316_v9, 1  ;;  %v3887_v52 = vsel %vm3881_vm13, %v3874_v23, %v11998_v54  ;;  %v10625_v7 = vadd.f32 %v9977_v63, %v4247_v45  ;;  %v3697_v21 = vsel %vm3665_vm7, %v3501_v43, 0.0  ;;  %4965 = vperm.xlu0 %5619, %v4876_v61   ;;  %v13060_v61 = vld [vmem:[#allocation294_spill] sm:$0xff]  ;;  %v13095_v28 = vld [vmem:[#allocation257_spill] sm:$0xff] }
 0x3fe   : > { %v3200_v32 = vsel %vm3168_vm0, %v13050_v36, 0.0  ;;  %v4229_v56 = vsel %vm4197_vm14, %v3887_v52, 0.0  ;;  %v10634_v9 = vadd.f32 %v3697_v21, %v13051_v19  ;;  %v13053_v63 = vrot.slane %v10600_v14, 1  ;;  %v13061_v21 = vld [vmem:[#allocation187_spill] sm:$0xff]  ;;  %v13062_v36 = vld [vmem:[#allocation26_spill] sm:$0xff] }
 0x3ff   : > { %v13054_v23 = vrot.slane %v10500_v0, 1  ;;  %v13056_v45 = vrot.slane %v12718_v29, 7  ;;  %v13058_v43 = vrot.slane %v13057_v59, 7  ;;  %v4852_v42 = vsel %vm10607_vm6, 1, %v12072_v58 }
 0x400   : > { %13052 = vst [vmem:[#allocation79_spill] sm:$0xff] %v10634_v9  ;;  %vm4193_vm4 = vcmp.eq.s32.totalorder %v4145_v6, 1  ;;  %v10655_v52 = vadd.f32 %v4229_v56, %v13060_v61  ;;  %vm2400_vm5 = vcmp.eq.s32.totalorder %v13061_v21, 1  ;;  %vm4560_vm1 = vcmp.eq.s32.totalorder %v13062_v36, 1  ;;  %4893 = vperm.xlu2 %5621, %v4852_v42   ;;  %v4124_v6 = vpop.permute.xlu0 %4123  ;;  %v13069_v61 = vld [vmem:[#allocation284_spill] sm:$0xff]  ;;  %v10682_v42 = vpop.f32.mrf.mxu2 }
 0x401   : > { %v10643_v50 = vsel %vm3881_vm13, %v13054_v23, %v13053_v63  ;;  %v2272_v19 = vsel %vm13059_vm12, %v13058_v43, %v13056_v45  ;;  %v13063_v63 = vld [vmem:[#allocation270_spill] sm:$0xff]  ;;  %v13065_v29 = vrot.slane %v13039_v12, 7  ;;  %v13067_v45 = vld [vmem:[#allocation111_spill] sm:$0xff]  ;;  %v4225_v5 = vsel %vm4193_vm4, %v10236_v40, 0.0  ;;  %v13068_v43 = vld [vmem:[#allocation252_spill] sm:$0xff] }
 0x402   : > { %13055 = vst [vmem:[#allocation88_spill] sm:$0xff] %v10643_v50  ;;  %v13064_v23 = vrot.slane %v13063_v63, 7  ;;  %vm3158_vm15 = vcmp.eq.s32.totalorder %v13067_v45, 1  ;;  %vm2873_vm7 = vcmp.eq.s32.totalorder %v13068_v43, 1  ;;  %v3232_v56 = vadd.f32 %v3200_v32, %v10425_v15  ;;  %v4459_v63 = vpop.permute.xlu2 %4458  ;;  %v13080_v40 = vld [vmem:[#allocation325_spill] sm:$0xff]  ;;  %vm13088_vm4 = vmmov %vm13066_vm9  ;;  %v13089_v43 = vld [vmem:[#allocation92_spill] sm:$0xff] }
 0x403   : > { %v10670_v54 = vadd.f32 %v4225_v5, %v13069_v61  ;;  %vm4186_vm8 = vcmp.eq.s32.totalorder %v4124_v6, 1  ;;  %vm2013_vm0 = vcmp.eq.s32.totalorder %v13071_v44, 1  ;;  %vm13072_vm11 = vcmp.ne.s32.totalorder %v9955_v27, 0  ;;  %v13077_v5 = vld [vmem:[#allocation217_spill] sm:$0xff]  ;;  %v10690_v6 = vpop.f32.mrf.mxu3  ;;  %v3504_v45 = vpop.f32.mrf.mxu1  ;;  %v13097_v36 = vld [vmem:[#allocation308_spill] sm:$0xff] }
 0x404   : > { %v2262_v59 = vsel %vm13066_vm9, %v13065_v29, %v13064_v23  ;;  %v13073_v23 = vld [vmem:[#allocation165_spill] sm:$0xff]  ;;  %v4218_v15 = vsel %vm4186_vm8, %v9924_v25, 0.0  ;;  %vm4545_vm14 = vcmp.eq.s32.totalorder %v4459_v63, 1  ;;  %v3190_v27 = vsel %vm3158_vm15, %v13077_v5, 0.0  ;;  %4890 = vperm.xlu1 %5620, %v10482_v22   ;;  %vm13093_vm15 = vmmov %vm13088_vm4 }
 0x405   : > { %13070 = vst [vmem:[#allocation151_spill] sm:$0xff] %v10670_v54  ;;  %vm13074_vm2 = vcmp.lt.f32.partialorder %v13073_v23, 15.0  ;;  %v2429_v32 = vsel %vm2397_vm10, %v2262_v59, 0.0  ;;  %v4250_v61 = vadd.f32 %v4218_v15, %v3232_v56  ;;  %v13078_v23 = vld [vmem:[#allocation19_spill] sm:$0xff]  ;;  %v13079_v54 = vld [vmem:[#allocation29_spill] sm:$0xff]  ;;  %vm3666_vm12 = vcmp.eq.s32.totalorder %v13080_v40, 1 }
 0x406   : > { %vm10677_vm6 = vmand %vm13074_vm2, %vm13072_vm11  ;;  %v4577_v9 = vsel %vm4545_vm14, %v13078_v23, 0.0  ;;  %v13081_v2 = vrot.slane %v10223_v47, 1  ;;  %v13082_v25 = vrot.slane %v10185_v20, 1  ;;  %v13083_v63 = vld [vmem:[#allocation153_spill] sm:$0xff]  ;;  %v13084_v40 = vld [vmem:[#allocation303_spill] sm:$0xff]  ;;  %v3698_v5 = vsel %vm3666_vm12, %v3504_v45, 0.0 }
 0x407   : > { %v4609_v59 = vadd.f32 %v4577_v9, %v10570_v62  ;;  %vm2383_vm10 = vcmp.eq.s32.totalorder %v13083_v63, 1  ;;  %v4879_v56 = vsel %vm10677_vm6, 1, %v12072_v58  ;;  %v10707_v15 = vadd.f32 %v10127_v60, %v4250_v61  ;;  %v13085_v23 = vld [vmem:[#allocation279_spill] sm:$0xff]  ;;  %v13091_v45 = vld [vmem:[#allocation228_spill] sm:$0xff] }
 0x408   : > { %v4424_v10 = vsel %vm3881_vm13, %v13082_v25, %v13081_v2  ;;  %v2905_v47 = vsel %vm2873_vm7, %v13084_v40, 0.0  ;;  %v13086_v50 = vrot.slane %v13085_v23, 7  ;;  %v13087_v2 = vrot.slane %v13079_v54, 7  ;;  %v4154_v25 = vpop.permute.xlu1 %4153  ;;  %4974 = vperm.xlu0 %5619, %v4879_v56   ;;  %4899 = vperm.xlu2 %5621, %v10487_v48   ;;  %v13096_v23 = vld [vmem:[#allocation291_spill] sm:$0xff]  ;;  %v13114_v63 = vld [vmem:[#allocation160_spill] sm:$0xff] }
 0x409   : > { %v10719_v9 = vadd.f32 %v4609_v59, %v10266_v24  ;;  %v10721_v29 = vadd.f32 %v3698_v5, %v2905_v47  ;;  %v2419_v60 = vsel %vm2387_vm3, %v2272_v19, 0.0  ;;  %vm2390_vm9 = vcmp.eq.s32.totalorder %v13089_v43, 1  ;;  %v13094_v59 = vld [vmem:[#allocation66_spill] sm:$0xff]  ;;  %v4133_v47 = vpop.permute.xlu0 %4132 }
 0x40a   : > { %v2259_v62 = vsel %vm13088_vm4, %v13087_v2, %v13086_v50  ;;  %v13090_v61 = vrot.slane %v12772_v17, 7  ;;  %v13092_v40 = vrot.slane %v13091_v45, 7  ;;  %v2045_v24 = vsel %vm2013_vm0, %v10401_v16, 0.0  ;;  %v4465_v16 = vpop.permute.xlu2 %4464  ;;  %v13098_v2 = vld [vmem:[#allocation199_spill] sm:$0xff] }
 0x40b   : > { %v4592_v22 = vsel %vm4560_vm1, %v4424_v10, 0.0  ;;  %vm4196_vm7 = vcmp.eq.s32.totalorder %v4154_v25, 1  ;;  %vm2874_vm8 = vcmp.eq.s32.totalorder %v13094_v59, 1  ;;  %v3382_v19 = vadd.f32 %v13095_v28, %v2429_v32  ;;  %v13100_v25 = vld [vmem:[#allocation145_spill] sm:$0xff]  ;;  %v13106_v28 = vld [vmem:[#allocation31_spill] sm:$0xff] }
 0x40c   : > { %v2269_v50 = vsel %vm13093_vm15, %v13092_v40, %v13090_v61  ;;  %v3222_v56 = vadd.f32 %v3190_v27, %v2045_v24  ;;  %v4228_v17 = vsel %vm4196_vm7, %v10534_v26, 0.0  ;;  %v2432_v5 = vsel %vm2400_vm5, %v2259_v62, 0.0  ;;  %v10757_v26 = vpop.f32.mrf.mxu2  ;;  %v13104_v62 = vld [vmem:[#allocation192_spill] sm:$0xff]  ;;  %v4363_v40 = vpop.f32.mrf.mxu3  ;;  %v13105_v24 = vld [vmem:[#allocation3_spill] sm:$0xff] }
 0x40d   : > { %v10745_v44 = vadd.f32 %v4228_v17, %v13096_v23  ;;  %vm4189_vm3 = vcmp.eq.s32.totalorder %v4133_v47, 1  ;;  %v2906_v10 = vsel %vm2874_vm8, %v13097_v36, 0.0  ;;  %vm13099_vm1 = vcmp.ne.s32.totalorder %v13098_v2, 0 }
 0x40e   : > { %vm13101_vm0 = vcmp.lt.f32.partialorder %v13100_v25, 15.0  ;;  %v12003_v48 = vrot.slane %v10354_v51, 1  ;;  %v4221_v21 = vsel %vm4189_vm3, %v10046_v55, 0.0  ;;  %v4624_v27 = vadd.f32 %v4592_v22, %v3382_v19  ;;  %v3507_v19 = vpop.f32.mrf.mxu1 }
 0x40f   : > { %vm10752_vm11 = vmand %vm13101_vm0, %vm13099_vm1  ;;  %vm4547_vm5 = vcmp.eq.s32.totalorder %v4465_v16, 1  ;;  %vm2403_vm2 = vcmp.eq.s32.totalorder %v13104_v62, 1  ;;  %v12006_v61 = vrot.slane %v10682_v42, 1  ;;  %v3877_v45 = vrot.slane %v10757_v26, 1  ;;  %v13110_v26 = vld [vmem:[#allocation136_spill] sm:$0xff] }
 0x410   : > { %v4253_v59 = vadd.f32 %v4221_v21, %v13105_v24  ;;  %v4579_v17 = vsel %vm4547_vm5, %v13106_v28, 0.0  ;;  %v4240_v47 = vadd.f32 %v9984_v39, %v3222_v56  ;;  %vm3667_vm6 = vcmp.eq.s32.totalorder %v10162_v18, 1  ;;  %v13108_v18 = vld [vmem:[#allocation96_spill] sm:$0xff]  ;;  %v4163_v25 = vpop.permute.xlu1 %4162  ;;  %v13112_v28 = vld [vmem:[#allocation38_spill] sm:$0xff]  ;;  %4908 = vperm.xlu2 %5621, %v10546_v57  }
 0x411   : > { %v13107_v23 = vrot.slane %v10500_v0, 1  ;;  %v4611_v22 = vadd.f32 %v4579_v17, %v10590_v11  ;;  %v4853_v16 = vsel %vm10752_vm11, 1, %v12072_v58  ;;  %v3699_v2 = vsel %vm3667_vm6, %v3507_v19, 0.0  ;;  %v13109_v0 = vld [vmem:[#allocation224_spill] sm:$0xff]  ;;  %v13113_v17 = vld [vmem:[#allocation273_spill] sm:$0xff]  ;;  %v13117_v19 = vld [vmem:[#allocation338_spill] sm:$0xff] }
 0x412   : > { %v10777_v36 = vadd.f32 %v4624_v27, %v4253_v59  ;;  %v3885_v39 = vsel %vm3881_vm13, %v12006_v61, %v3877_v45  ;;  %vm2393_vm14 = vcmp.eq.s32.totalorder %v13108_v18, 1  ;;  %vm4563_vm12 = vcmp.eq.s32.totalorder %v13109_v0, 1  ;;  %4896 = vperm.xlu1 %5620, %v4853_v16   ;;  %v13111_v24 = vld [vmem:[#allocation208_spill] sm:$0xff]  ;;  %v13123_v16 = vld [vmem:[#allocation131_spill] sm:$0xff]  ;;  %v4474_v43 = vpop.permute.xlu2 %4473 }
 0x413   : > { %v4421_v55 = vsel %vm3881_vm13, %v12003_v48, %v13107_v23  ;;  %v10785_v56 = vadd.f32 %v4611_v22, %v4240_v47  ;;  %v10787_v11 = vadd.f32 %v3699_v2, %v2906_v10  ;;  %v10792_v32 = vsel %vm2383_vm10, %v10566_v1, 0.0  ;;  %v4142_v10 = vpop.permute.xlu0 %4141  ;;  %v13143_v18 = vld [vmem:[#allocation331_spill] sm:$0xff] }
 0x414   : > { %v12002_v21 = vrot.slane %v13110_v26, 7  ;;  %v4595_v27 = vsel %vm4563_vm12, %v4421_v55, 0.0  ;;  %vm4199_vm4 = vcmp.eq.s32.totalorder %v4163_v25, 1  ;;  %v3372_v59 = vadd.f32 %v13111_v24, %v2419_v60  ;;  %v13119_v60 = vld [vmem:[#allocation152_spill] sm:$0xff]  ;;  %v10824_v24 = vpop.f32.mrf.mxu2 }
 0x415   : > { %vm4566_vm15 = vcmp.eq.s32.totalorder %v13112_v28, 1  ;;  %v3385_v47 = vadd.f32 %v13113_v17, %v2432_v5  ;;  %v4231_v23 = vsel %vm4199_vm4, %v3885_v39, 0.0  ;;  %v2422_v22 = vsel %vm2390_vm9, %v2269_v50, 0.0  ;;  %v13125_v39 = vld [vmem:[#allocation243_spill] sm:$0xff] }
 0x416   : > { %v13115_v1 = vrot.slane %v13114_v63, 7  ;;  %vm13116_vm10 = vcmp.lt.s32.totalorder %v7472_v41, 1  ;;  %vm13118_vm7 = vcmp.ne.s32.totalorder %v13117_v19, 0  ;;  %vm13120_vm8 = vcmp.lt.f32.partialorder %v13119_v60, 15.0 }
 0x417   : > { %vm10811_vm3 = vmand %vm13120_vm8, %vm13118_vm7  ;;  %v4407_v57 = vrot.slane %v4363_v40, 1  ;;  %v10816_v2 = vadd.f32 %v4231_v23, %v13123_v16  ;;  %vm4192_vm9 = vcmp.eq.s32.totalorder %v4142_v10, 1  ;;  %v13124_v50 = vrot.slane %v12812_v31, 7  ;;  %v10830_v10 = vpop.f32.mrf.mxu3  ;;  %v13129_v31 = vld [vmem:[#allocation35_spill] sm:$0xff]  ;;  %v13130_v16 = vld [vmem:[#allocation69_spill] sm:$0xff] }
 0x418   : > { %v2256_v55 = vsel %vm13116_vm10, %v12002_v21, %v13115_v1  ;;  %v13126_v0 = vrot.slane %v13125_v39, 7  ;;  %vm13127_vm1 = vmmov %vm13116_vm10  ;;  %v4224_v17 = vsel %vm4192_vm9, %v10203_v30, 0.0  ;;  %v4627_v63 = vadd.f32 %v4595_v27, %v3385_v47  ;;  %v13128_v1 = vld [vmem:[#allocation99_spill] sm:$0xff]  ;;  %v13132_v39 = vld [vmem:[#allocation296_spill] sm:$0xff]  ;;  %4917 = vperm.xlu2 %5621, %v10555_v49  }
 0x419   : > { %vm4550_vm0 = vcmp.eq.s32.totalorder %v4474_v43, 1  ;;  %vm2396_vm11 = vcmp.eq.s32.totalorder %v13128_v1, 1  ;;  %v11999_v40 = vrot.slane %v10690_v6, 1  ;;  %v12005_v23 = vrot.slane %v10824_v24, 1  ;;  %vm13146_vm8 = vmmov %vm13127_vm1 }
 0x41a   : > { %v2266_v25 = vsel %vm13127_vm1, %v13126_v0, %v13124_v50  ;;  %v4256_v19 = vadd.f32 %v4224_v17, %v13129_v31  ;;  %v4582_v60 = vsel %vm4550_vm0, %v9773_v35, 0.0  ;;  %vm2378_vm5 = vcmp.eq.s32.totalorder %v13130_v16, 1  ;;  %v13131_v50 = vld [vmem:[#allocation200_spill] sm:$0xff]  ;;  %v13134_v31 = vld [vmem:[#allocation258_spill] sm:$0xff] }
 0x41b   : > { %vm2406_vm6 = vcmp.eq.s32.totalorder %v13131_v50, 1  ;;  %v2435_v30 = vsel %vm2403_vm2, %v2256_v55, 0.0  ;;  %v4856_v27 = vsel %vm10811_vm3, 1, %v12072_v58  ;;  %v12000_v47 = vrot.slane %v10830_v10, 1  ;;  %vm13136_vm2 = vmmov %vm13127_vm1  ;;  %v13164_v50 = vld [vmem:[#allocation188_spill] sm:$0xff] }
 0x41c   : > { %v4614_v43 = vadd.f32 %v4582_v60, %v3372_v59  ;;  %vm4200_vm12 = vcmp.eq.s32.totalorder %v10438_v3, 1  ;;  %v4418_v35 = vsel %vm3881_vm13, %v11999_v40, %v4407_v57  ;;  %v3884_v62 = vsel %vm3881_vm13, %v3877_v45, %v12005_v23  ;;  %4905 = vperm.xlu1 %5620, %v4856_v27   ;;  %v13138_v27 = vld [vmem:[#allocation302_spill] sm:$0xff]  ;;  %v13139_v40 = vld [vmem:[#allocation265_spill] sm:$0xff] }
 0x41d   : > { %v10851_v55 = vadd.f32 %v4627_v63, %v4256_v19  ;;  %v12004_v5 = vrot.slane %v13132_v39, 7  ;;  %v4232_v0 = vsel %vm4200_vm12, %v3884_v62, 0.0  ;;  %v10861_v3 = vsel %vm3881_vm13, %v4407_v57, %v12000_v47  ;;  %v4447_v63 = vpop.permute.xlu1 %4446  ;;  %v13137_v19 = vld [vmem:[#allocation219_spill] sm:$0xff]  ;;  %v13140_v57 = vld [vmem:[#allocation34_spill] sm:$0xff] }
 0x41e   : > { %v10855_v17 = vadd.f32 %v4614_v43, %v10029_v34  ;;  %v13133_v59 = vrot.slane %v13039_v12, 7  ;;  %v13135_v60 = vrot.slane %v13134_v31, 7  ;;  %v3375_v62 = vadd.f32 %v13137_v19, %v2422_v22  ;;  %v13141_v31 = vld [vmem:[#allocation268_spill] sm:$0xff]  ;;  %v13142_v22 = vld [vmem:[#allocation10_spill] sm:$0xff] }
 0x41f   : > { %v2425_v34 = vsel %vm2393_vm14, %v2266_v25, 0.0  ;;  %v10873_v43 = vadd.f32 %v4232_v0, %v13138_v27  ;;  %vm3155_vm4 = vcmp.eq.s32.totalorder %v13139_v40, 1  ;;  %v12001_v47 = vrot.slane %v13140_v57, 7  ;;  %v4483_v0 = vpop.permute.xlu2 %4482  ;;  %v13144_v19 = vld [vmem:[#allocation288_spill] sm:$0xff] }
 0x420   : > { %v2263_v45 = vsel %vm13136_vm2, %v13135_v60, %v13133_v59  ;;  %v4598_v12 = vsel %vm4566_vm15, %v4418_v35, 0.0  ;;  %vm4541_vm10 = vcmp.eq.s32.totalorder %v4447_v63, 1  ;;  %v4151_v59 = vpop.permute.xlu0 %4150  ;;  %vm3157_vm7 = vcmp.eq.s32.totalorder %v13141_v31, 1  ;;  %vm13148_vm15 = vmmov %vm13127_vm1  ;;  %v13151_v63 = vld [vmem:[#allocation162_spill] sm:$0xff]  ;;  %v13161_v40 = vld [vmem:[#allocation44_spill] sm:$0xff]  ;;  %4926 = vperm.xlu2 %5621, %v10560_v4  }
 0x421   : > { %v3388_v60 = vadd.f32 %v13142_v22, %v2435_v30  ;;  %v10883_v25 = vsel %vm4541_vm10, %v13143_v18, 0.0  ;;  %vm4195_vm14 = vcmp.eq.s32.totalorder %v4151_v59, 1  ;;  %v13145_v27 = vrot.slane %v13144_v19, 7  ;;  %v13149_v30 = vld [vmem:[#allocation144_spill] sm:$0xff]  ;;  %v10901_v59 = vpop.f32.mrf.mxu2  ;;  %v13153_v18 = vld [vmem:[#allocation250_spill] sm:$0xff]  ;;  %v10905_v19 = vpop.f32.mrf.mxu3 }
 0x422   : > { %v13147_v35 = vrot.slane %v12930_v53, 7  ;;  %vm13150_vm3 = vcmp.ne.s32.totalorder %v13149_v30, 0  ;;  %vm13152_vm9 = vcmp.lt.f32.partialorder %v13151_v63, 15.0  ;;  %v4227_v22 = vsel %vm4195_vm14, %v10385_v37, 0.0  ;;  %v13154_v53 = vld [vmem:[#allocation244_spill] sm:$0xff]  ;;  %v13156_v63 = vld [vmem:[#allocation205_spill] sm:$0xff] }
 0x423   : > { %v2253_v28 = vsel %vm13146_vm8, %v12001_v47, %v13145_v27  ;;  %vm4827_vm1 = vmand %vm13152_vm9, %vm13150_vm3  ;;  %vm4553_vm0 = vcmp.eq.s32.totalorder %v4483_v0, 1  ;;  %vm2010_vm12 = vcmp.eq.s32.totalorder %v13153_v18, 1  ;;  %v4259_v27 = vadd.f32 %v4227_v22, %v13154_v53  ;;  %v13165_v18 = vld [vmem:[#allocation236_spill] sm:$0xff] }
 0x424   : > { %v2281_v49 = vsel %vm13148_vm15, %v12004_v5, %v13147_v35  ;;  %v4630_v47 = vadd.f32 %v4598_v12, %v3388_v60  ;;  %v4585_v21 = vsel %vm4553_vm0, %v9931_v38, 0.0  ;;  %v13155_v35 = vld [vmem:[#allocation214_spill] sm:$0xff]  ;;  %v3187_v48 = vsel %vm3155_vm4, %v13156_v63, 0.0  ;;  %v13157_v12 = vld [vmem:[#allocation25_spill] sm:$0xff] }
 0x425   : > { %v3189_v30 = vsel %vm3157_vm7, %v13155_v35, 0.0  ;;  %v4617_v5 = vadd.f32 %v4585_v21, %v3375_v62  ;;  %v2428_v37 = vsel %vm2396_vm11, %v2263_v45, 0.0  ;;  %v2438_v0 = vsel %vm2406_vm6, %v2253_v28, 0.0  ;;  %v13159_v38 = vld [vmem:[#allocation169_spill] sm:$0xff]  ;;  %v13162_v21 = vld [vmem:[#allocation104_spill] sm:$0xff]  ;;  %v13163_v45 = vld [vmem:[#allocation71_spill] sm:$0xff]  ;;  %v4456_v63 = vpop.permute.xlu1 %4455 }
 0x426   : > { %v4859_v22 = vsel %vm4827_vm1, 1, %v12072_v58  ;;  %vm13158_vm2 = vcmp.ne.s32.totalorder %v13157_v12, 0  ;;  %vm13160_vm10 = vcmp.lt.f32.partialorder %v13159_v38, 15.0  ;;  %v2410_v31 = vsel %vm2378_vm5, %v2281_v49, 0.0  ;;  %v13166_v12 = vld [vmem:[#allocation235_spill] sm:$0xff] }
 0x427   : > { %vm4830_vm14 = vmand %vm13160_vm10, %vm13158_vm2  ;;  %v10926_v60 = vadd.f32 %v4630_v47, %v4259_v27  ;;  %vm4569_vm4 = vcmp.eq.s32.totalorder %v13161_v40, 1  ;;  %v2042_v1 = vsel %vm2010_vm12, %v13162_v21, 0.0  ;;  %v10931_v62 = vadd.f32 %v4617_v5, %v13163_v45  ;;  %4914 = vperm.xlu1 %5620, %v4859_v22   ;;  %v13167_v49 = vld [vmem:[#allocation251_spill] sm:$0xff]  ;;  %v13168_v27 = vld [vmem:[#allocation28_spill] sm:$0xff] }
 0x428   : > { %v3368_v28 = vadd.f32 %v13164_v50, %v10792_v32  ;;  %v3221_v53 = vadd.f32 %v3189_v30, %v13165_v18  ;;  %v3219_v35 = vadd.f32 %v3187_v48, %v2042_v1  ;;  %v3378_v16 = vadd.f32 %v13166_v12, %v2425_v34  ;;  %v13169_v21 = vld [vmem:[#allocation157_spill] sm:$0xff]  ;;  %v4160_v5 = vpop.permute.xlu0 %4159  ;;  %v13170_v22 = vld [vmem:[#allocation222_spill] sm:$0xff]  ;;  %v13174_v1 = vld [vmem:[#allocation7_spill] sm:$0xff]  ;;  %4935 = vperm.xlu2 %5621, %v10575_v13  }
 0x429   : > { %v3381_v47 = vadd.f32 %v13167_v49, %v2428_v37  ;;  %v3391_v38 = vadd.f32 %v13168_v27, %v2438_v0  ;;  %v4862_v23 = vsel %vm4830_vm14, 1, %v12072_v58  ;;  %v3363_v61 = vadd.f32 %v13169_v21, %v2410_v31  ;;  %v13171_v32 = vld [vmem:[#allocation234_spill] sm:$0xff]  ;;  %v4492_v0 = vpop.permute.xlu2 %4491  ;;  %v3846_v18 = vpop.f32.mrf.mxu2  ;;  %v13189_v40 = vld [vmem:[#allocation167_spill] sm:$0xff] }
 0x42a   : > { %vm4544_vm11 = vcmp.eq.s32.totalorder %v4456_v63, 1  ;;  %vm4170_vm5 = vcmp.eq.s32.totalorder %v13170_v22, 1  ;;  %v13172_v48 = vrot.slane %v10682_v42, 1  ;;  %v13173_v34 = vrot.slane %v10595_v33, 1  ;;  %v13175_v31 = vld [vmem:[#allocation194_spill] sm:$0xff]  ;;  %v10953_v49 = vpop.f32.mrf.mxu3  ;;  %v13176_v42 = vld [vmem:[#allocation249_spill] sm:$0xff] }
 0x42b   : > { %v4576_v30 = vsel %vm4544_vm11, %v13171_v32, 0.0  ;;  %vm4198_vm6 = vcmp.eq.s32.totalorder %v4160_v5, 1  ;;  %v4237_v45 = vadd.f32 %v13174_v1, %v3219_v35  ;;  %vm4556_vm7 = vcmp.eq.s32.totalorder %v4492_v0, 1  ;;  %v13177_v33 = vld [vmem:[#allocation231_spill] sm:$0xff]  ;;  %v13180_v0 = vld [vmem:[#allocation310_spill] sm:$0xff] }
 0x42c   : > { %v3886_v37 = vsel %vm3881_vm13, %v13173_v34, %v13172_v48  ;;  %v4608_v50 = vadd.f32 %v4576_v30, %v13175_v31  ;;  %v3879_v63 = vrot.slane %v10901_v59, 1  ;;  %v3880_v12 = vrot.slane %v3846_v18, 1  ;;  %v13178_v30 = vld [vmem:[#allocation14_spill] sm:$0xff] }
 0x42d   : > { %v4230_v4 = vsel %vm4198_vm6, %v3886_v37, 0.0  ;;  %v4588_v21 = vsel %vm4556_vm7, %v13177_v33, 0.0  ;;  %v4409_v32 = vrot.slane %v10905_v19, 1  ;;  %v4410_v35 = vrot.slane %v10953_v49, 1  ;;  %v13179_v37 = vld [vmem:[#allocation149_spill] sm:$0xff] }
 0x42e   : > { %v4262_v27 = vadd.f32 %v4230_v4, %v13176_v42  ;;  %v10958_v5 = vadd.f32 %v4608_v50, %v4237_v45  ;;  %v4620_v48 = vadd.f32 %v4588_v21, %v3378_v16  ;;  %v4239_v34 = vadd.f32 %v13178_v30, %v3221_v53  ;;  %v13182_v16 = vld [vmem:[#allocation229_spill] sm:$0xff]  ;;  %v4462_v30 = vpop.permute.xlu1 %4461 }
 0x42f   : > { %vm4171_vm8 = vcmp.eq.s32.totalorder %v13179_v37, 1  ;;  %v3882_v59 = vsel %vm3881_vm13, %v3879_v63, %v3880_v12  ;;  %v13181_v1 = vrot.slane %v13180_v0, 1  ;;  %v4415_v53 = vsel %vm3881_vm13, %v4409_v32, %v4410_v35  ;;  %4923 = vperm.xlu1 %5620, %v4862_v23   ;;  %v13183_v42 = vld [vmem:[#allocation313_spill] sm:$0xff] }
 0x430   : > { %v4202_v18 = vsel %vm4170_vm5, %v3882_v59, 0.0  ;;  %v10978_v50 = vadd.f32 %v4620_v48, %v13182_v16  ;;  %v4605_v4 = vadd.f32 %v10883_v25, %v3363_v61  ;;  %v4601_v22 = vsel %vm4569_vm4, %v4415_v53, 0.0  ;;  %v4169_v59 = vpop.permute.xlu0 %4168  ;;  %v13187_v25 = vld [vmem:[#allocation171_spill] sm:$0xff] }
 0x431   : > { %v3913_v31 = vsel %vm3881_vm13, %v3880_v12, %v13181_v1  ;;  %v4234_v33 = vadd.f32 %v4202_v18, %v13183_v42  ;;  %v13184_v12 = vld [vmem:[#allocation317_spill] sm:$0xff]  ;;  %v4633_v37 = vadd.f32 %v4601_v22, %v3391_v38  ;;  %vm4546_vm15 = vcmp.eq.s32.totalorder %v4462_v30, 1  ;;  %v4501_v38 = vpop.permute.xlu2 %4500  ;;  %v13195_v42 = vld [vmem:[#allocation275_spill] sm:$0xff] }
 0x432   : > { %v4203_v45 = vsel %vm4171_vm8, %v3913_v31, 0.0  ;;  %v13185_v0 = vrot.slane %v10824_v24, 1  ;;  %v13186_v61 = vrot.slane %v10185_v20, 1  ;;  %v13188_v48 = vrot.slane %v13187_v25, 1  ;;  %v13190_v24 = vld [vmem:[#allocation220_spill] sm:$0xff]  ;;  %v13199_v30 = vld [vmem:[#allocation175_spill] sm:$0xff] }
 0x433   : > { %v4235_v21 = vadd.f32 %v4203_v45, %v13184_v12  ;;  %v4578_v31 = vsel %vm4546_vm15, %v13189_v40, 0.0  ;;  %vm4201_vm3 = vcmp.eq.s32.totalorder %v4169_v59, 1  ;;  %v11000_v13 = vadd.f32 %v4605_v4, %v4234_v33  ;;  %v13192_v45 = vld [vmem:[#allocation174_spill] sm:$0xff]  ;;  %v13198_v4 = vld [vmem:[#allocation125_spill] sm:$0xff] }
 0x434   : > { %v3883_v23 = vsel %vm3881_vm13, %v13185_v0, %v3879_v63  ;;  %v4425_v1 = vsel %vm3881_vm13, %v13188_v48, %v13186_v61  ;;  %vm13191_vm9 = vcmp.ne.s32.totalorder %v13190_v24, 0  ;;  %vm13193_vm1 = vcmp.lt.f32.partialorder %v13192_v45, 15.0  ;;  %v13204_v59 = vld [vmem:[#allocation309_spill] sm:$0xff]  ;;  %v13206_v48 = vld [vmem:[#allocation75_spill] sm:$0xff] }
 0x435   : > { %v10998_v18 = vadd.f32 %v10616_v8, %v4235_v21  ;;  %vm4833_vm0 = vmand %vm13193_vm1, %vm13191_vm9  ;;  %v11006_v20 = vadd.f32 %v4633_v37, %v4262_v27  ;;  %v4610_v63 = vadd.f32 %v4578_v31, %v3368_v28  ;;  %v4233_v53 = vsel %vm4201_vm3, %v3883_v23, 0.0  ;;  %v11014_v21 = vpop.f32.mrf.mxu3  ;;  %v13201_v27 = vld [vmem:[#allocation45_spill] sm:$0xff]  ;;  %v13207_v31 = vld [vmem:[#allocation304_spill] sm:$0xff] }
 0x436   : > { %vm4559_vm12 = vcmp.eq.s32.totalorder %v4501_v38, 1  ;;  %v13194_v16 = vrot.slane %v13079_v54, 7  ;;  %v13196_v12 = vrot.slane %v13195_v42, 7  ;;  %vm13197_vm2 = vcmp.lt.s32.totalorder %v7472_v41, 1  ;;  %v13203_v54 = vld [vmem:[#allocation102_spill] sm:$0xff]  ;;  %v13205_v61 = vld [vmem:[#allocation161_spill] sm:$0xff]  ;;  %v4471_v24 = vpop.permute.xlu1 %4470 }
 0x437   : > { %v11017_v33 = vadd.f32 %v4233_v53, %v13198_v4  ;;  %v4591_v22 = vsel %vm4559_vm12, %v4425_v1, 0.0  ;;  %vm13200_vm10 = vcmp.ne.s32.totalorder %v13199_v30, 0  ;;  %vm13202_vm14 = vcmp.lt.f32.partialorder %v13201_v27, 15.0  ;;  %v13208_v45 = vld [vmem:[#allocation23_spill] sm:$0xff]  ;;  %vm13210_vm6 = vmmov %vm13197_vm2  ;;  %v13215_v30 = vld [vmem:[#allocation178_spill] sm:$0xff] }
 0x438   : > { %v2260_v8 = vsel %vm13197_vm2, %v13196_v12, %v13194_v16  ;;  %vm4837_vm4 = vmand %vm13202_vm14, %vm13200_vm10  ;;  %v11023_v28 = vadd.f32 %v4610_v63, %v4239_v34  ;;  %v4623_v37 = vadd.f32 %v4591_v22, %v3381_v47  ;;  %vm2399_vm11 = vcmp.eq.s32.totalorder %v13203_v54, 1  ;;  %v4888_v53 = vpop.permute.xlu0 %4887  ;;  %v13211_v16 = vld [vmem:[#allocation168_spill] sm:$0xff]  ;;  %v13213_v22 = vld [vmem:[#allocation18_spill] sm:$0xff] }
 0x439   : > { %v4757_v0 = vrot.slane %v13204_v59, 1  ;;  %v4865_v23 = vsel %vm4833_vm0, 1, %v12072_v58  ;;  %v2248_v25 = vrot.slane %v13205_v61, 7  ;;  %v2431_v1 = vsel %vm2399_vm11, %v2260_v8, 0.0  ;;  %v13212_v8 = vld [vmem:[#allocation267_spill] sm:$0xff]  ;;  %vm13226_vm0 = vmmov %vm13197_vm2 }
 0x43a   : > { %v11030_v40 = vadd.f32 %v4623_v37, %v13206_v48  ;;  %4932 = vperm.xlu1 %5620, %v4865_v23   ;;  %v4756_v38 = vrot.slane %v13207_v31, 1  ;;  %v4869_v34 = vsel %vm4837_vm4, 1, %v12072_v58  ;;  %vm2409_vm5 = vcmp.eq.s32.totalorder %v13208_v45, 1  ;;  %v13219_v37 = vld [vmem:[#allocation41_spill] sm:$0xff] }
 0x43b   : > { %v13209_v47 = vrot.slane %v13132_v39, 7  ;;  %vm4549_vm7 = vcmp.eq.s32.totalorder %v4471_v24, 1  ;;  %4944 = vperm.xlu2 %5621, %v4869_v34   ;;  %vm4978_vm8 = vcmp.eq.s32.totalorder %v4888_v53, 1  ;;  %v4510_v39 = vpop.permute.xlu2 %4509  ;;  %v3384_v4 = vadd.f32 %v13212_v8, %v2431_v1  ;;  %v13221_v24 = vld [vmem:[#allocation232_spill] sm:$0xff]  ;;  %v13224_v53 = vld [vmem:[#allocation106_spill] sm:$0xff]  ;;  %v13234_v45 = vld [vmem:[#allocation281_spill] sm:$0xff] }
 0x43c   : > { %v4581_v42 = vsel %vm4549_vm7, %v13211_v16, 0.0  ;;  %v4810_v12 = vsel %vm3881_vm13, %v4756_v38, %v4757_v0  ;;  %vm13214_vm15 = vcmp.ne.s32.totalorder %v13213_v22, 0  ;;  %vm13216_vm3 = vcmp.lt.f32.partialorder %v13215_v30, 15.0 }
 0x43d   : > { %v2250_v63 = vsel %vm13210_vm6, %v2248_v25, %v13209_v47  ;;  %vm11053_vm9 = vmand %vm13216_vm3, %vm13214_vm15  ;;  %v4613_v54 = vadd.f32 %v4581_v42, %v13219_v37  ;;  %v5010_v23 = vsel %vm4978_vm8, %v4810_v12, 0.0  ;;  %v13220_v48 = vrot.slane %v10354_v51, 1  ;;  %v11072_v42 = vpop.f32.mrf.mxu3  ;;  %v13227_v12 = vld [vmem:[#allocation201_spill] sm:$0xff] }
 0x43e   : > { %v13222_v34 = vrot.slane %v13221_v24, 1  ;;  %vm4562_vm1 = vcmp.eq.s32.totalorder %v4510_v39, 1  ;;  %v13223_v1 = vrot.slane %v13110_v26, 7  ;;  %v13225_v16 = vrot.slane %v13224_v53, 7  ;;  %v13228_v26 = vld [vmem:[#allocation179_spill] sm:$0xff]  ;;  %v13235_v24 = vld [vmem:[#allocation108_spill] sm:$0xff]  ;;  %v4480_v27 = vpop.permute.xlu1 %4479 }
 0x43f   : > { %v2441_v22 = vsel %vm2409_vm5, %v2250_v63, 0.0  ;;  %v5042_v51 = vadd.f32 %v5010_v23, %v13227_v12  ;;  %vm13229_vm12 = vcmp.ne.s32.totalorder %v13228_v26, 0  ;;  %v13230_v39 = vld [vmem:[#allocation51_spill] sm:$0xff]  ;;  %v11091_v63 = vadd.f32 %v4613_v54, %v13234_v45  ;;  %v13239_v26 = vld [vmem:[#allocation322_spill] sm:$0xff]  ;;  %v13249_v37 = vld [vmem:[#allocation185_spill] sm:$0xff] }
 0x440   : > { %v4422_v47 = vsel %vm3881_vm13, %v13222_v34, %v13220_v48  ;;  %v2257_v8 = vsel %vm13226_vm0, %v13225_v16, %v13223_v1  ;;  %vm13231_vm2 = vcmp.lt.f32.partialorder %v13230_v39, 15.0  ;;  %v4412_v23 = vrot.slane %v11072_v42, 1  ;;  %v13236_v34 = vld [vmem:[#allocation50_spill] sm:$0xff] }
 0x441   : > { %v4594_v30 = vsel %vm4562_vm1, %v4422_v47, 0.0  ;;  %vm11086_vm10 = vmand %vm13231_vm2, %vm13229_vm12  ;;  %vm2402_vm14 = vcmp.eq.s32.totalorder %v13235_v24, 1  ;;  %vm4572_vm4 = vcmp.eq.s32.totalorder %v13236_v34, 1  ;;  %v4868_v47 = vsel %vm11053_vm9, 1, %v12072_v58  ;;  %v13237_v1 = vld [vmem:[#allocation54_spill] sm:$0xff]  ;;  %v4903_v34 = vpop.permute.xlu0 %4902 }
 0x442   : > { %v4626_v48 = vadd.f32 %v4594_v30, %v3384_v4  ;;  %v5106_v53 = vadd.f32 %v13237_v1, %v5042_v51  ;;  %v13238_v16 = vld [vmem:[#allocation46_spill] sm:$0xff]  ;;  %v13240_v39 = vrot.slane %v13239_v26, 1  ;;  %v13241_v4 = vld [vmem:[#allocation116_spill] sm:$0xff]  ;;  %4941 = vperm.xlu1 %5620, %v4868_v47   ;;  %v2434_v45 = vsel %vm2402_vm14, %v2257_v8, 0.0  ;;  %vm13256_vm9 = vmmov %vm13226_vm0 }
 0x443   : > { %v3394_v12 = vadd.f32 %v13238_v16, %v2441_v22  ;;  %vm13242_vm11 = vcmask 31744   ;;  %v4872_v22 = vsel %vm11086_vm10, 1, %v12072_v58  ;;  %vm4552_vm5 = vcmp.eq.s32.totalorder %v4480_v27, 1  ;;  %v13243_v1 = vld [vmem:[#allocation264_spill] sm:$0xff]  ;;  %v4519_v26 = vpop.permute.xlu2 %4518 }
 0x444   : > { %v4444_v54 = vsel %vm3881_vm13, %v4412_v23, %v13240_v39  ;;  %v11108_v30 = vadd.f32 %v4626_v48, %v13241_v4  ;;  %5138 = vst.msk [vmem:[%s11080_s22 + $0x10] sm:$0xff] %vm13242_vm11, %v5106_v53  ;;  %4953 = vperm.xlu2 %5621, %v4872_v22   ;;  %v4584_v16 = vsel %vm4552_vm5, %v13243_v1, 0.0  ;;  %vm4983_vm6 = vcmp.eq.s32.totalorder %v4903_v34, 1  ;;  %v13244_v48 = vld [vmem:[#allocation5_spill] sm:$0xff]  ;;  %v13257_v1 = vld [vmem:[#allocation216_spill] sm:$0xff]  ;;  %vm13266_vm10 = vmmov %vm13242_vm11 }
 0x445   : > { %v4604_v24 = vsel %vm4572_vm4, %v4444_v54, 0.0  ;;  %v3387_v39 = vadd.f32 %v13244_v48, %v2434_v45  ;;  %v13245_v8 = vrot.slane %v10690_v6, 1  ;;  %v13246_v47 = vrot.slane %v10600_v14, 1  ;;  %v13247_v54 = vld [vmem:[#allocation70_spill] sm:$0xff]  ;;  %v13254_v14 = vld [vmem:[#allocation53_spill] sm:$0xff] }
 0x446   : > { %v4636_v51 = vadd.f32 %v4604_v24, %v3394_v12  ;;  %vm13248_vm7 = vcmp.ne.s32.totalorder %v13247_v54, 0  ;;  %vm13250_vm8 = vcmp.lt.f32.partialorder %v13249_v37, 15.0  ;;  %v13251_v12 = vld [vmem:[#allocation230_spill] sm:$0xff]  ;;  %v13252_v24 = vld [vmem:[#allocation8_spill] sm:$0xff]  ;;  %vm4565_vm3 = vcmp.eq.s32.totalorder %v4519_v26, 1  ;;  %v13262_v54 = vld [vmem:[#allocation259_spill] sm:$0xff] }
 0x447   : > { %v4419_v53 = vsel %vm3881_vm13, %v13246_v47, %v13245_v8  ;;  %vm4839_vm15 = vmand %vm13250_vm8, %vm13248_vm7  ;;  %v4616_v4 = vadd.f32 %v4584_v16, %v13251_v12  ;;  %v5015_v27 = vsel %vm4983_vm6, %v13252_v24, 0.0  ;;  %v13253_v6 = vrot.slane %v13140_v57, 7  ;;  %v13258_v47 = vld [vmem:[#allocation186_spill] sm:$0xff]  ;;  %v13260_v16 = vld [vmem:[#allocation57_spill] sm:$0xff] }
 0x448   : > { %v11130_v45 = vadd.f32 %v4636_v51, %v11017_v33  ;;  %v13255_v22 = vrot.slane %v13254_v14, 7  ;;  %v5047_v48 = vadd.f32 %v5015_v27, %v13257_v1  ;;  %v4597_v8 = vsel %vm4565_vm3, %v4419_v53, 0.0  ;;  %v13263_v51 = vld [vmem:[#allocation113_spill] sm:$0xff]  ;;  %v13264_v37 = vld [vmem:[#allocation266_spill] sm:$0xff]  ;;  %v4489_v27 = vpop.permute.xlu1 %4488  ;;  %vm13278_vm8 = vmmov %vm13256_vm9 }
 0x449   : > { %vm13259_vm1 = vcmp.ne.s32.totalorder %v13258_v47, 0  ;;  %vm13261_vm0 = vcmp.lt.f32.partialorder %v13260_v16, 15.0  ;;  %v11144_v26 = vadd.f32 %v4616_v4, %v13262_v54  ;;  %v4629_v33 = vadd.f32 %v4597_v8, %v3387_v39  ;;  %v13265_v24 = vld [vmem:[#allocation130_spill] sm:$0xff]  ;;  %v4912_v4 = vpop.permute.xlu0 %4911  ;;  %v13267_v39 = vld [vmem:[#allocation239_spill] sm:$0xff]  ;;  %v13273_v54 = vld [vmem:[#allocation245_spill] sm:$0xff] }
 0x44a   : > { %v2254_v34 = vsel %vm13256_vm9, %v13255_v22, %v13253_v6  ;;  %vm4843_vm12 = vmand %vm13261_vm0, %vm13259_vm1  ;;  %vm2405_vm2 = vcmp.eq.s32.totalorder %v13263_v51, 1  ;;  %v4871_v57 = vsel %vm4839_vm15, 1, %v12072_v58  ;;  %v5111_v12 = vadd.f32 %v13264_v37, %v5047_v48  ;;  %v13268_v8 = vld [vmem:[#allocation143_spill] sm:$0xff]  ;;  %v13271_v16 = vld [vmem:[#allocation190_spill] sm:$0xff] }
 0x44b   : > { %v11150_v6 = vadd.f32 %v4629_v33, %v13265_v24  ;;  %4950 = vperm.xlu1 %5620, %v4871_v57   ;;  %v2437_v53 = vsel %vm2405_vm2, %v2254_v34, 0.0  ;;  %v4875_v14 = vsel %vm4843_vm12, 1, %v12072_v58  ;;  %vm4555_vm14 = vcmp.eq.s32.totalorder %v4489_v27, 1  ;;  %v4528_v1 = vpop.permute.xlu2 %4527  ;;  %v13269_v48 = vld [vmem:[#allocation43_spill] sm:$0xff]  ;;  %v11161_v34 = vpop.f32.mrf.mxu0  ;;  %v13274_v51 = vld [vmem:[#allocation112_spill] sm:$0xff]  ;;  %vm13286_vm0 = vmmov %vm13266_vm10 }
 0x44c   : > { %5143 = vst.msk [vmem:[%s11080_s22 + $0x38] sm:$0xff] %vm13266_vm10, %v5111_v12  ;;  %4962 = vperm.xlu2 %5621, %v4875_v14   ;;  %v4587_v22 = vsel %vm4555_vm14, %v13267_v39, 0.0  ;;  %vm4986_vm4 = vcmp.eq.s32.totalorder %v4912_v4, 1  ;;  %v3390_v47 = vadd.f32 %v13268_v8, %v2437_v53  ;;  %vm13270_vm11 = vcmp.ne.s32.totalorder %v13269_v48, 0  ;;  %v13276_v24 = vld [vmem:[#allocation59_spill] sm:$0xff] }
 0x44d   : > { %vm13272_vm5 = vcmp.lt.f32.partialorder %v13271_v16, 15.0  ;;  %v4619_v33 = vadd.f32 %v4587_v22, %v13273_v54  ;;  %v5018_v57 = vsel %vm4986_vm4, %v13274_v51, 0.0  ;;  %v13275_v37 = vrot.slane %v10830_v10, 1  ;;  %v13279_v14 = vld [vmem:[#allocation183_spill] sm:$0xff] }
 0x44e   : > { %vm4842_vm6 = vmand %vm13272_vm5, %vm13270_vm11  ;;  %vm4568_vm7 = vcmp.eq.s32.totalorder %v4528_v1, 1  ;;  %v13277_v53 = vrot.slane %v13276_v24, 7  ;;  %v5050_v4 = vadd.f32 %v5018_v57, %v13279_v14  ;;  %v13280_v22 = vld [vmem:[#allocation191_spill] sm:$0xff]  ;;  %v13287_v57 = vld [vmem:[#allocation73_spill] sm:$0xff] }
 0x44f   : > { %v4416_v12 = vsel %vm3881_vm13, %v13275_v37, %v4409_v32  ;;  %vm13281_vm15 = vcmp.ne.s32.totalorder %v13280_v22, 0  ;;  %v13282_v8 = vld [vmem:[#allocation63_spill] sm:$0xff]  ;;  %v4874_v61 = vsel %vm4842_vm6, 1, %v12072_v58 }
 0x450   : > { %v2251_v27 = vsel %vm13278_vm8, %v13277_v53, %v2248_v25  ;;  %v4600_v39 = vsel %vm4568_vm7, %v4416_v12, 0.0  ;;  %vm13283_vm3 = vcmp.lt.f32.partialorder %v13282_v8, 15.0  ;;  %v13284_v10 = vld [vmem:[#allocation123_spill] sm:$0xff]  ;;  %v5114_v48 = vadd.f32 %v10527_v46, %v5050_v4  ;;  %v4498_v54 = vpop.permute.xlu1 %4497  ;;  %v13288_v46 = vld [vmem:[#allocation40_spill] sm:$0xff]  ;;  %v13291_v53 = vld [vmem:[#allocation198_spill] sm:$0xff] }
 0x451   : > { %vm4846_vm9 = vmand %vm13283_vm3, %vm13281_vm15  ;;  %v11183_v19 = vadd.f32 %v4619_v33, %v13284_v10  ;;  %v4632_v32 = vadd.f32 %v4600_v39, %v3390_v47  ;;  %v13285_v1 = vld [vmem:[#allocation119_spill] sm:$0xff]  ;;  %v4411_v33 = vrot.slane %v11014_v21, 1  ;;  %vm4558_vm12 = vcmp.eq.s32.totalorder %v4498_v54, 1  ;;  %v4921_v47 = vpop.permute.xlu0 %4920  ;;  %v13295_v8 = vld [vmem:[#allocation132_spill] sm:$0xff] }
 0x452   : > { %vm2408_vm1 = vcmp.eq.s32.totalorder %v13285_v1, 1  ;;  %5146 = vst.msk [vmem:[%s11080_s22 + $0x50] sm:$0xff] %vm13286_vm0, %v5114_v48  ;;  %v4878_v51 = vsel %vm4846_vm9, 1, %v12072_v58  ;;  %v4590_v37 = vsel %vm4558_vm12, %v13287_v57, 0.0  ;;  %vm4989_vm2 = vcmp.eq.s32.totalorder %v4921_v47, 1  ;;  %v13294_v4 = vld [vmem:[#allocation155_spill] sm:$0xff]  ;;  %vm13299_vm7 = vmmov %vm13286_vm0 }
 0x453   : > { %v11189_v25 = vadd.f32 %v4632_v32, %v10655_v52  ;;  %4959 = vperm.xlu1 %5620, %v4874_v61   ;;  %v2440_v16 = vsel %vm2408_vm1, %v2251_v27, 0.0  ;;  %v4537_v12 = vpop.permute.xlu2 %4536  ;;  %v13289_v52 = vld [vmem:[#allocation11_spill] sm:$0xff]  ;;  %vm13292_vm14 = vcmp.lt.f32.partialorder %v13291_v53, 15.0  ;;  %v13293_v27 = vld [vmem:[#allocation260_spill] sm:$0xff]  ;;  %v5021_v39 = vsel %vm4989_vm2, %v13294_v4, 0.0  ;;  %v11210_v1 = vpop.f32.mrf.mxu0  ;;  %v13297_v47 = vld [vmem:[#allocation150_spill] sm:$0xff] }
 0x454   : > { %4971 = vperm.xlu2 %5621, %v4878_v51   ;;  %v3393_v24 = vadd.f32 %v13288_v46, %v2440_v16  ;;  %vm13290_vm10 = vcmp.ne.s32.totalorder %v13289_v52, 0  ;;  %v4622_v14 = vadd.f32 %v4590_v37, %v13293_v27  ;;  %v4413_v22 = vsel %vm3881_vm13, %v4411_v33, %v4412_v23  ;;  %v13296_v61 = vld [vmem:[#allocation247_spill] sm:$0xff]  ;;  %v13298_v23 = vld [vmem:[#allocation105_spill] sm:$0xff]  ;;  %v13300_v37 = vld [vmem:[#allocation312_spill] sm:$0xff] }
 0x455   : > { %vm4845_vm4 = vmand %vm13292_vm14, %vm13290_vm10  ;;  %vm4571_vm11 = vcmp.eq.s32.totalorder %v4537_v12, 1  ;;  %v5053_v10 = vadd.f32 %v5021_v39, %v13295_v8  ;;  %vm2846_vm5 = vcmp.eq.s32.totalorder %v13297_v47, 1  ;;  %vm3639_vm6 = vcmp.eq.s32.totalorder %v13298_v23, 1  ;;  %v13307_v39 = vld [vmem:[#allocation207_spill] sm:$0xff]  ;;  %v13308_v8 = vld [vmem:[#allocation276_spill] sm:$0xff] }
 0x456   : > { %v4603_v32 = vsel %vm4571_vm11, %v4413_v22, 0.0  ;;  %v11213_v48 = vadd.f32 %v4622_v14, %v13296_v61  ;;  %v4877_v54 = vsel %vm4845_vm4, 1, %v12072_v58  ;;  %v3671_v12 = vsel %vm3639_vm6, %v13300_v37, 0.0  ;;  %v13302_v58 = vld [vmem:[#allocation103_spill] sm:$0xff]  ;;  %v13310_v23 = vld [vmem:[#allocation124_spill] sm:$0xff]  ;;  %vm13314_vm1 = vmmov %vm13286_vm0 }
 0x457   : > { %v4635_v16 = vadd.f32 %v4603_v32, %v3393_v24  ;;  %v5117_v51 = vadd.f32 %v10625_v7, %v5053_v10  ;;  %v13301_v24 = vld [vmem:[#allocation299_spill] sm:$0xff]  ;;  %v13303_v7 = vld [vmem:[#allocation218_spill] sm:$0xff]  ;;  %v2878_v22 = vsel %vm2846_vm5, %v13307_v39, 0.0  ;;  %v13316_v39 = vld [vmem:[#allocation328_spill] sm:$0xff] }
 0x458   : > { %v4507_v57 = vpop.permute.xlu1 %4506  ;;  %v4755_v52 = vrot.slane %v13301_v24, 1  ;;  %v13304_v27 = vrot.slane %v13303_v7, 1  ;;  %v13312_v7 = vld [vmem:[#allocation320_spill] sm:$0xff]  ;;  %vm13318_vm2 = vmmov %vm13314_vm1  ;;  %v13337_v21 = vld [vmem:[#allocation293_spill] sm:$0xff] }
 0x459   : > { %v11218_v42 = vadd.f32 %v4635_v16, %v10873_v43  ;;  %5149 = vst.msk [vmem:[%s11080_s22 + $0x68] sm:$0xff] %vm13299_vm7, %v5117_v51  ;;  %vm4561_vm8 = vcmp.eq.s32.totalorder %v4507_v57, 1  ;;  %v4930_v46 = vpop.permute.xlu0 %4929  ;;  %v13305_v43 = vld [vmem:[#allocation184_spill] sm:$0xff]  ;;  %v3703_v16 = vadd.f32 %v3671_v12, %v2878_v22  ;;  %v4759_v31 = vrot.slane %v13312_v7, 1  ;;  %vm13327_vm4 = vmmov %vm13314_vm1 }
 0x45a   : > { %v4593_v53 = vsel %vm4561_vm8, %v13302_v58, 0.0  ;;  %v13306_v14 = vrot.slane %v13305_v43, 1  ;;  %vm4992_vm15 = vcmp.eq.s32.totalorder %v4930_v46, 1  ;;  %v4811_v47 = vsel %vm3881_vm13, %v4755_v52, %v4756_v38  ;;  %v13311_v12 = vld [vmem:[#allocation52_spill] sm:$0xff]  ;;  %vm13328_vm5 = vmmov %vm13314_vm1 }
 0x45b   : > { %4968 = vperm.xlu1 %5620, %v4877_v54   ;;  %v4625_v10 = vadd.f32 %v4593_v53, %v13308_v8  ;;  %v4885_v61 = vpop.permute.xlu2 %4884  ;;  %v13309_v54 = vld [vmem:[#allocation55_spill] sm:$0xff]  ;;  %v11246_v53 = vpop.f32.mrf.mxu0  ;;  %vm3642_vm9 = vcmp.eq.s32.totalorder %v13311_v12, 1  ;;  %vm13335_vm8 = vmmov %vm13314_vm1 }
 0x45c   : > { %v4796_v4 = vsel %vm3881_vm13, %v13306_v14, %v13304_v27  ;;  %vm4977_vm3 = vcmp.eq.s32.totalorder %v4885_v61, 1  ;;  %v13313_v27 = vld [vmem:[#allocation223_spill] sm:$0xff]  ;;  %v3674_v22 = vsel %vm3642_vm9, %v13316_v39, 0.0 }
 0x45d   : > { %v5024_v32 = vsel %vm4992_vm15, %v4796_v4, 0.0  ;;  %v11243_v57 = vadd.f32 %v4625_v10, %v13310_v23  ;;  %v5009_v37 = vsel %vm4977_vm3, %v4811_v47, 0.0  ;;  %v4773_v43 = vrot.slane %v13313_v27, 1  ;;  %v13315_v4 = vld [vmem:[#allocation213_spill] sm:$0xff]  ;;  %v13317_v8 = vld [vmem:[#allocation315_spill] sm:$0xff]  ;;  %vm13336_vm3 = vmmov %vm13314_vm1 }
 0x45e   : > { %v5056_v51 = vadd.f32 %v5024_v32, %v13309_v54  ;;  %v5041_v58 = vadd.f32 %v5009_v37, %v3703_v16  ;;  %vm2849_vm0 = vcmp.eq.s32.totalorder %v13315_v4, 1  ;;  %v4758_v10 = vrot.slane %v13317_v8, 1  ;;  %v13319_v32 = vld [vmem:[#allocation88_spill] sm:$0xff]  ;;  %v13320_v16 = vld [vmem:[#allocation42_spill] sm:$0xff]  ;;  %v13323_v23 = vld [vmem:[#allocation137_spill] sm:$0xff] }
 0x45f   : > { %v13321_v54 = vrot.slane %v13320_v16, 1  ;;  %v13325_v39 = vld [vmem:[#allocation151_spill] sm:$0xff]  ;;  %v13371_v27 = vld [vmem:[#allocation13_spill] sm:$0xff] }
 0x460   : > { %v5120_v46 = vadd.f32 %v10707_v15, %v5056_v51  ;;  %v5105_v38 = vadd.f32 %v10998_v18, %v5041_v58  ;;  %v4516_v14 = vpop.permute.xlu1 %4515  ;;  %v13322_v51 = vld [vmem:[#allocation81_spill] sm:$0xff]  ;;  %v4808_v4 = vsel %vm3881_vm13, %v4758_v10, %v4759_v31 }
 0x461   : > { %vm4564_vm12 = vcmp.eq.s32.totalorder %v4516_v14, 1  ;;  %v4939_v15 = vpop.permute.xlu0 %4938  ;;  %v4793_v18 = vsel %vm3881_vm13, %v4773_v43, %v13321_v54  ;;  %v2881_v47 = vsel %vm2849_vm0, %v13322_v51, 0.0  ;;  %v13326_v54 = vld [vmem:[#allocation278_spill] sm:$0xff] }
 0x462   : > { %5152 = vst.msk [vmem:[%s11080_s22 + $0x80] sm:$0xff] %vm13314_vm1, %v5120_v46  ;;  %v4596_v61 = vsel %vm4564_vm12, %v13319_v32, 0.0  ;;  %vm4995_vm10 = vcmp.eq.s32.totalorder %v4939_v15, 1  ;;  %v3706_v12 = vadd.f32 %v3674_v22, %v2881_v47 }
 0x463   : > { %5137 = vst.msk [vmem:[%s11080_s22 + $0x8] sm:$0xff] %vm13318_vm2, %v5105_v38  ;;  %v4628_v37 = vadd.f32 %v4596_v61, %v13323_v23  ;;  %v5027_v46 = vsel %vm4995_vm10, %v4793_v18, 0.0  ;;  %v4894_v58 = vpop.permute.xlu2 %4893  ;;  %v13324_v38 = vld [vmem:[#allocation255_spill] sm:$0xff]  ;;  %v4776_v18 = vrot.slane %v13326_v54, 1  ;;  %v11283_v47 = vpop.f32.mrf.mxu0  ;;  %vm13346_vm10 = vmmov %vm13318_vm2  ;;  %v13378_v54 = vld [vmem:[#allocation118_spill] sm:$0xff] }
 0x464   : > { %v5059_v14 = vadd.f32 %v5027_v46, %v13324_v38  ;;  %vm4980_vm14 = vcmp.eq.s32.totalorder %v4894_v58, 1  ;;  %v13329_v46 = vld [vmem:[#allocation238_spill] sm:$0xff] }
 0x465   : > { %v11276_v15 = vadd.f32 %v4628_v37, %v13325_v39  ;;  %v5012_v32 = vsel %vm4980_vm14, %v4808_v4, 0.0  ;;  %v13330_v58 = vrot.slane %v13329_v46, 1  ;;  %v13332_v4 = vld [vmem:[#allocation65_spill] sm:$0xff] }
 0x466   : > { %v5123_v61 = vadd.f32 %v10777_v36, %v5059_v14  ;;  %v5044_v16 = vadd.f32 %v5012_v32, %v3706_v12  ;;  %v13331_v12 = vld [vmem:[#allocation158_spill] sm:$0xff] }
 0x467   : > { %v4790_v36 = vsel %vm3881_vm13, %v4776_v18, %v13330_v58 }
 0x468   : > { %5155 = vst.msk [vmem:[%s11080_s22 + $0x98] sm:$0xff] %vm13327_vm4, %v5123_v61  ;;  %v5108_v22 = vadd.f32 %v10719_v9, %v5044_v16  ;;  %v4525_v51 = vpop.permute.xlu1 %4524  ;;  %v4780_v16 = vrot.slane %v11210_v1, 1 }
 0x469   : > { %vm4567_vm11 = vcmp.eq.s32.totalorder %v4525_v51, 1  ;;  %v4948_v23 = vpop.permute.xlu0 %4947  ;;  %v13334_v51 = vld [vmem:[#allocation172_spill] sm:$0xff] }
 0x46a   : > { %5140 = vst.msk [vmem:[%s11080_s22 + $0x20] sm:$0xff] %vm13328_vm5, %v5108_v22  ;;  %v4599_v37 = vsel %vm4567_vm11, %v10861_v3, 0.0  ;;  %vm4998_vm6 = vcmp.eq.s32.totalorder %v4948_v23, 1  ;;  %v13333_v3 = vld [vmem:[#allocation334_spill] sm:$0xff]  ;;  %v4779_v23 = vrot.slane %v11161_v34, 1  ;;  %v4781_v34 = vrot.slane %v11246_v53, 1 }
 0x46b   : > { %v4631_v9 = vadd.f32 %v4599_v37, %v13331_v12  ;;  %v5030_v38 = vsel %vm4998_vm6, %v4790_v36, 0.0  ;;  %v4900_v14 = vpop.permute.xlu2 %4899  ;;  %v11321_v12 = vpop.f32.mrf.mxu0 }
 0x46c   : > { %v5062_v39 = vadd.f32 %v5030_v38, %v13332_v4  ;;  %vm4982_vm7 = vcmp.eq.s32.totalorder %v4900_v14, 1  ;;  %v13339_v14 = vld [vmem:[#allocation72_spill] sm:$0xff] }
 0x46d   : > { %v11297_v32 = vadd.f32 %v4631_v9, %v10745_v44  ;;  %v5014_v61 = vsel %vm4982_vm7, %v13333_v3, 0.0  ;;  %v4414_v44 = vsel %vm3881_vm13, %v4410_v35, %v4411_v33  ;;  %v13338_v33 = vld [vmem:[#allocation248_spill] sm:$0xff]  ;;  %vm2845_vm0 = vcmp.eq.s32.totalorder %v13339_v14, 1  ;;  %vm13353_vm7 = vmmov %vm13318_vm2 }
 0x46e   : > { %v5126_v22 = vadd.f32 %v10851_v55, %v5062_v39  ;;  %v5046_v46 = vadd.f32 %v5014_v61, %v13334_v51  ;;  %v13340_v39 = vld [vmem:[#allocation107_spill] sm:$0xff] }
 0x46f   : > { %v13341_v61 = vld [vmem:[#allocation287_spill] sm:$0xff] }
 0x470   : > { %5158 = vst.msk [vmem:[%s11080_s22 + $0xb0] sm:$0xff] %vm13335_vm8, %v5126_v22  ;;  %v5110_v37 = vadd.f32 %v10785_v56, %v5046_v46  ;;  %v4534_v58 = vpop.permute.xlu1 %4533  ;;  %v4787_v56 = vsel %vm3881_vm13, %v4779_v23, %v4780_v16  ;;  %vm3638_vm12 = vcmp.eq.s32.totalorder %v13341_v61, 1  ;;  %v4783_v22 = vrot.slane %v11321_v12, 1  ;;  %v13342_v46 = vld [vmem:[#allocation6_spill] sm:$0xff]  ;;  %vm13355_vm8 = vmmov %vm13318_vm2 }
 0x471   : > { %vm4570_vm15 = vcmp.eq.s32.totalorder %v4534_v58, 1  ;;  %v4957_v36 = vpop.permute.xlu0 %4956  ;;  %v13343_v58 = vld [vmem:[#allocation64_spill] sm:$0xff] }
 0x472   : > { %5142 = vst.msk [vmem:[%s11080_s22 + $0x30] sm:$0xff] %vm13336_vm3, %v5110_v37  ;;  %v4602_v55 = vsel %vm4570_vm15, %v4414_v44, 0.0  ;;  %vm5001_vm9 = vcmp.eq.s32.totalorder %v4957_v36, 1  ;;  %v4754_v44 = vrot.slane %v13343_v58, 1  ;;  %v13344_v36 = vld [vmem:[#allocation307_spill] sm:$0xff]  ;;  %v13349_v58 = vld [vmem:[#allocation37_spill] sm:$0xff]  ;;  %vm13356_vm15 = vmmov %vm13318_vm2 }
 0x473   : > { %v4634_v49 = vadd.f32 %v4602_v55, %v13337_v21  ;;  %v5033_v9 = vsel %vm5001_vm9, %v4787_v56, 0.0  ;;  %v4909_v35 = vpop.permute.xlu2 %4908  ;;  %v3670_v55 = vsel %vm3638_vm12, %v13344_v36, 0.0  ;;  %v4782_v56 = vrot.slane %v11283_v47, 1  ;;  %v13345_v21 = vld [vmem:[#allocation204_spill] sm:$0xff] }
 0x474   : > { %v5065_v38 = vadd.f32 %v5033_v9, %v13338_v33  ;;  %vm4985_vm1 = vcmp.eq.s32.totalorder %v4909_v35, 1  ;;  %v13391_v47 = vld [vmem:[#allocation76_spill] sm:$0xff] }
 0x475   : > { %v11327_v4 = vadd.f32 %v4634_v49, %v10816_v2  ;;  %v5017_v3 = vsel %vm4985_vm1, %v13340_v39, 0.0  ;;  %v2877_v49 = vsel %vm2845_vm0, %v13345_v21, 0.0  ;;  %v13351_v21 = vld [vmem:[#allocation324_spill] sm:$0xff]  ;;  %vm13360_vm0 = vmmov %vm13318_vm2 }
 0x476   : > { %v5129_v51 = vadd.f32 %v10926_v60, %v5065_v38  ;;  %v5049_v37 = vadd.f32 %v5017_v3, %v13342_v46  ;;  %v4812_v60 = vsel %vm3881_vm13, %v4754_v44, %v4755_v52  ;;  %v3702_v33 = vadd.f32 %v3670_v55, %v2877_v49  ;;  %v13347_v3 = vld [vmem:[#allocation211_spill] sm:$0xff]  ;;  %v13350_v55 = vld [vmem:[#allocation58_spill] sm:$0xff]  ;;  %vm13361_vm12 = vmmov %vm13360_vm0 }
 0x478   : > { %5161 = vst.msk [vmem:[%s11080_s22 + $0xc8] sm:$0xff] %vm13318_vm2, %v5129_v51  ;;  %v5113_v2 = vadd.f32 %v10855_v17, %v5049_v37  ;;  %v4882_v9 = vpop.permute.xlu1 %4881  ;;  %v4784_v17 = vsel %vm3881_vm13, %v4782_v56, %v4783_v22  ;;  %v13348_v51 = vld [vmem:[#allocation290_spill] sm:$0xff]  ;;  %vm13362_vm2 = vmmov %vm13360_vm0 }
 0x479   : > { %v4966_v35 = vpop.permute.xlu0 %4965  ;;  %vm4976_vm14 = vcmp.eq.s32.totalorder %v4882_v9, 1  ;;  %vm3641_vm5 = vcmp.eq.s32.totalorder %v13348_v51, 1  ;;  %v13352_v9 = vld [vmem:[#allocation74_spill] sm:$0xff]  ;;  %v13359_v51 = vld [vmem:[#allocation67_spill] sm:$0xff] }
 0x47a   : > { %5145 = vst.msk [vmem:[%s11080_s22 + $0x48] sm:$0xff] %vm13346_vm10, %v5113_v2  ;;  %vm5004_vm4 = vcmp.eq.s32.totalorder %v4966_v35, 1  ;;  %v5008_v38 = vsel %vm4976_vm14, %v4812_v60, 0.0  ;;  %v4753_v2 = vrot.slane %v13350_v55, 1  ;;  %v3673_v49 = vsel %vm3641_vm5, %v13351_v21, 0.0  ;;  %v13354_v60 = vld [vmem:[#allocation78_spill] sm:$0xff] }
 0x47b   : > { %v5036_v14 = vsel %vm5004_vm4, %v4784_v17, 0.0  ;;  %v4918_v24 = vpop.permute.xlu2 %4917  ;;  %v5040_v39 = vadd.f32 %v5008_v38, %v3702_v33  ;;  %vm2848_vm6 = vcmp.eq.s32.totalorder %v13352_v9, 1  ;;  %v13365_v21 = vld [vmem:[#allocation209_spill] sm:$0xff]  ;;  %vm13369_vm4 = vmmov %vm13360_vm0 }
 0x47c   : > { %v5068_v52 = vadd.f32 %v5036_v14, %v10721_v29  ;;  %vm4988_vm11 = vcmp.eq.s32.totalorder %v4918_v24, 1  ;;  %v2880_v35 = vsel %vm2848_vm6, %v13354_v60, 0.0 }
 0x47d   : > { %v5020_v61 = vsel %vm4988_vm11, %v13347_v3, 0.0  ;;  %v5104_v46 = vadd.f32 %v11000_v13, %v5040_v39  ;;  %v3705_v17 = vadd.f32 %v3673_v49, %v2880_v35  ;;  %v13358_v3 = vld [vmem:[#allocation30_spill] sm:$0xff]  ;;  %v13368_v35 = vld [vmem:[#allocation61_spill] sm:$0xff]  ;;  %vm13370_vm11 = vmmov %vm13360_vm0 }
 0x47e   : > { %v5132_v37 = vadd.f32 %v11006_v20, %v5068_v52  ;;  %v5052_v36 = vadd.f32 %v5020_v61, %v13349_v58  ;;  %v4813_v20 = vsel %vm3881_vm13, %v4753_v2, %v4754_v44  ;;  %v13357_v44 = vld [vmem:[#allocation333_spill] sm:$0xff] }
 0x47f   : > { %5136 = vst.msk [vmem:[%s11080_s22] sm:$0xff] %vm13353_vm7, %v5104_v46  ;;  %vm13376_vm7 = vmmov %vm13360_vm0 }
 0x480   : > { %v5116_v29 = vadd.f32 %v10931_v62, %v5052_v36  ;;  %5164 = vst.msk [vmem:[%s11080_s22 + $0xe0] sm:$0xff] %vm13355_vm8, %v5132_v37  ;;  %v4891_v33 = vpop.permute.xlu1 %4890  ;;  %v4809_v62 = vsel %vm3881_vm13, %v4757_v0, %v4758_v10  ;;  %v13363_v37 = vld [vmem:[#allocation327_spill] sm:$0xff]  ;;  %vm13377_vm8 = vmmov %vm13360_vm0 }
 0x481   : > { %v4975_v13 = vpop.permute.xlu0 %4974  ;;  %vm4979_vm3 = vcmp.eq.s32.totalorder %v4891_v33, 1  ;;  %v13364_v58 = vrot.slane %v13363_v37, 1 }
 0x482   : > { %5148 = vst.msk [vmem:[%s11080_s22 + $0x60] sm:$0xff] %vm13356_vm15, %v5116_v29  ;;  %vm5007_vm9 = vcmp.eq.s32.totalorder %v4975_v13, 1  ;;  %v5011_v38 = vsel %vm4979_vm3, %v4809_v62, 0.0 }
 0x483   : > { %v5039_v14 = vsel %vm5007_vm9, %v4813_v20, 0.0  ;;  %v4927_v24 = vpop.permute.xlu2 %4926  ;;  %v5043_v39 = vadd.f32 %v5011_v38, %v3705_v17  ;;  %v13373_v38 = vld [vmem:[#allocation48_spill] sm:$0xff]  ;;  %vm13383_vm9 = vmmov %vm13360_vm0 }
 0x484   : > { %v5071_v52 = vadd.f32 %v5039_v14, %v13357_v44  ;;  %vm4991_vm1 = vcmp.eq.s32.totalorder %v4927_v24, 1 }
 0x485   : > { %v5023_v61 = vsel %vm4991_vm1, %v13358_v3, 0.0  ;;  %v5107_v8 = vadd.f32 %v10958_v5, %v5043_v39  ;;  %v4807_v5 = vsel %vm3881_vm13, %v4759_v31, %v13364_v58  ;;  %v13375_v39 = vld [vmem:[#allocation271_spill] sm:$0xff]  ;;  %vm13384_vm1 = vmmov %vm13360_vm0 }
 0x486   : > { %v5135_v59 = vadd.f32 %v11130_v45, %v5071_v52  ;;  %v5055_v46 = vadd.f32 %v5023_v61, %v13359_v51  ;;  %v13380_v51 = vld [vmem:[#allocation226_spill] sm:$0xff] }
 0x487   : > { %5139 = vst.msk [vmem:[%s11080_s22 + $0x18] sm:$0xff] %vm13360_vm0, %v5107_v8 }
 0x488   : > { %v5119_v0 = vadd.f32 %v10978_v50, %v5055_v46  ;;  %5167 = vst.msk [vmem:[%s11080_s22 + $0xf8] sm:$0xff] %vm13361_vm12, %v5135_v59  ;;  %v4897_v10 = vpop.permute.xlu1 %4896  ;;  %v13366_v50 = vld [vmem:[#allocation36_spill] sm:$0xff] }
 0x489   : > { %vm4981_vm10 = vcmp.eq.s32.totalorder %v4897_v10, 1  ;;  %v13367_v9 = vrot.slane %v13366_v50, 1  ;;  %v13382_v10 = vld [vmem:[#allocation77_spill] sm:$0xff] }
 0x48a   : > { %5151 = vst.msk [vmem:[%s11080_s22 + $0x78] sm:$0xff] %vm13362_vm2, %v5119_v0  ;;  %v5013_v45 = vsel %vm4981_vm10, %v4807_v5, 0.0  ;;  %vm13388_vm2 = vmmov %vm13384_vm1 }
 0x48b   : > { %v4936_v36 = vpop.permute.xlu2 %4935  ;;  %v5045_v49 = vadd.f32 %v5013_v45, %v13365_v21  ;;  %v4794_v29 = vsel %vm3881_vm13, %v13367_v9, %v4773_v43  ;;  %v13372_v43 = vld [vmem:[#allocation49_spill] sm:$0xff]  ;;  %v13385_v45 = vld [vmem:[#allocation24_spill] sm:$0xff]  ;;  %v13387_v9 = vld [vmem:[#allocation79_spill] sm:$0xff] }
 0x48c   : > { %vm4994_vm14 = vcmp.eq.s32.totalorder %v4936_v36, 1  ;;  %v13386_v21 = vld [vmem:[#allocation212_spill] sm:$0xff]  ;;  %vm13390_vm10 = vmmov %vm13384_vm1 }
 0x48d   : > { %v5026_v60 = vsel %vm4994_vm14, %v4794_v29, 0.0  ;;  %v5109_v7 = vadd.f32 %v11023_v28, %v5045_v49  ;;  %v13374_v28 = vrot.slane %v13373_v38, 1  ;;  %v13396_v38 = vld [vmem:[#allocation225_spill] sm:$0xff] }
 0x48e   : > { %v5058_v33 = vadd.f32 %v5026_v60, %v13368_v35 }
 0x48f   : > { %5141 = vst.msk [vmem:[%s11080_s22 + $0x28] sm:$0xff] %vm13369_vm4, %v5109_v7  ;;  %v4791_v14 = vsel %vm3881_vm13, %v13374_v28, %v4776_v18  ;;  %v13379_v18 = vld [vmem:[#allocation164_spill] sm:$0xff]  ;;  %v13397_v28 = vld [vmem:[#allocation233_spill] sm:$0xff] }
 0x490   : > { %v5122_v31 = vadd.f32 %v11030_v40, %v5058_v33  ;;  %v4906_v13 = vpop.permute.xlu1 %4905  ;;  %v13389_v7 = vld [vmem:[#allocation292_spill] sm:$0xff] }
 0x491   : > { %vm4984_vm5 = vcmp.eq.s32.totalorder %v4906_v13, 1  ;;  %v4752_v35 = vrot.slane %v13389_v7, 1 }
 0x492   : > { %5154 = vst.msk [vmem:[%s11080_s22 + $0x90] sm:$0xff] %vm13370_vm11, %v5122_v31  ;;  %v5016_v20 = vsel %vm4984_vm5, %v13371_v27, 0.0  ;;  %v13392_v31 = vld [vmem:[#allocation80_spill] sm:$0xff]  ;;  %vm13394_vm11 = vmmov %vm13384_vm1 }
 0x493   : > { %v5048_v62 = vadd.f32 %v5016_v20, %v13372_v43  ;;  %v4814_v13 = vsel %vm3881_vm13, %v4752_v35, %v4753_v2  ;;  %v13393_v20 = vld [vmem:[#allocation329_spill] sm:$0xff]  ;;  %vm13395_vm5 = vmmov %vm13384_vm1 }
 0x495   : > { %v4945_v17 = vpop.permute.xlu2 %4944  ;;  %v5112_v40 = vadd.f32 %v11091_v63, %v5048_v62  ;;  %v13381_v63 = vrot.slane %v13380_v51, 1 }
 0x496   : > { %vm4997_vm6 = vcmp.eq.s32.totalorder %v4945_v17, 1 }
 0x497   : > { %v5029_v24 = vsel %vm4997_vm6, %v4791_v14, 0.0  ;;  %5144 = vst.msk [vmem:[%s11080_s22 + $0x40] sm:$0xff] %vm13376_vm7, %v5112_v40  ;;  %v4788_v46 = vsel %vm3881_vm13, %v13381_v63, %v4779_v23  ;;  %vm13398_vm7 = vmmov %vm13384_vm1 }
 0x498   : > { %v5061_v44 = vadd.f32 %v5029_v24, %v13375_v39  ;;  %v13399_v24 = vld [vmem:[#allocation60_spill] sm:$0xff]  ;;  %v13400_v39 = vld [vmem:[#allocation142_spill] sm:$0xff] }
 0x499   : > { %v4915_v3 = vpop.permute.xlu1 %4914 }
 0x49a   : > { %v5125_v52 = vadd.f32 %v11108_v30, %v5061_v44  ;;  %vm4987_vm15 = vcmp.eq.s32.totalorder %v4915_v3, 1  ;;  %v4786_v3 = vsel %vm3881_vm13, %v4780_v16, %v4781_v34 }
 0x49b   : > { %v5019_v61 = vsel %vm4987_vm15, %v13378_v54, 0.0  ;;  %vm13401_vm15 = vmmov %vm13384_vm1  ;;  %v13402_v54 = vld [vmem:[#allocation195_spill] sm:$0xff] }
 0x49c   : > { %5157 = vst.msk [vmem:[%s11080_s22 + $0xa8] sm:$0xff] %vm13377_vm8, %v5125_v52  ;;  %v5051_v59 = vadd.f32 %v5019_v61, %v13379_v18 }
 0x49e   : > { %v4954_v8 = vpop.permute.xlu2 %4953  ;;  %v5115_v30 = vadd.f32 %v11144_v26, %v5051_v59  ;;  %v4785_v26 = vsel %vm3881_vm13, %v4781_v34, %v4782_v56 }
 0x49f   : > { %vm5000_vm3 = vcmp.eq.s32.totalorder %v4954_v8, 1 }
 0x4a0   : > { %v5032_v0 = vsel %vm5000_vm3, %v4788_v46, 0.0  ;;  %5147 = vst.msk [vmem:[%s11080_s22 + $0x58] sm:$0xff] %vm13383_vm9, %v5115_v30  ;;  %vm13403_vm9 = vmmov %vm13384_vm1 }
 0x4a1   : > { %v5064_v37 = vadd.f32 %v5032_v0, %v13382_v10  ;;  %v4924_v5 = vpop.permute.xlu1 %4923 }
 0x4a2   : > { %vm4990_vm0 = vcmp.eq.s32.totalorder %v4924_v5, 1 }
 0x4a3   : > { %v5128_v58 = vadd.f32 %v11150_v6, %v5064_v37  ;;  %v5022_v23 = vsel %vm4990_vm0, %v13385_v45, 0.0  ;;  %vm13404_vm0 = vmmov %vm13388_vm2 }
 0x4a4   : > { %v5054_v49 = vadd.f32 %v5022_v23, %v13386_v21 }
 0x4a5   : > { %5160 = vst.msk [vmem:[%s11080_s22 + $0xc0] sm:$0xff] %vm13384_vm1, %v5128_v58 }
 0x4a6   : > { %v4963_v36 = vpop.permute.xlu2 %4962  ;;  %v5118_v6 = vadd.f32 %v11183_v19, %v5054_v49 }
 0x4a7   : > { %vm5003_vm12 = vcmp.eq.s32.totalorder %v4963_v36, 1 }
 0x4a8   : > { %v5035_v50 = vsel %vm5003_vm12, %v4785_v26, 0.0  ;;  %5150 = vst.msk [vmem:[%s11080_s22 + $0x70] sm:$0xff] %vm13388_vm2, %v5118_v6 }
 0x4a9   : > { %v5067_v53 = vadd.f32 %v5035_v50, %v13387_v9 }
 0x4ab   : > { %v5131_v29 = vadd.f32 %v11189_v25, %v5067_v53 }
 0x4ac   : > { %v4933_v60 = vpop.permute.xlu1 %4932 }
 0x4ad   : > { %5163 = vst.msk [vmem:[%s11080_s22 + $0xd8] sm:$0xff] %vm13390_vm10, %v5131_v29  ;;  %vm4993_vm14 = vcmp.eq.s32.totalorder %v4933_v60, 1 }
 0x4ae   : > { %v5025_v56 = vsel %vm4993_vm14, %v13391_v47, 0.0  ;;  %v4972_v33 = vpop.permute.xlu2 %4971 }
 0x4af   : > { %v5057_v19 = vadd.f32 %v5025_v56, %v13392_v31  ;;  %vm5006_vm4 = vcmp.eq.s32.totalorder %v4972_v33, 1 }
 0x4b0   : > { %v5038_v25 = vsel %vm5006_vm4, %v4814_v13, 0.0 }
 0x4b1   : > { %v5121_v27 = vadd.f32 %v11213_v48, %v5057_v19  ;;  %v5070_v17 = vadd.f32 %v5038_v25, %v13393_v20 }
 0x4b3   : > { %5153 = vst.msk [vmem:[%s11080_s22 + $0x88] sm:$0xff] %vm13394_vm11, %v5121_v27  ;;  %v5134_v43 = vadd.f32 %v11218_v42, %v5070_v17 }
 0x4b4   : > { %v4942_v62 = vpop.permute.xlu1 %4941 }
 0x4b5   : > { %5166 = vst.msk [vmem:[%s11080_s22 + $0xf0] sm:$0xff] %vm13395_vm5, %v5134_v43  ;;  %vm4996_vm6 = vcmp.eq.s32.totalorder %v4942_v62, 1 }
 0x4b6   : > { %v5028_v55 = vsel %vm4996_vm6, %v13396_v38, 0.0 }
 0x4b7   : > { %v5060_v2 = vadd.f32 %v5028_v55, %v13397_v28 }
 0x4b9   : > { %v5124_v14 = vadd.f32 %v11243_v57, %v5060_v2 }
 0x4bb   : > { %5156 = vst.msk [vmem:[%s11080_s22 + $0xa0] sm:$0xff] %vm13398_vm7, %v5124_v14 }
 0x4bd   : > { %v4951_v48 = vpop.permute.xlu1 %4950 }
 0x4be   : > { %vm4999_vm8 = vcmp.eq.s32.totalorder %v4951_v48, 1 }
 0x4bf   : > { %v5031_v40 = vsel %vm4999_vm8, %v13399_v24, 0.0 }
 0x4c0   : > { %v5063_v44 = vadd.f32 %v5031_v40, %v13400_v39 }
 0x4c2   : > { %v5127_v42 = vadd.f32 %v11276_v15, %v5063_v44  ;;  %v4815_v15 = vsel %vm3881_vm13, %v4783_v22, %v4752_v35 }
 0x4c4   : > { %5159 = vst.msk [vmem:[%s11080_s22 + $0xb8] sm:$0xff] %vm13401_vm15, %v5127_v42 }
 0x4c5   : > { %v4960_v52 = vpop.permute.xlu1 %4959 }
 0x4c6   : > { %vm5002_vm3 = vcmp.eq.s32.totalorder %v4960_v52, 1 }
 0x4c7   : > { %v5034_v57 = vsel %vm5002_vm3, %v4786_v3, 0.0 }
 0x4c8   : > { %v5066_v61 = vadd.f32 %v5034_v57, %v13402_v54 }
 0x4ca   : > { %v5130_v8 = vadd.f32 %v11297_v32, %v5066_v61 }
 0x4cc   : > { %5162 = vst.msk [vmem:[%s11080_s22 + $0xd0] sm:$0xff] %vm13403_vm9, %v5130_v8 }
 0x4cd   : > { %v4969_v18 = vpop.permute.xlu1 %4968 }
 0x4ce   : > { %vm5005_vm1 = vcmp.eq.s32.totalorder %v4969_v18, 1 }
 0x4cf   : > { %v5037_v59 = vsel %vm5005_vm1, %v4815_v15, 0.0 }
 0x4d0   : > { %v5069_v1 = vadd.f32 %v5037_v59, %v10787_v11 }
 0x4d2   : > { %v5133_v16 = vadd.f32 %v11327_v4, %v5069_v1 }
 0x4d4   : > { %5165 = vst.msk [vmem:[%s11080_s22 + $0xe8] sm:$0xff] %vm13404_vm0, %v5133_v16 }
 0x4d5 PF: > { %s17_s24 = sadd.s32 1, %s5713_s24  }
 0x4d6   : > { %p14_p4 = scmp.ge.s32.totalorder %s17_s24, 4  }
 0x4d8   :  { %16 = sbr.rel (!%p14_p4) target bundleno = 1 (0x1), region = 92 }

</bundles_post_ra>
